<compile_context>
chip_gen: v7x
topology: tpu7x:2x2x1
jax: 0.10.0
libtpu: 0.0.40
codegen_flags: <defaults>
</compile_context>

<pallas_src>
import math

import jax
import jax.numpy as jnp
from jax.experimental import pallas as pl
from jax.experimental.pallas import tpu as pltpu

TM_MAX = 1024                     # GEMM row tile (review: 512-1024)
VMEM_LIMIT = 32 * 1024 * 1024     # safe on v5e/v6e/v7x, far above actual block usage


def _round_up(x, m):
    return ((x + m - 1) // m) * m


# ---------------------------------------------------------------------------
# ConvTranspose3d(k=2, s=2, bias=False) + BatchNorm3d(training stats) + LeakyReLU
# ---------------------------------------------------------------------------
def transposed_conv2x_bn_lrelu(x_cl, wt, gamma, beta, eps=1e-5):
    """x_cl: (N, D, H, W, Cf) channels-last.  wt: (Cf_in, Cf_out, 2, 2, 2) (PyTorch layout).
    Returns LeakyReLU(BN(upsample_2x(x))) as (N, 2D, 2H, 2W, Cf) float32."""
    N, D, H, W, Cf = x_cl.shape
    C8 = 8 * Cf
    M1 = N * D * H * W
    x2d = x_cl.reshape(M1, Cf)
    # weight as (Cf_in, (dz,dy,dx,co)) so the GEMM output columns are tap-major
    w2 = jnp.transpose(wt, (0, 2, 3, 4, 1)).reshape(Cf, C8).astype(jnp.float32)

    tm = min(TM_MAX, _round_up(M1, 8))
    grid_m = pl.cdiv(M1, tm)

    # ---- pass 1: tiled global per-channel sum / sumsq (BN batch statistics) ----
    def stats_kernel(x_ref, w_ref, s_ref):
        i = pl.program_id(0)

        @pl.when(i == 0)
        def _():
            s_ref[...] = jnp.zeros_like(s_ref)

        rows = i * tm + jax.lax.broadcasted_iota(jnp.int32, (tm, 1), 0)
        a = jnp.where(rows < M1, x_ref[...], 0.0).astype(jnp.bfloat16)
        y = jnp.dot(a, w_ref[...].astype(jnp.bfloat16),
                    preferred_element_type=jnp.float32)          # (tm, 8*Cf)
        s_ref[0:1, :] += jnp.sum(y, axis=0, keepdims=True)
        s_ref[1:2, :] += jnp.sum(y * y, axis=0, keepdims=True)

    stats = pl.pallas_call(
        stats_kernel,
        out_shape=jax.ShapeDtypeStruct((2, C8), jnp.float32),
        grid=(grid_m,),
        in_specs=[
            pl.BlockSpec((tm, Cf), lambda i: (i, 0)),
            pl.BlockSpec((Cf, C8), lambda i: (0, 0)),
        ],
        out_specs=pl.BlockSpec((2, C8), lambda i: (0, 0)),
        compiler_params=pltpu.CompilerParams(
            dimension_semantics=("arbitrary",),      # reduction axis: keep sequential
            vmem_limit_bytes=VMEM_LIMIT),
    )(x2d, w2)

    # finalize stats in f32 (biased variance, eps=1e-5 -> PyTorch training-mode BN)
    cnt = jnp.float32(M1 * 8)
    ch_sum = stats[0].reshape(8, Cf).sum(axis=0)
    ch_sq = stats[1].reshape(8, Cf).sum(axis=0)
    mean = ch_sum / cnt
    var = jnp.maximum(ch_sq / cnt - mean * mean, 0.0)
    scale = gamma * jax.lax.rsqrt(var + eps)
    shift = beta - mean * scale

    # fold BN scale into the (tiny) transposed-conv weights; shift added in the epilogue
    w2s = (w2 * jnp.tile(scale, 8)[None, :]).astype(jnp.bfloat16)
    shift_row = jnp.tile(shift, 8).reshape(1, C8).astype(jnp.float32)

    # ---- pass 2: recompute GEMM with folded scale + shift + LeakyReLU(0.01) ----
    def apply_kernel(x_ref, w_ref, t_ref, o_ref):
        y = jnp.dot(x_ref[...].astype(jnp.bfloat16), w_ref[...],
                    preferred_element_type=jnp.float32) + t_ref[...]
        o_ref[...] = jnp.where(y >= 0.0, y, 0.01 * y)

    out = pl.pallas_call(
        apply_kernel,
        out_shape=jax.ShapeDtypeStruct((M1, C8), jnp.float32),
        grid=(grid_m,),
        in_specs=[
            pl.BlockSpec((tm, Cf), lambda i: (i, 0)),
            pl.BlockSpec((Cf, C8), lambda i: (0, 0)),
            pl.BlockSpec((1, C8), lambda i: (0, 0)),
        ],
        out_specs=pl.BlockSpec((tm, C8), lambda i: (i, 0)),
        compiler_params=pltpu.CompilerParams(
            dimension_semantics=("parallel",),       # independent tiles -> megacore
            vmem_limit_bytes=VMEM_LIMIT),
    )(x2d, w2s, shift_row)

    # interleave the 8 sub-voxel taps back to full resolution (NDHWC).
    # TODO(synk): fuse this stride-2 sub-voxel scatter into the kernel stores; a strided
    # scatter has no clean BlockSpec expression, so it is one XLA transpose pass here.
    out = out.reshape(N, D, H, W, 2, 2, 2, Cf)
    out = jnp.transpose(out, (0, 1, 4, 2, 5, 3, 6, 7))
    return out.reshape(N, 2 * D, 2 * H, 2 * W, Cf)


# ---------------------------------------------------------------------------
# Direct Conv3d, kernel 3x3x3, stride 1, padding 1 (no im2col materialization)
# ---------------------------------------------------------------------------
def conv3d_3x3x3(x_cl, w, b):
    """x_cl: (N, Do, Ho, Wo, C) channels-last.  w: (ncls, C, 3, 3, 3), b: (ncls,)."""
    N, Do, Ho, Wo, C = x_cl.shape
    ncls = w.shape[0]
    Dp, Hp, Wp = Do + 2, Ho + 3, Wo + 3   # extra +1 row/col so flat row-offset taps stay in bounds
    L = Ho * Wp                           # per-plane accumulator rows (junk cols x>=Wo dropped later)

    xp = jnp.pad(x_cl, ((0, 0), (1, 1), (1, 2), (1, 2), (0, 0)))
    xp = xp.reshape(N, Dp, Hp * Wp, C)

    # weights per kz-plane: (3, 9, C, ncls), taps ordered t = ky*3 + kx
    w4 = jnp.transpose(w, (2, 3, 4, 1, 0)).reshape(3, 9, C, ncls).astype(jnp.float32)
    b2 = b.reshape(1, ncls).astype(jnp.float32)

    def kernel(x_ref, w_ref, b_ref, o_ref):
        kz = pl.program_id(2)

        @pl.when(kz == 0)
        def _():
            o_ref[0, 0] = jnp.broadcast_to(b_ref[...], (L, ncls))

        acc = o_ref[0, 0]
        for t in range(9):                                  # static unroll of in-plane taps
            ky, kx = t // 3, t % 3
            off = ky * Wp + kx
            a = x_ref[0, 0, off:off + L, :].astype(jnp.bfloat16)
            acc = acc + jnp.dot(a, w_ref[0, t].astype(jnp.bfloat16),
                                preferred_element_type=jnp.float32)
        o_ref[0, 0] = acc

    out = pl.pallas_call(
        kernel,
        out_shape=jax.ShapeDtypeStruct((N, Do, L, ncls), jnp.float32),
        grid=(N, Do, 3),
        in_specs=[
            pl.BlockSpec((1, 1, Hp * Wp, C), lambda n, z, kz: (n, z + kz, 0, 0)),
            pl.BlockSpec((1, 9, C, ncls), lambda n, z, kz: (kz, 0, 0, 0)),
            pl.BlockSpec((1, ncls), lambda n, z, kz: (0, 0)),
        ],
        out_specs=pl.BlockSpec((1, 1, L, ncls), lambda n, z, kz: (n, z, 0, 0)),
        compiler_params=pltpu.CompilerParams(
            dimension_semantics=("parallel", "parallel", "arbitrary"),
            vmem_limit_bytes=VMEM_LIMIT),
    )(xp, w4, b2)

    # drop the junk columns introduced by the flat row-offset trick
    return out.reshape(N, Do, Ho, Wp, ncls)[:, :, :, :Wo, :]


# ---------------------------------------------------------------------------
# Final.forward(x, y)
# ---------------------------------------------------------------------------
def final_forward(params, x, y):
    """x: (N, first_out_chans, D, H, W); y: (N, in_chans, 2D, 2H, 2W)
    -> (N, num_class, 2D, 2H, 2W)."""
    x_cl = jnp.transpose(x, (0, 2, 3, 4, 1)).astype(jnp.float32)
    y_cl = jnp.transpose(y, (0, 2, 3, 4, 1)).astype(jnp.float32)

    xu = transposed_conv2x_bn_lrelu(x_cl, params["wt"], params["gamma"], params["beta"])
    cat = jnp.concatenate([y_cl, xu], axis=-1)      # torch.cat([y, x], dim=1)
    out = conv3d_3x3x3(cat, params["w1"], params["b1"])
    return jnp.transpose(out, (0, 4, 1, 2, 3))      # NDHWC -> NCDHW


# ---------------------------------------------------------------------------
# Deterministic parameter init matching the module's shapes
# ---------------------------------------------------------------------------
def init_params(key, in_chans, first_out_chans, num_class):
    k1, k2, k3 = jax.random.split(key, 3)
    cin = in_chans + first_out_chans
    bound1 = 1.0 / math.sqrt(cin * 27)
    bound_t = 1.0 / math.sqrt(first_out_chans * 8)
    return dict(
        w1=jax.random.uniform(k1, (num_class, cin, 3, 3, 3), jnp.float32, -bound1, bound1),
        b1=jax.random.uniform(k2, (num_class,), jnp.float32, -bound1, bound1),
        wt=jax.random.uniform(k3, (first_out_chans, first_out_chans, 2, 2, 2),
                              jnp.float32, -bound_t, bound_t),
        gamma=jnp.ones((first_out_chans,), jnp.float32),
        beta=jnp.zeros((first_out_chans,), jnp.float32),
    )


# ---------------------------------------------------------------------------
if __name__ == "__main__":
    N = 2
    in_chans = 2
    first_out_chans = 4
    num_class = 3
    D = H = W = 8                      # low-res input; output is 2x resolution

    key = jax.random.PRNGKey(0)
    kp, kx, ky = jax.random.split(key, 3)
    params = init_params(kp, in_chans, first_out_chans, num_class)
    x = jax.random.normal(kx, (N, first_out_chans, D, H, W), jnp.float32)
    y = jax.random.normal(ky, (N, in_chans, 2 * D, 2 * H, 2 * W), jnp.float32)

    fwd = jax.jit(final_forward)
    out = jax.block_until_ready(fwd(params, x, y))

    assert out.shape == (N, num_class, 2 * D, 2 * H, 2 * W), out.shape
    assert bool(jnp.all(jnp.isfinite(out)))
    print("KERNEL_OK")
</pallas_src>

<mosaic_0001>
module attributes {stable_mosaic.version = 11 : i64} {
  func.func @stats_kernel(%arg0: i32, %arg1: memref<1024x4xf32, #tpu.memory_space<vmem>>, %arg2: memref<4x32xf32, #tpu.memory_space<vmem>>, %arg3: memref<2x32xf32, #tpu.memory_space<vmem>>) attributes {dimension_semantics = [#tpu.dimension_semantics<arbitrary>], iteration_bounds = array<i64: 1>, scalar_prefetch = 0 : i64, scratch_operands = 0 : i64, tpu.core_type = #tpu.core_type<tc>, window_params = [{transform_indices = @transform_0, window_bounds = array<i64: 1024, 4>}, {pipeline_mode = #tpu.pipeline_mode<synchronous>, transform_indices = @transform_1, window_bounds = array<i64: 4, 32>}, {pipeline_mode = #tpu.pipeline_mode<synchronous>, transform_indices = @transform_2, window_bounds = array<i64: 2, 32>}]} {
    %c0_i32 = arith.constant 0 : i32
    %0 = arith.cmpi eq, %arg0, %c0_i32 : i32
    %1 = arith.extui %0 : i1 to i32
    %c0_i32_0 = arith.constant 0 : i32
    %2 = arith.cmpi ne, %1, %c0_i32_0 : i32
    scf.if %2 {
      %cst_15 = arith.constant 0.000000e+00 : f32
      %29 = vector.broadcast %cst_15 : f32 to vector<2x32xf32>
      %c0_16 = arith.constant 0 : index
      %c0_17 = arith.constant 0 : index
      %30 = vector.load %arg3[%c0_16, %c0_17] : memref<2x32xf32, #tpu.memory_space<vmem>>, vector<2x32xf32>
      tpu.vector_store %arg3[%c0_16, %c0_17], %29 {strides = array<i32>} : memref<2x32xf32, #tpu.memory_space<vmem>>, vector<2x32xf32>,
    } else {
    }
    %c1024_i32 = arith.constant 1024 : i32
    %3 = arith.muli %arg0, %c1024_i32 : i32
    %4 = tpu.iota {dimensions = array<i32: 0>} : vector<1024x1xi32>
    %5 = vector.broadcast %3 : i32 to vector<1024x1xi32>
    %6 = arith.addi %5, %4 : vector<1024x1xi32>
    %c1024_i32_1 = arith.constant 1024 : i32
    %7 = vector.broadcast %c1024_i32_1 : i32 to vector<1024x1xi32>
    %8 = arith.cmpi slt, %6, %7 : vector<1024x1xi32>
    %c0 = arith.constant 0 : index
    %c0_2 = arith.constant 0 : index
    %9 = vector.load %arg1[%c0, %c0_2] : memref<1024x4xf32, #tpu.memory_space<vmem>>, vector<1024x4xf32>
    %cst = arith.constant 0.000000e+00 : f32
    %10 = vector.shape_cast %8 : vector<1024x1xi1> to vector<1024x1xi1>
    %11 = vector.broadcast %10 : vector<1024x1xi1> to vector<1024x4xi1>
    %12 = vector.broadcast %cst : f32 to vector<1024x4xf32>
    %13 = arith.select %11, %9, %12 : vector<1024x4xi1>, vector<1024x4xf32>
    %14 = arith.truncf %13 : vector<1024x4xf32> to vector<1024x4xbf16>
    %c0_3 = arith.constant 0 : index
    %c0_4 = arith.constant 0 : index
    %15 = vector.load %arg2[%c0_3, %c0_4] : memref<4x32xf32, #tpu.memory_space<vmem>>, vector<4x32xf32>
    %16 = arith.truncf %15 : vector<4x32xf32> to vector<4x32xbf16>
    %cst_5 = arith.constant dense<0.000000e+00> : vector<1024x32xf32>
    %17 = tpu.matmul %14, %16, %cst_5 {dimension_numbers = #tpu.dot_dimension_numbers<[1], [0], [0], [1], [0, 0, 1, 1], [], []>} : vector<1024x4xbf16>, vector<4x32xbf16>, vector<1024x32xf32> -> vector<1024x32xf32>
    %c0_6 = arith.constant 0 : index
    %c0_7 = arith.constant 0 : index
    %18 = vector.load %arg3[%c0_6, %c0_7] : memref<2x32xf32, #tpu.memory_space<vmem>>, vector<1x32xf32>
    %cst_8 = arith.constant dense<0.000000e+00> : vector<32xf32>
    %19 = vector.multi_reduction <add>, %17, %cst_8 [0] : vector<1024x32xf32> to vector<32xf32>
    %20 = vector.shape_cast %19 : vector<32xf32> to vector<1x32xf32>
    %21 = arith.addf %18, %20 : vector<1x32xf32>
    %c0_9 = arith.constant 0 : index
    %c0_10 = arith.constant 0 : index
    %22 = vector.load %arg3[%c0_9, %c0_10] : memref<2x32xf32, #tpu.memory_space<vmem>>, vector<1x32xf32>
    tpu.vector_store %arg3[%c0_9, %c0_10], %21 {strides = array<i32>} : memref<2x32xf32, #tpu.memory_space<vmem>>, vector<1x32xf32>,
    %c1 = arith.constant 1 : index
    %c0_11 = arith.constant 0 : index
    %23 = vector.load %arg3[%c1, %c0_11] : memref<2x32xf32, #tpu.memory_space<vmem>>, vector<1x32xf32>
    %24 = arith.mulf %17, %17 : vector<1024x32xf32>
    %cst_12 = arith.constant dense<0.000000e+00> : vector<32xf32>
    %25 = vector.multi_reduction <add>, %24, %cst_12 [0] : vector<1024x32xf32> to vector<32xf32>
    %26 = vector.shape_cast %25 : vector<32xf32> to vector<1x32xf32>
    %27 = arith.addf %23, %26 : vector<1x32xf32>
    %c1_13 = arith.constant 1 : index
    %c0_14 = arith.constant 0 : index
    %28 = vector.load %arg3[%c1_13, %c0_14] : memref<2x32xf32, #tpu.memory_space<vmem>>, vector<1x32xf32>
    tpu.vector_store %arg3[%c1_13, %c0_14], %27 {strides = array<i32>} : memref<2x32xf32, #tpu.memory_space<vmem>>, vector<1x32xf32>,
    return
  }
  func.func @transform_0(%arg0: i32) -> (i32, i32) {
    %c0_i32 = arith.constant 0 : i32
    %c0_i32_0 = arith.constant 0 : i32
    return %arg0, %c0_i32 : i32, i32
  }
  func.func @transform_1(%arg0: i32) -> (i32, i32) {
    %c0_i32 = arith.constant 0 : i32
    %c0_i32_0 = arith.constant 0 : i32
    %c0_i32_1 = arith.constant 0 : i32
    return %c0_i32, %c0_i32_0 : i32, i32
  }
  func.func @transform_2(%arg0: i32) -> (i32, i32) {
    %c0_i32 = arith.constant 0 : i32
    %c0_i32_0 = arith.constant 0 : i32
    %c0_i32_1 = arith.constant 0 : i32
    return %c0_i32, %c0_i32_0 : i32, i32
  }
}

module attributes {stable_mosaic.version = 11 : i64} {
  func.func @apply_kernel(%arg0: i32, %arg1: memref<1024x4xf32, #tpu.memory_space<vmem>>, %arg2: memref<4x32xbf16, #tpu.memory_space<vmem>>, %arg3: memref<1x32xf32, #tpu.memory_space<vmem>>, %arg4: memref<1024x32xf32, #tpu.memory_space<vmem>>) attributes {dimension_semantics = [#tpu.dimension_semantics<parallel>], iteration_bounds = array<i64: 1>, scalar_prefetch = 0 : i64, scratch_operands = 0 : i64, tpu.core_type = #tpu.core_type<tc>, window_params = [{transform_indices = @transform_0, window_bounds = array<i64: 1024, 4>}, {pipeline_mode = #tpu.pipeline_mode<synchronous>, transform_indices = @transform_1, window_bounds = array<i64: 4, 32>}, {pipeline_mode = #tpu.pipeline_mode<synchronous>, transform_indices = @transform_2, window_bounds = array<i64: 1, 32>}, {transform_indices = @transform_3, window_bounds = array<i64: 1024, 32>}]} {
    %c0 = arith.constant 0 : index
    %c0_0 = arith.constant 0 : index
    %0 = vector.load %arg1[%c0, %c0_0] : memref<1024x4xf32, #tpu.memory_space<vmem>>, vector<1024x4xf32>
    %1 = arith.truncf %0 : vector<1024x4xf32> to vector<1024x4xbf16>
    %c0_1 = arith.constant 0 : index
    %c0_2 = arith.constant 0 : index
    %2 = vector.load %arg2[%c0_1, %c0_2] : memref<4x32xbf16, #tpu.memory_space<vmem>>, vector<4x32xbf16>
    %cst = arith.constant dense<0.000000e+00> : vector<1024x32xf32>
    %3 = tpu.matmul %1, %2, %cst {dimension_numbers = #tpu.dot_dimension_numbers<[1], [0], [0], [1], [0, 0, 1, 1], [], []>} : vector<1024x4xbf16>, vector<4x32xbf16>, vector<1024x32xf32> -> vector<1024x32xf32>
    %c0_3 = arith.constant 0 : index
    %c0_4 = arith.constant 0 : index
    %4 = vector.load %arg3[%c0_3, %c0_4] : memref<1x32xf32, #tpu.memory_space<vmem>>, vector<1x32xf32>
    %5 = vector.broadcast %4 : vector<1x32xf32> to vector<1024x32xf32>
    %6 = arith.addf %3, %5 : vector<1024x32xf32>
    %cst_5 = arith.constant 0.000000e+00 : f32
    %7 = vector.broadcast %cst_5 : f32 to vector<1024x32xf32>
    %8 = arith.cmpf oge, %6, %7 : vector<1024x32xf32>
    %cst_6 = arith.constant 0.00999999977 : f32
    %9 = vector.broadcast %cst_6 : f32 to vector<1024x32xf32>
    %10 = arith.mulf %9, %6 : vector<1024x32xf32>
    %11 = arith.select %8, %6, %10 : vector<1024x32xi1>, vector<1024x32xf32>
    %c0_7 = arith.constant 0 : index
    %c0_8 = arith.constant 0 : index
    %12 = vector.load %arg4[%c0_7, %c0_8] : memref<1024x32xf32, #tpu.memory_space<vmem>>, vector<1024x32xf32>
    tpu.vector_store %arg4[%c0_7, %c0_8], %11 {strides = array<i32>} : memref<1024x32xf32, #tpu.memory_space<vmem>>, vector<1024x32xf32>,
    return
  }
  func.func @transform_0(%arg0: i32) -> (i32, i32) {
    %c0_i32 = arith.constant 0 : i32
    %c0_i32_0 = arith.constant 0 : i32
    return %arg0, %c0_i32 : i32, i32
  }
  func.func @transform_1(%arg0: i32) -> (i32, i32) {
    %c0_i32 = arith.constant 0 : i32
    %c0_i32_0 = arith.constant 0 : i32
    %c0_i32_1 = arith.constant 0 : i32
    return %c0_i32, %c0_i32_0 : i32, i32
  }
  func.func @transform_2(%arg0: i32) -> (i32, i32) {
    %c0_i32 = arith.constant 0 : i32
    %c0_i32_0 = arith.constant 0 : i32
    %c0_i32_1 = arith.constant 0 : i32
    return %c0_i32, %c0_i32_0 : i32, i32
  }
  func.func @transform_3(%arg0: i32) -> (i32, i32) {
    %c0_i32 = arith.constant 0 : i32
    %c0_i32_0 = arith.constant 0 : i32
    return %arg0, %c0_i32 : i32, i32
  }
}

module attributes {stable_mosaic.version = 11 : i64} {
  func.func @kernel(%arg0: i32, %arg1: i32, %arg2: i32, %arg3: memref<1x1x361x6xf32, #tpu.memory_space<vmem>>, %arg4: memref<1x9x6x3xf32, #tpu.memory_space<vmem>>, %arg5: memref<1x3xf32, #tpu.memory_space<vmem>>, %arg6: memref<1x1x304x3xf32, #tpu.memory_space<vmem>>) attributes {dimension_semantics = [#tpu.dimension_semantics<parallel>, #tpu.dimension_semantics<parallel>, #tpu.dimension_semantics<arbitrary>], iteration_bounds = array<i64: 2, 16, 3>, scalar_prefetch = 0 : i64, scratch_operands = 0 : i64, tpu.core_type = #tpu.core_type<tc>, window_params = [{transform_indices = @transform_0, window_bounds = array<i64: 1, 1, 361, 6>}, {transform_indices = @transform_1, window_bounds = array<i64: 1, 9, 6, 3>}, {pipeline_mode = #tpu.pipeline_mode<synchronous>, transform_indices = @transform_2, window_bounds = array<i64: 1, 3>}, {transform_indices = @transform_3, window_bounds = array<i64: 1, 1, 304, 3>}]} {
    %c0_i32 = arith.constant 0 : i32
    %0 = arith.cmpi eq, %arg2, %c0_i32 : i32
    %1 = arith.extui %0 : i1 to i32
    %c0_i32_0 = arith.constant 0 : i32
    %2 = arith.cmpi ne, %1, %c0_i32_0 : i32
    scf.if %2 {
      %c0_74 = arith.constant 0 : index
      %c0_75 = arith.constant 0 : index
      %80 = vector.load %arg5[%c0_74, %c0_75] : memref<1x3xf32, #tpu.memory_space<vmem>>, vector<1x3xf32>
      %81 = vector.shape_cast %80 : vector<1x3xf32> to vector<1x3xf32>
      %82 = vector.broadcast %81 : vector<1x3xf32> to vector<304x3xf32>
      %c0_76 = arith.constant 0 : index
      %c0_77 = arith.constant 0 : index
      %c0_78 = arith.constant 0 : index
      %c0_79 = arith.constant 0 : index
      %83 = vector.load %arg6[%c0_76, %c0_77, %c0_78, %c0_79] : memref<1x1x304x3xf32, #tpu.memory_space<vmem>>, vector<1x1x304x3xf32>
      %84 = vector.shape_cast %83 : vector<1x1x304x3xf32> to vector<304x3xf32>
      %85 = vector.shape_cast %82 : vector<304x3xf32> to vector<1x1x304x3xf32>
      tpu.vector_store %arg6[%c0_76, %c0_77, %c0_78, %c0_79], %85 {strides = array<i32>} : memref<1x1x304x3xf32, #tpu.memory_space<vmem>>, vector<1x1x304x3xf32>,
    } else {
    }
    %c0 = arith.constant 0 : index
    %c0_1 = arith.constant 0 : index
    %c0_2 = arith.constant 0 : index
    %c0_3 = arith.constant 0 : index
    %3 = vector.load %arg6[%c0, %c0_1, %c0_2, %c0_3] : memref<1x1x304x3xf32, #tpu.memory_space<vmem>>, vector<1x1x304x3xf32>
    %4 = vector.shape_cast %3 : vector<1x1x304x3xf32> to vector<304x3xf32>
    %c0_4 = arith.constant 0 : index
    %c0_5 = arith.constant 0 : index
    %c0_6 = arith.constant 0 : index
    %c0_7 = arith.constant 0 : index
    %5 = vector.load %arg3[%c0_4, %c0_5, %c0_6, %c0_7] : memref<1x1x361x6xf32, #tpu.memory_space<vmem>>, vector<1x1x304x6xf32>
    %6 = vector.shape_cast %5 : vector<1x1x304x6xf32> to vector<304x6xf32>
    %7 = arith.truncf %6 : vector<304x6xf32> to vector<304x6xbf16>
    %c0_8 = arith.constant 0 : index
    %c0_9 = arith.constant 0 : index
    %c0_10 = arith.constant 0 : index
    %c0_11 = arith.constant 0 : index
    %8 = vector.load %arg4[%c0_8, %c0_9, %c0_10, %c0_11] : memref<1x9x6x3xf32, #tpu.memory_space<vmem>>, vector<1x1x6x3xf32>
    %9 = vector.shape_cast %8 : vector<1x1x6x3xf32> to vector<6x3xf32>
    %10 = arith.truncf %9 : vector<6x3xf32> to vector<6x3xbf16>
    %cst = arith.constant dense<0.000000e+00> : vector<304x3xf32>
    %11 = tpu.matmul %7, %10, %cst {dimension_numbers = #tpu.dot_dimension_numbers<[1], [0], [0], [1], [0, 0, 1, 1], [], []>} : vector<304x6xbf16>, vector<6x3xbf16>, vector<304x3xf32> -> vector<304x3xf32>
    %12 = arith.addf %4, %11 : vector<304x3xf32>
    %c0_12 = arith.constant 0 : index
    %c0_13 = arith.constant 0 : index
    %c1 = arith.constant 1 : index
    %c0_14 = arith.constant 0 : index
    %13 = vector.load %arg3[%c0_12, %c0_13, %c1, %c0_14] : memref<1x1x361x6xf32, #tpu.memory_space<vmem>>, vector<1x1x304x6xf32>
    %14 = vector.shape_cast %13 : vector<1x1x304x6xf32> to vector<304x6xf32>
    %15 = arith.truncf %14 : vector<304x6xf32> to vector<304x6xbf16>
    %c0_15 = arith.constant 0 : index
    %c1_16 = arith.constant 1 : index
    %c0_17 = arith.constant 0 : index
    %c0_18 = arith.constant 0 : index
    %16 = vector.load %arg4[%c0_15, %c1_16, %c0_17, %c0_18] : memref<1x9x6x3xf32, #tpu.memory_space<vmem>>, vector<1x1x6x3xf32>
    %17 = vector.shape_cast %16 : vector<1x1x6x3xf32> to vector<6x3xf32>
    %18 = arith.truncf %17 : vector<6x3xf32> to vector<6x3xbf16>
    %cst_19 = arith.constant dense<0.000000e+00> : vector<304x3xf32>
    %19 = tpu.matmul %15, %18, %cst_19 {dimension_numbers = #tpu.dot_dimension_numbers<[1], [0], [0], [1], [0, 0, 1, 1], [], []>} : vector<304x6xbf16>, vector<6x3xbf16>, vector<304x3xf32> -> vector<304x3xf32>
    %20 = arith.addf %12, %19 : vector<304x3xf32>
    %c0_20 = arith.constant 0 : index
    %c0_21 = arith.constant 0 : index
    %c2 = arith.constant 2 : index
    %c0_22 = arith.constant 0 : index
    %21 = vector.load %arg3[%c0_20, %c0_21, %c2, %c0_22] : memref<1x1x361x6xf32, #tpu.memory_space<vmem>>, vector<1x1x304x6xf32>
    %22 = vector.shape_cast %21 : vector<1x1x304x6xf32> to vector<304x6xf32>
    %23 = arith.truncf %22 : vector<304x6xf32> to vector<304x6xbf16>
    %c0_23 = arith.constant 0 : index
    %c2_24 = arith.constant 2 : index
    %c0_25 = arith.constant 0 : index
    %c0_26 = arith.constant 0 : index
    %24 = vector.load %arg4[%c0_23, %c2_24, %c0_25, %c0_26] : memref<1x9x6x3xf32, #tpu.memory_space<vmem>>, vector<1x1x6x3xf32>
    %25 = vector.shape_cast %24 : vector<1x1x6x3xf32> to vector<6x3xf32>
    %26 = arith.truncf %25 : vector<6x3xf32> to vector<6x3xbf16>
    %cst_27 = arith.constant dense<0.000000e+00> : vector<304x3xf32>
    %27 = tpu.matmul %23, %26, %cst_27 {dimension_numbers = #tpu.dot_dimension_numbers<[1], [0], [0], [1], [0, 0, 1, 1], [], []>} : vector<304x6xbf16>, vector<6x3xbf16>, vector<304x3xf32> -> vector<304x3xf32>
    %28 = arith.addf %20, %27 : vector<304x3xf32>
    %c0_28 = arith.constant 0 : index
    %c0_29 = arith.constant 0 : index
    %c19 = arith.constant 19 : index
    %c0_30 = arith.constant 0 : index
    %29 = vector.load %arg3[%c0_28, %c0_29, %c19, %c0_30] : memref<1x1x361x6xf32, #tpu.memory_space<vmem>>, vector<1x1x304x6xf32>
    %30 = vector.shape_cast %29 : vector<1x1x304x6xf32> to vector<304x6xf32>
    %31 = arith.truncf %30 : vector<304x6xf32> to vector<304x6xbf16>
    %c0_31 = arith.constant 0 : index
    %c3 = arith.constant 3 : index
    %c0_32 = arith.constant 0 : index
    %c0_33 = arith.constant 0 : index
    %32 = vector.load %arg4[%c0_31, %c3, %c0_32, %c0_33] : memref<1x9x6x3xf32, #tpu.memory_space<vmem>>, vector<1x1x6x3xf32>
    %33 = vector.shape_cast %32 : vector<1x1x6x3xf32> to vector<6x3xf32>
    %34 = arith.truncf %33 : vector<6x3xf32> to vector<6x3xbf16>
    %cst_34 = arith.constant dense<0.000000e+00> : vector<304x3xf32>
    %35 = tpu.matmul %31, %34, %cst_34 {dimension_numbers = #tpu.dot_dimension_numbers<[1], [0], [0], [1], [0, 0, 1, 1], [], []>} : vector<304x6xbf16>, vector<6x3xbf16>, vector<304x3xf32> -> vector<304x3xf32>
    %36 = arith.addf %28, %35 : vector<304x3xf32>
    %c0_35 = arith.constant 0 : index
    %c0_36 = arith.constant 0 : index
    %c20 = arith.constant 20 : index
    %c0_37 = arith.constant 0 : index
    %37 = vector.load %arg3[%c0_35, %c0_36, %c20, %c0_37] : memref<1x1x361x6xf32, #tpu.memory_space<vmem>>, vector<1x1x304x6xf32>
    %38 = vector.shape_cast %37 : vector<1x1x304x6xf32> to vector<304x6xf32>
    %39 = arith.truncf %38 : vector<304x6xf32> to vector<304x6xbf16>
    %c0_38 = arith.constant 0 : index
    %c4 = arith.constant 4 : index
    %c0_39 = arith.constant 0 : index
    %c0_40 = arith.constant 0 : index
    %40 = vector.load %arg4[%c0_38, %c4, %c0_39, %c0_40] : memref<1x9x6x3xf32, #tpu.memory_space<vmem>>, vector<1x1x6x3xf32>
    %41 = vector.shape_cast %40 : vector<1x1x6x3xf32> to vector<6x3xf32>
    %42 = arith.truncf %41 : vector<6x3xf32> to vector<6x3xbf16>
    %cst_41 = arith.constant dense<0.000000e+00> : vector<304x3xf32>
    %43 = tpu.matmul %39, %42, %cst_41 {dimension_numbers = #tpu.dot_dimension_numbers<[1], [0], [0], [1], [0, 0, 1, 1], [], []>} : vector<304x6xbf16>, vector<6x3xbf16>, vector<304x3xf32> -> vector<304x3xf32>
    %44 = arith.addf %36, %43 : vector<304x3xf32>
    %c0_42 = arith.constant 0 : index
    %c0_43 = arith.constant 0 : index
    %c21 = arith.constant 21 : index
    %c0_44 = arith.constant 0 : index
    %45 = vector.load %arg3[%c0_42, %c0_43, %c21, %c0_44] : memref<1x1x361x6xf32, #tpu.memory_space<vmem>>, vector<1x1x304x6xf32>
    %46 = vector.shape_cast %45 : vector<1x1x304x6xf32> to vector<304x6xf32>
    %47 = arith.truncf %46 : vector<304x6xf32> to vector<304x6xbf16>
    %c0_45 = arith.constant 0 : index
    %c5 = arith.constant 5 : index
    %c0_46 = arith.constant 0 : index
    %c0_47 = arith.constant 0 : index
    %48 = vector.load %arg4[%c0_45, %c5, %c0_46, %c0_47] : memref<1x9x6x3xf32, #tpu.memory_space<vmem>>, vector<1x1x6x3xf32>
    %49 = vector.shape_cast %48 : vector<1x1x6x3xf32> to vector<6x3xf32>
    %50 = arith.truncf %49 : vector<6x3xf32> to vector<6x3xbf16>
    %cst_48 = arith.constant dense<0.000000e+00> : vector<304x3xf32>
    %51 = tpu.matmul %47, %50, %cst_48 {dimension_numbers = #tpu.dot_dimension_numbers<[1], [0], [0], [1], [0, 0, 1, 1], [], []>} : vector<304x6xbf16>, vector<6x3xbf16>, vector<304x3xf32> -> vector<304x3xf32>
    %52 = arith.addf %44, %51 : vector<304x3xf32>
    %c0_49 = arith.constant 0 : index
    %c0_50 = arith.constant 0 : index
    %c38 = arith.constant 38 : index
    %c0_51 = arith.constant 0 : index
    %53 = vector.load %arg3[%c0_49, %c0_50, %c38, %c0_51] : memref<1x1x361x6xf32, #tpu.memory_space<vmem>>, vector<1x1x304x6xf32>
    %54 = vector.shape_cast %53 : vector<1x1x304x6xf32> to vector<304x6xf32>
    %55 = arith.truncf %54 : vector<304x6xf32> to vector<304x6xbf16>
    %c0_52 = arith.constant 0 : index
    %c6 = arith.constant 6 : index
    %c0_53 = arith.constant 0 : index
    %c0_54 = arith.constant 0 : index
    %56 = vector.load %arg4[%c0_52, %c6, %c0_53, %c0_54] : memref<1x9x6x3xf32, #tpu.memory_space<vmem>>, vector<1x1x6x3xf32>
    %57 = vector.shape_cast %56 : vector<1x1x6x3xf32> to vector<6x3xf32>
    %58 = arith.truncf %57 : vector<6x3xf32> to vector<6x3xbf16>
    %cst_55 = arith.constant dense<0.000000e+00> : vector<304x3xf32>
    %59 = tpu.matmul %55, %58, %cst_55 {dimension_numbers = #tpu.dot_dimension_numbers<[1], [0], [0], [1], [0, 0, 1, 1], [], []>} : vector<304x6xbf16>, vector<6x3xbf16>, vector<304x3xf32> -> vector<304x3xf32>
    %60 = arith.addf %52, %59 : vector<304x3xf32>
    %c0_56 = arith.constant 0 : index
    %c0_57 = arith.constant 0 : index
    %c39 = arith.constant 39 : index
    %c0_58 = arith.constant 0 : index
    %61 = vector.load %arg3[%c0_56, %c0_57, %c39, %c0_58] : memref<1x1x361x6xf32, #tpu.memory_space<vmem>>, vector<1x1x304x6xf32>
    %62 = vector.shape_cast %61 : vector<1x1x304x6xf32> to vector<304x6xf32>
    %63 = arith.truncf %62 : vector<304x6xf32> to vector<304x6xbf16>
    %c0_59 = arith.constant 0 : index
    %c7 = arith.constant 7 : index
    %c0_60 = arith.constant 0 : index
    %c0_61 = arith.constant 0 : index
    %64 = vector.load %arg4[%c0_59, %c7, %c0_60, %c0_61] : memref<1x9x6x3xf32, #tpu.memory_space<vmem>>, vector<1x1x6x3xf32>
    %65 = vector.shape_cast %64 : vector<1x1x6x3xf32> to vector<6x3xf32>
    %66 = arith.truncf %65 : vector<6x3xf32> to vector<6x3xbf16>
    %cst_62 = arith.constant dense<0.000000e+00> : vector<304x3xf32>
    %67 = tpu.matmul %63, %66, %cst_62 {dimension_numbers = #tpu.dot_dimension_numbers<[1], [0], [0], [1], [0, 0, 1, 1], [], []>} : vector<304x6xbf16>, vector<6x3xbf16>, vector<304x3xf32> -> vector<304x3xf32>
    %68 = arith.addf %60, %67 : vector<304x3xf32>
    %c0_63 = arith.constant 0 : index
    %c0_64 = arith.constant 0 : index
    %c40 = arith.constant 40 : index
    %c0_65 = arith.constant 0 : index
    %69 = vector.load %arg3[%c0_63, %c0_64, %c40, %c0_65] : memref<1x1x361x6xf32, #tpu.memory_space<vmem>>, vector<1x1x304x6xf32>
    %70 = vector.shape_cast %69 : vector<1x1x304x6xf32> to vector<304x6xf32>
    %71 = arith.truncf %70 : vector<304x6xf32> to vector<304x6xbf16>
    %c0_66 = arith.constant 0 : index
    %c8 = arith.constant 8 : index
    %c0_67 = arith.constant 0 : index
    %c0_68 = arith.constant 0 : index
    %72 = vector.load %arg4[%c0_66, %c8, %c0_67, %c0_68] : memref<1x9x6x3xf32, #tpu.memory_space<vmem>>, vector<1x1x6x3xf32>
    %73 = vector.shape_cast %72 : vector<1x1x6x3xf32> to vector<6x3xf32>
    %74 = arith.truncf %73 : vector<6x3xf32> to vector<6x3xbf16>
    %cst_69 = arith.constant dense<0.000000e+00> : vector<304x3xf32>
    %75 = tpu.matmul %71, %74, %cst_69 {dimension_numbers = #tpu.dot_dimension_numbers<[1], [0], [0], [1], [0, 0, 1, 1], [], []>} : vector<304x6xbf16>, vector<6x3xbf16>, vector<304x3xf32> -> vector<304x3xf32>
    %76 = arith.addf %68, %75 : vector<304x3xf32>
    %c0_70 = arith.constant 0 : index
    %c0_71 = arith.constant 0 : index
    %c0_72 = arith.constant 0 : index
    %c0_73 = arith.constant 0 : index
    %77 = vector.load %arg6[%c0_70, %c0_71, %c0_72, %c0_73] : memref<1x1x304x3xf32, #tpu.memory_space<vmem>>, vector<1x1x304x3xf32>
    %78 = vector.shape_cast %77 : vector<1x1x304x3xf32> to vector<304x3xf32>
    %79 = vector.shape_cast %76 : vector<304x3xf32> to vector<1x1x304x3xf32>
    tpu.vector_store %arg6[%c0_70, %c0_71, %c0_72, %c0_73], %79 {strides = array<i32>} : memref<1x1x304x3xf32, #tpu.memory_space<vmem>>, vector<1x1x304x3xf32>,
    return
  }
  func.func @transform_0(%arg0: i32, %arg1: i32, %arg2: i32) -> (i32, i32, i32, i32) {
    %0 = arith.addi %arg1, %arg2 : i32
    %c0_i32 = arith.constant 0 : i32
    %c0_i32_0 = arith.constant 0 : i32
    %c0_i32_1 = arith.constant 0 : i32
    return %arg0, %0, %c0_i32, %c0_i32_0 : i32, i32, i32, i32
  }
  func.func @transform_1(%arg0: i32, %arg1: i32, %arg2: i32) -> (i32, i32, i32, i32) {
    %c0_i32 = arith.constant 0 : i32
    %c0_i32_0 = arith.constant 0 : i32
    %c0_i32_1 = arith.constant 0 : i32
    %c0_i32_2 = arith.constant 0 : i32
    return %arg2, %c0_i32, %c0_i32_0, %c0_i32_1 : i32, i32, i32, i32
  }
  func.func @transform_2(%arg0: i32, %arg1: i32, %arg2: i32) -> (i32, i32) {
    %c0_i32 = arith.constant 0 : i32
    %c0_i32_0 = arith.constant 0 : i32
    %c0_i32_1 = arith.constant 0 : i32
    return %c0_i32, %c0_i32_0 : i32, i32
  }
  func.func @transform_3(%arg0: i32, %arg1: i32, %arg2: i32) -> (i32, i32, i32, i32) {
    %c0_i32 = arith.constant 0 : i32
    %c0_i32_0 = arith.constant 0 : i32
    %c0_i32_1 = arith.constant 0 : i32
    return %arg0, %arg1, %c0_i32, %c0_i32_0 : i32, i32, i32, i32
  }
}

</mosaic_0001>

<bundles_post_ra>
// kernel: squeeze.2
= control target key start
LH: loop header
LB: loop body
LE: loop exit
PB: predicated region body
PF: predicated region fallthrough
CT: control target
= control target key end

     0   :  { %s66_s8 = smov 116   ;;  %vm7_vm0 = vcmask 31744   ;;  %s67_s11 = smov 120   ;;  %s117_s0 = inlined_call_operand.vmem [shape: f32[32], index: 0, kind: input, shape index: {}]   ;;  %s118_s1 = inlined_call_operand.vmem [shape: f32[8,4], index: 1, kind: output, shape index: {}]  }
   0x1   :  { %v4_v0 = vld [vmem:[%s117_s0] sm:$0x1]  ;;  %s65_s0 = smov 124   ;;  %s68_s12 = smov 112  }
   0x2   :  { %5 = vst [vmem:[#allocation0] sm:$0x1] %v4_v0  ;;  %s69_s13 = smov 108   ;;  %s70_s14 = smov 104  }
   0x3   :  { %s71_s15 = smov 100  }
   0x9   :  { %v9_v1 = vld [vmem:[#allocation0] sm:$0x1]  }
   0xa   :  { %v21_v2 = vld [vmem:[#allocation0] sm:$0x1]   ;;  %10 = vrot.lane.b32.xlu0 %v9_v1, %s65_s0 }
   0xb   :  { %22 = vrot.lane.b32.xlu1 %v21_v2, %s66_s8  ;;  %v15_v3 = vld [vmem:[#allocation0] sm:$0x1]  }
   0xc   :  { %v27_v4 = vld [vmem:[#allocation0] sm:$0x1]  }
   0xd   :  { %v6_v5 = vld [vmem:[#allocation0] sm:$0x1]  }
   0xe   :  { %8 = vst.msk [vmem:[%s118_s1] sm:$0x1] %vm7_vm0, %v6_v5   ;;  %16 = vrot.lane.b32.xlu0 %v15_v3, %s67_s11  ;;  %v33_v6 = vld [vmem:[#allocation0] sm:$0x1]  }
   0xf   :  { %28 = vrot.lane.b32.xlu1 %v27_v4, %s68_s12  ;;  %v39_v7 = vld [vmem:[#allocation0] sm:$0x1]  }
  0x10   :  { %v45_v8 = vld [vmem:[#allocation0] sm:$0x1]  }
  0x12   :  { %34 = vrot.lane.b32.xlu0 %v33_v6, %s69_s13 }
  0x13   :  { %40 = vrot.lane.b32.xlu1 %v39_v7, %s70_s14 }
  0x16   :  { %46 = vrot.lane.b32.xlu0 %v45_v8, %s71_s15 }
  0x7c   :  { %v11_v9 = vpop.permute.xlu0 %10  }
  0x7d   :  { %v23_v10 = vpop.permute.xlu1 %22   ;;  %51 = vst.msk [vmem:[%s118_s1 + $0x1] sm:$0x1] %vm7_vm0, %v11_v9  }
  0x7e   :  { %53 = vst.msk [vmem:[%s118_s1 + $0x3] sm:$0x1] %vm7_vm0, %v23_v10  }
  0x80   :  { %v17_v11 = vpop.permute.xlu0 %16  }
  0x81   :  { %v29_v12 = vpop.permute.xlu1 %28   ;;  %52 = vst.msk [vmem:[%s118_s1 + $0x2] sm:$0x1] %vm7_vm0, %v17_v11  }
  0x82   :  { %54 = vst.msk [vmem:[%s118_s1 + $0x4] sm:$0x1] %vm7_vm0, %v29_v12  }
  0x84   :  { %v35_v13 = vpop.permute.xlu0 %34  }
  0x85   :  { %v41_v14 = vpop.permute.xlu1 %40   ;;  %55 = vst.msk [vmem:[%s118_s1 + $0x5] sm:$0x1] %vm7_vm0, %v35_v13  }
  0x86   :  { %56 = vst.msk [vmem:[%s118_s1 + $0x6] sm:$0x1] %vm7_vm0, %v41_v14  }
  0x88   :  { %v47_v15 = vpop.permute.xlu0 %46  }
  0x89   :  { %57 = vst.msk [vmem:[%s118_s1 + $0x7] sm:$0x1] %vm7_vm0, %v47_v15  }

// kernel: tile.18
= control target key start
LH: loop header
LB: loop body
LE: loop exit
PB: predicated region body
PF: predicated region fallthrough
CT: control target
= control target key end

     0   :  { %s22_s0 = inlined_call_operand.vmem [shape: f32[4], index: 0, kind: input, shape index: {}]   ;;  %s23_s1 = inlined_call_operand.vmem [shape: f32[8,4], index: 1, kind: output, shape index: {}]  }
   0x1   :  { %v4_v0 = vld [vmem:[%s22_s0] ss:$0 sm:$0xff] }
   0x2   :  { %5 = vst [vmem:[%s23_s1] sm:$0xff] %v4_v0 }

// kernel: tile.19
= control target key start
LH: loop header
LB: loop body
LE: loop exit
PB: predicated region body
PF: predicated region fallthrough
CT: control target
= control target key end

     0   :  { %s67_s10 = smov 28   ;;  %s68_s11 = smov 20   ;;  %vm3_vm0 = vcmask 31744   ;;  %vm9_vm1 = vcmask 261344   ;;  %vm15_vm2 = vcmask 228544   ;;  %vm21_vm3 = vcmask 195744   ;;  %s111_s0 = inlined_call_operand.vmem [shape: f32[8,4], index: 0, kind: input, shape index: {}]   ;;  %s112_s1 = inlined_call_operand.vmem [shape: f32[1,32], index: 1, kind: output, shape index: {}]  }
   0x1   :  { %v53_v0 = vld [vmem:[%s111_s0 + $0x7] sm:$0x1]   ;;  %v55_v1 = vld [vmem:[%s111_s0 + $0x5] sm:$0x1]   ;;  %v54_v2 = vld [vmem:[%s111_s0 + $0x6] sm:$0x1]  }
   0x2   :  { %7 = vrot.lane.b32.xlu0 %v53_v0, %s67_s10  ;;  %19 = vrot.lane.b32.xlu1 %v55_v1, %s68_s11  ;;  %v56_v3 = vld [vmem:[%s111_s0 + $0x4] sm:$0x1]   ;;  %v2_v4 = vld [vmem:[%s111_s0] sm:$0x1]   ;;  %s69_s18 = smov 24   ;;  %s70_s19 = smov 16  }
   0x3   :  { %4 = vst.msk [vmem:[#allocation0] sm:$0x1] %vm3_vm0, %v2_v4   ;;  %v57_v5 = vld [vmem:[%s111_s0 + $0x3] sm:$0x1]   ;;  %v58_v6 = vld [vmem:[%s111_s0 + $0x2] sm:$0x1]  }
   0x4   :  { %s71_s24 = smov 12   ;;  %s72_s25 = smov 8   ;;  %v59_v7 = vld [vmem:[%s111_s0 + $0x1] sm:$0x1]   ;;  %vm27_vm4 = vcmask 162944   ;;  %vm33_vm5 = vcmask 130144  }
   0x5   :  { %s73_s0 = smov 4   ;;  %vm39_vm6 = vcmask 97344   ;;  %vm45_vm7 = vcmask 64544  }
   0x6   :  { %13 = vrot.lane.b32.xlu0 %v54_v2, %s69_s18  ;;  %25 = vrot.lane.b32.xlu1 %v56_v3, %s70_s19 }
   0xa   :  { %31 = vrot.lane.b32.xlu0 %v57_v5, %s71_s24  ;;  %37 = vrot.lane.b32.xlu1 %v58_v6, %s72_s25 }
   0xe   :  { %43 = vrot.lane.b32.xlu0 %v59_v7, %s73_s0 }
  0x74   :  { %v8_v8 = vpop.permute.xlu0 %7   ;;  %v20_v9 = vpop.permute.xlu1 %19  }
  0x75   :  { %10 = vst.msk [vmem:[#allocation0] sm:$0x1] %vm9_vm1, %v8_v8  }
  0x78   :  { %v14_v10 = vpop.permute.xlu0 %13   ;;  %v26_v11 = vpop.permute.xlu1 %25  }
  0x79   :  { %16 = vst.msk [vmem:[#allocation0] sm:$0x1] %vm15_vm2, %v14_v10  }
  0x7a   :  { %22 = vst.msk [vmem:[#allocation0] sm:$0x1] %vm21_vm3, %v20_v9  }
  0x7b   :  { %28 = vst.msk [vmem:[#allocation0] sm:$0x1] %vm27_vm4, %v26_v11  }
  0x7c   :  { %v32_v12 = vpop.permute.xlu0 %31   ;;  %v38_v13 = vpop.permute.xlu1 %37  }
  0x7d   :  { %34 = vst.msk [vmem:[#allocation0] sm:$0x1] %vm33_vm5, %v32_v12  }
  0x7e   :  { %40 = vst.msk [vmem:[#allocation0] sm:$0x1] %vm39_vm6, %v38_v13  }
  0x80   :  { %v44_v14 = vpop.permute.xlu0 %43  }
  0x81   :  { %46 = vst.msk [vmem:[#allocation0] sm:$0x1] %vm45_vm7, %v44_v14  }
  0x88   :  { %v50_v15 = vld [vmem:[#allocation0] sm:$0x1] }
  0x89   :  { %52 = vst [vmem:[%s112_s1] sm:$0x1] %v50_v15 }

// kernel: mul.11
= control target key start
LH: loop header
LB: loop body
LE: loop exit
PB: predicated region body
PF: predicated region fallthrough
CT: control target
= control target key end

     0   :  { %s67_s10 = smov 28   ;;  %s68_s11 = smov 20   ;;  %vm3_vm0 = vcmask 31744   ;;  %vm9_vm1 = vcmask 261344   ;;  %vm15_vm2 = vcmask 228544   ;;  %vm21_vm3 = vcmask 195744   ;;  %s111_s0 = inlined_call_operand.vmem [shape: f32[8,4], index: 0, kind: input, shape index: {}]   ;;  %s112_s1 = inlined_call_operand.vmem [shape: f32[32], index: 1, kind: output, shape index: {}]  }
   0x1   :  { %v53_v0 = vld [vmem:[%s111_s0 + $0x7] sm:$0x1]   ;;  %v55_v1 = vld [vmem:[%s111_s0 + $0x5] sm:$0x1]   ;;  %v54_v2 = vld [vmem:[%s111_s0 + $0x6] sm:$0x1]  }
   0x2   :  { %7 = vrot.lane.b32.xlu0 %v53_v0, %s67_s10  ;;  %19 = vrot.lane.b32.xlu1 %v55_v1, %s68_s11  ;;  %v56_v3 = vld [vmem:[%s111_s0 + $0x4] sm:$0x1]   ;;  %v2_v4 = vld [vmem:[%s111_s0] sm:$0x1]   ;;  %s69_s18 = smov 24   ;;  %s70_s19 = smov 16  }
   0x3   :  { %4 = vst.msk [vmem:[#allocation0] sm:$0x1] %vm3_vm0, %v2_v4   ;;  %v57_v5 = vld [vmem:[%s111_s0 + $0x3] sm:$0x1]   ;;  %v58_v6 = vld [vmem:[%s111_s0 + $0x2] sm:$0x1]  }
   0x4   :  { %s71_s24 = smov 12   ;;  %s72_s25 = smov 8   ;;  %v59_v7 = vld [vmem:[%s111_s0 + $0x1] sm:$0x1]   ;;  %vm27_vm4 = vcmask 162944   ;;  %vm33_vm5 = vcmask 130144  }
   0x5   :  { %s73_s0 = smov 4   ;;  %vm39_vm6 = vcmask 97344   ;;  %vm45_vm7 = vcmask 64544  }
   0x6   :  { %13 = vrot.lane.b32.xlu0 %v54_v2, %s69_s18  ;;  %25 = vrot.lane.b32.xlu1 %v56_v3, %s70_s19 }
   0xa   :  { %31 = vrot.lane.b32.xlu0 %v57_v5, %s71_s24  ;;  %37 = vrot.lane.b32.xlu1 %v58_v6, %s72_s25 }
   0xe   :  { %43 = vrot.lane.b32.xlu0 %v59_v7, %s73_s0 }
  0x74   :  { %v8_v8 = vpop.permute.xlu0 %7   ;;  %v20_v9 = vpop.permute.xlu1 %19  }
  0x75   :  { %10 = vst.msk [vmem:[#allocation0] sm:$0x1] %vm9_vm1, %v8_v8  }
  0x78   :  { %v14_v10 = vpop.permute.xlu0 %13   ;;  %v26_v11 = vpop.permute.xlu1 %25  }
  0x79   :  { %16 = vst.msk [vmem:[#allocation0] sm:$0x1] %vm15_vm2, %v14_v10  }
  0x7a   :  { %22 = vst.msk [vmem:[#allocation0] sm:$0x1] %vm21_vm3, %v20_v9  }
  0x7b   :  { %28 = vst.msk [vmem:[#allocation0] sm:$0x1] %vm27_vm4, %v26_v11  }
  0x7c   :  { %v32_v12 = vpop.permute.xlu0 %31   ;;  %v38_v13 = vpop.permute.xlu1 %37  }
  0x7d   :  { %34 = vst.msk [vmem:[#allocation0] sm:$0x1] %vm33_vm5, %v32_v12  }
  0x7e   :  { %40 = vst.msk [vmem:[#allocation0] sm:$0x1] %vm39_vm6, %v38_v13  }
  0x80   :  { %v44_v14 = vpop.permute.xlu0 %43  }
  0x81   :  { %46 = vst.msk [vmem:[#allocation0] sm:$0x1] %vm45_vm7, %v44_v14  }
  0x88   :  { %v50_v15 = vld [vmem:[#allocation0] sm:$0x1] }
  0x89   :  { %52 = vst [vmem:[%s112_s1] sm:$0x1] %v50_v15 }

// kernel: final_forward.3
= control target key start
LH: loop header
LB: loop body
LE: loop exit
PB: predicated region body
PF: predicated region fallthrough
CT: control target
= control target key end

     0   :  { %vm1176_vm0 = vcmask 1041408   ;;  %vm983_vm1 = vcmask 31744   ;;  %vm1726_vm2 = vcmask 261120   ;;  %vm16_vm3 = vcmask 254976   ;;  %s3712_s1 = inlined_call_operand.vmem [shape: f32[4,32], index: 1, kind: input, shape index: {}]   ;;  %s3713_s0 = inlined_call_operand.vmem [shape: f32[1024,4], index: 0, kind: input, shape index: {}]   ;;  %s3714_s2 = inlined_call_operand.vmem [shape: f32[2,32], index: 2, kind: output, shape index: {}]  }
   0x1   :  { %v981_v0 = vld [vmem:[%s3712_s1] sm:$0xf]  ;;  %v406_v2 = vld [vmem:[%s3713_s0 + $0x8] sm:$0xff]  ;;  %v407_v5 = vld [vmem:[%s3713_s0 + $0x10] sm:$0xff]  ;;  %vm1989_vm4 = vcmask 253952  }
   0x2   :  { %v405_v1 = vld [vmem:[%s3713_s0] sm:$0xff]  ;;  %v982_v3 = vpack.c.bf16 %v981_v0, %v981_v0  ;;  %v408_v6 = vld [vmem:[%s3713_s0 + $0x18] sm:$0xff]  ;;  %v410_v8 = vld [vmem:[%s3713_s0 + $0x28] sm:$0xff] }
   0x3   :  { %v917_v4 = vpack.c.bf16 %v406_v2, %v405_v1  ;;  %v409_v7 = vld [vmem:[%s3713_s0 + $0x20] sm:$0xff]  ;;  %v918_v10 = vpack.c.bf16 %v408_v6, %v407_v5  ;;  %v411_v12 = vld [vmem:[%s3713_s0 + $0x30] sm:$0xff]  ;;  %v412_v13 = vld [vmem:[%s3713_s0 + $0x38] sm:$0xff] }
   0x4   :  { %2648 = vmatprep.subr.msk.bf16.mxu0 %vm1176_vm0, %v982_v3  ;;  %v1178_v9 = vsel %vm1176_vm0, %v982_v3, 0  ;;  %v919_v11 = vpack.c.bf16 %v410_v8, %v409_v7  ;;  %2649 = vmatprep.subr.msk.bf16.mxu1 %vm1176_vm0, %v982_v3  ;;  %v413_v14 = vld [vmem:[%s3713_s0 + $0x40] sm:$0xff]  ;;  %v414_v15 = vld [vmem:[%s3713_s0 + $0x48] sm:$0xff]  ;;  %v920_v16 = vpack.c.bf16 %v412_v13, %v411_v12  ;;  %v415_v18 = vld [vmem:[%s3713_s0 + $0x50] sm:$0xff] }
   0x5   :  { %2518 = vmatprep.mubr.msk.bf16.mxu0 %vm983_vm1, %v917_v4  ;;  %2517 = vmatpush3.bf16.msra.mxu0 %v1178_v9  ;;  %v921_v17 = vpack.c.bf16 %v414_v15, %v413_v14  ;;  %v416_v19 = vld [vmem:[%s3713_s0 + $0x58] sm:$0xff]  ;;  %v417_v20 = vld [vmem:[%s3713_s0 + $0x60] sm:$0xff]  ;;  %v418_v21 = vld [vmem:[%s3713_s0 + $0x68] sm:$0xff] }
   0x6   :  { %2647 = vmatpush3.bf16.msra.mxu1 %v1178_v9  ;;  %v922_v22 = vpack.c.bf16 %v416_v19, %v415_v18  ;;  %v923_v23 = vpack.c.bf16 %v418_v21, %v417_v20  ;;  %v469_v24 = vld [vmem:[%s3713_s0 + $0x200] sm:$0xff]  ;;  %v470_v25 = vld [vmem:[%s3713_s0 + $0x208] sm:$0xff]  ;;  %v471_v26 = vld [vmem:[%s3713_s0 + $0x210] sm:$0xff] }
   0x7   :  { %v472_v27 = vld [vmem:[%s3713_s0 + $0x218] sm:$0xff]  ;;  %v949_v28 = vpack.c.bf16 %v470_v25, %v469_v24  ;;  %v473_v30 = vld [vmem:[%s3713_s0 + $0x220] sm:$0xff]  ;;  %v474_v31 = vld [vmem:[%s3713_s0 + $0x228] sm:$0xff] }
   0x8   :  { %2519 = vmatmul.mubr.msk.bf16.vlgmr.msra.gmra.mrb[0].mxu0 %vm983_vm1, %v918_v10  ;;  %v950_v29 = vpack.c.bf16 %v472_v27, %v471_v26  ;;  %v419_v32 = vld [vmem:[%s3713_s0 + $0x70] sm:$0xff]  ;;  %v420_v33 = vld [vmem:[%s3713_s0 + $0x78] sm:$0xff]  ;;  %v951_v34 = vpack.c.bf16 %v474_v31, %v473_v30  ;;  %v421_v35 = vld [vmem:[%s3713_s0 + $0x80] sm:$0xff] }
   0x9   :  { %2522 = vmatprep.mubr.msk.bf16.mxu0 %vm983_vm1, %v919_v11  ;;  %v422_v36 = vld [vmem:[%s3713_s0 + $0x88] sm:$0xff]  ;;  %2582 = vmatprep.mubr.msk.bf16.mxu1 %vm983_vm1, %v949_v28  ;;  %v924_v37 = vpack.c.bf16 %v420_v33, %v419_v32  ;;  %v475_v38 = vld [vmem:[%s3713_s0 + $0x230] sm:$0xff]  ;;  %v476_v39 = vld [vmem:[%s3713_s0 + $0x238] sm:$0xff] }
   0xa   :  { %2583 = vmatmul.mubr.msk.bf16.vlgmr.msra.gmra.mrb[0].mxu1 %vm983_vm1, %v950_v29  ;;  %v925_v40 = vpack.c.bf16 %v422_v36, %v421_v35  ;;  %v477_v41 = vld [vmem:[%s3713_s0 + $0x240] sm:$0xff]  ;;  %v478_v42 = vld [vmem:[%s3713_s0 + $0x248] sm:$0xff]  ;;  %v952_v43 = vpack.c.bf16 %v476_v39, %v475_v38  ;;  %v423_v45 = vld [vmem:[%s3713_s0 + $0x90] sm:$0xff] }
   0xb   :  { %2586 = vmatprep.mubr.msk.bf16.mxu1 %vm983_vm1, %v951_v34  ;;  %v953_v44 = vpack.c.bf16 %v478_v42, %v477_v41  ;;  %v424_v46 = vld [vmem:[%s3713_s0 + $0x98] sm:$0xff]  ;;  %v425_v47 = vld [vmem:[%s3713_s0 + $0xa0] sm:$0xff]  ;;  %v426_v48 = vld [vmem:[%s3713_s0 + $0xa8] sm:$0xff] }
   0xc   :  { %v926_v49 = vpack.c.bf16 %v424_v46, %v423_v45  ;;  %v479_v50 = vld [vmem:[%s3713_s0 + $0x250] sm:$0xff]  ;;  %v480_v51 = vld [vmem:[%s3713_s0 + $0x258] sm:$0xff]  ;;  %v927_v52 = vpack.c.bf16 %v426_v48, %v425_v47  ;;  %v481_v53 = vld [vmem:[%s3713_s0 + $0x260] sm:$0xff] }
   0xd   :  { %v482_v54 = vld [vmem:[%s3713_s0 + $0x268] sm:$0xff]  ;;  %v954_v55 = vpack.c.bf16 %v480_v51, %v479_v50  ;;  %v427_v57 = vld [vmem:[%s3713_s0 + $0xb0] sm:$0xff]  ;;  %v428_v58 = vld [vmem:[%s3713_s0 + $0xb8] sm:$0xff] }
   0xe   :  { %v955_v56 = vpack.c.bf16 %v482_v54, %v481_v53  ;;  %v429_v59 = vld [vmem:[%s3713_s0 + $0xc0] sm:$0xff]  ;;  %v430_v60 = vld [vmem:[%s3713_s0 + $0xc8] sm:$0xff]  ;;  %v928_v61 = vpack.c.bf16 %v428_v58, %v427_v57  ;;  %v483_v62 = vld [vmem:[%s3713_s0 + $0x270] sm:$0xff] }
   0xf   :  { %v484_v63 = vld [vmem:[%s3713_s0 + $0x278] sm:$0xff]  ;;  %v929_v0 = vpack.c.bf16 %v430_v60, %v429_v59  ;;  %v485_v1 = vld [vmem:[%s3713_s0 + $0x280] sm:$0xff]  ;;  %v486_v2 = vld [vmem:[%s3713_s0 + $0x288] sm:$0xff] }
  0x10   :  { %2523 = vmatmul.mubr.msk.bf16.gmra.mrb[4].mxu0 %vm983_vm1, %v920_v16  ;;  %v956_v3 = vpack.c.bf16 %v484_v63, %v483_v62  ;;  %v957_v4 = vpack.c.bf16 %v486_v2, %v485_v1  ;;  %v431_v5 = vld [vmem:[%s3713_s0 + $0xd0] sm:$0xff]  ;;  %v432_v6 = vld [vmem:[%s3713_s0 + $0xd8] sm:$0xff]  ;;  %v433_v7 = vld [vmem:[%s3713_s0 + $0xe0] sm:$0xff] }
  0x11   :  { %2526 = vmatprep.mubr.msk.bf16.mxu0 %vm983_vm1, %v921_v17  ;;  %v434_v8 = vld [vmem:[%s3713_s0 + $0xe8] sm:$0xff]  ;;  %v930_v9 = vpack.c.bf16 %v432_v6, %v431_v5  ;;  %v487_v10 = vld [vmem:[%s3713_s0 + $0x290] sm:$0xff]  ;;  %v488_v11 = vld [vmem:[%s3713_s0 + $0x298] sm:$0xff] }
  0x12   :  { %2587 = vmatmul.mubr.msk.bf16.gmra.mrb[4].mxu1 %vm983_vm1, %v952_v43  ;;  %v931_v12 = vpack.c.bf16 %v434_v8, %v433_v7  ;;  %v489_v13 = vld [vmem:[%s3713_s0 + $0x2a0] sm:$0xff]  ;;  %v490_v14 = vld [vmem:[%s3713_s0 + $0x2a8] sm:$0xff]  ;;  %v958_v15 = vpack.c.bf16 %v488_v11, %v487_v10  ;;  %v435_v17 = vld [vmem:[%s3713_s0 + $0xf0] sm:$0xff] }
  0x13   :  { %2590 = vmatprep.mubr.msk.bf16.mxu1 %vm983_vm1, %v953_v44  ;;  %v959_v16 = vpack.c.bf16 %v490_v14, %v489_v13  ;;  %v436_v18 = vld [vmem:[%s3713_s0 + $0xf8] sm:$0xff]  ;;  %v437_v19 = vld [vmem:[%s3713_s0 + $0x100] sm:$0xff]  ;;  %v438_v20 = vld [vmem:[%s3713_s0 + $0x108] sm:$0xff] }
  0x14   :  { %v932_v21 = vpack.c.bf16 %v436_v18, %v435_v17  ;;  %v933_v24 = vpack.c.bf16 %v438_v20, %v437_v19  ;;  %v493_v25 = vld [vmem:[%s3713_s0 + $0x2c0] sm:$0xff]  ;;  %v494_v26 = vld [vmem:[%s3713_s0 + $0x2c8] sm:$0xff]  ;;  %v439_v29 = vld [vmem:[%s3713_s0 + $0x110] sm:$0xff] }
  0x15   :  { %v961_v28 = vpack.c.bf16 %v494_v26, %v493_v25  ;;  %v440_v30 = vld [vmem:[%s3713_s0 + $0x118] sm:$0xff]  ;;  %v441_v31 = vld [vmem:[%s3713_s0 + $0x120] sm:$0xff]  ;;  %v442_v32 = vld [vmem:[%s3713_s0 + $0x128] sm:$0xff] }
  0x16   :  { %v934_v33 = vpack.c.bf16 %v440_v30, %v439_v29  ;;  %v495_v34 = vld [vmem:[%s3713_s0 + $0x2d0] sm:$0xff]  ;;  %v496_v35 = vld [vmem:[%s3713_s0 + $0x2d8] sm:$0xff]  ;;  %v935_v36 = vpack.c.bf16 %v442_v32, %v441_v31  ;;  %v498_v38 = vld [vmem:[%s3713_s0 + $0x2e8] sm:$0xff] }
  0x17   :  { %v962_v39 = vpack.c.bf16 %v496_v35, %v495_v34  ;;  %v443_v41 = vld [vmem:[%s3713_s0 + $0x130] sm:$0xff]  ;;  %v444_v42 = vld [vmem:[%s3713_s0 + $0x138] sm:$0xff]  ;;  %v445_v43 = vld [vmem:[%s3713_s0 + $0x140] sm:$0xff] }
  0x18   :  { %2527 = vmatmul.mubr.msk.bf16.gmra.mrb[8].mxu0 %vm983_vm1, %v922_v22  ;;  %v491_v22 = vld [vmem:[%s3713_s0 + $0x2b0] sm:$0xff]  ;;  %v446_v44 = vld [vmem:[%s3713_s0 + $0x148] sm:$0xff]  ;;  %v936_v45 = vpack.c.bf16 %v444_v42, %v443_v41  ;;  %v500_v47 = vld [vmem:[%s3713_s0 + $0x2f8] sm:$0xff] }
  0x19   :  { %2530 = vmatprep.mubr.msk.bf16.mxu0 %vm983_vm1, %v923_v23  ;;  %v492_v23 = vld [vmem:[%s3713_s0 + $0x2b8] sm:$0xff]  ;;  %v499_v46 = vld [vmem:[%s3713_s0 + $0x2f0] sm:$0xff]  ;;  %v937_v48 = vpack.c.bf16 %v446_v44, %v445_v43  ;;  %v502_v50 = vld [vmem:[%s3713_s0 + $0x308] sm:$0xff] }
  0x1a   :  { %2591 = vmatmul.mubr.msk.bf16.gmra.mrb[8].mxu1 %vm983_vm1, %v954_v55  ;;  %v960_v27 = vpack.c.bf16 %v492_v23, %v491_v22  ;;  %v964_v51 = vpack.c.bf16 %v500_v47, %v499_v46  ;;  %v447_v53 = vld [vmem:[%s3713_s0 + $0x150] sm:$0xff]  ;;  %v448_v54 = vld [vmem:[%s3713_s0 + $0x158] sm:$0xff]  ;;  %v449_v55 = vld [vmem:[%s3713_s0 + $0x160] sm:$0xff] }
  0x1b   :  { %2594 = vmatprep.mubr.msk.bf16.mxu1 %vm983_vm1, %v955_v56  ;;  %v450_v56 = vld [vmem:[%s3713_s0 + $0x168] sm:$0xff]  ;;  %v938_v57 = vpack.c.bf16 %v448_v54, %v447_v53  ;;  %v503_v58 = vld [vmem:[%s3713_s0 + $0x310] sm:$0xff]  ;;  %v504_v59 = vld [vmem:[%s3713_s0 + $0x318] sm:$0xff] }
  0x1c   :  { %v939_v60 = vpack.c.bf16 %v450_v56, %v449_v55  ;;  %v506_v62 = vld [vmem:[%s3713_s0 + $0x328] sm:$0xff]  ;;  %v966_v63 = vpack.c.bf16 %v504_v59, %v503_v58  ;;  %v451_v1 = vld [vmem:[%s3713_s0 + $0x170] sm:$0xff]  ;;  %v452_v2 = vld [vmem:[%s3713_s0 + $0x178] sm:$0xff] }
  0x1d   :  { %v940_v5 = vpack.c.bf16 %v452_v2, %v451_v1  ;;  %v507_v6 = vld [vmem:[%s3713_s0 + $0x330] sm:$0xff]  ;;  %v508_v7 = vld [vmem:[%s3713_s0 + $0x338] sm:$0xff]  ;;  %v510_v10 = vld [vmem:[%s3713_s0 + $0x348] sm:$0xff] }
  0x1e   :  { %v968_v11 = vpack.c.bf16 %v508_v7, %v507_v6  ;;  %v455_v13 = vld [vmem:[%s3713_s0 + $0x190] sm:$0xff]  ;;  %v456_v14 = vld [vmem:[%s3713_s0 + $0x198] sm:$0xff]  ;;  %v514_v22 = vld [vmem:[%s3713_s0 + $0x368] sm:$0xff] }
  0x1f   :  { %v942_v17 = vpack.c.bf16 %v456_v14, %v455_v13  ;;  %v511_v18 = vld [vmem:[%s3713_s0 + $0x350] sm:$0xff]  ;;  %v512_v19 = vld [vmem:[%s3713_s0 + $0x358] sm:$0xff]  ;;  %v518_v34 = vld [vmem:[%s3713_s0 + $0x388] sm:$0xff] }
  0x20   :  { %2531 = vmatmul.mubr.msk.bf16.gmra.mrb[12].mxu0 %vm983_vm1, %v924_v37  ;;  %v497_v37 = vld [vmem:[%s3713_s0 + $0x2e0] sm:$0xff]  ;;  %v970_v23 = vpack.c.bf16 %v512_v19, %v511_v18  ;;  %v459_v25 = vld [vmem:[%s3713_s0 + $0x1b0] sm:$0xff]  ;;  %v460_v26 = vld [vmem:[%s3713_s0 + $0x1b8] sm:$0xff] }
  0x21   :  { %2534 = vmatprep.mubr.msk.bf16.mxu0 %vm983_vm1, %v925_v40  ;;  %v963_v40 = vpack.c.bf16 %v498_v38, %v497_v37  ;;  %v944_v29 = vpack.c.bf16 %v460_v26, %v459_v25  ;;  %v515_v30 = vld [vmem:[%s3713_s0 + $0x370] sm:$0xff]  ;;  %v516_v31 = vld [vmem:[%s3713_s0 + $0x378] sm:$0xff]  ;;  %v522_v46 = vld [vmem:[%s3713_s0 + $0x3a8] sm:$0xff] }
  0x22   :  { %2595 = vmatmul.mubr.msk.bf16.gmra.mrb[12].mxu1 %vm983_vm1, %v956_v3  ;;  %v453_v3 = vld [vmem:[%s3713_s0 + $0x180] sm:$0xff]  ;;  %v972_v35 = vpack.c.bf16 %v516_v31, %v515_v30  ;;  %v463_v37 = vld [vmem:[%s3713_s0 + $0x1d0] sm:$0xff]  ;;  %v464_v38 = vld [vmem:[%s3713_s0 + $0x1d8] sm:$0xff] }
  0x23   :  { %2598 = vmatprep.mubr.msk.bf16.mxu1 %vm983_vm1, %v957_v4  ;;  %v454_v4 = vld [vmem:[%s3713_s0 + $0x188] sm:$0xff]  ;;  %v946_v41 = vpack.c.bf16 %v464_v38, %v463_v37  ;;  %v519_v42 = vld [vmem:[%s3713_s0 + $0x390] sm:$0xff]  ;;  %v520_v43 = vld [vmem:[%s3713_s0 + $0x398] sm:$0xff] }
  0x24   :  { %v941_v8 = vpack.c.bf16 %v454_v4, %v453_v3  ;;  %v974_v47 = vpack.c.bf16 %v520_v43, %v519_v42  ;;  %v524_v53 = vld [vmem:[%s3713_s0 + $0x3b8] sm:$0xff]  ;;  %v525_v54 = vld [vmem:[%s3713_s0 + $0x3c0] sm:$0xff]  ;;  %v526_v55 = vld [vmem:[%s3713_s0 + $0x3c8] sm:$0xff] }
  0x25   :  { %v527_v58 = vld [vmem:[%s3713_s0 + $0x3d0] sm:$0xff]  ;;  %v528_v59 = vld [vmem:[%s3713_s0 + $0x3d8] sm:$0xff] }
  0x26   :  { %v532_v1 = vld [vmem:[%s3713_s0 + $0x3f8] sm:$0xff] }
  0x28   :  { %2535 = vmatmul.mubr.msk.bf16.gmra.mrb[16].mxu0 %vm983_vm1, %v926_v49  ;;  %v501_v49 = vld [vmem:[%s3713_s0 + $0x300] sm:$0xff] }
  0x29   :  { %2538 = vmatprep.mubr.msk.bf16.mxu0 %vm983_vm1, %v927_v52  ;;  %v965_v52 = vpack.c.bf16 %v502_v50, %v501_v49  ;;  %v467_v49 = vld [vmem:[%s3713_s0 + $0x1f0] sm:$0xff]  ;;  %v468_v50 = vld [vmem:[%s3713_s0 + $0x1f8] sm:$0xff] }
  0x2a   :  { %2599 = vmatmul.mubr.msk.bf16.gmra.mrb[16].mxu1 %vm983_vm1, %v958_v15  ;;  %v457_v15 = vld [vmem:[%s3713_s0 + $0x1a0] sm:$0xff] }
  0x2b   :  { %2602 = vmatprep.mubr.msk.bf16.mxu1 %vm983_vm1, %v959_v16  ;;  %v458_v16 = vld [vmem:[%s3713_s0 + $0x1a8] sm:$0xff] }
  0x2c   :  { %v943_v20 = vpack.c.bf16 %v458_v16, %v457_v15 }
  0x30   :  { %2539 = vmatmul.mubr.msk.bf16.gmra.mrb[20].mxu0 %vm983_vm1, %v928_v61  ;;  %v505_v61 = vld [vmem:[%s3713_s0 + $0x320] sm:$0xff] }
  0x31   :  { %2542 = vmatprep.mubr.msk.bf16.mxu0 %vm983_vm1, %v929_v0  ;;  %v967_v0 = vpack.c.bf16 %v506_v62, %v505_v61  ;;  %v530_v61 = vld [vmem:[%s3713_s0 + $0x3e8] sm:$0xff]  ;;  %v978_v62 = vpack.c.bf16 %v528_v59, %v527_v58 }
  0x32   :  { %2603 = vmatmul.mubr.msk.bf16.gmra.mrb[20].mxu1 %vm983_vm1, %v960_v27  ;;  %v461_v27 = vld [vmem:[%s3713_s0 + $0x1c0] sm:$0xff] }
  0x33   :  { %2606 = vmatprep.mubr.msk.bf16.mxu1 %vm983_vm1, %v961_v28  ;;  %v462_v28 = vld [vmem:[%s3713_s0 + $0x1c8] sm:$0xff] }
  0x34   :  { %v945_v32 = vpack.c.bf16 %v462_v28, %v461_v27 }
  0x38   :  { %2543 = vmatmul.mubr.msk.bf16.gmra.mrb[24].mxu0 %vm983_vm1, %v930_v9  ;;  %v509_v9 = vld [vmem:[%s3713_s0 + $0x340] sm:$0xff] }
  0x39   :  { %2546 = vmatprep.mubr.msk.bf16.mxu0 %vm983_vm1, %v931_v12  ;;  %v969_v12 = vpack.c.bf16 %v510_v10, %v509_v9 }
  0x3a   :  { %2607 = vmatmul.mubr.msk.bf16.gmra.mrb[24].mxu1 %vm983_vm1, %v962_v39  ;;  %v465_v39 = vld [vmem:[%s3713_s0 + $0x1e0] sm:$0xff] }
  0x3b   :  { %2610 = vmatprep.mubr.msk.bf16.mxu1 %vm983_vm1, %v963_v40  ;;  %v466_v40 = vld [vmem:[%s3713_s0 + $0x1e8] sm:$0xff] }
  0x3c   :  { %v947_v44 = vpack.c.bf16 %v466_v40, %v465_v39 }
  0x40   :  { %2547 = vmatmul.mubr.msk.bf16.gmra.mrb[28].mxu0 %vm983_vm1, %v932_v21  ;;  %v513_v21 = vld [vmem:[%s3713_s0 + $0x360] sm:$0xff] }
  0x41   :  { %2550 = vmatprep.mubr.msk.bf16.mxu0 %vm983_vm1, %v933_v24  ;;  %v971_v24 = vpack.c.bf16 %v514_v22, %v513_v21 }
  0x42   :  { %2611 = vmatmul.mubr.msk.bf16.gmra.mrb[28].mxu1 %vm983_vm1, %v964_v51  ;;  %v948_v51 = vpack.c.bf16 %v468_v50, %v467_v49 }
  0x43   :  { %2614 = vmatprep.mubr.msk.bf16.mxu1 %vm983_vm1, %v965_v52  ;;  %v523_v52 = vld [vmem:[%s3713_s0 + $0x3b0] sm:$0xff] }
  0x44   :  { %v976_v56 = vpack.c.bf16 %v524_v53, %v523_v52 }
  0x48   :  { %2551 = vmatmul.mubr.msk.bf16.gmra.mrb[32].mxu0 %vm983_vm1, %v934_v33  ;;  %v517_v33 = vld [vmem:[%s3713_s0 + $0x380] sm:$0xff] }
  0x49   :  { %2554 = vmatprep.mubr.msk.bf16.mxu0 %vm983_vm1, %v935_v36  ;;  %v973_v36 = vpack.c.bf16 %v518_v34, %v517_v33 }
  0x4a   :  { %2615 = vmatmul.mubr.msk.bf16.gmra.mrb[32].mxu1 %vm983_vm1, %v966_v63 }
  0x4b   :  { %2618 = vmatprep.mubr.msk.bf16.mxu1 %vm983_vm1, %v967_v0  ;;  %v531_v0 = vld [vmem:[%s3713_s0 + $0x3f0] sm:$0xff] }
  0x4c   :  { %v980_v2 = vpack.c.bf16 %v532_v1, %v531_v0 }
  0x50   :  { %2555 = vmatmul.mubr.msk.bf16.gmra.mrb[36].mxu0 %vm983_vm1, %v936_v45  ;;  %v521_v45 = vld [vmem:[%s3713_s0 + $0x3a0] sm:$0xff] }
  0x51   :  { %2558 = vmatprep.mubr.msk.bf16.mxu0 %vm983_vm1, %v937_v48  ;;  %v975_v48 = vpack.c.bf16 %v522_v46, %v521_v45 }
  0x52   :  { %2619 = vmatmul.mubr.msk.bf16.gmra.mrb[36].mxu1 %vm983_vm1, %v968_v11 }
  0x53   :  { %2622 = vmatprep.mubr.msk.bf16.mxu1 %vm983_vm1, %v969_v12 }
  0x58   :  { %2559 = vmatmul.mubr.msk.bf16.gmra.mrb[40].mxu0 %vm983_vm1, %v938_v57  ;;  %v977_v57 = vpack.c.bf16 %v526_v55, %v525_v54 }
  0x59   :  { %2562 = vmatprep.mubr.msk.bf16.mxu0 %vm983_vm1, %v939_v60  ;;  %v529_v60 = vld [vmem:[%s3713_s0 + $0x3e0] sm:$0xff] }
  0x5a   :  { %2623 = vmatmul.mubr.msk.bf16.gmra.mrb[40].mxu1 %vm983_vm1, %v970_v23  ;;  %v979_v63 = vpack.c.bf16 %v530_v61, %v529_v60 }
  0x5b   :  { %2626 = vmatprep.mubr.msk.bf16.mxu1 %vm983_vm1, %v971_v24 }
  0x60   :  { %2563 = vmatmul.mubr.msk.bf16.gmra.mrb[44].mxu0 %vm983_vm1, %v940_v5 }
  0x61   :  { %2566 = vmatprep.mubr.msk.bf16.mxu0 %vm983_vm1, %v941_v8 }
  0x62   :  { %2627 = vmatmul.mubr.msk.bf16.gmra.mrb[44].mxu1 %vm983_vm1, %v972_v35 }
  0x63   :  { %2630 = vmatprep.mubr.msk.bf16.mxu1 %vm983_vm1, %v973_v36 }
  0x68   :  { %2567 = vmatmul.mubr.msk.bf16.gmra.mrb[48].mxu0 %vm983_vm1, %v942_v17 }
  0x69   :  { %2570 = vmatprep.mubr.msk.bf16.mxu0 %vm983_vm1, %v943_v20 }
  0x6a   :  { %2631 = vmatmul.mubr.msk.bf16.gmra.mrb[48].mxu1 %vm983_vm1, %v974_v47 }
  0x6b   :  { %2634 = vmatprep.mubr.msk.bf16.mxu1 %vm983_vm1, %v975_v48 }
  0x70   :  { %2571 = vmatmul.mubr.msk.bf16.gmra.mrb[52].mxu0 %vm983_vm1, %v944_v29 }
  0x71   :  { %2574 = vmatprep.mubr.msk.bf16.mxu0 %vm983_vm1, %v945_v32 }
  0x72   :  { %2635 = vmatmul.mubr.msk.bf16.gmra.mrb[52].mxu1 %vm983_vm1, %v976_v56 }
  0x73   :  { %2638 = vmatprep.mubr.msk.bf16.mxu1 %vm983_vm1, %v977_v57 }
  0x78   :  { %2575 = vmatmul.mubr.msk.bf16.gmra.mrb[56].mxu0 %vm983_vm1, %v946_v41 }
  0x79   :  { %2578 = vmatprep.mubr.msk.bf16.mxu0 %vm983_vm1, %v947_v44 }
  0x7a   :  { %2639 = vmatmul.mubr.msk.bf16.gmra.mrb[56].mxu1 %vm983_vm1, %v978_v62 }
  0x7b   :  { %2642 = vmatprep.mubr.msk.bf16.mxu1 %vm983_vm1, %v979_v63 }
  0x80   :  { %2579 = vmatmul.mubr.msk.bf16.gmra.mrb[60].mxu0 %vm983_vm1, %v948_v51 }
  0x82   :  { %2643 = vmatmul.mubr.msk.bf16.gmra.mrb[60].mxu1 %vm983_vm1, %v980_v2 }
  0xdb   :  { %v2520_v3 = vpop.f32.mrb[0].mxu0 }
  0xdc   :  { %v1214_v4 = vpop.f32.mrb[1].mxu0  ;;  %v1994_v8 = vmul.f32 %v2520_v3, %v2520_v3  ;;  %v1730_v13 = vsel %vm1726_vm2, %v2520_v3, 0.0 }
  0xdd   :  { %v1992_v5 = vmul.f32 %v1214_v4, %v1214_v4  ;;  %v2521_v6 = vpop.f32.mrb[2].mxu0  ;;  %v1727_v9 = vsel %vm1726_vm2, %v1214_v4, 0.0  ;;  %v3138_v56 = vpop.f32.mrb[0].mxu1 }
  0xde   :  { %v1217_v7 = vpop.f32.mrb[3].mxu0  ;;  %v1995_v15 = vmul.f32 %v2521_v6, %v2521_v6  ;;  %v2123_v19 = vsel %vm1726_vm2, %v1994_v8, 0.0  ;;  %v1732_v20 = vsel %vm1726_vm2, %v2521_v6, 0.0  ;;  %v3142_v61 = vpop.f32.mrb[1].mxu1 }
  0xdf   :  { %v1728_v10 = vsel %vm1726_vm2, %v1217_v7, 0.0  ;;  %v1993_v11 = vmul.f32 %v1217_v7, %v1217_v7  ;;  %v2120_v14 = vsel %vm1726_vm2, %v1992_v5, 0.0  ;;  %v3144_v0 = vpop.f32.mrb[2].mxu1 }
  0xe0   :  { %v1729_v12 = vadd.f32 %v1728_v10, %v1727_v9  ;;  %v2125_v25 = vsel %vm1726_vm2, %v1995_v15, 0.0  ;;  %v3148_v4 = vpop.f32.mrb[3].mxu1 }
  0xe1   :  { %v2121_v16 = vsel %vm1726_vm2, %v1993_v11, 0.0 }
  0xe2   :  { %v1731_v17 = vadd.f32 %v1730_v13, %v1729_v12  ;;  %v2122_v18 = vadd.f32 %v2121_v16, %v2120_v14 }
  0xe3   :  { %v2524_v21 = vpop.f32.mrb[4].mxu0 }
  0xe4   :  { %v2124_v22 = vadd.f32 %v2123_v19, %v2122_v18  ;;  %v1230_v23 = vpop.f32.mrb[5].mxu0  ;;  %v1733_v24 = vadd.f32 %v1732_v20, %v1731_v17  ;;  %v1998_v32 = vmul.f32 %v2524_v21, %v2524_v21  ;;  %v1738_v38 = vsel %vm1726_vm2, %v2524_v21, 0.0 }
  0xe5   :  { %v1734_v26 = vsel %vm1726_vm2, %v1230_v23, 0.0  ;;  %v1996_v27 = vmul.f32 %v1230_v23, %v1230_v23  ;;  %v2525_v28 = vpop.f32.mrb[6].mxu0  ;;  %v3154_v20 = vpop.f32.mrb[4].mxu1 }
  0xe6   :  { %v1735_v29 = vadd.f32 %v1734_v26, %v1733_v24  ;;  %v2126_v30 = vadd.f32 %v2125_v25, %v2124_v22  ;;  %v1233_v31 = vpop.f32.mrb[7].mxu0  ;;  %v1999_v39 = vmul.f32 %v2525_v28, %v2525_v28  ;;  %v2131_v43 = vsel %vm1726_vm2, %v1998_v32, 0.0  ;;  %v3158_v25 = vpop.f32.mrb[5].mxu1 }
  0xe7   :  { %v2127_v33 = vsel %vm1726_vm2, %v1996_v27, 0.0  ;;  %v1736_v34 = vsel %vm1726_vm2, %v1233_v31, 0.0  ;;  %v1997_v35 = vmul.f32 %v1233_v31, %v1233_v31  ;;  %v1740_v44 = vsel %vm1726_vm2, %v2525_v28, 0.0  ;;  %v3160_v28 = vpop.f32.mrb[6].mxu1 }
  0xe8   :  { %v2128_v36 = vadd.f32 %v2127_v33, %v2126_v30  ;;  %v1737_v37 = vadd.f32 %v1736_v34, %v1735_v29  ;;  %v2133_v49 = vsel %vm1726_vm2, %v1999_v39, 0.0  ;;  %v3164_v32 = vpop.f32.mrb[7].mxu1 }
  0xe9   :  { %v2129_v40 = vsel %vm1726_vm2, %v1997_v35, 0.0 }
  0xea   :  { %v1739_v41 = vadd.f32 %v1738_v38, %v1737_v37  ;;  %v2130_v42 = vadd.f32 %v2129_v40, %v2128_v36 }
  0xeb   :  { %v2528_v45 = vpop.f32.mrb[8].mxu0 }
  0xec   :  { %v2132_v46 = vadd.f32 %v2131_v43, %v2130_v42  ;;  %v1246_v47 = vpop.f32.mrb[9].mxu0  ;;  %v1741_v48 = vadd.f32 %v1740_v44, %v1739_v41  ;;  %v2002_v57 = vmul.f32 %v2528_v45, %v2528_v45  ;;  %v1746_v1 = vsel %vm1726_vm2, %v2528_v45, 0.0 }
  0xed   :  { %v1742_v50 = vsel %vm1726_vm2, %v1246_v47, 0.0  ;;  %v2000_v51 = vmul.f32 %v1246_v47, %v1246_v47  ;;  %v2529_v52 = vpop.f32.mrb[10].mxu0 }
  0xee   :  { %v1743_v53 = vadd.f32 %v1742_v50, %v1741_v48  ;;  %v2134_v54 = vadd.f32 %v2133_v49, %v2132_v46  ;;  %v1249_v55 = vpop.f32.mrb[11].mxu0  ;;  %v2003_v2 = vmul.f32 %v2529_v52, %v2529_v52  ;;  %v2139_v7 = vsel %vm1726_vm2, %v2002_v57, 0.0  ;;  %v3170_v48 = vpop.f32.mrb[8].mxu1 }
  0xef   :  { %v2135_v58 = vsel %vm1726_vm2, %v2000_v51, 0.0  ;;  %v1744_v59 = vsel %vm1726_vm2, %v1249_v55, 0.0  ;;  %v2001_v60 = vmul.f32 %v1249_v55, %v1249_v55  ;;  %v1748_v8 = vsel %vm1726_vm2, %v2529_v52, 0.0 }
  0xf0   :  { %v2136_v62 = vadd.f32 %v2135_v58, %v2134_v54  ;;  %v1745_v63 = vadd.f32 %v1744_v59, %v1743_v53  ;;  %v2141_v13 = vsel %vm1726_vm2, %v2003_v2, 0.0  ;;  %v3174_v53 = vpop.f32.mrb[9].mxu1 }
  0xf1   :  { %v2137_v3 = vsel %vm1726_vm2, %v2001_v60, 0.0  ;;  %v3176_v57 = vpop.f32.mrb[10].mxu1 }
  0xf2   :  { %v1747_v5 = vadd.f32 %v1746_v1, %v1745_v63  ;;  %v2138_v6 = vadd.f32 %v2137_v3, %v2136_v62  ;;  %v3180_v62 = vpop.f32.mrb[11].mxu1 }
  0xf3   :  { %v2532_v9 = vpop.f32.mrb[12].mxu0 }
  0xf4   :  { %v2140_v10 = vadd.f32 %v2139_v7, %v2138_v6  ;;  %v1262_v11 = vpop.f32.mrb[13].mxu0  ;;  %v1749_v12 = vadd.f32 %v1748_v8, %v1747_v5  ;;  %v2006_v21 = vmul.f32 %v2532_v9, %v2532_v9  ;;  %v1754_v29 = vsel %vm1726_vm2, %v2532_v9, 0.0 }
  0xf5   :  { %v1750_v14 = vsel %vm1726_vm2, %v1262_v11, 0.0  ;;  %v2004_v15 = vmul.f32 %v1262_v11, %v1262_v11  ;;  %v2533_v16 = vpop.f32.mrb[14].mxu0 }
  0xf6   :  { %v1751_v17 = vadd.f32 %v1750_v14, %v1749_v12  ;;  %v2142_v18 = vadd.f32 %v2141_v13, %v2140_v10  ;;  %v1265_v19 = vpop.f32.mrb[15].mxu0  ;;  %v2007_v30 = vmul.f32 %v2533_v16, %v2533_v16  ;;  %v2147_v35 = vsel %vm1726_vm2, %v2006_v21, 0.0 }
  0xf7   :  { %v2143_v22 = vsel %vm1726_vm2, %v2004_v15, 0.0  ;;  %v1752_v23 = vsel %vm1726_vm2, %v1265_v19, 0.0  ;;  %v2005_v24 = vmul.f32 %v1265_v19, %v1265_v19  ;;  %v1756_v36 = vsel %vm1726_vm2, %v2533_v16, 0.0  ;;  %v3186_v16 = vpop.f32.mrb[12].mxu1 }
  0xf8   :  { %v2144_v26 = vadd.f32 %v2143_v22, %v2142_v18  ;;  %v1753_v27 = vadd.f32 %v1752_v23, %v1751_v17  ;;  %v2149_v41 = vsel %vm1726_vm2, %v2007_v30, 0.0  ;;  %v3190_v22 = vpop.f32.mrb[13].mxu1 }
  0xf9   :  { %v2145_v31 = vsel %vm1726_vm2, %v2005_v24, 0.0 }
  0xfa   :  { %v1755_v33 = vadd.f32 %v1754_v29, %v1753_v27  ;;  %v2146_v34 = vadd.f32 %v2145_v31, %v2144_v26  ;;  %v3192_v26 = vpop.f32.mrb[14].mxu1 }
  0xfb   :  { %v2536_v37 = vpop.f32.mrb[16].mxu0  ;;  %v3196_v31 = vpop.f32.mrb[15].mxu1 }
  0xfc   :  { %v2148_v38 = vadd.f32 %v2147_v35, %v2146_v34  ;;  %v1278_v39 = vpop.f32.mrb[17].mxu0  ;;  %v1757_v40 = vadd.f32 %v1756_v36, %v1755_v33  ;;  %v2010_v49 = vmul.f32 %v2536_v37, %v2536_v37  ;;  %v1762_v58 = vsel %vm1726_vm2, %v2536_v37, 0.0 }
  0xfd   :  { %v1758_v42 = vsel %vm1726_vm2, %v1278_v39, 0.0  ;;  %v2008_v43 = vmul.f32 %v1278_v39, %v1278_v39  ;;  %v2537_v44 = vpop.f32.mrb[18].mxu0 }
  0xfe   :  { %v1759_v45 = vadd.f32 %v1758_v42, %v1757_v40  ;;  %v2150_v46 = vadd.f32 %v2149_v41, %v2148_v38  ;;  %v1281_v47 = vpop.f32.mrb[19].mxu0  ;;  %v2011_v59 = vmul.f32 %v2537_v44, %v2537_v44  ;;  %v2155_v2 = vsel %vm1726_vm2, %v2010_v49, 0.0  ;;  %v3202_v49 = vpop.f32.mrb[16].mxu1 }
  0xff   :  { %v2151_v50 = vsel %vm1726_vm2, %v2008_v43, 0.0  ;;  %v1760_v51 = vsel %vm1726_vm2, %v1281_v47, 0.0  ;;  %v2009_v52 = vmul.f32 %v1281_v47, %v1281_v47  ;;  %v1764_v3 = vsel %vm1726_vm2, %v2537_v44, 0.0 }
 0x100   :  { %v2152_v54 = vadd.f32 %v2151_v50, %v2150_v46  ;;  %v1761_v55 = vadd.f32 %v1760_v51, %v1759_v45  ;;  %v2157_v9 = vsel %vm1726_vm2, %v2011_v59, 0.0 }
 0x101   :  { %v2153_v60 = vsel %vm1726_vm2, %v2009_v52, 0.0 }
 0x102   :  { %v1763_v63 = vadd.f32 %v1762_v58, %v1761_v55  ;;  %v2154_v1 = vadd.f32 %v2153_v60, %v2152_v54  ;;  %v3206_v55 = vpop.f32.mrb[17].mxu1 }
 0x103   :  { %v2540_v5 = vpop.f32.mrb[20].mxu0  ;;  %v3208_v60 = vpop.f32.mrb[18].mxu1 }
 0x104   :  { %v2156_v6 = vadd.f32 %v2155_v2, %v2154_v1  ;;  %v1294_v7 = vpop.f32.mrb[21].mxu0  ;;  %v1765_v8 = vadd.f32 %v1764_v3, %v1763_v63  ;;  %v2014_v17 = vmul.f32 %v2540_v5, %v2540_v5  ;;  %v1770_v27 = vsel %vm1726_vm2, %v2540_v5, 0.0  ;;  %v3212_v3 = vpop.f32.mrb[19].mxu1 }
 0x105   :  { %v1766_v10 = vsel %vm1726_vm2, %v1294_v7, 0.0  ;;  %v2012_v11 = vmul.f32 %v1294_v7, %v1294_v7  ;;  %v2541_v12 = vpop.f32.mrb[22].mxu0 }
 0x106   :  { %v1767_v13 = vadd.f32 %v1766_v10, %v1765_v8  ;;  %v2158_v14 = vadd.f32 %v2157_v9, %v2156_v6  ;;  %v1297_v15 = vpop.f32.mrb[23].mxu0  ;;  %v2015_v29 = vmul.f32 %v2541_v12, %v2541_v12  ;;  %v2163_v35 = vsel %vm1726_vm2, %v2014_v17, 0.0 }
 0x107   :  { %v2159_v18 = vsel %vm1726_vm2, %v2012_v11, 0.0  ;;  %v1768_v19 = vsel %vm1726_vm2, %v1297_v15, 0.0  ;;  %v2013_v21 = vmul.f32 %v1297_v15, %v1297_v15  ;;  %v1772_v36 = vsel %vm1726_vm2, %v2541_v12, 0.0 }
 0x108   :  { %v2160_v23 = vadd.f32 %v2159_v18, %v2158_v14  ;;  %v1769_v24 = vadd.f32 %v1768_v19, %v1767_v13  ;;  %v2165_v41 = vsel %vm1726_vm2, %v2015_v29, 0.0 }
 0x109   :  { %v2161_v30 = vsel %vm1726_vm2, %v2013_v21, 0.0 }
 0x10a   :  { %v1771_v33 = vadd.f32 %v1770_v27, %v1769_v24  ;;  %v2162_v34 = vadd.f32 %v2161_v30, %v2160_v23  ;;  %v3218_v23 = vpop.f32.mrb[20].mxu1 }
 0x10b   :  { %v2544_v37 = vpop.f32.mrb[24].mxu0 }
 0x10c   :  { %v2164_v38 = vadd.f32 %v2163_v35, %v2162_v34  ;;  %v1310_v39 = vpop.f32.mrb[25].mxu0  ;;  %v1773_v40 = vadd.f32 %v1772_v36, %v1771_v33  ;;  %v2018_v50 = vmul.f32 %v2544_v37, %v2544_v37  ;;  %v1778_v63 = vsel %vm1726_vm2, %v2544_v37, 0.0  ;;  %v3222_v33 = vpop.f32.mrb[21].mxu1 }
 0x10d   :  { %v1774_v42 = vsel %vm1726_vm2, %v1310_v39, 0.0  ;;  %v2016_v43 = vmul.f32 %v1310_v39, %v1310_v39  ;;  %v2545_v44 = vpop.f32.mrb[26].mxu0  ;;  %v3224_v36 = vpop.f32.mrb[22].mxu1 }
 0x10e   :  { %v1775_v45 = vadd.f32 %v1774_v42, %v1773_v40  ;;  %v2166_v46 = vadd.f32 %v2165_v41, %v2164_v38  ;;  %v1313_v47 = vpop.f32.mrb[27].mxu0  ;;  %v2019_v1 = vmul.f32 %v2545_v44, %v2545_v44  ;;  %v2171_v7 = vsel %vm1726_vm2, %v2018_v50, 0.0  ;;  %v3228_v40 = vpop.f32.mrb[23].mxu1 }
 0x10f   :  { %v2167_v51 = vsel %vm1726_vm2, %v2016_v43, 0.0  ;;  %v1776_v52 = vsel %vm1726_vm2, %v1313_v47, 0.0  ;;  %v2017_v54 = vmul.f32 %v1313_v47, %v1313_v47  ;;  %v1780_v8 = vsel %vm1726_vm2, %v2545_v44, 0.0 }
 0x110   :  { %v2168_v58 = vadd.f32 %v2167_v51, %v2166_v46  ;;  %v1777_v59 = vadd.f32 %v1776_v52, %v1775_v45  ;;  %v2173_v13 = vsel %vm1726_vm2, %v2019_v1, 0.0 }
 0x111   :  { %v2169_v2 = vsel %vm1726_vm2, %v2017_v54, 0.0 }
 0x112   :  { %v1779_v5 = vadd.f32 %v1778_v63, %v1777_v59  ;;  %v2170_v6 = vadd.f32 %v2169_v2, %v2168_v58  ;;  %v3234_v2 = vpop.f32.mrb[24].mxu1 }
 0x113   :  { %v2548_v9 = vpop.f32.mrb[28].mxu0 }
 0x114   :  { %v2172_v10 = vadd.f32 %v2171_v7, %v2170_v6  ;;  %v1326_v11 = vpop.f32.mrb[29].mxu0  ;;  %v1781_v12 = vadd.f32 %v1780_v8, %v1779_v5  ;;  %v2022_v24 = vmul.f32 %v2548_v9, %v2548_v9  ;;  %v1786_v37 = vsel %vm1726_vm2, %v2548_v9, 0.0  ;;  %v3238_v9 = vpop.f32.mrb[25].mxu1 }
 0x115   :  { %v1782_v14 = vsel %vm1726_vm2, %v1326_v11, 0.0  ;;  %v2020_v15 = vmul.f32 %v1326_v11, %v1326_v11  ;;  %v2549_v17 = vpop.f32.mrb[30].mxu0 }
 0x116   :  { %v1783_v18 = vadd.f32 %v1782_v14, %v1781_v12  ;;  %v2174_v19 = vadd.f32 %v2173_v13, %v2172_v10  ;;  %v1329_v21 = vpop.f32.mrb[31].mxu0  ;;  %v2023_v38 = vmul.f32 %v2549_v17, %v2549_v17  ;;  %v2179_v43 = vsel %vm1726_vm2, %v2022_v24, 0.0  ;;  %v3240_v12 = vpop.f32.mrb[26].mxu1 }
 0x117   :  { %v2175_v27 = vsel %vm1726_vm2, %v2020_v15, 0.0  ;;  %v1784_v29 = vsel %vm1726_vm2, %v1329_v21, 0.0  ;;  %v2021_v30 = vmul.f32 %v1329_v21, %v1329_v21  ;;  %v1788_v44 = vsel %vm1726_vm2, %v2549_v17, 0.0  ;;  %v3244_v17 = vpop.f32.mrb[27].mxu1 }
 0x118   :  { %v2176_v34 = vadd.f32 %v2175_v27, %v2174_v19  ;;  %v1785_v35 = vadd.f32 %v1784_v29, %v1783_v18  ;;  %v2181_v51 = vsel %vm1726_vm2, %v2023_v38, 0.0 }
 0x119   :  { %v2177_v39 = vsel %vm1726_vm2, %v2021_v30, 0.0 }
 0x11a   :  { %v1787_v41 = vadd.f32 %v1786_v37, %v1785_v35  ;;  %v2178_v42 = vadd.f32 %v2177_v39, %v2176_v34 }
 0x11b   :  { %v2552_v45 = vpop.f32.mrb[32].mxu0 }
 0x11c   :  { %v2180_v46 = vadd.f32 %v2179_v43, %v2178_v42  ;;  %v1342_v47 = vpop.f32.mrb[33].mxu0  ;;  %v1789_v50 = vadd.f32 %v1788_v44, %v1787_v41  ;;  %v2026_v5 = vmul.f32 %v2552_v45, %v2552_v45  ;;  %v1794_v13 = vsel %vm1726_vm2, %v2552_v45, 0.0  ;;  %v3250_v44 = vpop.f32.mrb[28].mxu1 }
 0x11d   :  { %v1790_v52 = vsel %vm1726_vm2, %v1342_v47, 0.0  ;;  %v2024_v54 = vmul.f32 %v1342_v47, %v1342_v47  ;;  %v2553_v58 = vpop.f32.mrb[34].mxu0 }
 0x11e   :  { %v1791_v59 = vadd.f32 %v1790_v52, %v1789_v50  ;;  %v2182_v63 = vadd.f32 %v2181_v51, %v2180_v46  ;;  %v1345_v1 = vpop.f32.mrb[35].mxu0  ;;  %v2027_v14 = vmul.f32 %v2553_v58, %v2553_v58  ;;  %v2187_v21 = vsel %vm1726_vm2, %v2026_v5, 0.0  ;;  %v3254_v51 = vpop.f32.mrb[29].mxu1 }
 0x11f   :  { %v2183_v6 = vsel %vm1726_vm2, %v2024_v54, 0.0  ;;  %v1792_v7 = vsel %vm1726_vm2, %v1345_v1, 0.0  ;;  %v2025_v8 = vmul.f32 %v1345_v1, %v1345_v1  ;;  %v1796_v24 = vsel %vm1726_vm2, %v2553_v58, 0.0  ;;  %v3256_v58 = vpop.f32.mrb[30].mxu1 }
 0x120   :  { %v2184_v10 = vadd.f32 %v2183_v6, %v2182_v63  ;;  %v1793_v11 = vadd.f32 %v1792_v7, %v1791_v59  ;;  %v2189_v35 = vsel %vm1726_vm2, %v2027_v14, 0.0  ;;  %v3260_v5 = vpop.f32.mrb[31].mxu1 }
 0x121   :  { %v2185_v15 = vsel %vm1726_vm2, %v2025_v8, 0.0 }
 0x122   :  { %v1795_v18 = vadd.f32 %v1794_v13, %v1793_v11  ;;  %v2186_v19 = vadd.f32 %v2185_v15, %v2184_v10 }
 0x123   :  { %v2556_v27 = vpop.f32.mrb[36].mxu0 }
 0x124   :  { %v2188_v29 = vadd.f32 %v2187_v21, %v2186_v19  ;;  %v1358_v30 = vpop.f32.mrb[37].mxu0  ;;  %v1797_v34 = vadd.f32 %v1796_v24, %v1795_v18  ;;  %v2030_v45 = vmul.f32 %v2556_v27, %v2556_v27  ;;  %v1802_v59 = vsel %vm1726_vm2, %v2556_v27, 0.0 }
 0x125   :  { %v1798_v37 = vsel %vm1726_vm2, %v1358_v30, 0.0  ;;  %v2028_v38 = vmul.f32 %v1358_v30, %v1358_v30  ;;  %v2557_v39 = vpop.f32.mrb[38].mxu0 }
 0x126   :  { %v1799_v41 = vadd.f32 %v1798_v37, %v1797_v34  ;;  %v2190_v42 = vadd.f32 %v2189_v35, %v2188_v29  ;;  %v1361_v43 = vpop.f32.mrb[39].mxu0  ;;  %v2031_v63 = vmul.f32 %v2557_v39, %v2557_v39  ;;  %v2195_v8 = vsel %vm1726_vm2, %v2030_v45, 0.0  ;;  %v3266_v34 = vpop.f32.mrb[32].mxu1 }
 0x127   :  { %v2191_v46 = vsel %vm1726_vm2, %v2028_v38, 0.0  ;;  %v1800_v47 = vsel %vm1726_vm2, %v1361_v43, 0.0  ;;  %v2029_v50 = vmul.f32 %v1361_v43, %v1361_v43  ;;  %v1804_v10 = vsel %vm1726_vm2, %v2557_v39, 0.0 }
 0x128   :  { %v2192_v52 = vadd.f32 %v2191_v46, %v2190_v42  ;;  %v1801_v54 = vadd.f32 %v1800_v47, %v1799_v41  ;;  %v2197_v18 = vsel %vm1726_vm2, %v2031_v63, 0.0  ;;  %v3270_v41 = vpop.f32.mrb[33].mxu1 }
 0x129   :  { %v2193_v1 = vsel %vm1726_vm2, %v2029_v50, 0.0  ;;  %v3272_v45 = vpop.f32.mrb[34].mxu1 }
 0x12a   :  { %v1803_v6 = vadd.f32 %v1802_v59, %v1801_v54  ;;  %v2194_v7 = vadd.f32 %v2193_v1, %v2192_v52  ;;  %v3276_v52 = vpop.f32.mrb[35].mxu1 }
 0x12b   :  { %v2560_v11 = vpop.f32.mrb[40].mxu0 }
 0x12c   :  { %v2196_v13 = vadd.f32 %v2195_v8, %v2194_v7  ;;  %v1374_v14 = vpop.f32.mrb[41].mxu0  ;;  %v1805_v15 = vadd.f32 %v1804_v10, %v1803_v6  ;;  %v2034_v35 = vmul.f32 %v2560_v11, %v2560_v11  ;;  %v1810_v46 = vsel %vm1726_vm2, %v2560_v11, 0.0 }
 0x12d   :  { %v1806_v19 = vsel %vm1726_vm2, %v1374_v14, 0.0  ;;  %v2032_v21 = vmul.f32 %v1374_v14, %v1374_v14  ;;  %v2561_v24 = vpop.f32.mrb[42].mxu0 }
 0x12e   :  { %v1807_v27 = vadd.f32 %v1806_v19, %v1805_v15  ;;  %v2198_v29 = vadd.f32 %v2197_v18, %v2196_v13  ;;  %v1377_v30 = vpop.f32.mrb[43].mxu0  ;;  %v2035_v47 = vmul.f32 %v2561_v24, %v2561_v24  ;;  %v2203_v63 = vsel %vm1726_vm2, %v2034_v35, 0.0 }
 0x12f   :  { %v2199_v37 = vsel %vm1726_vm2, %v2032_v21, 0.0  ;;  %v1808_v38 = vsel %vm1726_vm2, %v1377_v30, 0.0  ;;  %v2033_v39 = vmul.f32 %v1377_v30, %v1377_v30  ;;  %v1812_v1 = vsel %vm1726_vm2, %v2561_v24, 0.0 }
 0x130   :  { %v2200_v42 = vadd.f32 %v2199_v37, %v2198_v29  ;;  %v1809_v43 = vadd.f32 %v1808_v38, %v1807_v27  ;;  %v2205_v13 = vsel %vm1726_vm2, %v2035_v47, 0.0  ;;  %v3282_v27 = vpop.f32.mrb[36].mxu1 }
 0x131   :  { %v2201_v50 = vsel %vm1726_vm2, %v2033_v39, 0.0  ;;  %v3286_v37 = vpop.f32.mrb[37].mxu1 }
 0x132   :  { %v1811_v54 = vadd.f32 %v1810_v46, %v1809_v43  ;;  %v2202_v59 = vadd.f32 %v2201_v50, %v2200_v42  ;;  %v3288_v42 = vpop.f32.mrb[38].mxu1 }
 0x133   :  { %v2564_v6 = vpop.f32.mrb[44].mxu0  ;;  %v3292_v50 = vpop.f32.mrb[39].mxu1 }
 0x134   :  { %v2204_v7 = vadd.f32 %v2203_v63, %v2202_v59  ;;  %v1390_v8 = vpop.f32.mrb[45].mxu0  ;;  %v1813_v10 = vadd.f32 %v1812_v1, %v1811_v54  ;;  %v2038_v29 = vmul.f32 %v2564_v6, %v2564_v6  ;;  %v1818_v43 = vsel %vm1726_vm2, %v2564_v6, 0.0 }
 0x135   :  { %v1814_v14 = vsel %vm1726_vm2, %v1390_v8, 0.0  ;;  %v2036_v11 = vmul.f32 %v1390_v8, %v1390_v8  ;;  %v2565_v15 = vpop.f32.mrb[46].mxu0 }
 0x136   :  { %v1815_v18 = vadd.f32 %v1814_v14, %v1813_v10  ;;  %v2206_v19 = vadd.f32 %v2205_v13, %v2204_v7  ;;  %v1393_v21 = vpop.f32.mrb[47].mxu0  ;;  %v2039_v46 = vmul.f32 %v2565_v15, %v2565_v15  ;;  %v2211_v63 = vsel %vm1726_vm2, %v2038_v29, 0.0 }
 0x137   :  { %v2207_v30 = vsel %vm1726_vm2, %v2036_v11, 0.0  ;;  %v1816_v24 = vsel %vm1726_vm2, %v1393_v21, 0.0  ;;  %v2037_v35 = vmul.f32 %v1393_v21, %v1393_v21  ;;  %v1820_v1 = vsel %vm1726_vm2, %v2565_v15, 0.0 }
 0x138   :  { %v2208_v38 = vadd.f32 %v2207_v30, %v2206_v19  ;;  %v1817_v39 = vadd.f32 %v1816_v24, %v1815_v18  ;;  %v2213_v14 = vsel %vm1726_vm2, %v2039_v46, 0.0  ;;  %v3298_v24 = vpop.f32.mrb[40].mxu1 }
 0x139   :  { %v2209_v47 = vsel %vm1726_vm2, %v2037_v35, 0.0  ;;  %3726 = vst [vmem:[#allocation2_spill] sm:$0xff] %v3298_v24 }
 0x13a   :  { %v1819_v54 = vadd.f32 %v1818_v43, %v1817_v39  ;;  %v2210_v59 = vadd.f32 %v2209_v47, %v2208_v38  ;;  %v3302_v39 = vpop.f32.mrb[41].mxu1 }
 0x13b   :  { %v2568_v7 = vpop.f32.mrb[48].mxu0  ;;  %v3304_v46 = vpop.f32.mrb[42].mxu1 }
 0x13c   :  { %v2212_v8 = vadd.f32 %v2211_v63, %v2210_v59  ;;  %v1406_v10 = vpop.f32.mrb[49].mxu0  ;;  %v1821_v13 = vadd.f32 %v1820_v1, %v1819_v54  ;;  %v2042_v35 = vmul.f32 %v2568_v7, %v2568_v7  ;;  %3727 = vst [vmem:[#allocation3_spill] sm:$0xff] %v3304_v46  ;;  %v1826_v54 = vsel %vm1726_vm2, %v2568_v7, 0.0  ;;  %v3308_v1 = vpop.f32.mrb[43].mxu1 }
 0x13d   :  { %v1822_v11 = vsel %vm1726_vm2, %v1406_v10, 0.0  ;;  %v2040_v6 = vmul.f32 %v1406_v10, %v1406_v10  ;;  %v2569_v18 = vpop.f32.mrb[50].mxu0  ;;  %3728 = vst [vmem:[#allocation4_spill] sm:$0xff] %v3308_v1  ;;  %v3314_v1 = vpop.f32.mrb[44].mxu1 }
 0x13e   :  { %v1823_v19 = vadd.f32 %v1822_v11, %v1821_v13  ;;  %v2214_v21 = vadd.f32 %v2213_v14, %v2212_v8  ;;  %v1409_v30 = vpop.f32.mrb[51].mxu0  ;;  %v2043_v59 = vmul.f32 %v2569_v18, %v2569_v18  ;;  %v2219_v13 = vsel %vm1726_vm2, %v2042_v35, 0.0  ;;  %3729 = vst [vmem:[#allocation5_spill] sm:$0xff] %v3314_v1 }
 0x13f   :  { %v2215_v29 = vsel %vm1726_vm2, %v2040_v6, 0.0  ;;  %v1824_v15 = vsel %vm1726_vm2, %v1409_v30, 0.0  ;;  %v2041_v38 = vmul.f32 %v1409_v30, %v1409_v30  ;;  %v1828_v14 = vsel %vm1726_vm2, %v2569_v18, 0.0 }
 0x140   :  { %v2216_v43 = vadd.f32 %v2215_v29, %v2214_v21  ;;  %v1825_v47 = vadd.f32 %v1824_v15, %v1823_v19  ;;  %v2221_v19 = vsel %vm1726_vm2, %v2043_v59, 0.0 }
 0x141   :  { %v2217_v63 = vsel %vm1726_vm2, %v2041_v38, 0.0 }
 0x142   :  { %v1827_v8 = vadd.f32 %v1826_v54, %v1825_v47  ;;  %v2218_v10 = vadd.f32 %v2217_v63, %v2216_v43  ;;  %v3318_v54 = vpop.f32.mrb[45].mxu1 }
 0x143   :  { %v2572_v11 = vpop.f32.mrb[52].mxu0  ;;  %3730 = vst [vmem:[#allocation6_spill] sm:$0xff] %v3318_v54  ;;  %v3320_v59 = vpop.f32.mrb[46].mxu1 }
 0x144   :  { %v2220_v6 = vadd.f32 %v2219_v13, %v2218_v10  ;;  %v1422_v30 = vpop.f32.mrb[53].mxu0  ;;  %v1829_v21 = vadd.f32 %v1828_v14, %v1827_v8  ;;  %v2046_v43 = vmul.f32 %v2572_v11, %v2572_v11  ;;  %3731 = vst [vmem:[#allocation7_spill] sm:$0xff] %v3320_v59  ;;  %v1834_v10 = vsel %vm1726_vm2, %v2572_v11, 0.0 }
 0x145   :  { %v1830_v29 = vsel %vm1726_vm2, %v1422_v30, 0.0  ;;  %v2044_v7 = vmul.f32 %v1422_v30, %v1422_v30  ;;  %v2573_v15 = vpop.f32.mrb[54].mxu0 }
 0x146   :  { %v1831_v46 = vadd.f32 %v1830_v29, %v1829_v21  ;;  %v2222_v38 = vadd.f32 %v2221_v19, %v2220_v6  ;;  %v1425_v24 = vpop.f32.mrb[55].mxu0  ;;  %v2047_v13 = vmul.f32 %v2573_v15, %v2573_v15  ;;  %v3324_v6 = vpop.f32.mrb[47].mxu1  ;;  %v2227_v19 = vsel %vm1726_vm2, %v2046_v43, 0.0 }
 0x147   :  { %v2223_v35 = vsel %vm1726_vm2, %v2044_v7, 0.0  ;;  %v1832_v18 = vsel %vm1726_vm2, %v1425_v24, 0.0  ;;  %v2045_v47 = vmul.f32 %v1425_v24, %v1425_v24  ;;  %3732 = vst [vmem:[#allocation8_spill] sm:$0xff] %v3324_v6  ;;  %v1836_v29 = vsel %vm1726_vm2, %v2573_v15, 0.0  ;;  %v3330_v6 = vpop.f32.mrb[48].mxu1 }
 0x148   :  { %v2224_v63 = vadd.f32 %v2223_v35, %v2222_v38  ;;  %v1833_v8 = vadd.f32 %v1832_v18, %v1831_v46  ;;  %v2229_v46 = vsel %vm1726_vm2, %v2047_v13, 0.0  ;;  %3733 = vst [vmem:[#allocation9_spill] sm:$0xff] %v3330_v6 }
 0x149   :  { %v2225_v14 = vsel %vm1726_vm2, %v2045_v47, 0.0 }
 0x14a   :  { %v1835_v30 = vadd.f32 %v1834_v10, %v1833_v8  ;;  %v2226_v21 = vadd.f32 %v2225_v14, %v2224_v63  ;;  %v3334_v10 = vpop.f32.mrb[49].mxu1 }
 0x14b   :  { %v2576_v24 = vpop.f32.mrb[56].mxu0  ;;  %3734 = vst [vmem:[#allocation10_spill] sm:$0xff] %v3334_v10  ;;  %v3336_v13 = vpop.f32.mrb[50].mxu1 }
 0x14c   :  { %v2228_v7 = vadd.f32 %v2227_v19, %v2226_v21  ;;  %v1438_v1 = vpop.f32.mrb[57].mxu0  ;;  %v1837_v38 = vadd.f32 %v1836_v29, %v1835_v30  ;;  %v2050_v63 = vmul.f32 %v2576_v24, %v2576_v24  ;;  %3735 = vst [vmem:[#allocation11_spill] sm:$0xff] %v3336_v13  ;;  %v3340_v29 = vpop.f32.mrb[51].mxu1 }
 0x14d   :  { %v1838_v35 = vsel %vm1726_vm2, %v1438_v1, 0.0  ;;  %v2048_v11 = vmul.f32 %v1438_v1, %v1438_v1  ;;  %v2577_v18 = vpop.f32.mrb[58].mxu0  ;;  %v1842_v1 = vsel %vm1726_vm2, %v2576_v24, 0.0  ;;  %3736 = vst [vmem:[#allocation12_spill] sm:$0xff] %v3340_v29  ;;  %v3346_v29 = vpop.f32.mrb[52].mxu1 }
 0x14e   :  { %v1839_v59 = vadd.f32 %v1838_v35, %v1837_v38  ;;  %v2230_v47 = vadd.f32 %v2229_v46, %v2228_v7  ;;  %v1441_v54 = vpop.f32.mrb[59].mxu0  ;;  %v2051_v21 = vmul.f32 %v2577_v18, %v2577_v18  ;;  %v2235_v46 = vsel %vm1726_vm2, %v2050_v63, 0.0 }
 0x14f   :  { %v2231_v43 = vsel %vm1726_vm2, %v2048_v11, 0.0  ;;  %v1840_v15 = vsel %vm1726_vm2, %v1441_v54, 0.0  ;;  %v2049_v8 = vmul.f32 %v1441_v54, %v1441_v54  ;;  %v1844_v35 = vsel %vm1726_vm2, %v2577_v18, 0.0 }
 0x150   :  { %v2232_v14 = vadd.f32 %v2231_v43, %v2230_v47  ;;  %v1841_v30 = vadd.f32 %v1840_v15, %v1839_v59  ;;  %v2237_v59 = vsel %vm1726_vm2, %v2051_v21, 0.0 }
 0x151   :  { %v2233_v19 = vsel %vm1726_vm2, %v2049_v8, 0.0 }
 0x152   :  { %v1843_v7 = vadd.f32 %v1842_v1, %v1841_v30  ;;  %v2234_v38 = vadd.f32 %v2233_v19, %v2232_v14  ;;  %v3350_v1 = vpop.f32.mrb[53].mxu1 }
 0x153   :  { %v2580_v54 = vpop.f32.mrb[60].mxu0  ;;  %v3352_v21 = vpop.f32.mrb[54].mxu1 }
 0x154   :  { %v2236_v11 = vadd.f32 %v2235_v46, %v2234_v38  ;;  %v1454_v6 = vpop.f32.mrb[61].mxu0  ;;  %v1845_v47 = vadd.f32 %v1844_v35, %v1843_v7  ;;  %v2054_v14 = vmul.f32 %v2580_v54, %v2580_v54  ;;  %v2056_v35 = vmul.f32 %v3142_v61, %v3142_v61 }
 0x155   :  { %v1846_v43 = vsel %vm1726_vm2, %v1454_v6, 0.0  ;;  %v2052_v24 = vmul.f32 %v1454_v6, %v1454_v6  ;;  %v2581_v15 = vpop.f32.mrb[62].mxu0  ;;  %v1850_v6 = vsel %vm1726_vm2, %v2580_v54, 0.0 }
 0x156   :  { %v1847_v13 = vadd.f32 %v1846_v43, %v1845_v47  ;;  %v2238_v8 = vadd.f32 %v2237_v59, %v2236_v11  ;;  %v1457_v10 = vpop.f32.mrb[63].mxu0  ;;  %v2055_v38 = vmul.f32 %v2581_v15, %v2581_v15  ;;  %v3358_v11 = vpop.f32.mrb[55].mxu1  ;;  %v1852_v43 = vsel %vm1726_vm2, %v2581_v15, 0.0 }
 0x157   :  { %v2239_v63 = vsel %vm1726_vm2, %v2052_v24, 0.0  ;;  %v1848_v18 = vsel %vm1726_vm2, %v1457_v10, 0.0  ;;  %v2053_v30 = vmul.f32 %v1457_v10, %v1457_v10  ;;  %v2243_v10 = vsel %vm1726_vm2, %v2054_v14, 0.0 }
 0x158   :  { %v2240_v19 = vadd.f32 %v2239_v63, %v2238_v8  ;;  %v1849_v7 = vadd.f32 %v1848_v18, %v1847_v13  ;;  %v1854_v13 = vsel %vm1726_vm2, %v3142_v61, 0.0  ;;  %v2245_v54 = vsel %vm1726_vm2, %v2055_v38, 0.0 }
 0x159   :  { %v2241_v46 = vsel %vm1726_vm2, %v2053_v30, 0.0  ;;  %v2247_v63 = vsel %vm1726_vm2, %v2056_v35, 0.0  ;;  %v2057_v18 = vmul.f32 %v3148_v4, %v3148_v4  ;;  %v2651_v30 = vmov 0.0  }
 0x15a   :  { %v1851_v47 = vadd.f32 %v1850_v6, %v1849_v7  ;;  %v2242_v59 = vadd.f32 %v2241_v46, %v2240_v19  ;;  %17 = vst.msk [vmem:[%s3714_s2] sm:$0x3] %vm16_vm3, %v2651_v30  ;;  %v3371_v19 = vpop.f32.mrb[56].mxu1  ;;  %v2058_v61 = vmul.f32 %v3138_v56, %v3138_v56  ;;  %v1856_v7 = vsel %vm1726_vm2, %v3148_v4, 0.0 }
 0x15b   :  { %v3377_v6 = vpop.f32.mrb[57].mxu1 }
 0x15c   :  { %v1853_v24 = vadd.f32 %v1852_v43, %v1851_v47  ;;  %v2244_v8 = vadd.f32 %v2243_v10, %v2242_v59  ;;  %v3379_v35 = vpop.f32.mrb[58].mxu1  ;;  %v1858_v47 = vsel %vm1726_vm2, %v3138_v56, 0.0  ;;  %v2059_v59 = vmul.f32 %v3144_v0, %v3144_v0 }
 0x15d   :  { %v2249_v10 = vsel %vm1726_vm2, %v2057_v18, 0.0  ;;  %v2060_v43 = vmul.f32 %v3158_v25, %v3158_v25  ;;  %v1862_v56 = vsel %vm1726_vm2, %v3158_v25, 0.0 }
 0x15e   :  { %v2246_v14 = vadd.f32 %v2245_v54, %v2244_v8  ;;  %v1855_v15 = vadd.f32 %v1854_v13, %v1853_v24  ;;  %v3388_v13 = vpop.f32.mrb[59].mxu1  ;;  %v2251_v8 = vsel %vm1726_vm2, %v2058_v61, 0.0  ;;  %v1860_v54 = vsel %vm1726_vm2, %v3144_v0, 0.0 }
 0x15f   :  { %v2255_v18 = vsel %vm1726_vm2, %v2060_v43, 0.0  ;;  %v2062_v61 = vmul.f32 %v3154_v20, %v3154_v20  ;;  %v1864_v0 = vsel %vm1726_vm2, %v3164_v32, 0.0  ;;  %v1866_v43 = vsel %vm1726_vm2, %v3154_v20, 0.0 }
 0x160   :  { %v2248_v38 = vadd.f32 %v2247_v63, %v2246_v14  ;;  %v1857_v46 = vadd.f32 %v1856_v7, %v1855_v15  ;;  %v2253_v14 = vsel %vm1726_vm2, %v2059_v59, 0.0  ;;  %v2061_v15 = vmul.f32 %v3164_v32, %v3164_v32 }
 0x161   :  { %v1870_v20 = vsel %vm1726_vm2, %v3174_v53, 0.0 }
 0x162   :  { %v1859_v4 = vadd.f32 %v1858_v47, %v1857_v46  ;;  %v2250_v24 = vadd.f32 %v2249_v10, %v2248_v38  ;;  %v3399_v38 = vpop.f32.mrb[60].mxu1 }
 0x163   :  { %v3405_v25 = vpop.f32.mrb[61].mxu1 }
 0x164   :  { %v2252_v63 = vadd.f32 %v2251_v8, %v2250_v24  ;;  %v1861_v30 = vadd.f32 %v1860_v54, %v1859_v4  ;;  %v3407_v59 = vpop.f32.mrb[62].mxu1  ;;  %v2063_v4 = vmul.f32 %v3160_v28, %v3160_v28  ;;  %v2257_v24 = vsel %vm1726_vm2, %v2061_v15, 0.0 }
 0x165   :  { %v2064_v8 = vmul.f32 %v3174_v53, %v3174_v53  ;;  %v3416_v54 = vpop.f32.mrb[63].mxu1  ;;  %v1874_v53 = vsel %vm1726_vm2, %v3170_v48, 0.0 }
 0x166   :  { %v1863_v7 = vadd.f32 %v1862_v56, %v1861_v30  ;;  %v2254_v46 = vadd.f32 %v2253_v14, %v2252_v63  ;;  %v2259_v63 = vsel %vm1726_vm2, %v2062_v61, 0.0  ;;  %v1868_v30 = vsel %vm1726_vm2, %v3160_v28, 0.0 }
 0x167   :  { %v2263_v15 = vsel %vm1726_vm2, %v2064_v8, 0.0  ;;  %v2066_v61 = vmul.f32 %v3170_v48, %v3170_v48  ;;  %v1872_v28 = vsel %vm1726_vm2, %v3180_v62, 0.0  ;;  %v2068_v8 = vmul.f32 %v3190_v22, %v3190_v22 }
 0x168   :  { %v2256_v47 = vadd.f32 %v2255_v18, %v2254_v46  ;;  %v1865_v10 = vadd.f32 %v1864_v0, %v1863_v7  ;;  %v2261_v7 = vsel %vm1726_vm2, %v2063_v4, 0.0  ;;  %v2065_v46 = vmul.f32 %v3180_v62, %v3180_v62 }
 0x169   :  { %v2067_v4 = vmul.f32 %v3176_v57, %v3176_v57  ;;  %v1876_v62 = vsel %vm1726_vm2, %v3176_v57, 0.0  ;;  %v1880_v57 = vsel %vm1726_vm2, %v3196_v31, 0.0 }
 0x16a   :  { %v1867_v32 = vadd.f32 %v1866_v43, %v1865_v10  ;;  %v2258_v56 = vadd.f32 %v2257_v24, %v2256_v47  ;;  %v2265_v24 = vsel %vm1726_vm2, %v2065_v46, 0.0 }
 0x16c   :  { %v2260_v14 = vadd.f32 %v2259_v63, %v2258_v56  ;;  %v1869_v18 = vadd.f32 %v1868_v30, %v1867_v32  ;;  %v2267_v63 = vsel %vm1726_vm2, %v2066_v61, 0.0  ;;  %v1878_v30 = vsel %vm1726_vm2, %v3190_v22, 0.0 }
 0x16d   :  { %v1882_v22 = vsel %vm1726_vm2, %v3186_v16, 0.0 }
 0x16e   :  { %v1871_v0 = vadd.f32 %v1870_v20, %v1869_v18  ;;  %v2262_v10 = vadd.f32 %v2261_v7, %v2260_v14  ;;  %v2269_v14 = vsel %vm1726_vm2, %v2067_v4, 0.0  ;;  %v2271_v18 = vsel %vm1726_vm2, %v2068_v8, 0.0 }
 0x16f   :  { %v2069_v7 = vmul.f32 %v3196_v31, %v3196_v31  ;;  %v1884_v31 = vsel %vm1726_vm2, %v3192_v26, 0.0  ;;  %v1886_v8 = vsel %vm1726_vm2, %v3206_v55, 0.0 }
 0x170   :  { %v2264_v47 = vadd.f32 %v2263_v15, %v2262_v10  ;;  %v1873_v43 = vadd.f32 %v1872_v28, %v1871_v0  ;;  %v2070_v0 = vmul.f32 %v3186_v16, %v3186_v16  ;;  %v2071_v28 = vmul.f32 %v3192_v26, %v3192_v26 }
 0x171   :  { %v1888_v26 = vsel %vm1726_vm2, %v3212_v3, 0.0 }
 0x172   :  { %v1875_v32 = vadd.f32 %v1874_v53, %v1873_v43  ;;  %v2266_v56 = vadd.f32 %v2265_v24, %v2264_v47  ;;  %v2273_v47 = vsel %vm1726_vm2, %v2069_v7, 0.0  ;;  %v2072_v43 = vmul.f32 %v3206_v55, %v3206_v55 }
 0x173   :  { %v2275_v24 = vsel %vm1726_vm2, %v2070_v0, 0.0  ;;  %v1890_v55 = vsel %vm1726_vm2, %v3202_v49, 0.0  ;;  %v2075_v7 = vmul.f32 %v3208_v60, %v3208_v60 }
 0x174   :  { %v2268_v20 = vadd.f32 %v2267_v63, %v2266_v56  ;;  %v1877_v48 = vadd.f32 %v1876_v62, %v1875_v32  ;;  %v2277_v56 = vsel %vm1726_vm2, %v2071_v28, 0.0  ;;  %v2279_v63 = vsel %vm1726_vm2, %v2072_v43, 0.0 }
 0x175   :  { %v2073_v62 = vmul.f32 %v3212_v3, %v3212_v3  ;;  %v1892_v3 = vsel %vm1726_vm2, %v3208_v60, 0.0  ;;  %v2285_v28 = vsel %vm1726_vm2, %v2075_v7, 0.0  ;;  %v2077_v43 = vmul.f32 %v3228_v40, %v3228_v40 }
 0x176   :  { %v1879_v15 = vadd.f32 %v1878_v30, %v1877_v48  ;;  %v2270_v46 = vadd.f32 %v2269_v14, %v2268_v20  ;;  %v2074_v48 = vmul.f32 %v3202_v49, %v3202_v49  ;;  %v1896_v60 = vsel %vm1726_vm2, %v3228_v40, 0.0 }
 0x177   :  { %v1900_v40 = vsel %vm1726_vm2, %v3224_v36, 0.0 }
 0x178   :  { %v2272_v10 = vadd.f32 %v2271_v18, %v2270_v46  ;;  %v1881_v61 = vadd.f32 %v1880_v57, %v1879_v15  ;;  %v2281_v15 = vsel %vm1726_vm2, %v2073_v62, 0.0  ;;  %v2076_v46 = vmul.f32 %v3222_v33, %v3222_v33 }
 0x17a   :  { %v1883_v53 = vadd.f32 %v1882_v22, %v1881_v61  ;;  %v2274_v4 = vadd.f32 %v2273_v47, %v2272_v10  ;;  %v2283_v10 = vsel %vm1726_vm2, %v2074_v48, 0.0  ;;  %v1894_v61 = vsel %vm1726_vm2, %v3222_v33, 0.0 }
 0x17b   :  { %v2287_v47 = vsel %vm1726_vm2, %v2076_v46, 0.0  ;;  %v1898_v33 = vsel %vm1726_vm2, %v3218_v23, 0.0 }
 0x17c   :  { %v2276_v32 = vadd.f32 %v2275_v24, %v2274_v4  ;;  %v1885_v16 = vadd.f32 %v1884_v31, %v1883_v53  ;;  %v2078_v24 = vmul.f32 %v3218_v23, %v3218_v23 }
 0x17e   :  { %v1887_v30 = vadd.f32 %v1886_v8, %v1885_v16  ;;  %v2278_v20 = vadd.f32 %v2277_v56, %v2276_v32  ;;  %v2079_v32 = vmul.f32 %v3224_v36, %v3224_v36  ;;  %v2289_v16 = vsel %vm1726_vm2, %v2077_v43, 0.0 }
 0x17f   :  { %v2080_v56 = vmul.f32 %v3238_v9, %v3238_v9  ;;  %v1904_v36 = vsel %vm1726_vm2, %v3244_v17, 0.0 }
 0x180   :  { %v2280_v14 = vadd.f32 %v2279_v63, %v2278_v20  ;;  %v1889_v18 = vadd.f32 %v1888_v26, %v1887_v30  ;;  %v2291_v30 = vsel %vm1726_vm2, %v2078_v24, 0.0  ;;  %v1902_v20 = vsel %vm1726_vm2, %v3238_v9, 0.0 }
 0x181   :  { %v2293_v26 = vsel %vm1726_vm2, %v2079_v32, 0.0  ;;  %v1906_v9 = vsel %vm1726_vm2, %v3234_v2, 0.0  ;;  %v2087_v32 = vmul.f32 %v3256_v58, %v3256_v58 }
 0x182   :  { %v1891_v0 = vadd.f32 %v1890_v55, %v1889_v18  ;;  %v2282_v57 = vadd.f32 %v2281_v15, %v2280_v14  ;;  %v2295_v14 = vsel %vm1726_vm2, %v2080_v56, 0.0  ;;  %v2081_v18 = vmul.f32 %v3244_v17, %v3244_v17 }
 0x183   :  { %v2082_v15 = vmul.f32 %v3234_v2, %v3234_v2  ;;  %v1908_v17 = vsel %vm1726_vm2, %v3240_v12, 0.0  ;;  %v2088_v56 = vmul.f32 %v3270_v41, %v3270_v41 }
 0x184   :  { %v2284_v22 = vadd.f32 %v2283_v10, %v2282_v57  ;;  %v1893_v49 = vadd.f32 %v1892_v3, %v1891_v0  ;;  %v2083_v57 = vmul.f32 %v3240_v12, %v3240_v12  ;;  %v2297_v10 = vsel %vm1726_vm2, %v2081_v18, 0.0 }
 0x185   :  { %v2084_v3 = vmul.f32 %v3254_v51, %v3254_v51  ;;  %v1912_v12 = vsel %vm1726_vm2, %v3260_v5, 0.0 }
 0x186   :  { %v1895_v53 = vadd.f32 %v1894_v61, %v1893_v49  ;;  %v2286_v4 = vadd.f32 %v2285_v28, %v2284_v22  ;;  %v2299_v49 = vsel %vm1726_vm2, %v2082_v15, 0.0  ;;  %v1910_v28 = vsel %vm1726_vm2, %v3254_v51, 0.0 }
 0x187   :  { %v2301_v43 = vsel %vm1726_vm2, %v2083_v57, 0.0  ;;  %v1914_v51 = vsel %vm1726_vm2, %v3250_v44, 0.0 }
 0x188   :  { %v2288_v31 = vadd.f32 %v2287_v47, %v2286_v4  ;;  %v1897_v8 = vadd.f32 %v1896_v60, %v1895_v53  ;;  %v2303_v53 = vsel %vm1726_vm2, %v2084_v3, 0.0  ;;  %v2085_v4 = vmul.f32 %v3260_v5, %v3260_v5 }
 0x189   :  { %v1916_v5 = vsel %vm1726_vm2, %v3256_v58, 0.0  ;;  %v1920_v58 = vsel %vm1726_vm2, %v3276_v52, 0.0  ;;  %v1926_v3 = vsel %vm1726_vm2, %v3286_v37, 0.0 }
 0x18a   :  { %v1899_v63 = vadd.f32 %v1898_v33, %v1897_v8  ;;  %v2290_v62 = vadd.f32 %v2289_v16, %v2288_v31  ;;  %v2086_v31 = vmul.f32 %v3250_v44, %v3250_v44  ;;  %v2305_v16 = vsel %vm1726_vm2, %v2085_v4, 0.0 }
 0x18b   :  { %v2095_v4 = vmul.f32 %v3288_v42, %v3288_v42 }
 0x18c   :  { %v2292_v48 = vadd.f32 %v2291_v30, %v2290_v62  ;;  %v1901_v23 = vadd.f32 %v1900_v40, %v1899_v63  ;;  %v2307_v30 = vsel %vm1726_vm2, %v2086_v31, 0.0  ;;  %v1918_v40 = vsel %vm1726_vm2, %v3270_v41, 0.0 }
 0x18d   :  { %v1922_v41 = vsel %vm1726_vm2, %v3266_v34, 0.0 }
 0x18e   :  { %v1903_v55 = vadd.f32 %v1902_v20, %v1901_v23  ;;  %v2294_v7 = vadd.f32 %v2293_v26, %v2292_v48  ;;  %v2309_v48 = vsel %vm1726_vm2, %v2087_v32, 0.0  ;;  %v2311_v23 = vsel %vm1726_vm2, %v2088_v56, 0.0  ;;  %v3737_v56 = vld [vmem:[#allocation4_spill] sm:$0xff] }
 0x18f   :  { %v2089_v26 = vmul.f32 %v3276_v52, %v3276_v52  ;;  %v1924_v52 = vsel %vm1726_vm2, %v3272_v45, 0.0  ;;  %v2325_v32 = vsel %vm1726_vm2, %v2095_v4, 0.0 }
 0x190   :  { %v2296_v46 = vadd.f32 %v2295_v14, %v2294_v7  ;;  %v1905_v0 = vadd.f32 %v1904_v36, %v1903_v55  ;;  %v2090_v55 = vmul.f32 %v3266_v34, %v3266_v34  ;;  %v2091_v36 = vmul.f32 %v3272_v45, %v3272_v45 }
 0x191   :  { %v1928_v45 = vsel %vm1726_vm2, %v3292_v50, 0.0 }
 0x192   :  { %v1907_v61 = vadd.f32 %v1906_v9, %v1905_v0  ;;  %v2298_v22 = vadd.f32 %v2297_v10, %v2296_v46  ;;  %v2313_v46 = vsel %vm1726_vm2, %v2089_v26, 0.0  ;;  %v2092_v0 = vmul.f32 %v3286_v37, %v3286_v37 }
 0x193   :  { %v2315_v10 = vsel %vm1726_vm2, %v2090_v55, 0.0  ;;  %v1930_v37 = vsel %vm1726_vm2, %v3282_v27, 0.0 }
 0x194   :  { %v2300_v47 = vadd.f32 %v2299_v49, %v2298_v22  ;;  %v1909_v2 = vadd.f32 %v1908_v17, %v1907_v61  ;;  %v2317_v22 = vsel %vm1726_vm2, %v2091_v36, 0.0  ;;  %v2319_v49 = vsel %vm1726_vm2, %v2092_v0, 0.0 }
 0x195   :  { %v2093_v17 = vmul.f32 %v3292_v50, %v3292_v50  ;;  %v1932_v50 = vsel %vm1726_vm2, %v3288_v42, 0.0  ;;  %v1936_v42 = vsel %vm1726_vm2, %v3737_v56, 0.0 }
 0x196   :  { %v1911_v24 = vadd.f32 %v1910_v28, %v1909_v2  ;;  %v2302_v60 = vadd.f32 %v2301_v43, %v2300_v47  ;;  %v2094_v2 = vmul.f32 %v3282_v27, %v3282_v27 }
 0x198   :  { %v2304_v8 = vadd.f32 %v2303_v53, %v2302_v60  ;;  %v1913_v33 = vadd.f32 %v1912_v12, %v1911_v24  ;;  %v2321_v24 = vsel %vm1726_vm2, %v2093_v17, 0.0  ;;  %v2096_v60 = vmul.f32 %v3302_v39, %v3302_v39 }
 0x19a   :  { %v1915_v63 = vadd.f32 %v1914_v51, %v1913_v33  ;;  %v2306_v62 = vadd.f32 %v2305_v16, %v2304_v8  ;;  %v2323_v8 = vsel %vm1726_vm2, %v2094_v2, 0.0  ;;  %v1934_v33 = vsel %vm1726_vm2, %v3302_v39, 0.0 }
 0x19b   :  { %v2327_v16 = vsel %vm1726_vm2, %v2096_v60, 0.0 }
 0x19c   :  { %v2308_v20 = vadd.f32 %v2307_v30, %v2306_v62  ;;  %v1917_v44 = vadd.f32 %v1916_v5, %v1915_v63  ;;  %v2097_v63 = vmul.f32 %v3737_v56, %v3737_v56  ;;  %v3738_v5 = vld [vmem:[#allocation2_spill] sm:$0xff]  ;;  %v3746_v56 = vld [vmem:[#allocation9_spill] sm:$0xff] }
 0x19d   :  { %v1938_v39 = vsel %vm1726_vm2, %v3738_v5, 0.0 }
 0x19e   :  { %v1919_v14 = vadd.f32 %v1918_v40, %v1917_v44  ;;  %v2310_v18 = vadd.f32 %v2309_v48, %v2308_v20  ;;  %v2098_v40 = vmul.f32 %v3738_v5, %v3738_v5  ;;  %v3739_v48 = vld [vmem:[#allocation3_spill] sm:$0xff]  ;;  %v2329_v26 = vsel %vm1726_vm2, %v2097_v63, 0.0 }
 0x19f   :  { %v2106_v63 = vmul.f32 %v3746_v56, %v3746_v56 }
 0x1a0   :  { %v2312_v7 = vadd.f32 %v2311_v23, %v2310_v18  ;;  %v1921_v15 = vadd.f32 %v1920_v58, %v1919_v14  ;;  %v2099_v23 = vmul.f32 %v3739_v48, %v3739_v48  ;;  %v3740_v14 = vld [vmem:[#allocation6_spill] sm:$0xff] }
 0x1a1   :  { %v2100_v18 = vmul.f32 %v3740_v14, %v3740_v14 }
 0x1a2   :  { %v1923_v9 = vadd.f32 %v1922_v41, %v1921_v15  ;;  %v2314_v57 = vadd.f32 %v2313_v46, %v2312_v7  ;;  %v2331_v7 = vsel %vm1726_vm2, %v2098_v40, 0.0  ;;  %v1940_v15 = vsel %vm1726_vm2, %v3739_v48, 0.0 }
 0x1a3   :  { %v1942_v41 = vsel %vm1726_vm2, %v3740_v14, 0.0  ;;  %v2333_v0 = vsel %vm1726_vm2, %v2099_v23, 0.0  ;;  %v1954_v40 = vsel %vm1726_vm2, %v3746_v56, 0.0  ;;  %v2117_v56 = vmul.f32 %v3416_v54, %v3416_v54 }
 0x1a4   :  { %v2316_v61 = vadd.f32 %v2315_v10, %v2314_v57  ;;  %v1925_v34 = vadd.f32 %v1924_v52, %v1923_v9  ;;  %v2335_v9 = vsel %vm1726_vm2, %v2100_v18, 0.0  ;;  %v3741_v57 = vld [vmem:[#allocation8_spill] sm:$0xff]  ;;  %v1958_v18 = vsel %vm1726_vm2, %v3350_v1, 0.0 }
 0x1a5   :  { %v2101_v10 = vmul.f32 %v3741_v57, %v3741_v57 }
 0x1a6   :  { %v1927_v28 = vadd.f32 %v1926_v3, %v1925_v34  ;;  %v2318_v47 = vadd.f32 %v2317_v22, %v2316_v61  ;;  %v3742_v61 = vld [vmem:[#allocation5_spill] sm:$0xff]  ;;  %v1944_v22 = vsel %vm1726_vm2, %v3741_v57, 0.0 }
 0x1a7   :  { %v2102_v34 = vmul.f32 %v3742_v61, %v3742_v61 }
 0x1a8   :  { %v2320_v43 = vadd.f32 %v2319_v49, %v2318_v47  ;;  %v1929_v53 = vadd.f32 %v1928_v45, %v1927_v28  ;;  %v1946_v28 = vsel %vm1726_vm2, %v3742_v61, 0.0  ;;  %v3743_v47 = vld [vmem:[#allocation7_spill] sm:$0xff]  ;;  %v2337_v45 = vsel %vm1726_vm2, %v2101_v10, 0.0 }
 0x1a9   :  { %v2103_v2 = vmul.f32 %v3743_v47, %v3743_v47  ;;  %v1948_v60 = vsel %vm1726_vm2, %v3743_v47, 0.0  ;;  %v2112_v61 = vmul.f32 %v3377_v6, %v3377_v6 }
 0x1aa   :  { %v1931_v31 = vadd.f32 %v1930_v37, %v1929_v53  ;;  %v2322_v12 = vadd.f32 %v2321_v24, %v2320_v43  ;;  %v3744_v43 = vld [vmem:[#allocation10_spill] sm:$0xff]  ;;  %v2339_v24 = vsel %vm1726_vm2, %v2102_v34, 0.0 }
 0x1ab   :  { %v2104_v53 = vmul.f32 %v3744_v43, %v3744_v43 }
 0x1ac   :  { %v2324_v51 = vadd.f32 %v2323_v8, %v2322_v12  ;;  %v1933_v27 = vadd.f32 %v1932_v50, %v1931_v31  ;;  %v1950_v31 = vsel %vm1726_vm2, %v3744_v43, 0.0  ;;  %v2341_v50 = vsel %vm1726_vm2, %v2103_v2, 0.0 }
 0x1ad   :  { %v2359_v2 = vsel %vm1726_vm2, %v2112_v61, 0.0 }
 0x1ae   :  { %v1935_v62 = vadd.f32 %v1934_v33, %v1933_v27  ;;  %v2326_v30 = vadd.f32 %v2325_v32, %v2324_v51  ;;  %v2343_v33 = vsel %vm1726_vm2, %v2104_v53, 0.0  ;;  %v3745_v51 = vld [vmem:[#allocation12_spill] sm:$0xff] }
 0x1af   :  { %v2105_v27 = vmul.f32 %v3745_v51, %v3745_v51 }
 0x1b0   :  { %v2328_v20 = vadd.f32 %v2327_v16, %v2326_v30  ;;  %v1937_v44 = vadd.f32 %v1936_v42, %v1935_v62  ;;  %v1952_v62 = vsel %vm1726_vm2, %v3745_v51, 0.0  ;;  %v3747_v42 = vld [vmem:[#allocation11_spill] sm:$0xff]  ;;  %v1974_v51 = vsel %vm1726_vm2, %v3405_v25, 0.0 }
 0x1b1   :  { %v1956_v14 = vsel %vm1726_vm2, %v3747_v42, 0.0 }
 0x1b2   :  { %v1939_v55 = vadd.f32 %v1938_v39, %v1937_v44  ;;  %v2330_v58 = vadd.f32 %v2329_v26, %v2328_v20  ;;  %v2107_v20 = vmul.f32 %v3747_v42, %v3747_v42  ;;  %v2345_v44 = vsel %vm1726_vm2, %v2105_v27, 0.0 }
 0x1b3   :  { %v2108_v39 = vmul.f32 %v3350_v1, %v3350_v1  ;;  %v2347_v26 = vsel %vm1726_vm2, %v2106_v63, 0.0  ;;  %v1962_v1 = vsel %vm1726_vm2, %v3346_v29, 0.0  ;;  %v2119_v42 = vmul.f32 %v3407_v59, %v3407_v59 }
 0x1b4   :  { %v2332_v36 = vadd.f32 %v2331_v7, %v2330_v58  ;;  %v1941_v46 = vadd.f32 %v1940_v15, %v1939_v55  ;;  %v2349_v7 = vsel %vm1726_vm2, %v2107_v20, 0.0  ;;  %v2369_v20 = vsel %vm1726_vm2, %v2117_v56, 0.0 }
 0x1b5   :  { %v2351_v15 = vsel %vm1726_vm2, %v2108_v39, 0.0 }
 0x1b6   :  { %v1943_v52 = vadd.f32 %v1942_v41, %v1941_v46  ;;  %v2334_v3 = vadd.f32 %v2333_v0, %v2332_v36  ;;  %v2109_v41 = vmul.f32 %v3358_v11, %v3358_v11  ;;  %v2110_v0 = vmul.f32 %v3346_v29, %v3346_v29 }
 0x1b8   :  { %v2336_v49 = vadd.f32 %v2335_v9, %v2334_v3  ;;  %v1945_v17 = vadd.f32 %v1944_v22, %v1943_v52  ;;  %v1960_v9 = vsel %vm1726_vm2, %v3358_v11, 0.0  ;;  %v2111_v52 = vmul.f32 %v3352_v21, %v3352_v21 }
 0x1b9   :  { %v2353_v3 = vsel %vm1726_vm2, %v2109_v41, 0.0  ;;  %v1964_v11 = vsel %vm1726_vm2, %v3352_v21, 0.0  ;;  %v1968_v21 = vsel %vm1726_vm2, %v3388_v13, 0.0 }
 0x1ba   :  { %v1947_v37 = vadd.f32 %v1946_v28, %v1945_v17  ;;  %v2338_v4 = vadd.f32 %v2337_v45, %v2336_v49  ;;  %v2355_v49 = vsel %vm1726_vm2, %v2110_v0, 0.0  ;;  %v1966_v17 = vsel %vm1726_vm2, %v3377_v6, 0.0 }
 0x1bb   :  { %v2357_v47 = vsel %vm1726_vm2, %v2111_v52, 0.0  ;;  %v2113_v45 = vmul.f32 %v3388_v13, %v3388_v13  ;;  %v1970_v6 = vsel %vm1726_vm2, %v3371_v19, 0.0  ;;  %v1972_v13 = vsel %vm1726_vm2, %v3379_v35, 0.0 }
 0x1bc   :  { %v2340_v12 = vadd.f32 %v2339_v24, %v2338_v4  ;;  %v1949_v8 = vadd.f32 %v1948_v60, %v1947_v37  ;;  %v2114_v37 = vmul.f32 %v3371_v19, %v3371_v19  ;;  %v2115_v60 = vmul.f32 %v3379_v35, %v3379_v35 }
 0x1bd   :  { %v1976_v35 = vsel %vm1726_vm2, %v3416_v54, 0.0  ;;  %v2373_v54 = vsel %vm1726_vm2, %v2119_v42, 0.0 }
 0x1be   :  { %v1951_v32 = vadd.f32 %v1950_v31, %v1949_v8  ;;  %v2342_v16 = vadd.f32 %v2341_v50, %v2340_v12  ;;  %v2361_v31 = vsel %vm1726_vm2, %v2113_v45, 0.0  ;;  %v2116_v12 = vmul.f32 %v3405_v25, %v3405_v25 }
 0x1bf   :  { %v1978_v25 = vsel %vm1726_vm2, %v3399_v38, 0.0 }
 0x1c0   :  { %v2344_v30 = vadd.f32 %v2343_v33, %v2342_v16  ;;  %v1953_v5 = vadd.f32 %v1952_v62, %v1951_v32  ;;  %v2363_v33 = vsel %vm1726_vm2, %v2114_v37, 0.0  ;;  %v2365_v32 = vsel %vm1726_vm2, %v2115_v60, 0.0 }
 0x1c1   :  { %v2367_v16 = vsel %vm1726_vm2, %v2116_v12, 0.0 }
 0x1c2   :  { %v1955_v48 = vadd.f32 %v1954_v40, %v1953_v5  ;;  %v2346_v23 = vadd.f32 %v2345_v44, %v2344_v30  ;;  %v2118_v30 = vmul.f32 %v3399_v38, %v3399_v38 }
 0x1c4   :  { %v2348_v55 = vadd.f32 %v2347_v26, %v2346_v23  ;;  %v1957_v58 = vadd.f32 %v1956_v14, %v1955_v48  ;;  %v2371_v48 = vsel %vm1726_vm2, %v2118_v30, 0.0  ;;  %v1980_v23 = vsel %vm1726_vm2, %v3407_v59, 0.0 }
 0x1c6   :  { %v1959_v36 = vadd.f32 %v1958_v18, %v1957_v58  ;;  %v2350_v46 = vadd.f32 %v2349_v7, %v2348_v55 }
 0x1c8   :  { %v2352_v57 = vadd.f32 %v2351_v15, %v2350_v46  ;;  %v1961_v10 = vadd.f32 %v1960_v9, %v1959_v36  ;;  %v1725_v9 = vld [vmem:[%s3714_s2] sm:$0x1] }
 0x1ca   :  { %v1963_v34 = vadd.f32 %v1962_v1, %v1961_v10  ;;  %v2354_v22 = vadd.f32 %v2353_v3, %v2352_v57  ;;  %v1991_v10 = vld [vmem:[%s3714_s2 + $0x1] sm:$0x1] }
 0x1cc   :  { %v2356_v28 = vadd.f32 %v2355_v49, %v2354_v22  ;;  %v1965_v29 = vadd.f32 %v1964_v11, %v1963_v34 }
 0x1ce   :  { %v1967_v43 = vadd.f32 %v1966_v17, %v1965_v29  ;;  %v2358_v53 = vadd.f32 %v2357_v47, %v2356_v28 }
 0x1d0   :  { %v2360_v4 = vadd.f32 %v2359_v2, %v2358_v53  ;;  %v1969_v24 = vadd.f32 %v1968_v21, %v1967_v43 }
 0x1d2   :  { %v1971_v8 = vadd.f32 %v1970_v6, %v1969_v24  ;;  %v2362_v50 = vadd.f32 %v2361_v31, %v2360_v4 }
 0x1d4   :  { %v2364_v27 = vadd.f32 %v2363_v33, %v2362_v50  ;;  %v1973_v19 = vadd.f32 %v1972_v13, %v1971_v8 }
 0x1d6   :  { %v1975_v63 = vadd.f32 %v1974_v51, %v1973_v19  ;;  %v2366_v62 = vadd.f32 %v2365_v32, %v2364_v27 }
 0x1d8   :  { %v2368_v5 = vadd.f32 %v2367_v16, %v2366_v62  ;;  %v1977_v40 = vadd.f32 %v1976_v35, %v1975_v63 }
 0x1da   :  { %v1979_v44 = vadd.f32 %v1978_v25, %v1977_v40  ;;  %v2370_v39 = vadd.f32 %v2369_v20, %v2368_v5 }
 0x1dc   :  { %v1981_v26 = vadd.f32 %v1980_v23, %v1979_v44  ;;  %v2372_v14 = vadd.f32 %v2371_v48, %v2370_v39 }
 0x1de   :  { %v1982_v18 = vrot.slane %v1981_v26, 4  ;;  %v2374_v55 = vadd.f32 %v2373_v54, %v2372_v14 }
 0x1e0   :  { %v1983_v58 = vadd.f32 %v1982_v18, %v1981_v26  ;;  %v2375_v38 = vrot.slane %v2374_v55, 4 }
 0x1e2   :  { %v1984_v7 = vrot.slane %v1983_v58, 2  ;;  %v2376_v15 = vadd.f32 %v2375_v38, %v2374_v55 }
 0x1e4   :  { %v1985_v41 = vadd.f32 %v1984_v7, %v1983_v58  ;;  %v2377_v36 = vrot.slane %v2376_v15, 2 }
 0x1e6   :  { %v1986_v46 = vrot.slane %v1985_v41, 1  ;;  %v2378_v0 = vadd.f32 %v2377_v36, %v2376_v15 }
 0x1e8   :  { %v1987_v57 = vadd.f32 %v1986_v46, %v1985_v41  ;;  %v2379_v59 = vrot.slane %v2378_v0, 1 }
 0x1ea   :  { %v1988_v1 = vadd.f32 %v1987_v57, %v1725_v9  ;;  %v2380_v52 = vadd.f32 %v2379_v59, %v2378_v0 }
 0x1ec   :  { %1990 = vst.msk [vmem:[%s3714_s2] sm:$0x1] %vm1989_vm4, %v1988_v1  ;;  %v2381_v3 = vadd.f32 %v2380_v52, %v1991_v10 }
 0x1ee   :  { %2382 = vst.msk [vmem:[%s3714_s2 + $0x1] sm:$0x1] %vm1989_vm4, %v2381_v3 }

// kernel: final_forward.4
= control target key start
LH: loop header
LB: loop body
LE: loop exit
PB: predicated region body
PF: predicated region fallthrough
CT: control target
= control target key end

     0   :  { %vm408_vm0 = vcmask 1041408   ;;  %vm215_vm1 = vcmask 31744   ;;  %vm1341_vm2 = vcmask 261120   ;;  %s2860_s1 = inlined_call_operand.vmem [shape: bf16[4,32], index: 1, kind: input, shape index: {}]   ;;  %s2861_s0 = inlined_call_operand.vmem [shape: f32[1024,4], index: 0, kind: input, shape index: {}]   ;;  %s2862_s2 = inlined_call_operand.vmem [shape: f32[1,32], index: 2, kind: input, shape index: {}]   ;;  %s2863_s3 = inlined_call_operand.vmem [shape: f32[1024,32], index: 3, kind: output, shape index: {}]  }
   0x1   :  { %v207_v0 = vld [vmem:[%s2860_s1] sm:$0x3]  ;;  %v16_v2 = vld [vmem:[%s2861_s0 + $0x8] sm:$0xff]  ;;  %v17_v7 = vld [vmem:[%s2861_s0 + $0x10] sm:$0xff] }
   0x2   :  { %v15_v1 = vld [vmem:[%s2861_s0] sm:$0xff]  ;;  %1736 = vmatprep.subr.msk.bf16.mxu0 %vm408_vm0, %v207_v0  ;;  %1737 = vmatprep.subr.msk.bf16.mxu1 %vm408_vm0, %v207_v0  ;;  %v410_v3 = vsel %vm408_vm0, %v207_v0, 0  ;;  %v80_v6 = vld [vmem:[%s2861_s0 + $0x208] sm:$0xff]  ;;  %v18_v9 = vld [vmem:[%s2861_s0 + $0x18] sm:$0xff] }
   0x3   :  { %v143_v4 = vpack.c.bf16 %v16_v2, %v15_v1  ;;  %v79_v5 = vld [vmem:[%s2861_s0 + $0x200] sm:$0xff]  ;;  %1605 = vmatpush3.bf16.msra.mxu0 %v410_v3  ;;  %1735 = vmatpush3.bf16.msra.mxu1 %v410_v3  ;;  %v81_v10 = vld [vmem:[%s2861_s0 + $0x210] sm:$0xff]  ;;  %v82_v11 = vld [vmem:[%s2861_s0 + $0x218] sm:$0xff]  ;;  %v144_v12 = vpack.c.bf16 %v18_v9, %v17_v7 }
   0x4   :  { %v175_v8 = vpack.c.bf16 %v80_v6, %v79_v5  ;;  %v176_v13 = vpack.c.bf16 %v82_v11, %v81_v10  ;;  %v19_v14 = vld [vmem:[%s2861_s0 + $0x20] sm:$0xff]  ;;  %v20_v15 = vld [vmem:[%s2861_s0 + $0x28] sm:$0xff]  ;;  %v21_v20 = vld [vmem:[%s2861_s0 + $0x30] sm:$0xff] }
   0x5   :  { %1606 = vmatprep.mubr.msk.bf16.mxu0 %vm215_vm1, %v143_v4  ;;  %v83_v16 = vld [vmem:[%s2861_s0 + $0x220] sm:$0xff]  ;;  %v145_v17 = vpack.c.bf16 %v20_v15, %v19_v14  ;;  %v84_v18 = vld [vmem:[%s2861_s0 + $0x228] sm:$0xff]  ;;  %v22_v21 = vld [vmem:[%s2861_s0 + $0x38] sm:$0xff] }
   0x6   :  { %1670 = vmatprep.mubr.msk.bf16.mxu1 %vm215_vm1, %v175_v8  ;;  %1607 = vmatmul.mubr.msk.bf16.vlgmr.msra.gmra.mrb[0].mxu0 %vm215_vm1, %v144_v12  ;;  %v177_v19 = vpack.c.bf16 %v84_v18, %v83_v16  ;;  %v85_v22 = vld [vmem:[%s2861_s0 + $0x230] sm:$0xff]  ;;  %v86_v23 = vld [vmem:[%s2861_s0 + $0x238] sm:$0xff]  ;;  %v23_v24 = vld [vmem:[%s2861_s0 + $0x40] sm:$0xff]  ;;  %v146_v28 = vpack.c.bf16 %v22_v21, %v21_v20 }
   0x7   :  { %1671 = vmatmul.mubr.msk.bf16.vlgmr.msra.gmra.mrb[0].mxu1 %vm215_vm1, %v176_v13  ;;  %1610 = vmatprep.mubr.msk.bf16.mxu0 %vm215_vm1, %v145_v17  ;;  %v24_v25 = vld [vmem:[%s2861_s0 + $0x48] sm:$0xff]  ;;  %v87_v26 = vld [vmem:[%s2861_s0 + $0x240] sm:$0xff]  ;;  %v178_v29 = vpack.c.bf16 %v86_v23, %v85_v22  ;;  %v25_v32 = vld [vmem:[%s2861_s0 + $0x50] sm:$0xff] }
   0x8   :  { %1674 = vmatprep.mubr.msk.bf16.mxu1 %vm215_vm1, %v177_v19  ;;  %v88_v27 = vld [vmem:[%s2861_s0 + $0x248] sm:$0xff]  ;;  %v147_v30 = vpack.c.bf16 %v24_v25, %v23_v24  ;;  %v26_v33 = vld [vmem:[%s2861_s0 + $0x58] sm:$0xff]  ;;  %v89_v34 = vld [vmem:[%s2861_s0 + $0x250] sm:$0xff] }
   0x9   :  { %v179_v31 = vpack.c.bf16 %v88_v27, %v87_v26  ;;  %v90_v35 = vld [vmem:[%s2861_s0 + $0x258] sm:$0xff]  ;;  %v27_v36 = vld [vmem:[%s2861_s0 + $0x60] sm:$0xff]  ;;  %v28_v37 = vld [vmem:[%s2861_s0 + $0x68] sm:$0xff]  ;;  %v148_v40 = vpack.c.bf16 %v26_v33, %v25_v32 }
   0xa   :  { %v91_v38 = vld [vmem:[%s2861_s0 + $0x260] sm:$0xff]  ;;  %v92_v39 = vld [vmem:[%s2861_s0 + $0x268] sm:$0xff]  ;;  %v180_v41 = vpack.c.bf16 %v90_v35, %v89_v34  ;;  %v149_v42 = vpack.c.bf16 %v28_v37, %v27_v36  ;;  %v29_v44 = vld [vmem:[%s2861_s0 + $0x70] sm:$0xff] }
   0xb   :  { %v181_v43 = vpack.c.bf16 %v92_v39, %v91_v38  ;;  %v30_v45 = vld [vmem:[%s2861_s0 + $0x78] sm:$0xff]  ;;  %v93_v46 = vld [vmem:[%s2861_s0 + $0x270] sm:$0xff]  ;;  %v31_v48 = vld [vmem:[%s2861_s0 + $0x80] sm:$0xff] }
   0xc   :  { %v94_v47 = vld [vmem:[%s2861_s0 + $0x278] sm:$0xff]  ;;  %v32_v49 = vld [vmem:[%s2861_s0 + $0x88] sm:$0xff]  ;;  %v95_v50 = vld [vmem:[%s2861_s0 + $0x280] sm:$0xff]  ;;  %v150_v52 = vpack.c.bf16 %v30_v45, %v29_v44 }
   0xd   :  { %v96_v51 = vld [vmem:[%s2861_s0 + $0x288] sm:$0xff]  ;;  %v182_v53 = vpack.c.bf16 %v94_v47, %v93_v46  ;;  %v151_v54 = vpack.c.bf16 %v32_v49, %v31_v48  ;;  %v33_v56 = vld [vmem:[%s2861_s0 + $0x90] sm:$0xff]  ;;  %v34_v57 = vld [vmem:[%s2861_s0 + $0x98] sm:$0xff] }
   0xe   :  { %1611 = vmatmul.mubr.msk.bf16.gmra.mrb[4].mxu0 %vm215_vm1, %v146_v28  ;;  %v183_v55 = vpack.c.bf16 %v96_v51, %v95_v50  ;;  %v97_v58 = vld [vmem:[%s2861_s0 + $0x290] sm:$0xff]  ;;  %v98_v59 = vld [vmem:[%s2861_s0 + $0x298] sm:$0xff]  ;;  %v35_v60 = vld [vmem:[%s2861_s0 + $0xa0] sm:$0xff]  ;;  %v152_v0 = vpack.c.bf16 %v34_v57, %v33_v56 }
   0xf   :  { %1675 = vmatmul.mubr.msk.bf16.gmra.mrb[4].mxu1 %vm215_vm1, %v178_v29  ;;  %1614 = vmatprep.mubr.msk.bf16.mxu0 %vm215_vm1, %v147_v30  ;;  %v36_v61 = vld [vmem:[%s2861_s0 + $0xa8] sm:$0xff]  ;;  %v99_v62 = vld [vmem:[%s2861_s0 + $0x2a0] sm:$0xff]  ;;  %v184_v1 = vpack.c.bf16 %v98_v59, %v97_v58  ;;  %v37_v4 = vld [vmem:[%s2861_s0 + $0xb0] sm:$0xff] }
  0x10   :  { %1678 = vmatprep.mubr.msk.bf16.mxu1 %vm215_vm1, %v179_v31  ;;  %v100_v63 = vld [vmem:[%s2861_s0 + $0x2a8] sm:$0xff]  ;;  %v153_v2 = vpack.c.bf16 %v36_v61, %v35_v60  ;;  %v38_v5 = vld [vmem:[%s2861_s0 + $0xb8] sm:$0xff]  ;;  %v101_v6 = vld [vmem:[%s2861_s0 + $0x2b0] sm:$0xff] }
  0x11   :  { %v185_v3 = vpack.c.bf16 %v100_v63, %v99_v62  ;;  %v102_v7 = vld [vmem:[%s2861_s0 + $0x2b8] sm:$0xff]  ;;  %v39_v8 = vld [vmem:[%s2861_s0 + $0xc0] sm:$0xff]  ;;  %v40_v9 = vld [vmem:[%s2861_s0 + $0xc8] sm:$0xff]  ;;  %v154_v12 = vpack.c.bf16 %v38_v5, %v37_v4 }
  0x12   :  { %v103_v10 = vld [vmem:[%s2861_s0 + $0x2c0] sm:$0xff]  ;;  %v104_v11 = vld [vmem:[%s2861_s0 + $0x2c8] sm:$0xff]  ;;  %v186_v13 = vpack.c.bf16 %v102_v7, %v101_v6  ;;  %v155_v14 = vpack.c.bf16 %v40_v9, %v39_v8  ;;  %v41_v16 = vld [vmem:[%s2861_s0 + $0xd0] sm:$0xff] }
  0x13   :  { %v187_v15 = vpack.c.bf16 %v104_v11, %v103_v10  ;;  %v42_v17 = vld [vmem:[%s2861_s0 + $0xd8] sm:$0xff]  ;;  %v105_v18 = vld [vmem:[%s2861_s0 + $0x2d0] sm:$0xff]  ;;  %v43_v20 = vld [vmem:[%s2861_s0 + $0xe0] sm:$0xff] }
  0x14   :  { %v106_v19 = vld [vmem:[%s2861_s0 + $0x2d8] sm:$0xff]  ;;  %v44_v21 = vld [vmem:[%s2861_s0 + $0xe8] sm:$0xff]  ;;  %v107_v22 = vld [vmem:[%s2861_s0 + $0x2e0] sm:$0xff]  ;;  %v156_v24 = vpack.c.bf16 %v42_v17, %v41_v16 }
  0x15   :  { %v108_v23 = vld [vmem:[%s2861_s0 + $0x2e8] sm:$0xff]  ;;  %v188_v25 = vpack.c.bf16 %v106_v19, %v105_v18  ;;  %v157_v26 = vpack.c.bf16 %v44_v21, %v43_v20  ;;  %v45_v28 = vld [vmem:[%s2861_s0 + $0xf0] sm:$0xff]  ;;  %v46_v29 = vld [vmem:[%s2861_s0 + $0xf8] sm:$0xff] }
  0x16   :  { %1615 = vmatmul.mubr.msk.bf16.gmra.mrb[8].mxu0 %vm215_vm1, %v148_v40  ;;  %v189_v27 = vpack.c.bf16 %v108_v23, %v107_v22  ;;  %v109_v30 = vld [vmem:[%s2861_s0 + $0x2f0] sm:$0xff]  ;;  %v110_v31 = vld [vmem:[%s2861_s0 + $0x2f8] sm:$0xff]  ;;  %v47_v32 = vld [vmem:[%s2861_s0 + $0x100] sm:$0xff]  ;;  %v158_v36 = vpack.c.bf16 %v46_v29, %v45_v28 }
  0x17   :  { %1679 = vmatmul.mubr.msk.bf16.gmra.mrb[8].mxu1 %vm215_vm1, %v180_v41  ;;  %1618 = vmatprep.mubr.msk.bf16.mxu0 %vm215_vm1, %v149_v42  ;;  %v48_v33 = vld [vmem:[%s2861_s0 + $0x108] sm:$0xff]  ;;  %v111_v34 = vld [vmem:[%s2861_s0 + $0x300] sm:$0xff]  ;;  %v190_v37 = vpack.c.bf16 %v110_v31, %v109_v30  ;;  %v49_v40 = vld [vmem:[%s2861_s0 + $0x110] sm:$0xff] }
  0x18   :  { %1682 = vmatprep.mubr.msk.bf16.mxu1 %vm215_vm1, %v181_v43  ;;  %v112_v35 = vld [vmem:[%s2861_s0 + $0x308] sm:$0xff]  ;;  %v159_v38 = vpack.c.bf16 %v48_v33, %v47_v32  ;;  %v50_v41 = vld [vmem:[%s2861_s0 + $0x118] sm:$0xff]  ;;  %v113_v42 = vld [vmem:[%s2861_s0 + $0x310] sm:$0xff] }
  0x19   :  { %v191_v39 = vpack.c.bf16 %v112_v35, %v111_v34  ;;  %v114_v43 = vld [vmem:[%s2861_s0 + $0x318] sm:$0xff]  ;;  %v51_v44 = vld [vmem:[%s2861_s0 + $0x120] sm:$0xff]  ;;  %v52_v45 = vld [vmem:[%s2861_s0 + $0x128] sm:$0xff]  ;;  %v160_v48 = vpack.c.bf16 %v50_v41, %v49_v40 }
  0x1a   :  { %v115_v46 = vld [vmem:[%s2861_s0 + $0x320] sm:$0xff]  ;;  %v116_v47 = vld [vmem:[%s2861_s0 + $0x328] sm:$0xff]  ;;  %v192_v49 = vpack.c.bf16 %v114_v43, %v113_v42  ;;  %v161_v50 = vpack.c.bf16 %v52_v45, %v51_v44 }
  0x1b   :  { %v193_v51 = vpack.c.bf16 %v116_v47, %v115_v46  ;;  %v55_v56 = vld [vmem:[%s2861_s0 + $0x140] sm:$0xff]  ;;  %v56_v57 = vld [vmem:[%s2861_s0 + $0x148] sm:$0xff] }
  0x1c   :  { %v119_v58 = vld [vmem:[%s2861_s0 + $0x340] sm:$0xff]  ;;  %v120_v59 = vld [vmem:[%s2861_s0 + $0x348] sm:$0xff]  ;;  %v163_v62 = vpack.c.bf16 %v56_v57, %v55_v56 }
  0x1d   :  { %v195_v63 = vpack.c.bf16 %v120_v59, %v119_v58  ;;  %v59_v4 = vld [vmem:[%s2861_s0 + $0x160] sm:$0xff]  ;;  %v60_v5 = vld [vmem:[%s2861_s0 + $0x168] sm:$0xff] }
  0x1e   :  { %1619 = vmatmul.mubr.msk.bf16.gmra.mrb[12].mxu0 %vm215_vm1, %v150_v52  ;;  %v53_v52 = vld [vmem:[%s2861_s0 + $0x130] sm:$0xff]  ;;  %v123_v6 = vld [vmem:[%s2861_s0 + $0x360] sm:$0xff]  ;;  %v124_v7 = vld [vmem:[%s2861_s0 + $0x368] sm:$0xff]  ;;  %v165_v10 = vpack.c.bf16 %v60_v5, %v59_v4 }
  0x1f   :  { %1683 = vmatmul.mubr.msk.bf16.gmra.mrb[12].mxu1 %vm215_vm1, %v182_v53  ;;  %1622 = vmatprep.mubr.msk.bf16.mxu0 %vm215_vm1, %v151_v54  ;;  %v54_v53 = vld [vmem:[%s2861_s0 + $0x138] sm:$0xff]  ;;  %v117_v54 = vld [vmem:[%s2861_s0 + $0x330] sm:$0xff]  ;;  %v197_v11 = vpack.c.bf16 %v124_v7, %v123_v6  ;;  %v63_v16 = vld [vmem:[%s2861_s0 + $0x180] sm:$0xff] }
  0x20   :  { %1686 = vmatprep.mubr.msk.bf16.mxu1 %vm215_vm1, %v183_v55  ;;  %v118_v55 = vld [vmem:[%s2861_s0 + $0x338] sm:$0xff]  ;;  %v162_v60 = vpack.c.bf16 %v54_v53, %v53_v52  ;;  %v64_v17 = vld [vmem:[%s2861_s0 + $0x188] sm:$0xff]  ;;  %v127_v18 = vld [vmem:[%s2861_s0 + $0x380] sm:$0xff] }
  0x21   :  { %v194_v61 = vpack.c.bf16 %v118_v55, %v117_v54  ;;  %v128_v19 = vld [vmem:[%s2861_s0 + $0x388] sm:$0xff]  ;;  %v167_v22 = vpack.c.bf16 %v64_v17, %v63_v16  ;;  %v67_v28 = vld [vmem:[%s2861_s0 + $0x1a0] sm:$0xff] }
  0x22   :  { %v199_v23 = vpack.c.bf16 %v128_v19, %v127_v18  ;;  %v68_v29 = vld [vmem:[%s2861_s0 + $0x1a8] sm:$0xff]  ;;  %v131_v30 = vld [vmem:[%s2861_s0 + $0x3a0] sm:$0xff] }
  0x23   :  { %v132_v31 = vld [vmem:[%s2861_s0 + $0x3a8] sm:$0xff]  ;;  %v169_v34 = vpack.c.bf16 %v68_v29, %v67_v28  ;;  %v71_v40 = vld [vmem:[%s2861_s0 + $0x1c0] sm:$0xff] }
  0x24   :  { %v201_v35 = vpack.c.bf16 %v132_v31, %v131_v30  ;;  %v72_v41 = vld [vmem:[%s2861_s0 + $0x1c8] sm:$0xff]  ;;  %v135_v42 = vld [vmem:[%s2861_s0 + $0x3c0] sm:$0xff] }
  0x25   :  { %v136_v43 = vld [vmem:[%s2861_s0 + $0x3c8] sm:$0xff]  ;;  %v171_v46 = vpack.c.bf16 %v72_v41, %v71_v40  ;;  %v75_v52 = vld [vmem:[%s2861_s0 + $0x1e0] sm:$0xff] }
  0x26   :  { %1623 = vmatmul.mubr.msk.bf16.gmra.mrb[16].mxu0 %vm215_vm1, %v152_v0  ;;  %v57_v0 = vld [vmem:[%s2861_s0 + $0x150] sm:$0xff]  ;;  %v203_v47 = vpack.c.bf16 %v136_v43, %v135_v42  ;;  %v76_v53 = vld [vmem:[%s2861_s0 + $0x1e8] sm:$0xff]  ;;  %v139_v54 = vld [vmem:[%s2861_s0 + $0x3e0] sm:$0xff] }
  0x27   :  { %1687 = vmatmul.mubr.msk.bf16.gmra.mrb[16].mxu1 %vm215_vm1, %v184_v1  ;;  %1626 = vmatprep.mubr.msk.bf16.mxu0 %vm215_vm1, %v153_v2  ;;  %v58_v1 = vld [vmem:[%s2861_s0 + $0x158] sm:$0xff]  ;;  %v121_v2 = vld [vmem:[%s2861_s0 + $0x350] sm:$0xff]  ;;  %v140_v55 = vld [vmem:[%s2861_s0 + $0x3e8] sm:$0xff]  ;;  %v173_v58 = vpack.c.bf16 %v76_v53, %v75_v52 }
  0x28   :  { %1690 = vmatprep.mubr.msk.bf16.mxu1 %vm215_vm1, %v185_v3  ;;  %v122_v3 = vld [vmem:[%s2861_s0 + $0x358] sm:$0xff]  ;;  %v164_v8 = vpack.c.bf16 %v58_v1, %v57_v0  ;;  %v205_v59 = vpack.c.bf16 %v140_v55, %v139_v54 }
  0x29   :  { %v196_v9 = vpack.c.bf16 %v122_v3, %v121_v2  ;;  %v2213_v2 = vld [vmem:[%s2862_s2] ss:$0 sm:$0xff] }
  0x2e   :  { %1627 = vmatmul.mubr.msk.bf16.gmra.mrb[20].mxu0 %vm215_vm1, %v154_v12  ;;  %v61_v12 = vld [vmem:[%s2861_s0 + $0x170] sm:$0xff] }
  0x2f   :  { %1691 = vmatmul.mubr.msk.bf16.gmra.mrb[20].mxu1 %vm215_vm1, %v186_v13  ;;  %1630 = vmatprep.mubr.msk.bf16.mxu0 %vm215_vm1, %v155_v14  ;;  %v62_v13 = vld [vmem:[%s2861_s0 + $0x178] sm:$0xff]  ;;  %v125_v14 = vld [vmem:[%s2861_s0 + $0x370] sm:$0xff] }
  0x30   :  { %1694 = vmatprep.mubr.msk.bf16.mxu1 %vm215_vm1, %v187_v15  ;;  %v126_v15 = vld [vmem:[%s2861_s0 + $0x378] sm:$0xff]  ;;  %v166_v20 = vpack.c.bf16 %v62_v13, %v61_v12 }
  0x31   :  { %v198_v21 = vpack.c.bf16 %v126_v15, %v125_v14 }
  0x36   :  { %1631 = vmatmul.mubr.msk.bf16.gmra.mrb[24].mxu0 %vm215_vm1, %v156_v24  ;;  %v65_v24 = vld [vmem:[%s2861_s0 + $0x190] sm:$0xff] }
  0x37   :  { %1695 = vmatmul.mubr.msk.bf16.gmra.mrb[24].mxu1 %vm215_vm1, %v188_v25  ;;  %1634 = vmatprep.mubr.msk.bf16.mxu0 %vm215_vm1, %v157_v26  ;;  %v66_v25 = vld [vmem:[%s2861_s0 + $0x198] sm:$0xff]  ;;  %v129_v26 = vld [vmem:[%s2861_s0 + $0x390] sm:$0xff] }
  0x38   :  { %1698 = vmatprep.mubr.msk.bf16.mxu1 %vm215_vm1, %v189_v27  ;;  %v130_v27 = vld [vmem:[%s2861_s0 + $0x398] sm:$0xff]  ;;  %v168_v32 = vpack.c.bf16 %v66_v25, %v65_v24 }
  0x39   :  { %v200_v33 = vpack.c.bf16 %v130_v27, %v129_v26 }
  0x3e   :  { %1635 = vmatmul.mubr.msk.bf16.gmra.mrb[28].mxu0 %vm215_vm1, %v158_v36  ;;  %v69_v36 = vld [vmem:[%s2861_s0 + $0x1b0] sm:$0xff] }
  0x3f   :  { %1699 = vmatmul.mubr.msk.bf16.gmra.mrb[28].mxu1 %vm215_vm1, %v190_v37  ;;  %1638 = vmatprep.mubr.msk.bf16.mxu0 %vm215_vm1, %v159_v38  ;;  %v70_v37 = vld [vmem:[%s2861_s0 + $0x1b8] sm:$0xff]  ;;  %v133_v38 = vld [vmem:[%s2861_s0 + $0x3b0] sm:$0xff] }
  0x40   :  { %1702 = vmatprep.mubr.msk.bf16.mxu1 %vm215_vm1, %v191_v39  ;;  %v134_v39 = vld [vmem:[%s2861_s0 + $0x3b8] sm:$0xff]  ;;  %v170_v44 = vpack.c.bf16 %v70_v37, %v69_v36 }
  0x41   :  { %v202_v45 = vpack.c.bf16 %v134_v39, %v133_v38 }
  0x46   :  { %1639 = vmatmul.mubr.msk.bf16.gmra.mrb[32].mxu0 %vm215_vm1, %v160_v48  ;;  %v73_v48 = vld [vmem:[%s2861_s0 + $0x1d0] sm:$0xff] }
  0x47   :  { %1703 = vmatmul.mubr.msk.bf16.gmra.mrb[32].mxu1 %vm215_vm1, %v192_v49  ;;  %1642 = vmatprep.mubr.msk.bf16.mxu0 %vm215_vm1, %v161_v50  ;;  %v74_v49 = vld [vmem:[%s2861_s0 + $0x1d8] sm:$0xff]  ;;  %v137_v50 = vld [vmem:[%s2861_s0 + $0x3d0] sm:$0xff] }
  0x48   :  { %1706 = vmatprep.mubr.msk.bf16.mxu1 %vm215_vm1, %v193_v51  ;;  %v138_v51 = vld [vmem:[%s2861_s0 + $0x3d8] sm:$0xff]  ;;  %v172_v56 = vpack.c.bf16 %v74_v49, %v73_v48 }
  0x49   :  { %v204_v57 = vpack.c.bf16 %v138_v51, %v137_v50 }
  0x4e   :  { %1643 = vmatmul.mubr.msk.bf16.gmra.mrb[36].mxu0 %vm215_vm1, %v162_v60  ;;  %v77_v60 = vld [vmem:[%s2861_s0 + $0x1f0] sm:$0xff] }
  0x4f   :  { %1707 = vmatmul.mubr.msk.bf16.gmra.mrb[36].mxu1 %vm215_vm1, %v194_v61  ;;  %1646 = vmatprep.mubr.msk.bf16.mxu0 %vm215_vm1, %v163_v62  ;;  %v78_v61 = vld [vmem:[%s2861_s0 + $0x1f8] sm:$0xff]  ;;  %v141_v62 = vld [vmem:[%s2861_s0 + $0x3f0] sm:$0xff] }
  0x50   :  { %1710 = vmatprep.mubr.msk.bf16.mxu1 %vm215_vm1, %v195_v63  ;;  %v142_v63 = vld [vmem:[%s2861_s0 + $0x3f8] sm:$0xff]  ;;  %v174_v0 = vpack.c.bf16 %v78_v61, %v77_v60 }
  0x51   :  { %v206_v1 = vpack.c.bf16 %v142_v63, %v141_v62 }
  0x56   :  { %1647 = vmatmul.mubr.msk.bf16.gmra.mrb[40].mxu0 %vm215_vm1, %v164_v8 }
  0x57   :  { %1711 = vmatmul.mubr.msk.bf16.gmra.mrb[40].mxu1 %vm215_vm1, %v196_v9  ;;  %1650 = vmatprep.mubr.msk.bf16.mxu0 %vm215_vm1, %v165_v10 }
  0x58   :  { %1714 = vmatprep.mubr.msk.bf16.mxu1 %vm215_vm1, %v197_v11 }
  0x5e   :  { %1651 = vmatmul.mubr.msk.bf16.gmra.mrb[44].mxu0 %vm215_vm1, %v166_v20 }
  0x5f   :  { %1715 = vmatmul.mubr.msk.bf16.gmra.mrb[44].mxu1 %vm215_vm1, %v198_v21  ;;  %1654 = vmatprep.mubr.msk.bf16.mxu0 %vm215_vm1, %v167_v22 }
  0x60   :  { %1718 = vmatprep.mubr.msk.bf16.mxu1 %vm215_vm1, %v199_v23 }
  0x66   :  { %1655 = vmatmul.mubr.msk.bf16.gmra.mrb[48].mxu0 %vm215_vm1, %v168_v32 }
  0x67   :  { %1719 = vmatmul.mubr.msk.bf16.gmra.mrb[48].mxu1 %vm215_vm1, %v200_v33  ;;  %1658 = vmatprep.mubr.msk.bf16.mxu0 %vm215_vm1, %v169_v34 }
  0x68   :  { %1722 = vmatprep.mubr.msk.bf16.mxu1 %vm215_vm1, %v201_v35 }
  0x6e   :  { %1659 = vmatmul.mubr.msk.bf16.gmra.mrb[52].mxu0 %vm215_vm1, %v170_v44 }
  0x6f   :  { %1723 = vmatmul.mubr.msk.bf16.gmra.mrb[52].mxu1 %vm215_vm1, %v202_v45  ;;  %1662 = vmatprep.mubr.msk.bf16.mxu0 %vm215_vm1, %v171_v46 }
  0x70   :  { %1726 = vmatprep.mubr.msk.bf16.mxu1 %vm215_vm1, %v203_v47 }
  0x76   :  { %1663 = vmatmul.mubr.msk.bf16.gmra.mrb[56].mxu0 %vm215_vm1, %v172_v56 }
  0x77   :  { %1727 = vmatmul.mubr.msk.bf16.gmra.mrb[56].mxu1 %vm215_vm1, %v204_v57  ;;  %1666 = vmatprep.mubr.msk.bf16.mxu0 %vm215_vm1, %v173_v58 }
  0x78   :  { %1730 = vmatprep.mubr.msk.bf16.mxu1 %vm215_vm1, %v205_v59 }
  0x7e   :  { %1667 = vmatmul.mubr.msk.bf16.gmra.mrb[60].mxu0 %vm215_vm1, %v174_v0 }
  0x7f   :  { %1731 = vmatmul.mubr.msk.bf16.gmra.mrb[60].mxu1 %vm215_vm1, %v206_v1 }
  0xd9   :  { %v1608_v3 = vpop.f32.mrb[0].mxu0 }
  0xda   :  { %v1672_v4 = vpop.f32.mrb[0].mxu1  ;;  %v455_v5 = vadd.f32 %v1608_v3, %v2213_v2  ;;  %v446_v7 = vpop.f32.mrb[1].mxu0 }
  0xdb   :  { %v711_v6 = vadd.f32 %v1672_v4, %v2213_v2  ;;  %v702_v8 = vpop.f32.mrb[1].mxu1  ;;  %v447_v9 = vadd.f32 %v2213_v2, %v446_v7  ;;  %v1609_v11 = vpop.f32.mrb[2].mxu0 }
  0xdc   :  { %v703_v10 = vadd.f32 %v2213_v2, %v702_v8  ;;  %v1673_v12 = vpop.f32.mrb[2].mxu1  ;;  %vm959_vm3 = vcmp.ge.f32.partialorder %v455_v5, 0.0  ;;  %v1087_v13 = vmul.f32 0.01, %v455_v5  ;;  %v458_v19 = vadd.f32 %v1609_v11, %v2213_v2  ;;  %v449_v21 = vpop.f32.mrb[3].mxu0 }
  0xdd   :  { %vm1023_vm4 = vcmp.ge.f32.partialorder %v711_v6, 0.0  ;;  %v1151_v14 = vmul.f32 0.01, %v711_v6  ;;  %vm957_vm5 = vcmp.ge.f32.partialorder %v447_v9, 0.0  ;;  %v1085_v15 = vmul.f32 0.01, %v447_v9 }
  0xde   :  { %vm1021_vm6 = vcmp.ge.f32.partialorder %v703_v10, 0.0  ;;  %v1149_v16 = vmul.f32 0.01, %v703_v10  ;;  %v1215_v17 = vsel %vm959_vm3, %v455_v5, %v1087_v13  ;;  %v714_v20 = vadd.f32 %v1673_v12, %v2213_v2  ;;  %v705_v22 = vpop.f32.mrb[3].mxu1 }
  0xdf   :  { %v1279_v18 = vsel %vm1023_vm4, %v711_v6, %v1151_v14  ;;  %1344 = vst.msk [vmem:[%s2863_s3 + $0x10] sm:$0xff] %vm1341_vm2, %v1215_v17  ;;  %v1213_v23 = vsel %vm957_vm5, %v447_v9, %v1085_v15  ;;  %v450_v25 = vadd.f32 %v2213_v2, %v449_v21  ;;  %v706_v26 = vadd.f32 %v2213_v2, %v705_v22 }
  0xe0   :  { %1408 = vst.msk [vmem:[%s2863_s3 + $0x210] sm:$0xff] %vm1341_vm2, %v1279_v18  ;;  %v1277_v24 = vsel %vm1021_vm6, %v703_v10, %v1149_v16  ;;  %1342 = vst.msk [vmem:[%s2863_s3] sm:$0xff] %vm1341_vm2, %v1213_v23  ;;  %vm960_vm7 = vcmp.ge.f32.partialorder %v458_v19, 0.0  ;;  %v1088_v27 = vmul.f32 0.01, %v458_v19  ;;  %vm1024_vm8 = vcmp.ge.f32.partialorder %v714_v20, 0.0 }
  0xe1   :  { %1406 = vst.msk [vmem:[%s2863_s3 + $0x200] sm:$0xff] %vm1341_vm2, %v1277_v24  ;;  %v1152_v28 = vmul.f32 0.01, %v714_v20  ;;  %vm958_vm9 = vcmp.ge.f32.partialorder %v450_v25, 0.0  ;;  %v1086_v29 = vmul.f32 0.01, %v450_v25 }
  0xe2   :  { %vm1022_vm10 = vcmp.ge.f32.partialorder %v706_v26, 0.0  ;;  %v1150_v30 = vmul.f32 0.01, %v706_v26  ;;  %v1216_v31 = vsel %vm960_vm7, %v458_v19, %v1088_v27  ;;  %v1612_v33 = vpop.f32.mrb[4].mxu0  ;;  %v1676_v34 = vpop.f32.mrb[4].mxu1 }
  0xe3   :  { %v1280_v32 = vsel %vm1024_vm8, %v714_v20, %v1152_v28  ;;  %1345 = vst.msk [vmem:[%s2863_s3 + $0x18] sm:$0xff] %vm1341_vm2, %v1216_v31  ;;  %v1214_v35 = vsel %vm958_vm9, %v450_v25, %v1086_v29  ;;  %v471_v37 = vadd.f32 %v1612_v33, %v2213_v2  ;;  %v727_v38 = vadd.f32 %v1676_v34, %v2213_v2  ;;  %v462_v39 = vpop.f32.mrb[5].mxu0  ;;  %v718_v40 = vpop.f32.mrb[5].mxu1 }
  0xe4   :  { %1409 = vst.msk [vmem:[%s2863_s3 + $0x218] sm:$0xff] %vm1341_vm2, %v1280_v32  ;;  %v1278_v36 = vsel %vm1022_vm10, %v706_v26, %v1150_v30  ;;  %1343 = vst.msk [vmem:[%s2863_s3 + $0x8] sm:$0xff] %vm1341_vm2, %v1214_v35  ;;  %v463_v41 = vadd.f32 %v2213_v2, %v462_v39  ;;  %v719_v42 = vadd.f32 %v2213_v2, %v718_v40  ;;  %v1613_v43 = vpop.f32.mrb[6].mxu0  ;;  %v1677_v44 = vpop.f32.mrb[6].mxu1 }
  0xe5   :  { %1407 = vst.msk [vmem:[%s2863_s3 + $0x208] sm:$0xff] %vm1341_vm2, %v1278_v36  ;;  %vm963_vm11 = vcmp.ge.f32.partialorder %v471_v37, 0.0  ;;  %v1091_v45 = vmul.f32 0.01, %v471_v37  ;;  %vm1027_vm12 = vcmp.ge.f32.partialorder %v727_v38, 0.0  ;;  %v474_v51 = vadd.f32 %v1613_v43, %v2213_v2  ;;  %v465_v53 = vpop.f32.mrb[7].mxu0 }
  0xe6   :  { %v1155_v46 = vmul.f32 0.01, %v727_v38  ;;  %vm961_vm13 = vcmp.ge.f32.partialorder %v463_v41, 0.0  ;;  %v1089_v47 = vmul.f32 0.01, %v463_v41  ;;  %vm1025_vm14 = vcmp.ge.f32.partialorder %v719_v42, 0.0 }
  0xe7   :  { %v1153_v48 = vmul.f32 0.01, %v719_v42  ;;  %v1219_v49 = vsel %vm963_vm11, %v471_v37, %v1091_v45  ;;  %v730_v52 = vadd.f32 %v1677_v44, %v2213_v2  ;;  %v721_v54 = vpop.f32.mrb[7].mxu1  ;;  %v466_v57 = vadd.f32 %v2213_v2, %v465_v53 }
  0xe8   :  { %v1283_v50 = vsel %vm1027_vm12, %v727_v38, %v1155_v46  ;;  %1348 = vst.msk [vmem:[%s2863_s3 + $0x30] sm:$0xff] %vm1341_vm2, %v1219_v49  ;;  %v1217_v55 = vsel %vm961_vm13, %v463_v41, %v1089_v47  ;;  %v722_v58 = vadd.f32 %v2213_v2, %v721_v54  ;;  %vm964_vm15 = vcmp.ge.f32.partialorder %v474_v51, 0.0 }
  0xe9   :  { %1412 = vst.msk [vmem:[%s2863_s3 + $0x230] sm:$0xff] %vm1341_vm2, %v1283_v50  ;;  %v1281_v56 = vsel %vm1025_vm14, %v719_v42, %v1153_v48  ;;  %1346 = vst.msk [vmem:[%s2863_s3 + $0x20] sm:$0xff] %vm1341_vm2, %v1217_v55  ;;  %v1092_v59 = vmul.f32 0.01, %v474_v51  ;;  %vm1028_vm0 = vcmp.ge.f32.partialorder %v730_v52, 0.0  ;;  %vm962_vm1 = vcmp.ge.f32.partialorder %v466_v57, 0.0 }
  0xea   :  { %1410 = vst.msk [vmem:[%s2863_s3 + $0x220] sm:$0xff] %vm1341_vm2, %v1281_v56  ;;  %v1156_v60 = vmul.f32 0.01, %v730_v52  ;;  %v1090_v61 = vmul.f32 0.01, %v466_v57  ;;  %vm1026_vm3 = vcmp.ge.f32.partialorder %v722_v58, 0.0 }
  0xeb   :  { %v1154_v62 = vmul.f32 0.01, %v722_v58  ;;  %v1220_v63 = vsel %vm964_vm15, %v474_v51, %v1092_v59  ;;  %v1616_v1 = vpop.f32.mrb[8].mxu0  ;;  %v1680_v3 = vpop.f32.mrb[8].mxu1 }
  0xec   :  { %v1284_v0 = vsel %vm1028_vm0, %v730_v52, %v1156_v60  ;;  %1349 = vst.msk [vmem:[%s2863_s3 + $0x38] sm:$0xff] %vm1341_vm2, %v1220_v63  ;;  %v1218_v4 = vsel %vm962_vm1, %v466_v57, %v1090_v61  ;;  %v487_v6 = vadd.f32 %v1616_v1, %v2213_v2  ;;  %v743_v7 = vadd.f32 %v1680_v3, %v2213_v2  ;;  %v478_v8 = vpop.f32.mrb[9].mxu0  ;;  %v734_v9 = vpop.f32.mrb[9].mxu1 }
  0xed   :  { %1413 = vst.msk [vmem:[%s2863_s3 + $0x238] sm:$0xff] %vm1341_vm2, %v1284_v0  ;;  %v1282_v5 = vsel %vm1026_vm3, %v722_v58, %v1154_v62  ;;  %1347 = vst.msk [vmem:[%s2863_s3 + $0x28] sm:$0xff] %vm1341_vm2, %v1218_v4  ;;  %v479_v10 = vadd.f32 %v2213_v2, %v478_v8  ;;  %v735_v11 = vadd.f32 %v2213_v2, %v734_v9  ;;  %v1617_v12 = vpop.f32.mrb[10].mxu0  ;;  %v1681_v13 = vpop.f32.mrb[10].mxu1 }
  0xee   :  { %1411 = vst.msk [vmem:[%s2863_s3 + $0x228] sm:$0xff] %vm1341_vm2, %v1282_v5  ;;  %vm967_vm4 = vcmp.ge.f32.partialorder %v487_v6, 0.0  ;;  %v1095_v14 = vmul.f32 0.01, %v487_v6  ;;  %vm1031_vm5 = vcmp.ge.f32.partialorder %v743_v7, 0.0  ;;  %v490_v20 = vadd.f32 %v1617_v12, %v2213_v2  ;;  %v481_v22 = vpop.f32.mrb[11].mxu0 }
  0xef   :  { %v1159_v15 = vmul.f32 0.01, %v743_v7  ;;  %vm965_vm6 = vcmp.ge.f32.partialorder %v479_v10, 0.0  ;;  %v1093_v16 = vmul.f32 0.01, %v479_v10  ;;  %vm1029_vm7 = vcmp.ge.f32.partialorder %v735_v11, 0.0 }
  0xf0   :  { %v1157_v17 = vmul.f32 0.01, %v735_v11  ;;  %v1223_v18 = vsel %vm967_vm4, %v487_v6, %v1095_v14  ;;  %v746_v21 = vadd.f32 %v1681_v13, %v2213_v2  ;;  %v737_v23 = vpop.f32.mrb[11].mxu1  ;;  %v482_v26 = vadd.f32 %v2213_v2, %v481_v22 }
  0xf1   :  { %v1287_v19 = vsel %vm1031_vm5, %v743_v7, %v1159_v15  ;;  %1352 = vst.msk [vmem:[%s2863_s3 + $0x50] sm:$0xff] %vm1341_vm2, %v1223_v18  ;;  %v1221_v24 = vsel %vm965_vm6, %v479_v10, %v1093_v16  ;;  %v738_v27 = vadd.f32 %v2213_v2, %v737_v23  ;;  %v1620_v28 = vpop.f32.mrb[12].mxu0  ;;  %vm968_vm8 = vcmp.ge.f32.partialorder %v490_v20, 0.0 }
  0xf2   :  { %1416 = vst.msk [vmem:[%s2863_s3 + $0x250] sm:$0xff] %vm1341_vm2, %v1287_v19  ;;  %v1285_v25 = vsel %vm1029_vm7, %v735_v11, %v1157_v17  ;;  %v1684_v29 = vpop.f32.mrb[12].mxu1  ;;  %1350 = vst.msk [vmem:[%s2863_s3 + $0x40] sm:$0xff] %vm1341_vm2, %v1221_v24  ;;  %v1096_v30 = vmul.f32 0.01, %v490_v20  ;;  %vm1032_vm9 = vcmp.ge.f32.partialorder %v746_v21, 0.0  ;;  %v503_v36 = vadd.f32 %v1620_v28, %v2213_v2 }
  0xf3   :  { %1414 = vst.msk [vmem:[%s2863_s3 + $0x240] sm:$0xff] %vm1341_vm2, %v1285_v25  ;;  %v1160_v31 = vmul.f32 0.01, %v746_v21  ;;  %vm966_vm10 = vcmp.ge.f32.partialorder %v482_v26, 0.0  ;;  %v1094_v32 = vmul.f32 0.01, %v482_v26  ;;  %v759_v37 = vadd.f32 %v1684_v29, %v2213_v2 }
  0xf4   :  { %vm1030_vm11 = vcmp.ge.f32.partialorder %v738_v27, 0.0  ;;  %v1158_v33 = vmul.f32 0.01, %v738_v27  ;;  %v1224_v34 = vsel %vm968_vm8, %v490_v20, %v1096_v30  ;;  %v494_v38 = vpop.f32.mrb[13].mxu0  ;;  %v750_v39 = vpop.f32.mrb[13].mxu1  ;;  %vm971_vm12 = vcmp.ge.f32.partialorder %v503_v36, 0.0 }
  0xf5   :  { %v1288_v35 = vsel %vm1032_vm9, %v746_v21, %v1160_v31  ;;  %1353 = vst.msk [vmem:[%s2863_s3 + $0x58] sm:$0xff] %vm1341_vm2, %v1224_v34  ;;  %v1222_v40 = vsel %vm966_vm10, %v482_v26, %v1094_v32  ;;  %v495_v42 = vadd.f32 %v2213_v2, %v494_v38  ;;  %v751_v43 = vadd.f32 %v2213_v2, %v750_v39  ;;  %v1621_v44 = vpop.f32.mrb[14].mxu0  ;;  %v1685_v45 = vpop.f32.mrb[14].mxu1 }
  0xf6   :  { %1417 = vst.msk [vmem:[%s2863_s3 + $0x258] sm:$0xff] %vm1341_vm2, %v1288_v35  ;;  %v1286_v41 = vsel %vm1030_vm11, %v738_v27, %v1158_v33  ;;  %1351 = vst.msk [vmem:[%s2863_s3 + $0x48] sm:$0xff] %vm1341_vm2, %v1222_v40  ;;  %v1099_v46 = vmul.f32 0.01, %v503_v36  ;;  %vm1035_vm13 = vcmp.ge.f32.partialorder %v759_v37, 0.0  ;;  %v506_v52 = vadd.f32 %v1621_v44, %v2213_v2  ;;  %v497_v54 = vpop.f32.mrb[15].mxu0 }
  0xf7   :  { %1415 = vst.msk [vmem:[%s2863_s3 + $0x248] sm:$0xff] %vm1341_vm2, %v1286_v41  ;;  %v1163_v47 = vmul.f32 0.01, %v759_v37  ;;  %vm969_vm14 = vcmp.ge.f32.partialorder %v495_v42, 0.0  ;;  %v1097_v48 = vmul.f32 0.01, %v495_v42  ;;  %v762_v53 = vadd.f32 %v1685_v45, %v2213_v2 }
  0xf8   :  { %vm1033_vm15 = vcmp.ge.f32.partialorder %v751_v43, 0.0  ;;  %v1161_v49 = vmul.f32 0.01, %v751_v43  ;;  %v1227_v50 = vsel %vm971_vm12, %v503_v36, %v1099_v46  ;;  %v753_v55 = vpop.f32.mrb[15].mxu1  ;;  %v498_v58 = vadd.f32 %v2213_v2, %v497_v54 }
  0xf9   :  { %v1291_v51 = vsel %vm1035_vm13, %v759_v37, %v1163_v47  ;;  %1356 = vst.msk [vmem:[%s2863_s3 + $0x70] sm:$0xff] %vm1341_vm2, %v1227_v50  ;;  %v1225_v56 = vsel %vm969_vm14, %v495_v42, %v1097_v48  ;;  %v754_v59 = vadd.f32 %v2213_v2, %v753_v55  ;;  %v1624_v60 = vpop.f32.mrb[16].mxu0  ;;  %vm972_vm0 = vcmp.ge.f32.partialorder %v506_v52, 0.0 }
  0xfa   :  { %1420 = vst.msk [vmem:[%s2863_s3 + $0x270] sm:$0xff] %vm1341_vm2, %v1291_v51  ;;  %v1289_v57 = vsel %vm1033_vm15, %v751_v43, %v1161_v49  ;;  %v1688_v61 = vpop.f32.mrb[16].mxu1  ;;  %1354 = vst.msk [vmem:[%s2863_s3 + $0x60] sm:$0xff] %vm1341_vm2, %v1225_v56  ;;  %v1100_v62 = vmul.f32 0.01, %v506_v52  ;;  %vm1036_vm1 = vcmp.ge.f32.partialorder %v762_v53, 0.0  ;;  %v519_v5 = vadd.f32 %v1624_v60, %v2213_v2 }
  0xfb   :  { %1418 = vst.msk [vmem:[%s2863_s3 + $0x260] sm:$0xff] %vm1341_vm2, %v1289_v57  ;;  %v1164_v63 = vmul.f32 0.01, %v762_v53  ;;  %vm970_vm3 = vcmp.ge.f32.partialorder %v498_v58, 0.0  ;;  %v1098_v0 = vmul.f32 0.01, %v498_v58  ;;  %v775_v6 = vadd.f32 %v1688_v61, %v2213_v2 }
  0xfc   :  { %vm1034_vm4 = vcmp.ge.f32.partialorder %v754_v59, 0.0  ;;  %v1162_v1 = vmul.f32 0.01, %v754_v59  ;;  %v1228_v3 = vsel %vm972_vm0, %v506_v52, %v1100_v62  ;;  %v510_v7 = vpop.f32.mrb[17].mxu0  ;;  %v766_v8 = vpop.f32.mrb[17].mxu1  ;;  %vm975_vm5 = vcmp.ge.f32.partialorder %v519_v5, 0.0 }
  0xfd   :  { %v1292_v4 = vsel %vm1036_vm1, %v762_v53, %v1164_v63  ;;  %1357 = vst.msk [vmem:[%s2863_s3 + $0x78] sm:$0xff] %vm1341_vm2, %v1228_v3  ;;  %v1226_v9 = vsel %vm970_vm3, %v498_v58, %v1098_v0  ;;  %v511_v11 = vadd.f32 %v2213_v2, %v510_v7  ;;  %v767_v12 = vadd.f32 %v2213_v2, %v766_v8  ;;  %v1625_v13 = vpop.f32.mrb[18].mxu0  ;;  %v1689_v14 = vpop.f32.mrb[18].mxu1 }
  0xfe   :  { %1421 = vst.msk [vmem:[%s2863_s3 + $0x278] sm:$0xff] %vm1341_vm2, %v1292_v4  ;;  %v1290_v10 = vsel %vm1034_vm4, %v754_v59, %v1162_v1  ;;  %1355 = vst.msk [vmem:[%s2863_s3 + $0x68] sm:$0xff] %vm1341_vm2, %v1226_v9  ;;  %v1103_v15 = vmul.f32 0.01, %v519_v5  ;;  %vm1039_vm6 = vcmp.ge.f32.partialorder %v775_v6, 0.0  ;;  %v522_v21 = vadd.f32 %v1625_v13, %v2213_v2  ;;  %v513_v23 = vpop.f32.mrb[19].mxu0 }
  0xff   :  { %1419 = vst.msk [vmem:[%s2863_s3 + $0x268] sm:$0xff] %vm1341_vm2, %v1290_v10  ;;  %v1167_v16 = vmul.f32 0.01, %v775_v6  ;;  %vm973_vm7 = vcmp.ge.f32.partialorder %v511_v11, 0.0  ;;  %v1101_v17 = vmul.f32 0.01, %v511_v11  ;;  %v778_v22 = vadd.f32 %v1689_v14, %v2213_v2 }
 0x100   :  { %vm1037_vm8 = vcmp.ge.f32.partialorder %v767_v12, 0.0  ;;  %v1165_v18 = vmul.f32 0.01, %v767_v12  ;;  %v1231_v19 = vsel %vm975_vm5, %v519_v5, %v1103_v15  ;;  %v769_v24 = vpop.f32.mrb[19].mxu1  ;;  %v514_v27 = vadd.f32 %v2213_v2, %v513_v23 }
 0x101   :  { %v1295_v20 = vsel %vm1039_vm6, %v775_v6, %v1167_v16  ;;  %1360 = vst.msk [vmem:[%s2863_s3 + $0x90] sm:$0xff] %vm1341_vm2, %v1231_v19  ;;  %v1229_v25 = vsel %vm973_vm7, %v511_v11, %v1101_v17  ;;  %v770_v28 = vadd.f32 %v2213_v2, %v769_v24  ;;  %v1628_v29 = vpop.f32.mrb[20].mxu0  ;;  %vm976_vm9 = vcmp.ge.f32.partialorder %v522_v21, 0.0 }
 0x102   :  { %1424 = vst.msk [vmem:[%s2863_s3 + $0x290] sm:$0xff] %vm1341_vm2, %v1295_v20  ;;  %v1293_v26 = vsel %vm1037_vm8, %v767_v12, %v1165_v18  ;;  %v1692_v30 = vpop.f32.mrb[20].mxu1  ;;  %1358 = vst.msk [vmem:[%s2863_s3 + $0x80] sm:$0xff] %vm1341_vm2, %v1229_v25  ;;  %v1104_v31 = vmul.f32 0.01, %v522_v21  ;;  %vm1040_vm10 = vcmp.ge.f32.partialorder %v778_v22, 0.0  ;;  %v535_v37 = vadd.f32 %v1628_v29, %v2213_v2 }
 0x103   :  { %1422 = vst.msk [vmem:[%s2863_s3 + $0x280] sm:$0xff] %vm1341_vm2, %v1293_v26  ;;  %v1168_v32 = vmul.f32 0.01, %v778_v22  ;;  %vm974_vm11 = vcmp.ge.f32.partialorder %v514_v27, 0.0  ;;  %v1102_v33 = vmul.f32 0.01, %v514_v27  ;;  %v791_v38 = vadd.f32 %v1692_v30, %v2213_v2 }
 0x104   :  { %vm1038_vm12 = vcmp.ge.f32.partialorder %v770_v28, 0.0  ;;  %v1166_v34 = vmul.f32 0.01, %v770_v28  ;;  %v1232_v35 = vsel %vm976_vm9, %v522_v21, %v1104_v31  ;;  %v526_v39 = vpop.f32.mrb[21].mxu0  ;;  %v782_v40 = vpop.f32.mrb[21].mxu1  ;;  %vm979_vm13 = vcmp.ge.f32.partialorder %v535_v37, 0.0 }
 0x105   :  { %v1296_v36 = vsel %vm1040_vm10, %v778_v22, %v1168_v32  ;;  %1361 = vst.msk [vmem:[%s2863_s3 + $0x98] sm:$0xff] %vm1341_vm2, %v1232_v35  ;;  %v1230_v41 = vsel %vm974_vm11, %v514_v27, %v1102_v33  ;;  %v527_v43 = vadd.f32 %v2213_v2, %v526_v39  ;;  %v783_v44 = vadd.f32 %v2213_v2, %v782_v40  ;;  %v1629_v45 = vpop.f32.mrb[22].mxu0  ;;  %v1693_v46 = vpop.f32.mrb[22].mxu1 }
 0x106   :  { %1425 = vst.msk [vmem:[%s2863_s3 + $0x298] sm:$0xff] %vm1341_vm2, %v1296_v36  ;;  %v1294_v42 = vsel %vm1038_vm12, %v770_v28, %v1166_v34  ;;  %1359 = vst.msk [vmem:[%s2863_s3 + $0x88] sm:$0xff] %vm1341_vm2, %v1230_v41  ;;  %v1107_v47 = vmul.f32 0.01, %v535_v37  ;;  %vm1043_vm14 = vcmp.ge.f32.partialorder %v791_v38, 0.0  ;;  %v538_v53 = vadd.f32 %v1629_v45, %v2213_v2  ;;  %v529_v55 = vpop.f32.mrb[23].mxu0 }
 0x107   :  { %1423 = vst.msk [vmem:[%s2863_s3 + $0x288] sm:$0xff] %vm1341_vm2, %v1294_v42  ;;  %v1171_v48 = vmul.f32 0.01, %v791_v38  ;;  %vm977_vm15 = vcmp.ge.f32.partialorder %v527_v43, 0.0  ;;  %v1105_v49 = vmul.f32 0.01, %v527_v43  ;;  %v794_v54 = vadd.f32 %v1693_v46, %v2213_v2 }
 0x108   :  { %vm1041_vm0 = vcmp.ge.f32.partialorder %v783_v44, 0.0  ;;  %v1169_v50 = vmul.f32 0.01, %v783_v44  ;;  %v1235_v51 = vsel %vm979_vm13, %v535_v37, %v1107_v47  ;;  %v785_v56 = vpop.f32.mrb[23].mxu1  ;;  %v530_v59 = vadd.f32 %v2213_v2, %v529_v55 }
 0x109   :  { %v1299_v52 = vsel %vm1043_vm14, %v791_v38, %v1171_v48  ;;  %1364 = vst.msk [vmem:[%s2863_s3 + $0xb0] sm:$0xff] %vm1341_vm2, %v1235_v51  ;;  %v1233_v57 = vsel %vm977_vm15, %v527_v43, %v1105_v49  ;;  %v786_v60 = vadd.f32 %v2213_v2, %v785_v56  ;;  %v1632_v61 = vpop.f32.mrb[24].mxu0  ;;  %vm980_vm1 = vcmp.ge.f32.partialorder %v538_v53, 0.0 }
 0x10a   :  { %1428 = vst.msk [vmem:[%s2863_s3 + $0x2b0] sm:$0xff] %vm1341_vm2, %v1299_v52  ;;  %v1297_v58 = vsel %vm1041_vm0, %v783_v44, %v1169_v50  ;;  %v1696_v62 = vpop.f32.mrb[24].mxu1  ;;  %1362 = vst.msk [vmem:[%s2863_s3 + $0xa0] sm:$0xff] %vm1341_vm2, %v1233_v57  ;;  %v1108_v63 = vmul.f32 0.01, %v538_v53  ;;  %vm1044_vm3 = vcmp.ge.f32.partialorder %v794_v54, 0.0  ;;  %v551_v6 = vadd.f32 %v1632_v61, %v2213_v2 }
 0x10b   :  { %1426 = vst.msk [vmem:[%s2863_s3 + $0x2a0] sm:$0xff] %vm1341_vm2, %v1297_v58  ;;  %v1172_v0 = vmul.f32 0.01, %v794_v54  ;;  %vm978_vm4 = vcmp.ge.f32.partialorder %v530_v59, 0.0  ;;  %v1106_v1 = vmul.f32 0.01, %v530_v59  ;;  %v807_v7 = vadd.f32 %v1696_v62, %v2213_v2 }
 0x10c   :  { %vm1042_vm5 = vcmp.ge.f32.partialorder %v786_v60, 0.0  ;;  %v1170_v3 = vmul.f32 0.01, %v786_v60  ;;  %v1236_v4 = vsel %vm980_vm1, %v538_v53, %v1108_v63  ;;  %v542_v8 = vpop.f32.mrb[25].mxu0  ;;  %v798_v9 = vpop.f32.mrb[25].mxu1  ;;  %vm983_vm6 = vcmp.ge.f32.partialorder %v551_v6, 0.0 }
 0x10d   :  { %v1300_v5 = vsel %vm1044_vm3, %v794_v54, %v1172_v0  ;;  %1365 = vst.msk [vmem:[%s2863_s3 + $0xb8] sm:$0xff] %vm1341_vm2, %v1236_v4  ;;  %v1234_v10 = vsel %vm978_vm4, %v530_v59, %v1106_v1  ;;  %v543_v12 = vadd.f32 %v2213_v2, %v542_v8  ;;  %v799_v13 = vadd.f32 %v2213_v2, %v798_v9  ;;  %v1633_v14 = vpop.f32.mrb[26].mxu0  ;;  %v1697_v15 = vpop.f32.mrb[26].mxu1 }
 0x10e   :  { %1429 = vst.msk [vmem:[%s2863_s3 + $0x2b8] sm:$0xff] %vm1341_vm2, %v1300_v5  ;;  %v1298_v11 = vsel %vm1042_vm5, %v786_v60, %v1170_v3  ;;  %1363 = vst.msk [vmem:[%s2863_s3 + $0xa8] sm:$0xff] %vm1341_vm2, %v1234_v10  ;;  %v1111_v16 = vmul.f32 0.01, %v551_v6  ;;  %vm1047_vm7 = vcmp.ge.f32.partialorder %v807_v7, 0.0  ;;  %v554_v22 = vadd.f32 %v1633_v14, %v2213_v2  ;;  %v545_v24 = vpop.f32.mrb[27].mxu0 }
 0x10f   :  { %1427 = vst.msk [vmem:[%s2863_s3 + $0x2a8] sm:$0xff] %vm1341_vm2, %v1298_v11  ;;  %v1175_v17 = vmul.f32 0.01, %v807_v7  ;;  %vm981_vm8 = vcmp.ge.f32.partialorder %v543_v12, 0.0  ;;  %v1109_v18 = vmul.f32 0.01, %v543_v12  ;;  %v810_v23 = vadd.f32 %v1697_v15, %v2213_v2 }
 0x110   :  { %vm1045_vm9 = vcmp.ge.f32.partialorder %v799_v13, 0.0  ;;  %v1173_v19 = vmul.f32 0.01, %v799_v13  ;;  %v1239_v20 = vsel %vm983_vm6, %v551_v6, %v1111_v16  ;;  %v801_v25 = vpop.f32.mrb[27].mxu1  ;;  %v546_v28 = vadd.f32 %v2213_v2, %v545_v24 }
 0x111   :  { %v1303_v21 = vsel %vm1047_vm7, %v807_v7, %v1175_v17  ;;  %1368 = vst.msk [vmem:[%s2863_s3 + $0xd0] sm:$0xff] %vm1341_vm2, %v1239_v20  ;;  %v1237_v26 = vsel %vm981_vm8, %v543_v12, %v1109_v18  ;;  %v802_v29 = vadd.f32 %v2213_v2, %v801_v25  ;;  %v1636_v30 = vpop.f32.mrb[28].mxu0  ;;  %vm984_vm10 = vcmp.ge.f32.partialorder %v554_v22, 0.0 }
 0x112   :  { %1432 = vst.msk [vmem:[%s2863_s3 + $0x2d0] sm:$0xff] %vm1341_vm2, %v1303_v21  ;;  %v1301_v27 = vsel %vm1045_vm9, %v799_v13, %v1173_v19  ;;  %v1700_v31 = vpop.f32.mrb[28].mxu1  ;;  %1366 = vst.msk [vmem:[%s2863_s3 + $0xc0] sm:$0xff] %vm1341_vm2, %v1237_v26  ;;  %v1112_v32 = vmul.f32 0.01, %v554_v22  ;;  %vm1048_vm11 = vcmp.ge.f32.partialorder %v810_v23, 0.0  ;;  %v567_v38 = vadd.f32 %v1636_v30, %v2213_v2 }
 0x113   :  { %1430 = vst.msk [vmem:[%s2863_s3 + $0x2c0] sm:$0xff] %vm1341_vm2, %v1301_v27  ;;  %v1176_v33 = vmul.f32 0.01, %v810_v23  ;;  %vm982_vm12 = vcmp.ge.f32.partialorder %v546_v28, 0.0  ;;  %v1110_v34 = vmul.f32 0.01, %v546_v28  ;;  %v823_v39 = vadd.f32 %v1700_v31, %v2213_v2 }
 0x114   :  { %vm1046_vm13 = vcmp.ge.f32.partialorder %v802_v29, 0.0  ;;  %v1174_v35 = vmul.f32 0.01, %v802_v29  ;;  %v1240_v36 = vsel %vm984_vm10, %v554_v22, %v1112_v32  ;;  %v558_v40 = vpop.f32.mrb[29].mxu0  ;;  %v814_v41 = vpop.f32.mrb[29].mxu1  ;;  %vm987_vm14 = vcmp.ge.f32.partialorder %v567_v38, 0.0 }
 0x115   :  { %v1304_v37 = vsel %vm1048_vm11, %v810_v23, %v1176_v33  ;;  %1369 = vst.msk [vmem:[%s2863_s3 + $0xd8] sm:$0xff] %vm1341_vm2, %v1240_v36  ;;  %v1238_v42 = vsel %vm982_vm12, %v546_v28, %v1110_v34  ;;  %v559_v44 = vadd.f32 %v2213_v2, %v558_v40  ;;  %v815_v45 = vadd.f32 %v2213_v2, %v814_v41  ;;  %v1637_v46 = vpop.f32.mrb[30].mxu0  ;;  %v1701_v47 = vpop.f32.mrb[30].mxu1 }
 0x116   :  { %1433 = vst.msk [vmem:[%s2863_s3 + $0x2d8] sm:$0xff] %vm1341_vm2, %v1304_v37  ;;  %v1302_v43 = vsel %vm1046_vm13, %v802_v29, %v1174_v35  ;;  %1367 = vst.msk [vmem:[%s2863_s3 + $0xc8] sm:$0xff] %vm1341_vm2, %v1238_v42  ;;  %v1115_v48 = vmul.f32 0.01, %v567_v38  ;;  %vm1051_vm15 = vcmp.ge.f32.partialorder %v823_v39, 0.0  ;;  %v570_v54 = vadd.f32 %v1637_v46, %v2213_v2  ;;  %v561_v56 = vpop.f32.mrb[31].mxu0 }
 0x117   :  { %1431 = vst.msk [vmem:[%s2863_s3 + $0x2c8] sm:$0xff] %vm1341_vm2, %v1302_v43  ;;  %v1179_v49 = vmul.f32 0.01, %v823_v39  ;;  %vm985_vm0 = vcmp.ge.f32.partialorder %v559_v44, 0.0  ;;  %v1113_v50 = vmul.f32 0.01, %v559_v44  ;;  %v826_v55 = vadd.f32 %v1701_v47, %v2213_v2 }
 0x118   :  { %vm1049_vm1 = vcmp.ge.f32.partialorder %v815_v45, 0.0  ;;  %v1177_v51 = vmul.f32 0.01, %v815_v45  ;;  %v1243_v52 = vsel %vm987_vm14, %v567_v38, %v1115_v48  ;;  %v817_v57 = vpop.f32.mrb[31].mxu1  ;;  %v562_v60 = vadd.f32 %v2213_v2, %v561_v56 }
 0x119   :  { %v1307_v53 = vsel %vm1051_vm15, %v823_v39, %v1179_v49  ;;  %1372 = vst.msk [vmem:[%s2863_s3 + $0xf0] sm:$0xff] %vm1341_vm2, %v1243_v52  ;;  %v1241_v58 = vsel %vm985_vm0, %v559_v44, %v1113_v50  ;;  %v818_v61 = vadd.f32 %v2213_v2, %v817_v57  ;;  %v1640_v62 = vpop.f32.mrb[32].mxu0  ;;  %vm988_vm3 = vcmp.ge.f32.partialorder %v570_v54, 0.0 }
 0x11a   :  { %1436 = vst.msk [vmem:[%s2863_s3 + $0x2f0] sm:$0xff] %vm1341_vm2, %v1307_v53  ;;  %v1305_v59 = vsel %vm1049_vm1, %v815_v45, %v1177_v51  ;;  %v1704_v63 = vpop.f32.mrb[32].mxu1  ;;  %1370 = vst.msk [vmem:[%s2863_s3 + $0xe0] sm:$0xff] %vm1341_vm2, %v1241_v58  ;;  %v1116_v0 = vmul.f32 0.01, %v570_v54  ;;  %vm1052_vm4 = vcmp.ge.f32.partialorder %v826_v55, 0.0  ;;  %v583_v7 = vadd.f32 %v1640_v62, %v2213_v2 }
 0x11b   :  { %1434 = vst.msk [vmem:[%s2863_s3 + $0x2e0] sm:$0xff] %vm1341_vm2, %v1305_v59  ;;  %v1180_v1 = vmul.f32 0.01, %v826_v55  ;;  %vm986_vm5 = vcmp.ge.f32.partialorder %v562_v60, 0.0  ;;  %v1114_v3 = vmul.f32 0.01, %v562_v60  ;;  %v839_v8 = vadd.f32 %v1704_v63, %v2213_v2 }
 0x11c   :  { %vm1050_vm6 = vcmp.ge.f32.partialorder %v818_v61, 0.0  ;;  %v1178_v4 = vmul.f32 0.01, %v818_v61  ;;  %v1244_v5 = vsel %vm988_vm3, %v570_v54, %v1116_v0  ;;  %v574_v9 = vpop.f32.mrb[33].mxu0  ;;  %v830_v10 = vpop.f32.mrb[33].mxu1  ;;  %vm991_vm7 = vcmp.ge.f32.partialorder %v583_v7, 0.0 }
 0x11d   :  { %v1308_v6 = vsel %vm1052_vm4, %v826_v55, %v1180_v1  ;;  %1373 = vst.msk [vmem:[%s2863_s3 + $0xf8] sm:$0xff] %vm1341_vm2, %v1244_v5  ;;  %v1242_v11 = vsel %vm986_vm5, %v562_v60, %v1114_v3  ;;  %v575_v13 = vadd.f32 %v2213_v2, %v574_v9  ;;  %v831_v14 = vadd.f32 %v2213_v2, %v830_v10  ;;  %v1641_v15 = vpop.f32.mrb[34].mxu0  ;;  %v1705_v16 = vpop.f32.mrb[34].mxu1 }
 0x11e   :  { %1437 = vst.msk [vmem:[%s2863_s3 + $0x2f8] sm:$0xff] %vm1341_vm2, %v1308_v6  ;;  %v1306_v12 = vsel %vm1050_vm6, %v818_v61, %v1178_v4  ;;  %1371 = vst.msk [vmem:[%s2863_s3 + $0xe8] sm:$0xff] %vm1341_vm2, %v1242_v11  ;;  %v1119_v17 = vmul.f32 0.01, %v583_v7  ;;  %vm1055_vm8 = vcmp.ge.f32.partialorder %v839_v8, 0.0  ;;  %v586_v23 = vadd.f32 %v1641_v15, %v2213_v2  ;;  %v577_v25 = vpop.f32.mrb[35].mxu0 }
 0x11f   :  { %1435 = vst.msk [vmem:[%s2863_s3 + $0x2e8] sm:$0xff] %vm1341_vm2, %v1306_v12  ;;  %v1183_v18 = vmul.f32 0.01, %v839_v8  ;;  %vm989_vm9 = vcmp.ge.f32.partialorder %v575_v13, 0.0  ;;  %v1117_v19 = vmul.f32 0.01, %v575_v13  ;;  %v842_v24 = vadd.f32 %v1705_v16, %v2213_v2 }
 0x120   :  { %vm1053_vm10 = vcmp.ge.f32.partialorder %v831_v14, 0.0  ;;  %v1181_v20 = vmul.f32 0.01, %v831_v14  ;;  %v1247_v21 = vsel %vm991_vm7, %v583_v7, %v1119_v17  ;;  %v833_v26 = vpop.f32.mrb[35].mxu1  ;;  %v578_v29 = vadd.f32 %v2213_v2, %v577_v25 }
 0x121   :  { %v1311_v22 = vsel %vm1055_vm8, %v839_v8, %v1183_v18  ;;  %1376 = vst.msk [vmem:[%s2863_s3 + $0x110] sm:$0xff] %vm1341_vm2, %v1247_v21  ;;  %v1245_v27 = vsel %vm989_vm9, %v575_v13, %v1117_v19  ;;  %v834_v30 = vadd.f32 %v2213_v2, %v833_v26  ;;  %v1644_v31 = vpop.f32.mrb[36].mxu0  ;;  %vm992_vm11 = vcmp.ge.f32.partialorder %v586_v23, 0.0 }
 0x122   :  { %1440 = vst.msk [vmem:[%s2863_s3 + $0x310] sm:$0xff] %vm1341_vm2, %v1311_v22  ;;  %v1309_v28 = vsel %vm1053_vm10, %v831_v14, %v1181_v20  ;;  %v1708_v32 = vpop.f32.mrb[36].mxu1  ;;  %1374 = vst.msk [vmem:[%s2863_s3 + $0x100] sm:$0xff] %vm1341_vm2, %v1245_v27  ;;  %v1120_v33 = vmul.f32 0.01, %v586_v23  ;;  %vm1056_vm12 = vcmp.ge.f32.partialorder %v842_v24, 0.0  ;;  %v599_v39 = vadd.f32 %v1644_v31, %v2213_v2 }
 0x123   :  { %1438 = vst.msk [vmem:[%s2863_s3 + $0x300] sm:$0xff] %vm1341_vm2, %v1309_v28  ;;  %v1184_v34 = vmul.f32 0.01, %v842_v24  ;;  %vm990_vm13 = vcmp.ge.f32.partialorder %v578_v29, 0.0  ;;  %v1118_v35 = vmul.f32 0.01, %v578_v29  ;;  %v855_v40 = vadd.f32 %v1708_v32, %v2213_v2 }
 0x124   :  { %vm1054_vm14 = vcmp.ge.f32.partialorder %v834_v30, 0.0  ;;  %v1182_v36 = vmul.f32 0.01, %v834_v30  ;;  %v1248_v37 = vsel %vm992_vm11, %v586_v23, %v1120_v33  ;;  %v590_v41 = vpop.f32.mrb[37].mxu0  ;;  %v846_v42 = vpop.f32.mrb[37].mxu1  ;;  %vm995_vm15 = vcmp.ge.f32.partialorder %v599_v39, 0.0 }
 0x125   :  { %v1312_v38 = vsel %vm1056_vm12, %v842_v24, %v1184_v34  ;;  %1377 = vst.msk [vmem:[%s2863_s3 + $0x118] sm:$0xff] %vm1341_vm2, %v1248_v37  ;;  %v1246_v43 = vsel %vm990_vm13, %v578_v29, %v1118_v35  ;;  %v591_v45 = vadd.f32 %v2213_v2, %v590_v41  ;;  %v847_v46 = vadd.f32 %v2213_v2, %v846_v42  ;;  %v1645_v47 = vpop.f32.mrb[38].mxu0  ;;  %v1709_v48 = vpop.f32.mrb[38].mxu1  ;;  %v2633_v31 = vld [vmem:[%s2862_s2] ss:$0 sm:$0xff] }
 0x126   :  { %1441 = vst.msk [vmem:[%s2863_s3 + $0x318] sm:$0xff] %vm1341_vm2, %v1312_v38  ;;  %v1310_v44 = vsel %vm1054_vm14, %v834_v30, %v1182_v36  ;;  %1375 = vst.msk [vmem:[%s2863_s3 + $0x108] sm:$0xff] %vm1341_vm2, %v1246_v43  ;;  %v1123_v49 = vmul.f32 0.01, %v599_v39  ;;  %vm1059_vm0 = vcmp.ge.f32.partialorder %v855_v40, 0.0  ;;  %v602_v55 = vadd.f32 %v1645_v47, %v2213_v2  ;;  %v593_v57 = vpop.f32.mrb[39].mxu0 }
 0x127   :  { %1439 = vst.msk [vmem:[%s2863_s3 + $0x308] sm:$0xff] %vm1341_vm2, %v1310_v44  ;;  %v1187_v50 = vmul.f32 0.01, %v855_v40  ;;  %vm993_vm1 = vcmp.ge.f32.partialorder %v591_v45, 0.0  ;;  %v1121_v51 = vmul.f32 0.01, %v591_v45  ;;  %v858_v56 = vadd.f32 %v1709_v48, %v2213_v2 }
 0x128   :  { %vm1057_vm3 = vcmp.ge.f32.partialorder %v847_v46, 0.0  ;;  %v1185_v52 = vmul.f32 0.01, %v847_v46  ;;  %v1251_v53 = vsel %vm995_vm15, %v599_v39, %v1123_v49  ;;  %v849_v58 = vpop.f32.mrb[39].mxu1  ;;  %v594_v61 = vadd.f32 %v2213_v2, %v593_v57 }
 0x129   :  { %v1315_v54 = vsel %vm1059_vm0, %v855_v40, %v1187_v50  ;;  %1380 = vst.msk [vmem:[%s2863_s3 + $0x130] sm:$0xff] %vm1341_vm2, %v1251_v53  ;;  %v1249_v59 = vsel %vm993_vm1, %v591_v45, %v1121_v51  ;;  %v850_v62 = vadd.f32 %v2213_v2, %v849_v58  ;;  %v1648_v63 = vpop.f32.mrb[40].mxu0  ;;  %vm996_vm4 = vcmp.ge.f32.partialorder %v602_v55, 0.0 }
 0x12a   :  { %1444 = vst.msk [vmem:[%s2863_s3 + $0x330] sm:$0xff] %vm1341_vm2, %v1315_v54  ;;  %v1313_v60 = vsel %vm1057_vm3, %v847_v46, %v1185_v52  ;;  %v1712_v0 = vpop.f32.mrb[40].mxu1  ;;  %1378 = vst.msk [vmem:[%s2863_s3 + $0x120] sm:$0xff] %vm1341_vm2, %v1249_v59  ;;  %v1124_v1 = vmul.f32 0.01, %v602_v55  ;;  %vm1060_vm5 = vcmp.ge.f32.partialorder %v858_v56, 0.0  ;;  %v615_v8 = vadd.f32 %v1648_v63, %v2213_v2 }
 0x12b   :  { %1442 = vst.msk [vmem:[%s2863_s3 + $0x320] sm:$0xff] %vm1341_vm2, %v1313_v60  ;;  %v1188_v3 = vmul.f32 0.01, %v858_v56  ;;  %vm994_vm6 = vcmp.ge.f32.partialorder %v594_v61, 0.0  ;;  %v1122_v4 = vmul.f32 0.01, %v594_v61  ;;  %v871_v9 = vadd.f32 %v1712_v0, %v2213_v2 }
 0x12c   :  { %vm1058_vm7 = vcmp.ge.f32.partialorder %v850_v62, 0.0  ;;  %v1186_v5 = vmul.f32 0.01, %v850_v62  ;;  %v1252_v6 = vsel %vm996_vm4, %v602_v55, %v1124_v1  ;;  %v606_v10 = vpop.f32.mrb[41].mxu0  ;;  %v862_v11 = vpop.f32.mrb[41].mxu1  ;;  %vm999_vm8 = vcmp.ge.f32.partialorder %v615_v8, 0.0 }
 0x12d   :  { %v1316_v7 = vsel %vm1060_vm5, %v858_v56, %v1188_v3  ;;  %1381 = vst.msk [vmem:[%s2863_s3 + $0x138] sm:$0xff] %vm1341_vm2, %v1252_v6  ;;  %v1250_v12 = vsel %vm994_vm6, %v594_v61, %v1122_v4  ;;  %v607_v14 = vadd.f32 %v2213_v2, %v606_v10  ;;  %v863_v15 = vadd.f32 %v2213_v2, %v862_v11  ;;  %v1649_v16 = vpop.f32.mrb[42].mxu0  ;;  %v1713_v17 = vpop.f32.mrb[42].mxu1 }
 0x12e   :  { %1445 = vst.msk [vmem:[%s2863_s3 + $0x338] sm:$0xff] %vm1341_vm2, %v1316_v7  ;;  %v1314_v13 = vsel %vm1058_vm7, %v850_v62, %v1186_v5  ;;  %1379 = vst.msk [vmem:[%s2863_s3 + $0x128] sm:$0xff] %vm1341_vm2, %v1250_v12  ;;  %v1127_v18 = vmul.f32 0.01, %v615_v8  ;;  %vm1063_vm9 = vcmp.ge.f32.partialorder %v871_v9, 0.0  ;;  %v618_v24 = vadd.f32 %v1649_v16, %v2213_v2  ;;  %v609_v26 = vpop.f32.mrb[43].mxu0 }
 0x12f   :  { %1443 = vst.msk [vmem:[%s2863_s3 + $0x328] sm:$0xff] %vm1341_vm2, %v1314_v13  ;;  %v1191_v19 = vmul.f32 0.01, %v871_v9  ;;  %vm997_vm10 = vcmp.ge.f32.partialorder %v607_v14, 0.0  ;;  %v1125_v20 = vmul.f32 0.01, %v607_v14  ;;  %v874_v25 = vadd.f32 %v1713_v17, %v2213_v2 }
 0x130   :  { %vm1061_vm11 = vcmp.ge.f32.partialorder %v863_v15, 0.0  ;;  %v1189_v21 = vmul.f32 0.01, %v863_v15  ;;  %v1255_v22 = vsel %vm999_vm8, %v615_v8, %v1127_v18  ;;  %v865_v27 = vpop.f32.mrb[43].mxu1  ;;  %v610_v30 = vadd.f32 %v2213_v2, %v609_v26 }
 0x131   :  { %v1319_v23 = vsel %vm1063_vm9, %v871_v9, %v1191_v19  ;;  %1384 = vst.msk [vmem:[%s2863_s3 + $0x150] sm:$0xff] %vm1341_vm2, %v1255_v22  ;;  %v1253_v28 = vsel %vm997_vm10, %v607_v14, %v1125_v20  ;;  %v866_v32 = vadd.f32 %v2633_v31, %v865_v27  ;;  %v1652_v33 = vpop.f32.mrb[44].mxu0  ;;  %vm1000_vm12 = vcmp.ge.f32.partialorder %v618_v24, 0.0 }
 0x132   :  { %1448 = vst.msk [vmem:[%s2863_s3 + $0x350] sm:$0xff] %vm1341_vm2, %v1319_v23  ;;  %v1317_v29 = vsel %vm1061_vm11, %v863_v15, %v1189_v21  ;;  %v1716_v34 = vpop.f32.mrb[44].mxu1  ;;  %1382 = vst.msk [vmem:[%s2863_s3 + $0x140] sm:$0xff] %vm1341_vm2, %v1253_v28  ;;  %v1128_v2 = vmul.f32 0.01, %v618_v24  ;;  %vm1064_vm13 = vcmp.ge.f32.partialorder %v874_v25, 0.0  ;;  %v631_v40 = vadd.f32 %v2633_v31, %v1652_v33 }
 0x133   :  { %1446 = vst.msk [vmem:[%s2863_s3 + $0x340] sm:$0xff] %vm1341_vm2, %v1317_v29  ;;  %v1192_v35 = vmul.f32 0.01, %v874_v25  ;;  %vm998_vm14 = vcmp.ge.f32.partialorder %v610_v30, 0.0  ;;  %v1126_v36 = vmul.f32 0.01, %v610_v30  ;;  %v887_v41 = vadd.f32 %v2633_v31, %v1716_v34 }
 0x134   :  { %vm1062_vm15 = vcmp.ge.f32.partialorder %v866_v32, 0.0  ;;  %v1190_v37 = vmul.f32 0.01, %v866_v32  ;;  %v1256_v38 = vsel %vm1000_vm12, %v618_v24, %v1128_v2  ;;  %v622_v42 = vpop.f32.mrb[45].mxu0  ;;  %v878_v43 = vpop.f32.mrb[45].mxu1  ;;  %vm1003_vm0 = vcmp.ge.f32.partialorder %v631_v40, 0.0 }
 0x135   :  { %v1320_v39 = vsel %vm1064_vm13, %v874_v25, %v1192_v35  ;;  %1385 = vst.msk [vmem:[%s2863_s3 + $0x158] sm:$0xff] %vm1341_vm2, %v1256_v38  ;;  %v1254_v44 = vsel %vm998_vm14, %v610_v30, %v1126_v36  ;;  %v623_v46 = vadd.f32 %v2633_v31, %v622_v42  ;;  %v879_v47 = vadd.f32 %v2633_v31, %v878_v43  ;;  %v1653_v48 = vpop.f32.mrb[46].mxu0  ;;  %v1717_v49 = vpop.f32.mrb[46].mxu1 }
 0x136   :  { %1449 = vst.msk [vmem:[%s2863_s3 + $0x358] sm:$0xff] %vm1341_vm2, %v1320_v39  ;;  %v1318_v45 = vsel %vm1062_vm15, %v866_v32, %v1190_v37  ;;  %1383 = vst.msk [vmem:[%s2863_s3 + $0x148] sm:$0xff] %vm1341_vm2, %v1254_v44  ;;  %v1131_v50 = vmul.f32 0.01, %v631_v40  ;;  %vm1067_vm1 = vcmp.ge.f32.partialorder %v887_v41, 0.0  ;;  %v634_v56 = vadd.f32 %v2633_v31, %v1653_v48  ;;  %v625_v58 = vpop.f32.mrb[47].mxu0 }
 0x137   :  { %1447 = vst.msk [vmem:[%s2863_s3 + $0x348] sm:$0xff] %vm1341_vm2, %v1318_v45  ;;  %v1195_v51 = vmul.f32 0.01, %v887_v41  ;;  %vm1001_vm3 = vcmp.ge.f32.partialorder %v623_v46, 0.0  ;;  %v1129_v52 = vmul.f32 0.01, %v623_v46  ;;  %v890_v57 = vadd.f32 %v2633_v31, %v1717_v49 }
 0x138   :  { %vm1065_vm4 = vcmp.ge.f32.partialorder %v879_v47, 0.0  ;;  %v1193_v53 = vmul.f32 0.01, %v879_v47  ;;  %v1259_v54 = vsel %vm1003_vm0, %v631_v40, %v1131_v50  ;;  %v881_v59 = vpop.f32.mrb[47].mxu1  ;;  %v626_v62 = vadd.f32 %v2633_v31, %v625_v58 }
 0x139   :  { %v1323_v55 = vsel %vm1067_vm1, %v887_v41, %v1195_v51  ;;  %1388 = vst.msk [vmem:[%s2863_s3 + $0x170] sm:$0xff] %vm1341_vm2, %v1259_v54  ;;  %v1257_v60 = vsel %vm1001_vm3, %v623_v46, %v1129_v52  ;;  %v882_v63 = vadd.f32 %v2633_v31, %v881_v59  ;;  %v1656_v0 = vpop.f32.mrb[48].mxu0  ;;  %vm1004_vm5 = vcmp.ge.f32.partialorder %v634_v56, 0.0 }
 0x13a   :  { %1452 = vst.msk [vmem:[%s2863_s3 + $0x370] sm:$0xff] %vm1341_vm2, %v1323_v55  ;;  %v1321_v61 = vsel %vm1065_vm4, %v879_v47, %v1193_v53  ;;  %v1720_v1 = vpop.f32.mrb[48].mxu1  ;;  %1386 = vst.msk [vmem:[%s2863_s3 + $0x160] sm:$0xff] %vm1341_vm2, %v1257_v60  ;;  %v1132_v3 = vmul.f32 0.01, %v634_v56  ;;  %vm1068_vm6 = vcmp.ge.f32.partialorder %v890_v57, 0.0  ;;  %v647_v9 = vadd.f32 %v2633_v31, %v1656_v0 }
 0x13b   :  { %1450 = vst.msk [vmem:[%s2863_s3 + $0x360] sm:$0xff] %vm1341_vm2, %v1321_v61  ;;  %v1196_v4 = vmul.f32 0.01, %v890_v57  ;;  %vm1002_vm7 = vcmp.ge.f32.partialorder %v626_v62, 0.0  ;;  %v1130_v5 = vmul.f32 0.01, %v626_v62  ;;  %v903_v10 = vadd.f32 %v2633_v31, %v1720_v1 }
 0x13c   :  { %vm1066_vm8 = vcmp.ge.f32.partialorder %v882_v63, 0.0  ;;  %v1194_v6 = vmul.f32 0.01, %v882_v63  ;;  %v1260_v7 = vsel %vm1004_vm5, %v634_v56, %v1132_v3  ;;  %v638_v11 = vpop.f32.mrb[49].mxu0  ;;  %v894_v12 = vpop.f32.mrb[49].mxu1  ;;  %vm1007_vm9 = vcmp.ge.f32.partialorder %v647_v9, 0.0 }
 0x13d   :  { %v1324_v8 = vsel %vm1068_vm6, %v890_v57, %v1196_v4  ;;  %1389 = vst.msk [vmem:[%s2863_s3 + $0x178] sm:$0xff] %vm1341_vm2, %v1260_v7  ;;  %v1258_v13 = vsel %vm1002_vm7, %v626_v62, %v1130_v5  ;;  %v639_v15 = vadd.f32 %v2633_v31, %v638_v11  ;;  %v895_v16 = vadd.f32 %v2633_v31, %v894_v12  ;;  %v1657_v17 = vpop.f32.mrb[50].mxu0  ;;  %v1721_v18 = vpop.f32.mrb[50].mxu1 }
 0x13e   :  { %1453 = vst.msk [vmem:[%s2863_s3 + $0x378] sm:$0xff] %vm1341_vm2, %v1324_v8  ;;  %v1322_v14 = vsel %vm1066_vm8, %v882_v63, %v1194_v6  ;;  %1387 = vst.msk [vmem:[%s2863_s3 + $0x168] sm:$0xff] %vm1341_vm2, %v1258_v13  ;;  %v1135_v19 = vmul.f32 0.01, %v647_v9  ;;  %vm1071_vm10 = vcmp.ge.f32.partialorder %v903_v10, 0.0  ;;  %v650_v25 = vadd.f32 %v2633_v31, %v1657_v17  ;;  %v641_v27 = vpop.f32.mrb[51].mxu0 }
 0x13f   :  { %1451 = vst.msk [vmem:[%s2863_s3 + $0x368] sm:$0xff] %vm1341_vm2, %v1322_v14  ;;  %v1199_v20 = vmul.f32 0.01, %v903_v10  ;;  %vm1005_vm11 = vcmp.ge.f32.partialorder %v639_v15, 0.0  ;;  %v1133_v21 = vmul.f32 0.01, %v639_v15  ;;  %v906_v26 = vadd.f32 %v2633_v31, %v1721_v18 }
 0x140   :  { %vm1069_vm12 = vcmp.ge.f32.partialorder %v895_v16, 0.0  ;;  %v1197_v22 = vmul.f32 0.01, %v895_v16  ;;  %v1263_v23 = vsel %vm1007_vm9, %v647_v9, %v1135_v19  ;;  %v897_v28 = vpop.f32.mrb[51].mxu1  ;;  %v642_v32 = vadd.f32 %v2633_v31, %v641_v27 }
 0x141   :  { %v1327_v24 = vsel %vm1071_vm10, %v903_v10, %v1199_v20  ;;  %1392 = vst.msk [vmem:[%s2863_s3 + $0x190] sm:$0xff] %vm1341_vm2, %v1263_v23  ;;  %v1261_v29 = vsel %vm1005_vm11, %v639_v15, %v1133_v21  ;;  %v898_v33 = vadd.f32 %v2633_v31, %v897_v28  ;;  %v1660_v34 = vpop.f32.mrb[52].mxu0  ;;  %vm1008_vm13 = vcmp.ge.f32.partialorder %v650_v25, 0.0 }
 0x142   :  { %1456 = vst.msk [vmem:[%s2863_s3 + $0x390] sm:$0xff] %vm1341_vm2, %v1327_v24  ;;  %v1325_v30 = vsel %vm1069_vm12, %v895_v16, %v1197_v22  ;;  %v1724_v2 = vpop.f32.mrb[52].mxu1  ;;  %1390 = vst.msk [vmem:[%s2863_s3 + $0x180] sm:$0xff] %vm1341_vm2, %v1261_v29  ;;  %v1136_v35 = vmul.f32 0.01, %v650_v25  ;;  %vm1072_vm14 = vcmp.ge.f32.partialorder %v906_v26, 0.0  ;;  %v663_v41 = vadd.f32 %v2633_v31, %v1660_v34 }
 0x143   :  { %1454 = vst.msk [vmem:[%s2863_s3 + $0x380] sm:$0xff] %vm1341_vm2, %v1325_v30  ;;  %v1200_v36 = vmul.f32 0.01, %v906_v26  ;;  %vm1006_vm15 = vcmp.ge.f32.partialorder %v642_v32, 0.0  ;;  %v1134_v37 = vmul.f32 0.01, %v642_v32  ;;  %v919_v42 = vadd.f32 %v2633_v31, %v1724_v2 }
 0x144   :  { %vm1070_vm0 = vcmp.ge.f32.partialorder %v898_v33, 0.0  ;;  %v1198_v38 = vmul.f32 0.01, %v898_v33  ;;  %v1264_v39 = vsel %vm1008_vm13, %v650_v25, %v1136_v35  ;;  %v654_v43 = vpop.f32.mrb[53].mxu0  ;;  %v910_v44 = vpop.f32.mrb[53].mxu1  ;;  %vm1011_vm1 = vcmp.ge.f32.partialorder %v663_v41, 0.0 }
 0x145   :  { %v1328_v40 = vsel %vm1072_vm14, %v906_v26, %v1200_v36  ;;  %1393 = vst.msk [vmem:[%s2863_s3 + $0x198] sm:$0xff] %vm1341_vm2, %v1264_v39  ;;  %v1262_v45 = vsel %vm1006_vm15, %v642_v32, %v1134_v37  ;;  %v655_v47 = vadd.f32 %v2633_v31, %v654_v43  ;;  %v911_v48 = vadd.f32 %v2633_v31, %v910_v44  ;;  %v1661_v49 = vpop.f32.mrb[54].mxu0  ;;  %v1725_v50 = vpop.f32.mrb[54].mxu1 }
 0x146   :  { %1457 = vst.msk [vmem:[%s2863_s3 + $0x398] sm:$0xff] %vm1341_vm2, %v1328_v40  ;;  %v1326_v46 = vsel %vm1070_vm0, %v898_v33, %v1198_v38  ;;  %1391 = vst.msk [vmem:[%s2863_s3 + $0x188] sm:$0xff] %vm1341_vm2, %v1262_v45  ;;  %v1139_v51 = vmul.f32 0.01, %v663_v41  ;;  %vm1075_vm3 = vcmp.ge.f32.partialorder %v919_v42, 0.0  ;;  %v666_v57 = vadd.f32 %v2633_v31, %v1661_v49  ;;  %v657_v59 = vpop.f32.mrb[55].mxu0 }
 0x147   :  { %1455 = vst.msk [vmem:[%s2863_s3 + $0x388] sm:$0xff] %vm1341_vm2, %v1326_v46  ;;  %v1203_v52 = vmul.f32 0.01, %v919_v42  ;;  %vm1009_vm4 = vcmp.ge.f32.partialorder %v655_v47, 0.0  ;;  %v1137_v53 = vmul.f32 0.01, %v655_v47  ;;  %v922_v58 = vadd.f32 %v2633_v31, %v1725_v50 }
 0x148   :  { %vm1073_vm5 = vcmp.ge.f32.partialorder %v911_v48, 0.0  ;;  %v1201_v54 = vmul.f32 0.01, %v911_v48  ;;  %v1267_v55 = vsel %vm1011_vm1, %v663_v41, %v1139_v51  ;;  %v913_v60 = vpop.f32.mrb[55].mxu1  ;;  %v658_v63 = vadd.f32 %v2633_v31, %v657_v59 }
 0x149   :  { %v1331_v56 = vsel %vm1075_vm3, %v919_v42, %v1203_v52  ;;  %1396 = vst.msk [vmem:[%s2863_s3 + $0x1b0] sm:$0xff] %vm1341_vm2, %v1267_v55  ;;  %v1265_v61 = vsel %vm1009_vm4, %v655_v47, %v1137_v53  ;;  %v914_v0 = vadd.f32 %v2633_v31, %v913_v60  ;;  %v1664_v1 = vpop.f32.mrb[56].mxu0  ;;  %vm1012_vm6 = vcmp.ge.f32.partialorder %v666_v57, 0.0 }
 0x14a   :  { %1460 = vst.msk [vmem:[%s2863_s3 + $0x3b0] sm:$0xff] %vm1341_vm2, %v1331_v56  ;;  %v1329_v62 = vsel %vm1073_vm5, %v911_v48, %v1201_v54  ;;  %v1728_v3 = vpop.f32.mrb[56].mxu1  ;;  %1394 = vst.msk [vmem:[%s2863_s3 + $0x1a0] sm:$0xff] %vm1341_vm2, %v1265_v61  ;;  %v1140_v4 = vmul.f32 0.01, %v666_v57  ;;  %vm1076_vm7 = vcmp.ge.f32.partialorder %v922_v58, 0.0  ;;  %v679_v10 = vadd.f32 %v2633_v31, %v1664_v1 }
 0x14b   :  { %1458 = vst.msk [vmem:[%s2863_s3 + $0x3a0] sm:$0xff] %vm1341_vm2, %v1329_v62  ;;  %v1204_v5 = vmul.f32 0.01, %v922_v58  ;;  %vm1010_vm8 = vcmp.ge.f32.partialorder %v658_v63, 0.0  ;;  %v1138_v6 = vmul.f32 0.01, %v658_v63  ;;  %v935_v11 = vadd.f32 %v2633_v31, %v1728_v3 }
 0x14c   :  { %vm1074_vm9 = vcmp.ge.f32.partialorder %v914_v0, 0.0  ;;  %v1202_v7 = vmul.f32 0.01, %v914_v0  ;;  %v1268_v8 = vsel %vm1012_vm6, %v666_v57, %v1140_v4  ;;  %v670_v12 = vpop.f32.mrb[57].mxu0  ;;  %v926_v13 = vpop.f32.mrb[57].mxu1  ;;  %vm1015_vm10 = vcmp.ge.f32.partialorder %v679_v10, 0.0 }
 0x14d   :  { %v1332_v9 = vsel %vm1076_vm7, %v922_v58, %v1204_v5  ;;  %1397 = vst.msk [vmem:[%s2863_s3 + $0x1b8] sm:$0xff] %vm1341_vm2, %v1268_v8  ;;  %v1266_v14 = vsel %vm1010_vm8, %v658_v63, %v1138_v6  ;;  %v671_v16 = vadd.f32 %v2633_v31, %v670_v12  ;;  %v927_v17 = vadd.f32 %v2633_v31, %v926_v13  ;;  %v1665_v18 = vpop.f32.mrb[58].mxu0  ;;  %v1729_v19 = vpop.f32.mrb[58].mxu1 }
 0x14e   :  { %1461 = vst.msk [vmem:[%s2863_s3 + $0x3b8] sm:$0xff] %vm1341_vm2, %v1332_v9  ;;  %v1330_v15 = vsel %vm1074_vm9, %v914_v0, %v1202_v7  ;;  %1395 = vst.msk [vmem:[%s2863_s3 + $0x1a8] sm:$0xff] %vm1341_vm2, %v1266_v14  ;;  %v1143_v20 = vmul.f32 0.01, %v679_v10  ;;  %vm1079_vm11 = vcmp.ge.f32.partialorder %v935_v11, 0.0  ;;  %v682_v26 = vadd.f32 %v2633_v31, %v1665_v18  ;;  %v673_v28 = vpop.f32.mrb[59].mxu0 }
 0x14f   :  { %1459 = vst.msk [vmem:[%s2863_s3 + $0x3a8] sm:$0xff] %vm1341_vm2, %v1330_v15  ;;  %v1207_v21 = vmul.f32 0.01, %v935_v11  ;;  %vm1013_vm12 = vcmp.ge.f32.partialorder %v671_v16, 0.0  ;;  %v1141_v22 = vmul.f32 0.01, %v671_v16  ;;  %v938_v27 = vadd.f32 %v2633_v31, %v1729_v19 }
 0x150   :  { %vm1077_vm13 = vcmp.ge.f32.partialorder %v927_v17, 0.0  ;;  %v1205_v23 = vmul.f32 0.01, %v927_v17  ;;  %v1271_v24 = vsel %vm1015_vm10, %v679_v10, %v1143_v20  ;;  %v929_v29 = vpop.f32.mrb[59].mxu1  ;;  %v674_v33 = vadd.f32 %v2633_v31, %v673_v28 }
 0x151   :  { %v1335_v25 = vsel %vm1079_vm11, %v935_v11, %v1207_v21  ;;  %1400 = vst.msk [vmem:[%s2863_s3 + $0x1d0] sm:$0xff] %vm1341_vm2, %v1271_v24  ;;  %v1269_v30 = vsel %vm1013_vm12, %v671_v16, %v1141_v22  ;;  %v930_v34 = vadd.f32 %v2633_v31, %v929_v29  ;;  %v1668_v2 = vpop.f32.mrb[60].mxu0  ;;  %vm1016_vm14 = vcmp.ge.f32.partialorder %v682_v26, 0.0 }
 0x152   :  { %1464 = vst.msk [vmem:[%s2863_s3 + $0x3d0] sm:$0xff] %vm1341_vm2, %v1335_v25  ;;  %v1333_v32 = vsel %vm1077_vm13, %v927_v17, %v1205_v23  ;;  %v1732_v35 = vpop.f32.mrb[60].mxu1  ;;  %1398 = vst.msk [vmem:[%s2863_s3 + $0x1c0] sm:$0xff] %vm1341_vm2, %v1269_v30  ;;  %v1144_v36 = vmul.f32 0.01, %v682_v26  ;;  %vm1080_vm15 = vcmp.ge.f32.partialorder %v938_v27, 0.0  ;;  %v695_v42 = vadd.f32 %v2633_v31, %v1668_v2 }
 0x153   :  { %1462 = vst.msk [vmem:[%s2863_s3 + $0x3c0] sm:$0xff] %vm1341_vm2, %v1333_v32  ;;  %v1208_v37 = vmul.f32 0.01, %v938_v27  ;;  %vm1014_vm0 = vcmp.ge.f32.partialorder %v674_v33, 0.0  ;;  %v1142_v38 = vmul.f32 0.01, %v674_v33  ;;  %v951_v43 = vadd.f32 %v2633_v31, %v1732_v35 }
 0x154   :  { %vm1078_vm1 = vcmp.ge.f32.partialorder %v930_v34, 0.0  ;;  %v1206_v39 = vmul.f32 0.01, %v930_v34  ;;  %v1272_v40 = vsel %vm1016_vm14, %v682_v26, %v1144_v36  ;;  %v686_v44 = vpop.f32.mrb[61].mxu0  ;;  %v942_v45 = vpop.f32.mrb[61].mxu1  ;;  %vm1019_vm3 = vcmp.ge.f32.partialorder %v695_v42, 0.0 }
 0x155   :  { %v1336_v41 = vsel %vm1080_vm15, %v938_v27, %v1208_v37  ;;  %1401 = vst.msk [vmem:[%s2863_s3 + $0x1d8] sm:$0xff] %vm1341_vm2, %v1272_v40  ;;  %v1270_v46 = vsel %vm1014_vm0, %v674_v33, %v1142_v38  ;;  %v687_v48 = vadd.f32 %v2633_v31, %v686_v44  ;;  %v943_v49 = vadd.f32 %v2633_v31, %v942_v45  ;;  %v1669_v50 = vpop.f32.mrb[62].mxu0  ;;  %v1733_v51 = vpop.f32.mrb[62].mxu1 }
 0x156   :  { %1465 = vst.msk [vmem:[%s2863_s3 + $0x3d8] sm:$0xff] %vm1341_vm2, %v1336_v41  ;;  %v1334_v47 = vsel %vm1078_vm1, %v930_v34, %v1206_v39  ;;  %1399 = vst.msk [vmem:[%s2863_s3 + $0x1c8] sm:$0xff] %vm1341_vm2, %v1270_v46  ;;  %v1147_v52 = vmul.f32 0.01, %v695_v42  ;;  %vm1083_vm4 = vcmp.ge.f32.partialorder %v951_v43, 0.0  ;;  %v698_v58 = vadd.f32 %v2633_v31, %v1669_v50  ;;  %v689_v60 = vpop.f32.mrb[63].mxu0 }
 0x157   :  { %1463 = vst.msk [vmem:[%s2863_s3 + $0x3c8] sm:$0xff] %vm1341_vm2, %v1334_v47  ;;  %v1211_v53 = vmul.f32 0.01, %v951_v43  ;;  %vm1017_vm5 = vcmp.ge.f32.partialorder %v687_v48, 0.0  ;;  %v1145_v54 = vmul.f32 0.01, %v687_v48  ;;  %v954_v59 = vadd.f32 %v2633_v31, %v1733_v51 }
 0x158   :  { %vm1081_vm6 = vcmp.ge.f32.partialorder %v943_v49, 0.0  ;;  %v1209_v55 = vmul.f32 0.01, %v943_v49  ;;  %v1275_v56 = vsel %vm1019_vm3, %v695_v42, %v1147_v52  ;;  %v945_v61 = vpop.f32.mrb[63].mxu1  ;;  %v690_v0 = vadd.f32 %v2633_v31, %v689_v60 }
 0x159   :  { %v1339_v57 = vsel %vm1083_vm4, %v951_v43, %v1211_v53  ;;  %1404 = vst.msk [vmem:[%s2863_s3 + $0x1f0] sm:$0xff] %vm1341_vm2, %v1275_v56  ;;  %v1273_v62 = vsel %vm1017_vm5, %v687_v48, %v1145_v54  ;;  %v946_v1 = vadd.f32 %v2633_v31, %v945_v61  ;;  %vm1020_vm7 = vcmp.ge.f32.partialorder %v698_v58, 0.0 }
 0x15a   :  { %1468 = vst.msk [vmem:[%s2863_s3 + $0x3f0] sm:$0xff] %vm1341_vm2, %v1339_v57  ;;  %v1337_v63 = vsel %vm1081_vm6, %v943_v49, %v1209_v55  ;;  %1402 = vst.msk [vmem:[%s2863_s3 + $0x1e0] sm:$0xff] %vm1341_vm2, %v1273_v62  ;;  %v1148_v3 = vmul.f32 0.01, %v698_v58  ;;  %vm1084_vm8 = vcmp.ge.f32.partialorder %v954_v59, 0.0  ;;  %vm1018_vm9 = vcmp.ge.f32.partialorder %v690_v0, 0.0 }
 0x15b   :  { %1466 = vst.msk [vmem:[%s2863_s3 + $0x3e0] sm:$0xff] %vm1341_vm2, %v1337_v63  ;;  %v1212_v4 = vmul.f32 0.01, %v954_v59  ;;  %v1146_v5 = vmul.f32 0.01, %v690_v0  ;;  %vm1082_vm10 = vcmp.ge.f32.partialorder %v946_v1, 0.0 }
 0x15c   :  { %v1210_v6 = vmul.f32 0.01, %v946_v1  ;;  %v1276_v7 = vsel %vm1020_vm7, %v698_v58, %v1148_v3 }
 0x15d   :  { %v1340_v31 = vsel %vm1084_vm8, %v954_v59, %v1212_v4  ;;  %1405 = vst.msk [vmem:[%s2863_s3 + $0x1f8] sm:$0xff] %vm1341_vm2, %v1276_v7  ;;  %v1274_v8 = vsel %vm1018_vm9, %v690_v0, %v1146_v5 }
 0x15e   :  { %1469 = vst.msk [vmem:[%s2863_s3 + $0x3f8] sm:$0xff] %vm1341_vm2, %v1340_v31  ;;  %v1338_v9 = vsel %vm1082_vm10, %v946_v1, %v1210_v6  ;;  %1403 = vst.msk [vmem:[%s2863_s3 + $0x1e8] sm:$0xff] %vm1341_vm2, %v1274_v8 }
 0x15f   :  { %1467 = vst.msk [vmem:[%s2863_s3 + $0x3e8] sm:$0xff] %vm1341_vm2, %v1338_v9 }

// kernel: final_forward.5
= control target key start
LH: loop header
LB: loop body
LE: loop exit
PB: predicated region body
PF: predicated region fallthrough
CT: control target
= control target key end

     0   :  { %s5394_s12 = smov 0   ;;  %s5396_s13 = smov 0   ;;  %s6605_s0 = inlined_call_operand.vmem [shape: f32[2,18,361,6], index: 0, kind: input, shape index: {}]   ;;  %s6606_s1 = inlined_call_operand.vmem [shape: f32[3,9,6,3], index: 1, kind: input, shape index: {}]   ;;  %s6607_s2 = inlined_call_operand.vmem [shape: f32[1,3], index: 2, kind: input, shape index: {}]   ;;  %s6608_s3 = inlined_call_operand.vmem [shape: f32[2,16,304,3], index: 3, kind: output, shape index: {}]  }
   0x1   :  { %s5398_s14 = smov 0   ;;  %s5400_s15 = smov 0  }
   0x2   :  { %s5402_s16 = smov 0   ;;  %s5404_s17 = smov 0  }
   0x3   :  { %s5406_s18 = smov 0  }
   0x4 LB: > { %s25_s19 = sadd.s32 1, %s5358_s15  ;;  %s28_s20 = sadd.s32 1, %s5362_s16  ;;  %s5370_s18 = sphi %s5406_s18, %s13_s18   ;;  %s5366_s17 = sphi %s5404_s17, %s6614_s17   ;;  %s5362_s16 = sphi %s5402_s16, %s6613_s16   ;;  %s5358_s15 = sphi %s5400_s15, %s6612_s15   ;;  %s5354_s14 = sphi %s5398_s14, %s6611_s14   ;;  %s5350_s13 = sphi %s5396_s13, %s6610_s13   ;;  %s5346_s12 = sphi %s5394_s12, %s6609_s12  }
   0x5   : > { %p26_p0 = scmp.ge.s32.totalorder %s25_s19, 3  ;;  %p3574_p1 = scmp.ge.s32.totalorder %s5370_s18, 1 }
   0x6   : > { %p178_p2 = scmp.lt.s32.totalorder %s5370_s18, 97  ;;  %s32_s21 = sadd.s32 1, %s5366_s17 }
   0x7   : > { %s6616_s19 = smov (%p26_p0, %s25_s19), 0  ;;  %s6618_s20 = smov (!%p26_p0, %s28_s20), %s5362_s16 }
   0x8   : > { %p179_p3 = pnand %p3574_p1, %p178_p2  ;;  %p30_p4 = scmp.ge.s32.totalorder %s6618_s20, 16 }
   0x9   : > { %s216_s22 = sadd.s32 (!%p179_p3), %s5346_s12, %s5350_s13  ;;  %p217_p6 = scmp.lt.s32.totalorder (!%p179_p3), %s5354_s14, 1 }
   0xa   : > { %s6620_s20 = smov (%p30_p4, %s6618_s20), 0  ;;  %s6622_s21 = smov (!%p30_p4, %s32_s21), %s5366_s17 }
   0xb   : > { %p34_p5 = scmp.ge.s32.totalorder %s6622_s21, 2  ;;  %182 = sbr.rel (%p179_p3) target bundleno = 953 (0x3b9), region = 32 }
   0xc   : > { %p219_p7 = scmp.lt.s32.totalorder (!%p179_p3), %s216_s22, 17  ;;  %p227_p8 = scmp.lt.s32.totalorder (!%p179_p3), %s5346_s12, 2 }
   0xd   : > { %s6624_s21 = smov (%p34_p5, %s6622_s21), 0  ;;  %p234_p9 = scmp.lt.s32.totalorder (!%p179_p3), %s5350_s13, 15 }
   0xe   : > { %p3578_p10 = scmp.ne.s32.totalorder (!%p179_p3), %s5346_s12, 0 }
  0x12   : > { %s6626_s14 = smov (!%p217_p6, %s5354_s14), 1  ;;  %s6628_s22 = smov (!%p219_p7, %s216_s22), 17 }
  0x13   : > { %s5254_s23 = smul.u32 828, %s6626_s14  ;;  %s6630_s13 = smov (!%p234_p9, %s5350_s13), 15  ;;  %v3579_v0 = vld [vmem:[%s6607_s2] ss:$0 sm:$0xff] (!%p3578_p10)  ;;  %vm253_vm0 = vcmask (!%p3578_p10), 23552  }
  0x14   : > { %s5253_s24 = smul.u32 46, %s6628_s22 }
  0x15   : > { %s228_s25 = scalar_select %p227_p8, %s5346_s12, 2 }
  0x16   : > { %s223_s26 = sadd.s32 %s5254_s23, %s5253_s24  ;;  %s5257_s8 = smul.u32 608, %s6626_s14 }
  0x17   : > { %s3575_s27 = sshll.u32 %s223_s26, 3  ;;  %s5255_s28 = smul.u32 72, %s228_s25 }
  0x18   : > { %s5448_s4 = scalar_lea.vmem %s6605_s0, %s3575_s27  ;;  %s5256_s9 = smul.u32 38, %s6630_s13 }
  0x19   : > { %s5453_s7 = scalar_lea.vmem %s6606_s1, %s5255_s28  ;;  %245 = sbr.rel (%p3578_p10) target bundleno = 48 (0x30), region = 36 }
  0x1a   : > { %s238_s10 = sadd.s32 %s5257_s8, %s5256_s9 }
  0x1b   : > { %s3577_s11 = sshll.u32 %s238_s10, 3 }
  0x1c   : > { %s5459_s24 = scalar_lea.vmem %s6608_s3, %s3577_s11 }
  0x1d   : > { %254 = vst.msk [vmem:[%s5459_s24] sm:$0xff] (!%p3578_p10), %vm253_vm0, %v3579_v0  ;;  %255 = vst.msk [vmem:[%s5459_s24 + $0x8] sm:$0xff] (!%p3578_p10), %vm253_vm0, %v3579_v0 }
  0x1e   : > { %256 = vst.msk [vmem:[%s5459_s24 + $0x10] sm:$0xff] (!%p3578_p10), %vm253_vm0, %v3579_v0  ;;  %257 = vst.msk [vmem:[%s5459_s24 + $0x18] sm:$0xff] (!%p3578_p10), %vm253_vm0, %v3579_v0 }
  0x1f   : > { %258 = vst.msk [vmem:[%s5459_s24 + $0x20] sm:$0xff] (!%p3578_p10), %vm253_vm0, %v3579_v0  ;;  %259 = vst.msk [vmem:[%s5459_s24 + $0x28] sm:$0xff] (!%p3578_p10), %vm253_vm0, %v3579_v0 }
  0x20   : > { %260 = vst.msk [vmem:[%s5459_s24 + $0x30] sm:$0xff] %vm253_vm0, %v3579_v0  ;;  %261 = vst.msk [vmem:[%s5459_s24 + $0x38] sm:$0xff] %vm253_vm0, %v3579_v0 }
  0x21   : > { %262 = vst.msk [vmem:[%s5459_s24 + $0x40] sm:$0xff] %vm253_vm0, %v3579_v0  ;;  %263 = vst.msk [vmem:[%s5459_s24 + $0x48] sm:$0xff] %vm253_vm0, %v3579_v0 }
  0x22   : > { %264 = vst.msk [vmem:[%s5459_s24 + $0x50] sm:$0xff] %vm253_vm0, %v3579_v0  ;;  %265 = vst.msk [vmem:[%s5459_s24 + $0x58] sm:$0xff] %vm253_vm0, %v3579_v0 }
  0x23   : > { %266 = vst.msk [vmem:[%s5459_s24 + $0x60] sm:$0xff] %vm253_vm0, %v3579_v0  ;;  %267 = vst.msk [vmem:[%s5459_s24 + $0x68] sm:$0xff] %vm253_vm0, %v3579_v0 }
  0x24   : > { %268 = vst.msk [vmem:[%s5459_s24 + $0x70] sm:$0xff] %vm253_vm0, %v3579_v0  ;;  %269 = vst.msk [vmem:[%s5459_s24 + $0x78] sm:$0xff] %vm253_vm0, %v3579_v0 }
  0x25   : > { %270 = vst.msk [vmem:[%s5459_s24 + $0x80] sm:$0xff] %vm253_vm0, %v3579_v0  ;;  %271 = vst.msk [vmem:[%s5459_s24 + $0x88] sm:$0xff] %vm253_vm0, %v3579_v0 }
  0x26   : > { %272 = vst.msk [vmem:[%s5459_s24 + $0x90] sm:$0xff] %vm253_vm0, %v3579_v0  ;;  %273 = vst.msk [vmem:[%s5459_s24 + $0x98] sm:$0xff] %vm253_vm0, %v3579_v0 }
  0x27   : > { %274 = vst.msk [vmem:[%s5459_s24 + $0xa0] sm:$0xff] %vm253_vm0, %v3579_v0  ;;  %275 = vst.msk [vmem:[%s5459_s24 + $0xa8] sm:$0xff] %vm253_vm0, %v3579_v0 }
  0x28   : > { %276 = vst.msk [vmem:[%s5459_s24 + $0xb0] sm:$0xff] %vm253_vm0, %v3579_v0  ;;  %277 = vst.msk [vmem:[%s5459_s24 + $0xb8] sm:$0xff] %vm253_vm0, %v3579_v0 }
  0x29   : > { %278 = vst.msk [vmem:[%s5459_s24 + $0xc0] sm:$0xff] %vm253_vm0, %v3579_v0  ;;  %279 = vst.msk [vmem:[%s5459_s24 + $0xc8] sm:$0xff] %vm253_vm0, %v3579_v0 }
  0x2a   : > { %280 = vst.msk [vmem:[%s5459_s24 + $0xd0] sm:$0xff] %vm253_vm0, %v3579_v0  ;;  %281 = vst.msk [vmem:[%s5459_s24 + $0xd8] sm:$0xff] %vm253_vm0, %v3579_v0 }
  0x2b   : > { %282 = vst.msk [vmem:[%s5459_s24 + $0xe0] sm:$0xff] %vm253_vm0, %v3579_v0  ;;  %283 = vst.msk [vmem:[%s5459_s24 + $0xe8] sm:$0xff] %vm253_vm0, %v3579_v0 }
  0x2c   : > { %284 = vst.msk [vmem:[%s5459_s24 + $0xf0] sm:$0xff] %vm253_vm0, %v3579_v0  ;;  %285 = vst.msk [vmem:[%s5459_s24 + $0xf8] sm:$0xff] %vm253_vm0, %v3579_v0 }
  0x2d   : > { %286 = vst.msk [vmem:[%s5459_s24 + $0x100] sm:$0xff] %vm253_vm0, %v3579_v0  ;;  %287 = vst.msk [vmem:[%s5459_s24 + $0x108] sm:$0xff] %vm253_vm0, %v3579_v0 }
  0x2e   : > { %288 = vst.msk [vmem:[%s5459_s24 + $0x110] sm:$0xff] %vm253_vm0, %v3579_v0  ;;  %289 = vst.msk [vmem:[%s5459_s24 + $0x118] sm:$0xff] %vm253_vm0, %v3579_v0 }
  0x2f   : > { %290 = vst.msk [vmem:[%s5459_s24 + $0x120] sm:$0xff] %vm253_vm0, %v3579_v0  ;;  %291 = vst.msk [vmem:[%s5459_s24 + $0x128] sm:$0xff] %vm253_vm0, %v3579_v0 }
  0x30 PF: > { %v387_v1 = vld [vmem:[%s5453_s7] sm:$0x3f]  ;;  %vm447_vm1 = vcmask 1042432   ;;  %v5372_v3 = vmov 0.0   ;;  %v331_v7 = vld [vmem:[%s5448_s4 + $0x8] sm:$0xff]  ;;  %v1703_v8 = vld [vmem:[%s5448_s4 + $0x14] sm:$0xff] }
  0x31   : > { %v3659_v2 = vld [vmem:[%s5453_s7 + $0x20] sm:$0x3f]  ;;  %3941 = vmatprep.subr.bf16.mxu1 %v5372_v3  ;;  %4253 = vmatprep.subr.bf16.mxu0 %v5372_v3  ;;  %v388_v4 = vpack.c.bf16 %v387_v1, %v387_v1  ;;  %vm5373_vm2 = vmmov 0   ;;  %v3679_v11 = vld [vmem:[%s5453_s7 + $0x28] sm:$0x3f]  ;;  %vm389_vm3 = vcmask 48128  }
  0x32   : > { %v1762_v5 = vpack.c.bf16 %v3659_v2, %v3659_v2  ;;  %v330_v6 = vld [vmem:[%s5448_s4] sm:$0xff]  ;;  %3943 = vmatprep.mubr.msk.bf16.mxu1 %vm5373_vm2, %v5372_v3  ;;  %4255 = vmatprep.mubr.msk.bf16.mxu0 %vm5373_vm2, %v5372_v3  ;;  %v3599_v12 = vld [vmem:[%s5453_s7 + $0x8] sm:$0x3f]  ;;  %v2105_v16 = vpack.c.bf16 %v3679_v11, %v3679_v11  ;;  %v332_v20 = vld [vmem:[%s5448_s4 + $0x10] sm:$0xff]  ;;  %vm3418_vm4 = vcmask 23552  }
  0x33   : > { %v368_v9 = vpack.c.bf16 %v331_v7, %v330_v6  ;;  %v1704_v10 = vld [vmem:[%s5448_s4 + $0x1c] sm:$0xff]  ;;  %v449_v13 = vsel %vm447_vm1, %v388_v4, 0  ;;  %v733_v17 = vpack.c.bf16 %v3599_v12, %v3599_v12  ;;  %v1705_v22 = vld [vmem:[%s5448_s4 + $0x24] sm:$0xff]  ;;  %v1706_v23 = vld [vmem:[%s5448_s4 + $0x2c] sm:$0xff] }
  0x34   : > { %v5557_v14 = vsel %vm447_vm1, %v1762_v5, 0  ;;  %v1741_v15 = vpack.c.bf16 %v1704_v10, %v1703_v8  ;;  %3942 = vmatpush3.bf16.msra.mxu1 %v449_v13  ;;  %v2164_v18 = vsel %vm447_vm1, %v2105_v16, 0  ;;  %v333_v21 = vld [vmem:[%s5448_s4 + $0x18] sm:$0xff]  ;;  %v1742_v25 = vpack.c.bf16 %v1706_v23, %v1705_v22  ;;  %v334_v26 = vld [vmem:[%s5448_s4 + $0x20] sm:$0xff]  ;;  %v335_v27 = vld [vmem:[%s5448_s4 + $0x28] sm:$0xff] }
  0x35   : > { %4254 = vmatpush3.bf16.msra.mxu0 %v5557_v14  ;;  %4019 = vmatprep.subr.bf16.mxu1 %v5372_v3  ;;  %v792_v19 = vsel %vm447_vm1, %v733_v17, 0  ;;  %v369_v24 = vpack.c.bf16 %v333_v21, %v332_v20  ;;  %v1707_v28 = vld [vmem:[%s5448_s4 + $0x34] sm:$0xff]  ;;  %v1708_v29 = vld [vmem:[%s5448_s4 + $0x3c] sm:$0xff]  ;;  %v370_v30 = vpack.c.bf16 %v335_v27, %v334_v26  ;;  %v1709_v34 = vld [vmem:[%s5448_s4 + $0x44] sm:$0xff] }
  0x36   : > { %4331 = vmatprep.subr.bf16.mxu0 %v5372_v3  ;;  %v1743_v31 = vpack.c.bf16 %v1708_v29, %v1707_v28  ;;  %v336_v32 = vld [vmem:[%s5448_s4 + $0x30] sm:$0xff]  ;;  %v337_v33 = vld [vmem:[%s5448_s4 + $0x38] sm:$0xff]  ;;  %v338_v38 = vld [vmem:[%s5448_s4 + $0x40] sm:$0xff] }
  0x37   : > { %3944 = vmatmul.mubr.msk.bf16.vlgmr.msra.gmra.mrb[0].mxu1 %vm389_vm3, %v368_v9  ;;  %v1710_v35 = vld [vmem:[%s5448_s4 + $0x4c] sm:$0xff]  ;;  %v371_v36 = vpack.c.bf16 %v337_v33, %v336_v32  ;;  %v1711_v40 = vld [vmem:[%s5448_s4 + $0x54] sm:$0xff]  ;;  %v1712_v41 = vld [vmem:[%s5448_s4 + $0x5c] sm:$0xff] }
  0x38   : > { %4256 = vmatmul.mubr.msk.bf16.vlgmr.msra.gmra.mrb[0].mxu0 %vm389_vm3, %v1741_v15  ;;  %3947 = vmatprep.mubr.msk.bf16.mxu1 %vm5373_vm2, %v5372_v3  ;;  %v1744_v37 = vpack.c.bf16 %v1710_v35, %v1709_v34  ;;  %v339_v39 = vld [vmem:[%s5448_s4 + $0x48] sm:$0xff]  ;;  %v1745_v43 = vpack.c.bf16 %v1712_v41, %v1711_v40  ;;  %v340_v44 = vld [vmem:[%s5448_s4 + $0x50] sm:$0xff]  ;;  %v341_v45 = vld [vmem:[%s5448_s4 + $0x58] sm:$0xff] }
  0x39   : > { %4332 = vmatpush3.bf16.msra.mxu0 %v2164_v18  ;;  %4020 = vmatpush3.bf16.msra.mxu1 %v792_v19  ;;  %v372_v42 = vpack.c.bf16 %v339_v39, %v338_v38  ;;  %v1713_v46 = vld [vmem:[%s5448_s4 + $0x64] sm:$0xff]  ;;  %v1714_v47 = vld [vmem:[%s5448_s4 + $0x6c] sm:$0xff]  ;;  %v373_v48 = vpack.c.bf16 %v341_v45, %v340_v44  ;;  %v1715_v52 = vld [vmem:[%s5448_s4 + $0x74] sm:$0xff] }
  0x3a   : > { %4259 = vmatprep.mubr.msk.bf16.mxu0 %vm5373_vm2, %v5372_v3  ;;  %4409 = vmatprep.subr.bf16.mxu0 %v5372_v3  ;;  %v1746_v49 = vpack.c.bf16 %v1714_v47, %v1713_v46  ;;  %v342_v50 = vld [vmem:[%s5448_s4 + $0x60] sm:$0xff]  ;;  %v343_v51 = vld [vmem:[%s5448_s4 + $0x68] sm:$0xff]  ;;  %v344_v56 = vld [vmem:[%s5448_s4 + $0x70] sm:$0xff] }
  0x3b   : > { %4097 = vmatprep.subr.bf16.mxu1 %v5372_v3  ;;  %v1716_v53 = vld [vmem:[%s5448_s4 + $0x7c] sm:$0xff]  ;;  %v374_v54 = vpack.c.bf16 %v343_v51, %v342_v50  ;;  %v1717_v58 = vld [vmem:[%s5448_s4 + $0x84] sm:$0xff]  ;;  %v1718_v59 = vld [vmem:[%s5448_s4 + $0x8c] sm:$0xff] }
  0x3c   : > { %v1747_v55 = vpack.c.bf16 %v1716_v53, %v1715_v52  ;;  %v345_v57 = vld [vmem:[%s5448_s4 + $0x78] sm:$0xff]  ;;  %v1748_v61 = vpack.c.bf16 %v1718_v59, %v1717_v58  ;;  %v346_v62 = vld [vmem:[%s5448_s4 + $0x80] sm:$0xff]  ;;  %v347_v63 = vld [vmem:[%s5448_s4 + $0x88] sm:$0xff] }
  0x3d   : > { %v375_v60 = vpack.c.bf16 %v345_v57, %v344_v56  ;;  %v1719_v0 = vld [vmem:[%s5448_s4 + $0x94] sm:$0xff]  ;;  %v1720_v1 = vld [vmem:[%s5448_s4 + $0x9c] sm:$0xff]  ;;  %v376_v2 = vpack.c.bf16 %v347_v63, %v346_v62  ;;  %v1721_v7 = vld [vmem:[%s5448_s4 + $0xa4] sm:$0xff] }
  0x3e   : > { %v1749_v4 = vpack.c.bf16 %v1720_v1, %v1719_v0  ;;  %v348_v5 = vld [vmem:[%s5448_s4 + $0x90] sm:$0xff]  ;;  %v349_v6 = vld [vmem:[%s5448_s4 + $0x98] sm:$0xff]  ;;  %v350_v12 = vld [vmem:[%s5448_s4 + $0xa0] sm:$0xff] }
  0x3f   : > { %3948 = vmatmul.mubr.msk.bf16.gmra.mrb[4].mxu1 %vm389_vm3, %v369_v24  ;;  %v1722_v8 = vld [vmem:[%s5448_s4 + $0xac] sm:$0xff]  ;;  %v377_v9 = vpack.c.bf16 %v349_v6, %v348_v5  ;;  %v2046_v15 = vld [vmem:[%s5448_s4 + $0x15] sm:$0xff]  ;;  %v2047_v16 = vld [vmem:[%s5448_s4 + $0x1d] sm:$0xff] }
  0x40   : > { %4260 = vmatmul.mubr.msk.bf16.gmra.mrb[4].mxu0 %vm389_vm3, %v1742_v25  ;;  %3951 = vmatprep.mubr.msk.bf16.mxu1 %vm5373_vm2, %v5372_v3  ;;  %v1750_v10 = vpack.c.bf16 %v1722_v8, %v1721_v7  ;;  %v3699_v11 = vld [vmem:[%s5453_s7 + $0x30] sm:$0x3f]  ;;  %v351_v13 = vld [vmem:[%s5448_s4 + $0xa8] sm:$0xff]  ;;  %v2084_v19 = vpack.c.bf16 %v2047_v16, %v2046_v15  ;;  %v353_v22 = vld [vmem:[%s5448_s4 + $0xb8] sm:$0xff] }
  0x41   : > { %4263 = vmatprep.mubr.msk.bf16.mxu0 %vm5373_vm2, %v5372_v3  ;;  %v2448_v17 = vpack.c.bf16 %v3699_v11, %v3699_v11  ;;  %v378_v18 = vpack.c.bf16 %v351_v13, %v350_v12  ;;  %v352_v21 = vld [vmem:[%s5448_s4 + $0xb0] sm:$0xff]  ;;  %v2048_v23 = vld [vmem:[%s5448_s4 + $0x25] sm:$0xff]  ;;  %v357_v34 = vld [vmem:[%s5448_s4 + $0xd8] sm:$0xff] }
  0x42   : > { %v2049_v24 = vld [vmem:[%s5448_s4 + $0x2d] sm:$0xff]  ;;  %v379_v25 = vpack.c.bf16 %v353_v22, %v352_v21  ;;  %v354_v27 = vld [vmem:[%s5448_s4 + $0xc0] sm:$0xff]  ;;  %v2050_v29 = vld [vmem:[%s5448_s4 + $0x35] sm:$0xff] }
  0x43   : > { %v2507_v20 = vsel %vm447_vm1, %v2448_v17, 0  ;;  %v2085_v26 = vpack.c.bf16 %v2049_v24, %v2048_v23  ;;  %v355_v28 = vld [vmem:[%s5448_s4 + $0xc8] sm:$0xff]  ;;  %v356_v33 = vld [vmem:[%s5448_s4 + $0xd0] sm:$0xff]  ;;  %v358_v39 = vld [vmem:[%s5448_s4 + $0xe0] sm:$0xff] }
  0x44   : > { %v2052_v35 = vld [vmem:[%s5448_s4 + $0x45] sm:$0xff]  ;;  %v2054_v41 = vld [vmem:[%s5448_s4 + $0x55] sm:$0xff] }
  0x45   : > { %v359_v40 = vld [vmem:[%s5448_s4 + $0xe8] sm:$0xff]  ;;  %v360_v45 = vld [vmem:[%s5448_s4 + $0xf0] sm:$0xff]  ;;  %v361_v46 = vld [vmem:[%s5448_s4 + $0xf8] sm:$0xff] }
  0x46   : > { %v2056_v47 = vld [vmem:[%s5448_s4 + $0x65] sm:$0xff]  ;;  %v2058_v53 = vld [vmem:[%s5448_s4 + $0x75] sm:$0xff] }
  0x47   : > { %3952 = vmatmul.mubr.msk.bf16.gmra.mrb[8].mxu1 %vm389_vm3, %v370_v30  ;;  %v2051_v30 = vld [vmem:[%s5448_s4 + $0x3d] sm:$0xff]  ;;  %v363_v52 = vld [vmem:[%s5448_s4 + $0x108] sm:$0xff]  ;;  %v364_v57 = vld [vmem:[%s5448_s4 + $0x110] sm:$0xff] }
  0x48   : > { %4264 = vmatmul.mubr.msk.bf16.gmra.mrb[8].mxu0 %vm389_vm3, %v1743_v31  ;;  %3955 = vmatprep.mubr.msk.bf16.mxu1 %vm5373_vm2, %v5372_v3  ;;  %v380_v31 = vpack.c.bf16 %v355_v28, %v354_v27  ;;  %v2086_v32 = vpack.c.bf16 %v2051_v30, %v2050_v29  ;;  %v362_v51 = vld [vmem:[%s5448_s4 + $0x100] sm:$0xff]  ;;  %v365_v58 = vld [vmem:[%s5448_s4 + $0x118] sm:$0xff]  ;;  %v367_v0 = vld [vmem:[%s5448_s4 + $0x128] sm:$0xff] }
  0x49   : > { %4267 = vmatprep.mubr.msk.bf16.mxu0 %vm5373_vm2, %v5372_v3  ;;  %v2060_v59 = vld [vmem:[%s5448_s4 + $0x85] sm:$0xff]  ;;  %v2062_v1 = vld [vmem:[%s5448_s4 + $0x95] sm:$0xff] }
  0x4a   : > { %v366_v63 = vld [vmem:[%s5448_s4 + $0x120] sm:$0xff]  ;;  %v3619_v6 = vld [vmem:[%s5453_s7 + $0x10] sm:$0x3f] }
  0x4b   : > { %v674_v7 = vld [vmem:[%s5448_s4 + $0x1] sm:$0xff]  ;;  %v675_v8 = vld [vmem:[%s5448_s4 + $0x9] sm:$0xff]  ;;  %v1076_v11 = vpack.c.bf16 %v3619_v6, %v3619_v6  ;;  %v676_v16 = vld [vmem:[%s5448_s4 + $0x11] sm:$0xff] }
  0x4c   : > { %v712_v12 = vpack.c.bf16 %v675_v8, %v674_v7  ;;  %v677_v17 = vld [vmem:[%s5448_s4 + $0x19] sm:$0xff]  ;;  %v678_v22 = vld [vmem:[%s5448_s4 + $0x21] sm:$0xff]  ;;  %v679_v23 = vld [vmem:[%s5448_s4 + $0x29] sm:$0xff] }
  0x4d   : > { %v1135_v15 = vsel %vm447_vm1, %v1076_v11, 0  ;;  %v2068_v24 = vld [vmem:[%s5448_s4 + $0xc5] sm:$0xff]  ;;  %v680_v28 = vld [vmem:[%s5448_s4 + $0x31] sm:$0xff]  ;;  %v681_v29 = vld [vmem:[%s5448_s4 + $0x39] sm:$0xff] }
  0x4e   : > { %v2070_v30 = vld [vmem:[%s5448_s4 + $0xd5] sm:$0xff]  ;;  %v694_v8 = vld [vmem:[%s5448_s4 + $0xa1] sm:$0xff] }
  0x4f   : > { %3956 = vmatmul.mubr.msk.bf16.gmra.mrb[12].mxu1 %vm389_vm3, %v371_v36  ;;  %v2053_v36 = vld [vmem:[%s5448_s4 + $0x4d] sm:$0xff]  ;;  %v3719_v7 = vld [vmem:[%s5453_s7 + $0x38] sm:$0x3f] }
  0x50   : > { %4268 = vmatmul.mubr.msk.bf16.gmra.mrb[12].mxu0 %vm389_vm3, %v1744_v37  ;;  %3959 = vmatprep.mubr.msk.bf16.mxu1 %vm5373_vm2, %v5372_v3  ;;  %v381_v37 = vpack.c.bf16 %v357_v34, %v356_v33  ;;  %v2087_v38 = vpack.c.bf16 %v2053_v36, %v2052_v35  ;;  %v682_v34 = vld [vmem:[%s5448_s4 + $0x41] sm:$0xff]  ;;  %v683_v35 = vld [vmem:[%s5448_s4 + $0x49] sm:$0xff] }
  0x51   : > { %4271 = vmatprep.mubr.msk.bf16.mxu0 %vm5373_vm2, %v5372_v3  ;;  %v2072_v36 = vld [vmem:[%s5448_s4 + $0xe5] sm:$0xff]  ;;  %v2390_v11 = vld [vmem:[%s5448_s4 + $0x2e] sm:$0xff] }
  0x57   : > { %3960 = vmatmul.mubr.msk.bf16.gmra.mrb[16].mxu1 %vm389_vm3, %v372_v42  ;;  %v2055_v42 = vld [vmem:[%s5448_s4 + $0x5d] sm:$0xff] }
  0x58   : > { %4272 = vmatmul.mubr.msk.bf16.gmra.mrb[16].mxu0 %vm389_vm3, %v1745_v43  ;;  %3963 = vmatprep.mubr.msk.bf16.mxu1 %vm5373_vm2, %v5372_v3  ;;  %v382_v43 = vpack.c.bf16 %v359_v40, %v358_v39  ;;  %v2088_v44 = vpack.c.bf16 %v2055_v42, %v2054_v41  ;;  %v684_v40 = vld [vmem:[%s5448_s4 + $0x51] sm:$0xff]  ;;  %v685_v41 = vld [vmem:[%s5448_s4 + $0x59] sm:$0xff] }
  0x59   : > { %4275 = vmatprep.mubr.msk.bf16.mxu0 %vm5373_vm2, %v5372_v3  ;;  %v2074_v42 = vld [vmem:[%s5448_s4 + $0xf5] sm:$0xff] }
  0x5f   : > { %3964 = vmatmul.mubr.msk.bf16.gmra.mrb[20].mxu1 %vm389_vm3, %v373_v48  ;;  %v2057_v48 = vld [vmem:[%s5448_s4 + $0x6d] sm:$0xff] }
  0x60   : > { %4276 = vmatmul.mubr.msk.bf16.gmra.mrb[20].mxu0 %vm389_vm3, %v1746_v49  ;;  %3967 = vmatprep.mubr.msk.bf16.mxu1 %vm5373_vm2, %v5372_v3  ;;  %v383_v49 = vpack.c.bf16 %v361_v46, %v360_v45  ;;  %v2089_v50 = vpack.c.bf16 %v2057_v48, %v2056_v47  ;;  %v686_v46 = vld [vmem:[%s5448_s4 + $0x61] sm:$0xff]  ;;  %v687_v47 = vld [vmem:[%s5448_s4 + $0x69] sm:$0xff] }
  0x61   : > { %4279 = vmatprep.mubr.msk.bf16.mxu0 %vm5373_vm2, %v5372_v3  ;;  %v2076_v48 = vld [vmem:[%s5448_s4 + $0x105] sm:$0xff] }
  0x67   : > { %3968 = vmatmul.mubr.msk.bf16.gmra.mrb[24].mxu1 %vm389_vm3, %v374_v54  ;;  %v2059_v54 = vld [vmem:[%s5448_s4 + $0x7d] sm:$0xff] }
  0x68   : > { %4280 = vmatmul.mubr.msk.bf16.gmra.mrb[24].mxu0 %vm389_vm3, %v1747_v55  ;;  %3971 = vmatprep.mubr.msk.bf16.mxu1 %vm5373_vm2, %v5372_v3  ;;  %v384_v55 = vpack.c.bf16 %v363_v52, %v362_v51  ;;  %v2090_v56 = vpack.c.bf16 %v2059_v54, %v2058_v53  ;;  %v688_v52 = vld [vmem:[%s5448_s4 + $0x71] sm:$0xff]  ;;  %v689_v53 = vld [vmem:[%s5448_s4 + $0x79] sm:$0xff] }
  0x69   : > { %4283 = vmatprep.mubr.msk.bf16.mxu0 %vm5373_vm2, %v5372_v3  ;;  %v2078_v54 = vld [vmem:[%s5448_s4 + $0x115] sm:$0xff] }
  0x6f   : > { %3972 = vmatmul.mubr.msk.bf16.gmra.mrb[28].mxu1 %vm389_vm3, %v375_v60  ;;  %v2061_v60 = vld [vmem:[%s5448_s4 + $0x8d] sm:$0xff] }
  0x70   : > { %4284 = vmatmul.mubr.msk.bf16.gmra.mrb[28].mxu0 %vm389_vm3, %v1748_v61  ;;  %3975 = vmatprep.mubr.msk.bf16.mxu1 %vm5373_vm2, %v5372_v3  ;;  %v385_v61 = vpack.c.bf16 %v365_v58, %v364_v57  ;;  %v2091_v62 = vpack.c.bf16 %v2061_v60, %v2060_v59  ;;  %v690_v58 = vld [vmem:[%s5448_s4 + $0x81] sm:$0xff]  ;;  %v691_v59 = vld [vmem:[%s5448_s4 + $0x89] sm:$0xff] }
  0x71   : > { %4287 = vmatprep.mubr.msk.bf16.mxu0 %vm5373_vm2, %v5372_v3  ;;  %v2080_v60 = vld [vmem:[%s5448_s4 + $0x125] sm:$0xff] }
  0x77   : > { %3976 = vmatmul.mubr.msk.bf16.gmra.mrb[32].mxu1 %vm389_vm3, %v376_v2  ;;  %v2063_v2 = vld [vmem:[%s5448_s4 + $0x9d] sm:$0xff] }
  0x78   : > { %4288 = vmatmul.mubr.msk.bf16.gmra.mrb[32].mxu0 %vm389_vm3, %v1749_v4  ;;  %3979 = vmatprep.mubr.msk.bf16.mxu1 %vm5373_vm2, %v5372_v3  ;;  %v386_v4 = vpack.c.bf16 %v367_v0, %v366_v63  ;;  %v2092_v5 = vpack.c.bf16 %v2063_v2, %v2062_v1  ;;  %v692_v0 = vld [vmem:[%s5448_s4 + $0x91] sm:$0xff]  ;;  %v693_v1 = vld [vmem:[%s5448_s4 + $0x99] sm:$0xff] }
  0x79   : > { %4291 = vmatprep.mubr.msk.bf16.mxu0 %vm5373_vm2, %v5372_v3  ;;  %v2082_v2 = vld [vmem:[%s5448_s4 + $0x135] sm:$0xff] }
  0x7f   : > { %3980 = vmatmul.mubr.msk.bf16.gmra.mrb[36].mxu1 %vm389_vm3, %v377_v9  ;;  %v2064_v9 = vld [vmem:[%s5448_s4 + $0xa5] sm:$0xff] }
  0x80   : > { %4292 = vmatmul.mubr.msk.bf16.gmra.mrb[36].mxu0 %vm389_vm3, %v1750_v10  ;;  %3983 = vmatprep.mubr.msk.bf16.mxu1 %vm5373_vm2, %v5372_v3  ;;  %v2065_v10 = vld [vmem:[%s5448_s4 + $0xad] sm:$0xff] }
  0x81   : > { %4333 = vmatprep.mubr.msk.bf16.mxu0 %vm5373_vm2, %v5372_v3  ;;  %v2093_v13 = vpack.c.bf16 %v2065_v10, %v2064_v9  ;;  %v695_v9 = vld [vmem:[%s5448_s4 + $0xa9] sm:$0xff] }
  0x82   : > { %v2389_v10 = vld [vmem:[%s5448_s4 + $0x26] sm:$0xff] }
  0x87   : > { %3984 = vmatmul.mubr.msk.bf16.gmra.mrb[40].mxu1 %vm389_vm3, %v378_v18  ;;  %v2066_v18 = vld [vmem:[%s5448_s4 + $0xb5] sm:$0xff] }
  0x88   : > { %4334 = vmatmul.mubr.msk.bf16.vlgmr.msra.gmra.mrb[0].mxu0 %vm389_vm3, %v2084_v19  ;;  %3987 = vmatprep.mubr.msk.bf16.mxu1 %vm5373_vm2, %v5372_v3  ;;  %v2067_v19 = vld [vmem:[%s5448_s4 + $0xbd] sm:$0xff] }
  0x89   : > { %4410 = vmatpush3.bf16.msra.mxu0 %v2507_v20  ;;  %4337 = vmatprep.mubr.msk.bf16.mxu0 %vm5373_vm2, %v5372_v3  ;;  %v713_v20 = vpack.c.bf16 %v677_v17, %v676_v16  ;;  %v2094_v21 = vpack.c.bf16 %v2067_v19, %v2066_v18  ;;  %v696_v17 = vld [vmem:[%s5448_s4 + $0xb1] sm:$0xff]  ;;  %v697_v18 = vld [vmem:[%s5448_s4 + $0xb9] sm:$0xff] }
  0x8a   : > { %4487 = vmatprep.subr.bf16.mxu0 %v5372_v3  ;;  %v2391_v19 = vld [vmem:[%s5448_s4 + $0x36] sm:$0xff] }
  0x8f   : > { %3988 = vmatmul.mubr.msk.bf16.gmra.mrb[44].mxu1 %vm389_vm3, %v379_v25  ;;  %v2069_v25 = vld [vmem:[%s5448_s4 + $0xcd] sm:$0xff] }
  0x90   : > { %4338 = vmatmul.mubr.msk.bf16.gmra.mrb[4].mxu0 %vm389_vm3, %v2085_v26  ;;  %3991 = vmatprep.mubr.msk.bf16.mxu1 %vm5373_vm2, %v5372_v3  ;;  %v714_v26 = vpack.c.bf16 %v679_v23, %v678_v22  ;;  %v2095_v27 = vpack.c.bf16 %v2069_v25, %v2068_v24  ;;  %v698_v23 = vld [vmem:[%s5448_s4 + $0xc1] sm:$0xff]  ;;  %v699_v24 = vld [vmem:[%s5448_s4 + $0xc9] sm:$0xff] }
  0x91   : > { %4341 = vmatprep.mubr.msk.bf16.mxu0 %vm5373_vm2, %v5372_v3  ;;  %v2393_v25 = vld [vmem:[%s5448_s4 + $0x46] sm:$0xff] }
  0x97   : > { %3992 = vmatmul.mubr.msk.bf16.gmra.mrb[48].mxu1 %vm389_vm3, %v380_v31  ;;  %v2071_v31 = vld [vmem:[%s5448_s4 + $0xdd] sm:$0xff] }
  0x98   : > { %4342 = vmatmul.mubr.msk.bf16.gmra.mrb[8].mxu0 %vm389_vm3, %v2086_v32  ;;  %3995 = vmatprep.mubr.msk.bf16.mxu1 %vm5373_vm2, %v5372_v3  ;;  %v715_v32 = vpack.c.bf16 %v681_v29, %v680_v28  ;;  %v2096_v33 = vpack.c.bf16 %v2071_v31, %v2070_v30  ;;  %v700_v29 = vld [vmem:[%s5448_s4 + $0xd1] sm:$0xff]  ;;  %v701_v30 = vld [vmem:[%s5448_s4 + $0xd9] sm:$0xff] }
  0x99   : > { %4345 = vmatprep.mubr.msk.bf16.mxu0 %vm5373_vm2, %v5372_v3  ;;  %v2395_v31 = vld [vmem:[%s5448_s4 + $0x56] sm:$0xff] }
  0x9f   : > { %3996 = vmatmul.mubr.msk.bf16.gmra.mrb[52].mxu1 %vm389_vm3, %v381_v37  ;;  %v2073_v37 = vld [vmem:[%s5448_s4 + $0xed] sm:$0xff] }
  0xa0   : > { %4346 = vmatmul.mubr.msk.bf16.gmra.mrb[12].mxu0 %vm389_vm3, %v2087_v38  ;;  %3999 = vmatprep.mubr.msk.bf16.mxu1 %vm5373_vm2, %v5372_v3  ;;  %v716_v38 = vpack.c.bf16 %v683_v35, %v682_v34  ;;  %v2097_v39 = vpack.c.bf16 %v2073_v37, %v2072_v36  ;;  %v702_v35 = vld [vmem:[%s5448_s4 + $0xe1] sm:$0xff]  ;;  %v703_v36 = vld [vmem:[%s5448_s4 + $0xe9] sm:$0xff] }
  0xa1   : > { %4349 = vmatprep.mubr.msk.bf16.mxu0 %vm5373_vm2, %v5372_v3  ;;  %v2397_v37 = vld [vmem:[%s5448_s4 + $0x66] sm:$0xff] }
  0xa7   : > { %4000 = vmatmul.mubr.msk.bf16.gmra.mrb[56].mxu1 %vm389_vm3, %v382_v43  ;;  %v2075_v43 = vld [vmem:[%s5448_s4 + $0xfd] sm:$0xff] }
  0xa8   : > { %4350 = vmatmul.mubr.msk.bf16.gmra.mrb[16].mxu0 %vm389_vm3, %v2088_v44  ;;  %4003 = vmatprep.mubr.msk.bf16.mxu1 %vm5373_vm2, %v5372_v3  ;;  %v717_v44 = vpack.c.bf16 %v685_v41, %v684_v40  ;;  %v2098_v45 = vpack.c.bf16 %v2075_v43, %v2074_v42  ;;  %v704_v41 = vld [vmem:[%s5448_s4 + $0xf1] sm:$0xff]  ;;  %v705_v42 = vld [vmem:[%s5448_s4 + $0xf9] sm:$0xff] }
  0xa9   : > { %4353 = vmatprep.mubr.msk.bf16.mxu0 %vm5373_vm2, %v5372_v3  ;;  %v2399_v43 = vld [vmem:[%s5448_s4 + $0x76] sm:$0xff] }
  0xaf   : > { %4004 = vmatmul.mubr.msk.bf16.gmra.mrb[60].mxu1 %vm389_vm3, %v383_v49  ;;  %v2077_v49 = vld [vmem:[%s5448_s4 + $0x10d] sm:$0xff] }
  0xb0   : > { %4354 = vmatmul.mubr.msk.bf16.gmra.mrb[20].mxu0 %vm389_vm3, %v2089_v50  ;;  %4007 = vmatprep.mubr.msk.bf16.mxu1 %vm5373_vm2, %v5372_v3  ;;  %v718_v50 = vpack.c.bf16 %v687_v47, %v686_v46  ;;  %v2099_v51 = vpack.c.bf16 %v2077_v49, %v2076_v48  ;;  %v706_v47 = vld [vmem:[%s5448_s4 + $0x101] sm:$0xff]  ;;  %v707_v48 = vld [vmem:[%s5448_s4 + $0x109] sm:$0xff] }
  0xb1   : > { %4357 = vmatprep.mubr.msk.bf16.mxu0 %vm5373_vm2, %v5372_v3  ;;  %v2401_v49 = vld [vmem:[%s5448_s4 + $0x86] sm:$0xff] }
  0xb7   : > { %4008 = vmatmul.mubr.msk.bf16.gmra.mrb[64].mxu1 %vm389_vm3, %v384_v55  ;;  %v2079_v55 = vld [vmem:[%s5448_s4 + $0x11d] sm:$0xff] }
  0xb8   : > { %4358 = vmatmul.mubr.msk.bf16.gmra.mrb[24].mxu0 %vm389_vm3, %v2090_v56  ;;  %4011 = vmatprep.mubr.msk.bf16.mxu1 %vm5373_vm2, %v5372_v3  ;;  %v719_v56 = vpack.c.bf16 %v689_v53, %v688_v52  ;;  %v2100_v57 = vpack.c.bf16 %v2079_v55, %v2078_v54  ;;  %v708_v53 = vld [vmem:[%s5448_s4 + $0x111] sm:$0xff]  ;;  %v709_v54 = vld [vmem:[%s5448_s4 + $0x119] sm:$0xff] }
  0xb9   : > { %4361 = vmatprep.mubr.msk.bf16.mxu0 %vm5373_vm2, %v5372_v3  ;;  %v2403_v55 = vld [vmem:[%s5448_s4 + $0x96] sm:$0xff] }
  0xbf   : > { %4012 = vmatmul.mubr.msk.bf16.gmra.mrb[68].mxu1 %vm389_vm3, %v385_v61  ;;  %v2081_v61 = vld [vmem:[%s5448_s4 + $0x12d] sm:$0xff] }
  0xc0   : > { %4362 = vmatmul.mubr.msk.bf16.gmra.mrb[28].mxu0 %vm389_vm3, %v2091_v62  ;;  %4015 = vmatprep.mubr.msk.bf16.mxu1 %vm5373_vm2, %v5372_v3  ;;  %v720_v62 = vpack.c.bf16 %v691_v59, %v690_v58  ;;  %v2101_v63 = vpack.c.bf16 %v2081_v61, %v2080_v60  ;;  %v710_v59 = vld [vmem:[%s5448_s4 + $0x121] sm:$0xff]  ;;  %v711_v60 = vld [vmem:[%s5448_s4 + $0x129] sm:$0xff] }
  0xc1   : > { %4365 = vmatprep.mubr.msk.bf16.mxu0 %vm5373_vm2, %v5372_v3  ;;  %v2405_v61 = vld [vmem:[%s5448_s4 + $0xa6] sm:$0xff] }
  0xc7   : > { %4016 = vmatmul.mubr.msk.bf16.gmra.mrb[72].mxu1 %vm389_vm3, %v386_v4  ;;  %v2083_v4 = vld [vmem:[%s5448_s4 + $0x13d] sm:$0xff] }
  0xc8   : > { %4366 = vmatmul.mubr.msk.bf16.gmra.mrb[32].mxu0 %vm389_vm3, %v2092_v5  ;;  %4021 = vmatprep.mubr.msk.bf16.mxu1 %vm5373_vm2, %v5372_v3  ;;  %v721_v5 = vpack.c.bf16 %v693_v1, %v692_v0  ;;  %v2102_v6 = vpack.c.bf16 %v2083_v4, %v2082_v2  ;;  %v3639_v1 = vld [vmem:[%s5453_s7 + $0x18] sm:$0x3f]  ;;  %v1017_v2 = vld [vmem:[%s5448_s4 + $0x2] sm:$0xff]  ;;  %v1018_v4 = vld [vmem:[%s5448_s4 + $0xa] sm:$0xff] }
  0xc9   : > { %4369 = vmatprep.mubr.msk.bf16.mxu0 %vm5373_vm2, %v5372_v3 }
  0xcf   : > { %4022 = vmatmul.mubr.msk.bf16.vlgmr.msra.gmra.mrb[0].mxu1 %vm389_vm3, %v712_v12  ;;  %v2791_v12 = vpack.c.bf16 %v3719_v7, %v3719_v7  ;;  %v1419_v7 = vpack.c.bf16 %v3639_v1, %v3639_v1 }
  0xd0   : > { %4370 = vmatmul.mubr.msk.bf16.gmra.mrb[36].mxu0 %vm389_vm3, %v2093_v13  ;;  %4025 = vmatprep.mubr.msk.bf16.mxu1 %vm5373_vm2, %v5372_v3  ;;  %v722_v13 = vpack.c.bf16 %v695_v9, %v694_v8  ;;  %v1055_v8 = vpack.c.bf16 %v1018_v4, %v1017_v2  ;;  %v3739_v2 = vld [vmem:[%s5453_s7 + $0x40] sm:$0x3f] }
  0xd1   : > { %4098 = vmatpush3.bf16.msra.mxu1 %v1135_v15  ;;  %4373 = vmatprep.mubr.msk.bf16.mxu0 %vm5373_vm2, %v5372_v3  ;;  %v2427_v15 = vpack.c.bf16 %v2390_v11, %v2389_v10  ;;  %v2850_v16 = vsel %vm447_vm1, %v2791_v12, 0  ;;  %v1478_v10 = vsel %vm447_vm1, %v1419_v7, 0  ;;  %v1019_v11 = vld [vmem:[%s5448_s4 + $0x12] sm:$0xff]  ;;  %v1020_v12 = vld [vmem:[%s5448_s4 + $0x1a] sm:$0xff]  ;;  %v1037_v4 = vld [vmem:[%s5448_s4 + $0xa2] sm:$0xff] }
  0xd2   : > { %4175 = vmatprep.subr.bf16.mxu1 %v5372_v3  ;;  %v2733_v7 = vld [vmem:[%s5448_s4 + $0x2f] sm:$0xff] }
  0xd7   : > { %4026 = vmatmul.mubr.msk.bf16.gmra.mrb[4].mxu1 %vm389_vm3, %v713_v20  ;;  %v2392_v20 = vld [vmem:[%s5448_s4 + $0x3e] sm:$0xff] }
  0xd8   : > { %4374 = vmatmul.mubr.msk.bf16.gmra.mrb[40].mxu0 %vm389_vm3, %v2094_v21  ;;  %4029 = vmatprep.mubr.msk.bf16.mxu1 %vm5373_vm2, %v5372_v3  ;;  %v723_v21 = vpack.c.bf16 %v697_v18, %v696_v17  ;;  %v2428_v22 = vpack.c.bf16 %v2392_v20, %v2391_v19  ;;  %v1021_v18 = vld [vmem:[%s5448_s4 + $0x22] sm:$0xff]  ;;  %v1022_v19 = vld [vmem:[%s5448_s4 + $0x2a] sm:$0xff]  ;;  %v2411_v20 = vld [vmem:[%s5448_s4 + $0xd6] sm:$0xff] }
  0xd9   : > { %4377 = vmatprep.mubr.msk.bf16.mxu0 %vm5373_vm2, %v5372_v3 }
  0xdf   : > { %4030 = vmatmul.mubr.msk.bf16.gmra.mrb[8].mxu1 %vm389_vm3, %v714_v26  ;;  %v2394_v26 = vld [vmem:[%s5448_s4 + $0x4e] sm:$0xff] }
  0xe0   : > { %4378 = vmatmul.mubr.msk.bf16.gmra.mrb[44].mxu0 %vm389_vm3, %v2095_v27  ;;  %4033 = vmatprep.mubr.msk.bf16.mxu1 %vm5373_vm2, %v5372_v3  ;;  %v724_v27 = vpack.c.bf16 %v699_v24, %v698_v23  ;;  %v2429_v28 = vpack.c.bf16 %v2394_v26, %v2393_v25  ;;  %v1023_v24 = vld [vmem:[%s5448_s4 + $0x32] sm:$0xff]  ;;  %v1024_v25 = vld [vmem:[%s5448_s4 + $0x3a] sm:$0xff]  ;;  %v2413_v26 = vld [vmem:[%s5448_s4 + $0xe6] sm:$0xff] }
  0xe1   : > { %4381 = vmatprep.mubr.msk.bf16.mxu0 %vm5373_vm2, %v5372_v3 }
  0xe7   : > { %4034 = vmatmul.mubr.msk.bf16.gmra.mrb[12].mxu1 %vm389_vm3, %v715_v32  ;;  %v2396_v32 = vld [vmem:[%s5448_s4 + $0x5e] sm:$0xff] }
  0xe8   : > { %4382 = vmatmul.mubr.msk.bf16.gmra.mrb[48].mxu0 %vm389_vm3, %v2096_v33  ;;  %4037 = vmatprep.mubr.msk.bf16.mxu1 %vm5373_vm2, %v5372_v3  ;;  %v725_v33 = vpack.c.bf16 %v701_v30, %v700_v29  ;;  %v2430_v34 = vpack.c.bf16 %v2396_v32, %v2395_v31  ;;  %v1025_v30 = vld [vmem:[%s5448_s4 + $0x42] sm:$0xff]  ;;  %v1026_v31 = vld [vmem:[%s5448_s4 + $0x4a] sm:$0xff]  ;;  %v2415_v32 = vld [vmem:[%s5448_s4 + $0xf6] sm:$0xff] }
  0xe9   : > { %4385 = vmatprep.mubr.msk.bf16.mxu0 %vm5373_vm2, %v5372_v3 }
  0xef   : > { %4038 = vmatmul.mubr.msk.bf16.gmra.mrb[16].mxu1 %vm389_vm3, %v716_v38  ;;  %v2398_v38 = vld [vmem:[%s5448_s4 + $0x6e] sm:$0xff] }
  0xf0   : > { %4386 = vmatmul.mubr.msk.bf16.gmra.mrb[52].mxu0 %vm389_vm3, %v2097_v39  ;;  %4041 = vmatprep.mubr.msk.bf16.mxu1 %vm5373_vm2, %v5372_v3  ;;  %v726_v39 = vpack.c.bf16 %v703_v36, %v702_v35  ;;  %v2431_v40 = vpack.c.bf16 %v2398_v38, %v2397_v37  ;;  %v1027_v36 = vld [vmem:[%s5448_s4 + $0x52] sm:$0xff]  ;;  %v1028_v37 = vld [vmem:[%s5448_s4 + $0x5a] sm:$0xff]  ;;  %v2417_v38 = vld [vmem:[%s5448_s4 + $0x106] sm:$0xff] }
  0xf1   : > { %4389 = vmatprep.mubr.msk.bf16.mxu0 %vm5373_vm2, %v5372_v3 }
  0xf7   : > { %4042 = vmatmul.mubr.msk.bf16.gmra.mrb[20].mxu1 %vm389_vm3, %v717_v44  ;;  %v2400_v44 = vld [vmem:[%s5448_s4 + $0x7e] sm:$0xff] }
  0xf8   : > { %4390 = vmatmul.mubr.msk.bf16.gmra.mrb[56].mxu0 %vm389_vm3, %v2098_v45  ;;  %4045 = vmatprep.mubr.msk.bf16.mxu1 %vm5373_vm2, %v5372_v3  ;;  %v727_v45 = vpack.c.bf16 %v705_v42, %v704_v41  ;;  %v2432_v46 = vpack.c.bf16 %v2400_v44, %v2399_v43  ;;  %v1029_v42 = vld [vmem:[%s5448_s4 + $0x62] sm:$0xff]  ;;  %v1030_v43 = vld [vmem:[%s5448_s4 + $0x6a] sm:$0xff]  ;;  %v2419_v44 = vld [vmem:[%s5448_s4 + $0x116] sm:$0xff] }
  0xf9   : > { %4393 = vmatprep.mubr.msk.bf16.mxu0 %vm5373_vm2, %v5372_v3 }
  0xff   : > { %4046 = vmatmul.mubr.msk.bf16.gmra.mrb[24].mxu1 %vm389_vm3, %v718_v50  ;;  %v2402_v50 = vld [vmem:[%s5448_s4 + $0x8e] sm:$0xff] }
 0x100   : > { %4394 = vmatmul.mubr.msk.bf16.gmra.mrb[60].mxu0 %vm389_vm3, %v2099_v51  ;;  %4049 = vmatprep.mubr.msk.bf16.mxu1 %vm5373_vm2, %v5372_v3  ;;  %v728_v51 = vpack.c.bf16 %v707_v48, %v706_v47  ;;  %v2433_v52 = vpack.c.bf16 %v2402_v50, %v2401_v49  ;;  %v1031_v48 = vld [vmem:[%s5448_s4 + $0x72] sm:$0xff]  ;;  %v1032_v49 = vld [vmem:[%s5448_s4 + $0x7a] sm:$0xff]  ;;  %v2421_v50 = vld [vmem:[%s5448_s4 + $0x126] sm:$0xff] }
 0x101   : > { %4397 = vmatprep.mubr.msk.bf16.mxu0 %vm5373_vm2, %v5372_v3 }
 0x107   : > { %4050 = vmatmul.mubr.msk.bf16.gmra.mrb[28].mxu1 %vm389_vm3, %v719_v56  ;;  %v2404_v56 = vld [vmem:[%s5448_s4 + $0x9e] sm:$0xff] }
 0x108   : > { %4398 = vmatmul.mubr.msk.bf16.gmra.mrb[64].mxu0 %vm389_vm3, %v2100_v57  ;;  %4053 = vmatprep.mubr.msk.bf16.mxu1 %vm5373_vm2, %v5372_v3  ;;  %v729_v57 = vpack.c.bf16 %v709_v54, %v708_v53  ;;  %v2434_v58 = vpack.c.bf16 %v2404_v56, %v2403_v55  ;;  %v1033_v54 = vld [vmem:[%s5448_s4 + $0x82] sm:$0xff]  ;;  %v1034_v55 = vld [vmem:[%s5448_s4 + $0x8a] sm:$0xff]  ;;  %v2423_v56 = vld [vmem:[%s5448_s4 + $0x136] sm:$0xff] }
 0x109   : > { %4401 = vmatprep.mubr.msk.bf16.mxu0 %vm5373_vm2, %v5372_v3 }
 0x10f   : > { %4054 = vmatmul.mubr.msk.bf16.gmra.mrb[32].mxu1 %vm389_vm3, %v720_v62  ;;  %v2406_v62 = vld [vmem:[%s5448_s4 + $0xae] sm:$0xff] }
 0x110   : > { %4402 = vmatmul.mubr.msk.bf16.gmra.mrb[68].mxu0 %vm389_vm3, %v2101_v63  ;;  %4057 = vmatprep.mubr.msk.bf16.mxu1 %vm5373_vm2, %v5372_v3  ;;  %v730_v63 = vpack.c.bf16 %v711_v60, %v710_v59  ;;  %v2435_v0 = vpack.c.bf16 %v2406_v62, %v2405_v61  ;;  %v1035_v60 = vld [vmem:[%s5448_s4 + $0x92] sm:$0xff]  ;;  %v1036_v61 = vld [vmem:[%s5448_s4 + $0x9a] sm:$0xff]  ;;  %v2425_v62 = vld [vmem:[%s5448_s4 + $0x146] sm:$0xff] }
 0x111   : > { %4405 = vmatprep.mubr.msk.bf16.mxu0 %vm5373_vm2, %v5372_v3 }
 0x117   : > { %4058 = vmatmul.mubr.msk.bf16.gmra.mrb[36].mxu1 %vm389_vm3, %v721_v5  ;;  %v2407_v5 = vld [vmem:[%s5448_s4 + $0xb6] sm:$0xff] }
 0x118   : > { %4406 = vmatmul.mubr.msk.bf16.gmra.mrb[72].mxu0 %vm389_vm3, %v2102_v6  ;;  %4061 = vmatprep.mubr.msk.bf16.mxu1 %vm5373_vm2, %v5372_v3  ;;  %v2408_v6 = vld [vmem:[%s5448_s4 + $0xbe] sm:$0xff] }
 0x119   : > { %4411 = vmatprep.mubr.msk.bf16.mxu0 %vm5373_vm2, %v5372_v3  ;;  %v2436_v9 = vpack.c.bf16 %v2408_v6, %v2407_v5  ;;  %v1038_v5 = vld [vmem:[%s5448_s4 + $0xaa] sm:$0xff] }
 0x11a   : > { %v2732_v6 = vld [vmem:[%s5448_s4 + $0x27] sm:$0xff] }
 0x11f   : > { %4062 = vmatmul.mubr.msk.bf16.gmra.mrb[40].mxu1 %vm389_vm3, %v722_v13  ;;  %v2409_v13 = vld [vmem:[%s5448_s4 + $0xc6] sm:$0xff] }
 0x120   : > { %4412 = vmatmul.mubr.msk.bf16.vlgmr.msra.gmra.mrb[0].mxu0 %vm389_vm3, %v2427_v15  ;;  %4065 = vmatprep.mubr.msk.bf16.mxu1 %vm5373_vm2, %v5372_v3  ;;  %v2410_v15 = vld [vmem:[%s5448_s4 + $0xce] sm:$0xff] }
 0x121   : > { %4488 = vmatpush3.bf16.msra.mxu0 %v2850_v16  ;;  %4415 = vmatprep.mubr.msk.bf16.mxu0 %vm5373_vm2, %v5372_v3  ;;  %v1056_v16 = vpack.c.bf16 %v1020_v12, %v1019_v11  ;;  %v2437_v17 = vpack.c.bf16 %v2410_v15, %v2409_v13  ;;  %v1039_v12 = vld [vmem:[%s5448_s4 + $0xb2] sm:$0xff]  ;;  %v1040_v13 = vld [vmem:[%s5448_s4 + $0xba] sm:$0xff] }
 0x122   : > { %4565 = vmatprep.subr.bf16.mxu0 %v5372_v3  ;;  %v2734_v15 = vld [vmem:[%s5448_s4 + $0x37] sm:$0xff] }
 0x127   : > { %4066 = vmatmul.mubr.msk.bf16.gmra.mrb[44].mxu1 %vm389_vm3, %v723_v21  ;;  %v2412_v21 = vld [vmem:[%s5448_s4 + $0xde] sm:$0xff] }
 0x128   : > { %4416 = vmatmul.mubr.msk.bf16.gmra.mrb[4].mxu0 %vm389_vm3, %v2428_v22  ;;  %4069 = vmatprep.mubr.msk.bf16.mxu1 %vm5373_vm2, %v5372_v3  ;;  %v1057_v22 = vpack.c.bf16 %v1022_v19, %v1021_v18  ;;  %v2438_v23 = vpack.c.bf16 %v2412_v21, %v2411_v20  ;;  %v1041_v19 = vld [vmem:[%s5448_s4 + $0xc2] sm:$0xff]  ;;  %v1042_v20 = vld [vmem:[%s5448_s4 + $0xca] sm:$0xff] }
 0x129   : > { %4419 = vmatprep.mubr.msk.bf16.mxu0 %vm5373_vm2, %v5372_v3  ;;  %v2736_v21 = vld [vmem:[%s5448_s4 + $0x47] sm:$0xff] }
 0x12f   : > { %4070 = vmatmul.mubr.msk.bf16.gmra.mrb[48].mxu1 %vm389_vm3, %v724_v27  ;;  %v2414_v27 = vld [vmem:[%s5448_s4 + $0xee] sm:$0xff] }
 0x130   : > { %4420 = vmatmul.mubr.msk.bf16.gmra.mrb[8].mxu0 %vm389_vm3, %v2429_v28  ;;  %4073 = vmatprep.mubr.msk.bf16.mxu1 %vm5373_vm2, %v5372_v3  ;;  %v1058_v28 = vpack.c.bf16 %v1024_v25, %v1023_v24  ;;  %v2439_v29 = vpack.c.bf16 %v2414_v27, %v2413_v26  ;;  %v1043_v25 = vld [vmem:[%s5448_s4 + $0xd2] sm:$0xff]  ;;  %v1044_v26 = vld [vmem:[%s5448_s4 + $0xda] sm:$0xff] }
 0x131   : > { %4423 = vmatprep.mubr.msk.bf16.mxu0 %vm5373_vm2, %v5372_v3  ;;  %v2738_v27 = vld [vmem:[%s5448_s4 + $0x57] sm:$0xff] }
 0x137   : > { %4074 = vmatmul.mubr.msk.bf16.gmra.mrb[52].mxu1 %vm389_vm3, %v725_v33  ;;  %v2416_v33 = vld [vmem:[%s5448_s4 + $0xfe] sm:$0xff] }
 0x138   : > { %4424 = vmatmul.mubr.msk.bf16.gmra.mrb[12].mxu0 %vm389_vm3, %v2430_v34  ;;  %4077 = vmatprep.mubr.msk.bf16.mxu1 %vm5373_vm2, %v5372_v3  ;;  %v1059_v34 = vpack.c.bf16 %v1026_v31, %v1025_v30  ;;  %v2440_v35 = vpack.c.bf16 %v2416_v33, %v2415_v32  ;;  %v1045_v31 = vld [vmem:[%s5448_s4 + $0xe2] sm:$0xff]  ;;  %v1046_v32 = vld [vmem:[%s5448_s4 + $0xea] sm:$0xff] }
 0x139   : > { %4427 = vmatprep.mubr.msk.bf16.mxu0 %vm5373_vm2, %v5372_v3  ;;  %v2740_v33 = vld [vmem:[%s5448_s4 + $0x67] sm:$0xff] }
 0x13f   : > { %4078 = vmatmul.mubr.msk.bf16.gmra.mrb[56].mxu1 %vm389_vm3, %v726_v39  ;;  %v2418_v39 = vld [vmem:[%s5448_s4 + $0x10e] sm:$0xff] }
 0x140   : > { %4428 = vmatmul.mubr.msk.bf16.gmra.mrb[16].mxu0 %vm389_vm3, %v2431_v40  ;;  %4081 = vmatprep.mubr.msk.bf16.mxu1 %vm5373_vm2, %v5372_v3  ;;  %v1060_v40 = vpack.c.bf16 %v1028_v37, %v1027_v36  ;;  %v2441_v41 = vpack.c.bf16 %v2418_v39, %v2417_v38  ;;  %v1047_v37 = vld [vmem:[%s5448_s4 + $0xf2] sm:$0xff]  ;;  %v1048_v38 = vld [vmem:[%s5448_s4 + $0xfa] sm:$0xff] }
 0x141   : > { %4431 = vmatprep.mubr.msk.bf16.mxu0 %vm5373_vm2, %v5372_v3  ;;  %v2742_v39 = vld [vmem:[%s5448_s4 + $0x77] sm:$0xff] }
 0x147   : > { %4082 = vmatmul.mubr.msk.bf16.gmra.mrb[60].mxu1 %vm389_vm3, %v727_v45  ;;  %v2420_v45 = vld [vmem:[%s5448_s4 + $0x11e] sm:$0xff] }
 0x148   : > { %4432 = vmatmul.mubr.msk.bf16.gmra.mrb[20].mxu0 %vm389_vm3, %v2432_v46  ;;  %4085 = vmatprep.mubr.msk.bf16.mxu1 %vm5373_vm2, %v5372_v3  ;;  %v1061_v46 = vpack.c.bf16 %v1030_v43, %v1029_v42  ;;  %v2442_v47 = vpack.c.bf16 %v2420_v45, %v2419_v44  ;;  %v1049_v43 = vld [vmem:[%s5448_s4 + $0x102] sm:$0xff]  ;;  %v1050_v44 = vld [vmem:[%s5448_s4 + $0x10a] sm:$0xff] }
 0x149   : > { %4435 = vmatprep.mubr.msk.bf16.mxu0 %vm5373_vm2, %v5372_v3  ;;  %v2744_v45 = vld [vmem:[%s5448_s4 + $0x87] sm:$0xff] }
 0x14f   : > { %4086 = vmatmul.mubr.msk.bf16.gmra.mrb[64].mxu1 %vm389_vm3, %v728_v51  ;;  %v2422_v51 = vld [vmem:[%s5448_s4 + $0x12e] sm:$0xff] }
 0x150   : > { %4436 = vmatmul.mubr.msk.bf16.gmra.mrb[24].mxu0 %vm389_vm3, %v2433_v52  ;;  %4089 = vmatprep.mubr.msk.bf16.mxu1 %vm5373_vm2, %v5372_v3  ;;  %v1062_v52 = vpack.c.bf16 %v1032_v49, %v1031_v48  ;;  %v2443_v53 = vpack.c.bf16 %v2422_v51, %v2421_v50  ;;  %v1051_v49 = vld [vmem:[%s5448_s4 + $0x112] sm:$0xff]  ;;  %v1052_v50 = vld [vmem:[%s5448_s4 + $0x11a] sm:$0xff] }
 0x151   : > { %4439 = vmatprep.mubr.msk.bf16.mxu0 %vm5373_vm2, %v5372_v3  ;;  %v2746_v51 = vld [vmem:[%s5448_s4 + $0x97] sm:$0xff] }
 0x157   : > { %4090 = vmatmul.mubr.msk.bf16.gmra.mrb[68].mxu1 %vm389_vm3, %v729_v57  ;;  %v2424_v57 = vld [vmem:[%s5448_s4 + $0x13e] sm:$0xff] }
 0x158   : > { %4440 = vmatmul.mubr.msk.bf16.gmra.mrb[28].mxu0 %vm389_vm3, %v2434_v58  ;;  %4093 = vmatprep.mubr.msk.bf16.mxu1 %vm5373_vm2, %v5372_v3  ;;  %v1063_v58 = vpack.c.bf16 %v1034_v55, %v1033_v54  ;;  %v2444_v59 = vpack.c.bf16 %v2424_v57, %v2423_v56  ;;  %v1053_v55 = vld [vmem:[%s5448_s4 + $0x122] sm:$0xff]  ;;  %v1054_v56 = vld [vmem:[%s5448_s4 + $0x12a] sm:$0xff] }
 0x159   : > { %4443 = vmatprep.mubr.msk.bf16.mxu0 %vm5373_vm2, %v5372_v3  ;;  %v2748_v57 = vld [vmem:[%s5448_s4 + $0xa7] sm:$0xff] }
 0x15f   : > { %4094 = vmatmul.mubr.msk.bf16.gmra.mrb[72].mxu1 %vm389_vm3, %v730_v63  ;;  %v2426_v63 = vld [vmem:[%s5448_s4 + $0x14e] sm:$0xff] }
 0x160   : > { %4444 = vmatmul.mubr.msk.bf16.gmra.mrb[32].mxu0 %vm389_vm3, %v2435_v0  ;;  %4099 = vmatprep.mubr.msk.bf16.mxu1 %vm5373_vm2, %v5372_v3  ;;  %v1064_v0 = vpack.c.bf16 %v1036_v61, %v1035_v60  ;;  %v2445_v1 = vpack.c.bf16 %v2426_v63, %v2425_v62  ;;  %v1360_v61 = vld [vmem:[%s5448_s4 + $0x13] sm:$0xff]  ;;  %v1361_v62 = vld [vmem:[%s5448_s4 + $0x1b] sm:$0xff] }
 0x161   : > { %4447 = vmatprep.mubr.msk.bf16.mxu0 %vm5373_vm2, %v5372_v3  ;;  %v2750_v63 = vld [vmem:[%s5448_s4 + $0xb7] sm:$0xff] }
 0x167   : > { %4100 = vmatmul.mubr.msk.bf16.vlgmr.msra.gmra.mrb[0].mxu1 %vm389_vm3, %v1055_v8  ;;  %v3134_v8 = vpack.c.bf16 %v3739_v2, %v3739_v2 }
 0x168   : > { %4448 = vmatmul.mubr.msk.bf16.gmra.mrb[36].mxu0 %vm389_vm3, %v2436_v9  ;;  %4103 = vmatprep.mubr.msk.bf16.mxu1 %vm5373_vm2, %v5372_v3  ;;  %v1065_v9 = vpack.c.bf16 %v1038_v5, %v1037_v4  ;;  %v1362_v4 = vld [vmem:[%s5448_s4 + $0x23] sm:$0xff]  ;;  %v1363_v5 = vld [vmem:[%s5448_s4 + $0x2b] sm:$0xff] }
 0x169   : > { %4176 = vmatpush3.bf16.msra.mxu1 %v1478_v10  ;;  %4451 = vmatprep.mubr.msk.bf16.mxu0 %vm5373_vm2, %v5372_v3  ;;  %v2770_v10 = vpack.c.bf16 %v2733_v7, %v2732_v6  ;;  %v3193_v11 = vsel %vm447_vm1, %v3134_v8, 0  ;;  %v2752_v6 = vld [vmem:[%s5448_s4 + $0xc7] sm:$0xff]  ;;  %v2753_v7 = vld [vmem:[%s5448_s4 + $0xcf] sm:$0xff]  ;;  %v1399_v8 = vpack.c.bf16 %v1363_v5, %v1362_v4 }
 0x16a   : > { %4643 = vmatprep.subr.bf16.mxu1 %v5372_v3  ;;  %v3078_v4 = vld [vmem:[%s5448_s4 + $0x40] sm:$0xff] }
 0x16f   : > { %4104 = vmatmul.mubr.msk.bf16.gmra.mrb[4].mxu1 %vm389_vm3, %v1056_v16  ;;  %v2735_v16 = vld [vmem:[%s5448_s4 + $0x3f] sm:$0xff] }
 0x170   : > { %4452 = vmatmul.mubr.msk.bf16.gmra.mrb[40].mxu0 %vm389_vm3, %v2437_v17  ;;  %4107 = vmatprep.mubr.msk.bf16.mxu1 %vm5373_vm2, %v5372_v3  ;;  %v1066_v17 = vpack.c.bf16 %v1040_v13, %v1039_v12  ;;  %v2771_v18 = vpack.c.bf16 %v2735_v16, %v2734_v15  ;;  %v2755_v12 = vld [vmem:[%s5448_s4 + $0xdf] sm:$0xff] }
 0x171   : > { %4455 = vmatprep.mubr.msk.bf16.mxu0 %vm5373_vm2, %v5372_v3  ;;  %v1366_v16 = vld [vmem:[%s5448_s4 + $0x43] sm:$0xff] }
 0x177   : > { %4108 = vmatmul.mubr.msk.bf16.gmra.mrb[8].mxu1 %vm389_vm3, %v1057_v22  ;;  %v2737_v22 = vld [vmem:[%s5448_s4 + $0x4f] sm:$0xff] }
 0x178   : > { %4456 = vmatmul.mubr.msk.bf16.gmra.mrb[44].mxu0 %vm389_vm3, %v2438_v23  ;;  %4111 = vmatprep.mubr.msk.bf16.mxu1 %vm5373_vm2, %v5372_v3  ;;  %v1067_v23 = vpack.c.bf16 %v1042_v20, %v1041_v19  ;;  %v2772_v24 = vpack.c.bf16 %v2737_v22, %v2736_v21  ;;  %v2757_v19 = vld [vmem:[%s5448_s4 + $0xef] sm:$0xff] }
 0x179   : > { %4459 = vmatprep.mubr.msk.bf16.mxu0 %vm5373_vm2, %v5372_v3  ;;  %v1368_v22 = vld [vmem:[%s5448_s4 + $0x53] sm:$0xff] }
 0x17f   : > { %4112 = vmatmul.mubr.msk.bf16.gmra.mrb[12].mxu1 %vm389_vm3, %v1058_v28  ;;  %v2739_v28 = vld [vmem:[%s5448_s4 + $0x5f] sm:$0xff] }
 0x180   : > { %4460 = vmatmul.mubr.msk.bf16.gmra.mrb[48].mxu0 %vm389_vm3, %v2439_v29  ;;  %4115 = vmatprep.mubr.msk.bf16.mxu1 %vm5373_vm2, %v5372_v3  ;;  %v1068_v29 = vpack.c.bf16 %v1044_v26, %v1043_v25  ;;  %v2773_v30 = vpack.c.bf16 %v2739_v28, %v2738_v27  ;;  %v2759_v25 = vld [vmem:[%s5448_s4 + $0xff] sm:$0xff] }
 0x181   : > { %4463 = vmatprep.mubr.msk.bf16.mxu0 %vm5373_vm2, %v5372_v3  ;;  %v1370_v28 = vld [vmem:[%s5448_s4 + $0x63] sm:$0xff] }
 0x187   : > { %4116 = vmatmul.mubr.msk.bf16.gmra.mrb[16].mxu1 %vm389_vm3, %v1059_v34  ;;  %v2741_v34 = vld [vmem:[%s5448_s4 + $0x6f] sm:$0xff] }
 0x188   : > { %4464 = vmatmul.mubr.msk.bf16.gmra.mrb[52].mxu0 %vm389_vm3, %v2440_v35  ;;  %4119 = vmatprep.mubr.msk.bf16.mxu1 %vm5373_vm2, %v5372_v3  ;;  %v1069_v35 = vpack.c.bf16 %v1046_v32, %v1045_v31  ;;  %v2774_v36 = vpack.c.bf16 %v2741_v34, %v2740_v33  ;;  %v2761_v31 = vld [vmem:[%s5448_s4 + $0x10f] sm:$0xff] }
 0x189   : > { %4467 = vmatprep.mubr.msk.bf16.mxu0 %vm5373_vm2, %v5372_v3  ;;  %v1372_v34 = vld [vmem:[%s5448_s4 + $0x73] sm:$0xff] }
 0x18f   : > { %4120 = vmatmul.mubr.msk.bf16.gmra.mrb[20].mxu1 %vm389_vm3, %v1060_v40  ;;  %v2743_v40 = vld [vmem:[%s5448_s4 + $0x7f] sm:$0xff] }
 0x190   : > { %4468 = vmatmul.mubr.msk.bf16.gmra.mrb[56].mxu0 %vm389_vm3, %v2441_v41  ;;  %4123 = vmatprep.mubr.msk.bf16.mxu1 %vm5373_vm2, %v5372_v3  ;;  %v1070_v41 = vpack.c.bf16 %v1048_v38, %v1047_v37  ;;  %v2775_v42 = vpack.c.bf16 %v2743_v40, %v2742_v39  ;;  %v2763_v37 = vld [vmem:[%s5448_s4 + $0x11f] sm:$0xff] }
 0x191   : > { %4471 = vmatprep.mubr.msk.bf16.mxu0 %vm5373_vm2, %v5372_v3  ;;  %v1374_v40 = vld [vmem:[%s5448_s4 + $0x83] sm:$0xff] }
 0x197   : > { %4124 = vmatmul.mubr.msk.bf16.gmra.mrb[24].mxu1 %vm389_vm3, %v1061_v46  ;;  %v2745_v46 = vld [vmem:[%s5448_s4 + $0x8f] sm:$0xff] }
 0x198   : > { %4472 = vmatmul.mubr.msk.bf16.gmra.mrb[60].mxu0 %vm389_vm3, %v2442_v47  ;;  %4127 = vmatprep.mubr.msk.bf16.mxu1 %vm5373_vm2, %v5372_v3  ;;  %v1071_v47 = vpack.c.bf16 %v1050_v44, %v1049_v43  ;;  %v2776_v48 = vpack.c.bf16 %v2745_v46, %v2744_v45  ;;  %v2765_v43 = vld [vmem:[%s5448_s4 + $0x12f] sm:$0xff] }
 0x199   : > { %4475 = vmatprep.mubr.msk.bf16.mxu0 %vm5373_vm2, %v5372_v3  ;;  %v1376_v46 = vld [vmem:[%s5448_s4 + $0x93] sm:$0xff] }
 0x19f   : > { %4128 = vmatmul.mubr.msk.bf16.gmra.mrb[28].mxu1 %vm389_vm3, %v1062_v52  ;;  %v2747_v52 = vld [vmem:[%s5448_s4 + $0x9f] sm:$0xff] }
 0x1a0   : > { %4476 = vmatmul.mubr.msk.bf16.gmra.mrb[64].mxu0 %vm389_vm3, %v2443_v53  ;;  %4131 = vmatprep.mubr.msk.bf16.mxu1 %vm5373_vm2, %v5372_v3  ;;  %v1072_v53 = vpack.c.bf16 %v1052_v50, %v1051_v49  ;;  %v2777_v54 = vpack.c.bf16 %v2747_v52, %v2746_v51  ;;  %v2767_v49 = vld [vmem:[%s5448_s4 + $0x13f] sm:$0xff] }
 0x1a1   : > { %4479 = vmatprep.mubr.msk.bf16.mxu0 %vm5373_vm2, %v5372_v3  ;;  %v1378_v52 = vld [vmem:[%s5448_s4 + $0xa3] sm:$0xff] }
 0x1a7   : > { %4132 = vmatmul.mubr.msk.bf16.gmra.mrb[32].mxu1 %vm389_vm3, %v1063_v58  ;;  %v2749_v58 = vld [vmem:[%s5448_s4 + $0xaf] sm:$0xff] }
 0x1a8   : > { %4480 = vmatmul.mubr.msk.bf16.gmra.mrb[68].mxu0 %vm389_vm3, %v2444_v59  ;;  %4135 = vmatprep.mubr.msk.bf16.mxu1 %vm5373_vm2, %v5372_v3  ;;  %v1073_v59 = vpack.c.bf16 %v1054_v56, %v1053_v55  ;;  %v2778_v60 = vpack.c.bf16 %v2749_v58, %v2748_v57  ;;  %v2769_v55 = vld [vmem:[%s5448_s4 + $0x14f] sm:$0xff] }
 0x1a9   : > { %4483 = vmatprep.mubr.msk.bf16.mxu0 %vm5373_vm2, %v5372_v3  ;;  %v1380_v58 = vld [vmem:[%s5448_s4 + $0xb3] sm:$0xff] }
 0x1af   : > { %4136 = vmatmul.mubr.msk.bf16.gmra.mrb[36].mxu1 %vm389_vm3, %v1064_v0  ;;  %v2751_v0 = vld [vmem:[%s5448_s4 + $0xbf] sm:$0xff] }
 0x1b0   : > { %4484 = vmatmul.mubr.msk.bf16.gmra.mrb[72].mxu0 %vm389_vm3, %v2445_v1  ;;  %4139 = vmatprep.mubr.msk.bf16.mxu1 %vm5373_vm2, %v5372_v3  ;;  %v1398_v1 = vpack.c.bf16 %v1361_v62, %v1360_v61  ;;  %v2779_v2 = vpack.c.bf16 %v2751_v0, %v2750_v63  ;;  %v3076_v61 = vld [vmem:[%s5448_s4 + $0x30] sm:$0xff]  ;;  %v1382_v0 = vld [vmem:[%s5448_s4 + $0xc3] sm:$0xff] }
 0x1b1   : > { %4489 = vmatprep.mubr.msk.bf16.mxu0 %vm5373_vm2, %v5372_v3 }
 0x1b7   : > { %4140 = vmatmul.mubr.msk.bf16.gmra.mrb[40].mxu1 %vm389_vm3, %v1065_v9  ;;  %v2780_v9 = vpack.c.bf16 %v2753_v7, %v2752_v6  ;;  %v1384_v7 = vld [vmem:[%s5448_s4 + $0xd3] sm:$0xff] }
 0x1b8   : > { %4490 = vmatmul.mubr.msk.bf16.vlgmr.msra.gmra.mrb[0].mxu0 %vm389_vm3, %v2770_v10  ;;  %4143 = vmatprep.mubr.msk.bf16.mxu1 %vm5373_vm2, %v5372_v3  ;;  %v1364_v10 = vld [vmem:[%s5448_s4 + $0x33] sm:$0xff] }
 0x1b9   : > { %4566 = vmatpush3.bf16.msra.mxu0 %v3193_v11  ;;  %4493 = vmatprep.mubr.msk.bf16.mxu0 %vm5373_vm2, %v5372_v3  ;;  %v2754_v11 = vld [vmem:[%s5448_s4 + $0xd7] sm:$0xff] }
 0x1ba   : > { %v2781_v15 = vpack.c.bf16 %v2755_v12, %v2754_v11  ;;  %v1386_v12 = vld [vmem:[%s5448_s4 + $0xe3] sm:$0xff] }
 0x1bf   : > { %4144 = vmatmul.mubr.msk.bf16.gmra.mrb[44].mxu1 %vm389_vm3, %v1066_v17  ;;  %v1367_v17 = vld [vmem:[%s5448_s4 + $0x4b] sm:$0xff] }
 0x1c0   : > { %4494 = vmatmul.mubr.msk.bf16.gmra.mrb[4].mxu0 %vm389_vm3, %v2771_v18  ;;  %4147 = vmatprep.mubr.msk.bf16.mxu1 %vm5373_vm2, %v5372_v3  ;;  %v2756_v18 = vld [vmem:[%s5448_s4 + $0xe7] sm:$0xff]  ;;  %v1401_v20 = vpack.c.bf16 %v1367_v17, %v1366_v16 }
 0x1c1   : > { %4497 = vmatprep.mubr.msk.bf16.mxu0 %vm5373_vm2, %v5372_v3  ;;  %v2782_v21 = vpack.c.bf16 %v2757_v19, %v2756_v18  ;;  %v3082_v16 = vld [vmem:[%s5448_s4 + $0x60] sm:$0xff]  ;;  %v1388_v19 = vld [vmem:[%s5448_s4 + $0xf3] sm:$0xff] }
 0x1c7   : > { %4148 = vmatmul.mubr.msk.bf16.gmra.mrb[48].mxu1 %vm389_vm3, %v1067_v23  ;;  %v1369_v23 = vld [vmem:[%s5448_s4 + $0x5b] sm:$0xff] }
 0x1c8   : > { %4498 = vmatmul.mubr.msk.bf16.gmra.mrb[8].mxu0 %vm389_vm3, %v2772_v24  ;;  %4151 = vmatprep.mubr.msk.bf16.mxu1 %vm5373_vm2, %v5372_v3  ;;  %v2758_v24 = vld [vmem:[%s5448_s4 + $0xf7] sm:$0xff]  ;;  %v1402_v26 = vpack.c.bf16 %v1369_v23, %v1368_v22 }
 0x1c9   : > { %4501 = vmatprep.mubr.msk.bf16.mxu0 %vm5373_vm2, %v5372_v3  ;;  %v2783_v27 = vpack.c.bf16 %v2759_v25, %v2758_v24  ;;  %v3084_v22 = vld [vmem:[%s5448_s4 + $0x70] sm:$0xff]  ;;  %v1390_v25 = vld [vmem:[%s5448_s4 + $0x103] sm:$0xff] }
 0x1cf   : > { %4152 = vmatmul.mubr.msk.bf16.gmra.mrb[52].mxu1 %vm389_vm3, %v1068_v29  ;;  %v1371_v29 = vld [vmem:[%s5448_s4 + $0x6b] sm:$0xff] }
 0x1d0   : > { %4502 = vmatmul.mubr.msk.bf16.gmra.mrb[12].mxu0 %vm389_vm3, %v2773_v30  ;;  %4155 = vmatprep.mubr.msk.bf16.mxu1 %vm5373_vm2, %v5372_v3  ;;  %v2760_v30 = vld [vmem:[%s5448_s4 + $0x107] sm:$0xff]  ;;  %v1403_v32 = vpack.c.bf16 %v1371_v29, %v1370_v28 }
 0x1d1   : > { %4505 = vmatprep.mubr.msk.bf16.mxu0 %vm5373_vm2, %v5372_v3  ;;  %v2784_v33 = vpack.c.bf16 %v2761_v31, %v2760_v30  ;;  %v3086_v28 = vld [vmem:[%s5448_s4 + $0x80] sm:$0xff]  ;;  %v1392_v31 = vld [vmem:[%s5448_s4 + $0x113] sm:$0xff] }
 0x1d7   : > { %4156 = vmatmul.mubr.msk.bf16.gmra.mrb[56].mxu1 %vm389_vm3, %v1069_v35  ;;  %v1373_v35 = vld [vmem:[%s5448_s4 + $0x7b] sm:$0xff] }
 0x1d8   : > { %4506 = vmatmul.mubr.msk.bf16.gmra.mrb[16].mxu0 %vm389_vm3, %v2774_v36  ;;  %4159 = vmatprep.mubr.msk.bf16.mxu1 %vm5373_vm2, %v5372_v3  ;;  %v2762_v36 = vld [vmem:[%s5448_s4 + $0x117] sm:$0xff]  ;;  %v1404_v38 = vpack.c.bf16 %v1373_v35, %v1372_v34 }
 0x1d9   : > { %4509 = vmatprep.mubr.msk.bf16.mxu0 %vm5373_vm2, %v5372_v3  ;;  %v2785_v39 = vpack.c.bf16 %v2763_v37, %v2762_v36  ;;  %v3088_v34 = vld [vmem:[%s5448_s4 + $0x90] sm:$0xff]  ;;  %v1394_v37 = vld [vmem:[%s5448_s4 + $0x123] sm:$0xff] }
 0x1df   : > { %4160 = vmatmul.mubr.msk.bf16.gmra.mrb[60].mxu1 %vm389_vm3, %v1070_v41  ;;  %v1375_v41 = vld [vmem:[%s5448_s4 + $0x8b] sm:$0xff] }
 0x1e0   : > { %4510 = vmatmul.mubr.msk.bf16.gmra.mrb[20].mxu0 %vm389_vm3, %v2775_v42  ;;  %4163 = vmatprep.mubr.msk.bf16.mxu1 %vm5373_vm2, %v5372_v3  ;;  %v2764_v42 = vld [vmem:[%s5448_s4 + $0x127] sm:$0xff]  ;;  %v1405_v44 = vpack.c.bf16 %v1375_v41, %v1374_v40 }
 0x1e1   : > { %4513 = vmatprep.mubr.msk.bf16.mxu0 %vm5373_vm2, %v5372_v3  ;;  %v2786_v45 = vpack.c.bf16 %v2765_v43, %v2764_v42  ;;  %v3090_v40 = vld [vmem:[%s5448_s4 + $0xa0] sm:$0xff]  ;;  %v1396_v43 = vld [vmem:[%s5448_s4 + $0x133] sm:$0xff] }
 0x1e7   : > { %4164 = vmatmul.mubr.msk.bf16.gmra.mrb[64].mxu1 %vm389_vm3, %v1071_v47  ;;  %v1377_v47 = vld [vmem:[%s5448_s4 + $0x9b] sm:$0xff] }
 0x1e8   : > { %4514 = vmatmul.mubr.msk.bf16.gmra.mrb[24].mxu0 %vm389_vm3, %v2776_v48  ;;  %4167 = vmatprep.mubr.msk.bf16.mxu1 %vm5373_vm2, %v5372_v3  ;;  %v2766_v48 = vld [vmem:[%s5448_s4 + $0x137] sm:$0xff]  ;;  %v1406_v50 = vpack.c.bf16 %v1377_v47, %v1376_v46 }
 0x1e9   : > { %4517 = vmatprep.mubr.msk.bf16.mxu0 %vm5373_vm2, %v5372_v3  ;;  %v2787_v51 = vpack.c.bf16 %v2767_v49, %v2766_v48  ;;  %v3092_v46 = vld [vmem:[%s5448_s4 + $0xb0] sm:$0xff] }
 0x1ea   : > { %v1723_v49 = vld [vmem:[%s5448_s4 + $0xb4] sm:$0xff] }
 0x1ef   : > { %4168 = vmatmul.mubr.msk.bf16.gmra.mrb[68].mxu1 %vm389_vm3, %v1072_v53  ;;  %v1379_v53 = vld [vmem:[%s5448_s4 + $0xab] sm:$0xff] }
 0x1f0   : > { %4518 = vmatmul.mubr.msk.bf16.gmra.mrb[28].mxu0 %vm389_vm3, %v2777_v54  ;;  %4171 = vmatprep.mubr.msk.bf16.mxu1 %vm5373_vm2, %v5372_v3  ;;  %v2768_v54 = vld [vmem:[%s5448_s4 + $0x147] sm:$0xff]  ;;  %v1407_v56 = vpack.c.bf16 %v1379_v53, %v1378_v52 }
 0x1f1   : > { %4521 = vmatprep.mubr.msk.bf16.mxu0 %vm5373_vm2, %v5372_v3  ;;  %v2788_v57 = vpack.c.bf16 %v2769_v55, %v2768_v54  ;;  %v3094_v52 = vld [vmem:[%s5448_s4 + $0xc0] sm:$0xff] }
 0x1f2   : > { %v1725_v55 = vld [vmem:[%s5448_s4 + $0xc4] sm:$0xff] }
 0x1f7   : > { %4172 = vmatmul.mubr.msk.bf16.gmra.mrb[72].mxu1 %vm389_vm3, %v1073_v59  ;;  %v1381_v59 = vld [vmem:[%s5448_s4 + $0xbb] sm:$0xff] }
 0x1f8   : > { %4522 = vmatmul.mubr.msk.bf16.gmra.mrb[32].mxu0 %vm389_vm3, %v2778_v60  ;;  %4177 = vmatprep.mubr.msk.bf16.mxu1 %vm5373_vm2, %v5372_v3  ;;  %v3075_v60 = vld [vmem:[%s5448_s4 + $0x28] sm:$0xff]  ;;  %v1408_v62 = vpack.c.bf16 %v1381_v59, %v1380_v58  ;;  %v3096_v58 = vld [vmem:[%s5448_s4 + $0xd0] sm:$0xff] }
 0x1f9   : > { %4525 = vmatprep.mubr.msk.bf16.mxu0 %vm5373_vm2, %v5372_v3  ;;  %v3113_v63 = vpack.c.bf16 %v3076_v61, %v3075_v60  ;;  %v1727_v61 = vld [vmem:[%s5448_s4 + $0xd4] sm:$0xff] }
 0x1ff   : > { %4178 = vmatmul.mubr.msk.bf16.vlgmr.msra.gmra.mrb[0].mxu1 %vm389_vm3, %v1398_v1  ;;  %v1383_v1 = vld [vmem:[%s5448_s4 + $0xcb] sm:$0xff] }
 0x200   : > { %4526 = vmatmul.mubr.msk.bf16.gmra.mrb[36].mxu0 %vm389_vm3, %v2779_v2  ;;  %4181 = vmatprep.mubr.msk.bf16.mxu1 %vm5373_vm2, %v5372_v3  ;;  %v3077_v2 = vld [vmem:[%s5448_s4 + $0x38] sm:$0xff]  ;;  %v1409_v5 = vpack.c.bf16 %v1383_v1, %v1382_v0  ;;  %v3098_v0 = vld [vmem:[%s5448_s4 + $0xe0] sm:$0xff] }
 0x201   : > { %4644 = vmatpush3.bf16.msra.mxu1 %v5557_v14  ;;  %4529 = vmatprep.mubr.msk.bf16.mxu0 %vm5373_vm2, %v5372_v3  ;;  %v1365_v14 = vld [vmem:[%s5448_s4 + $0x3b] sm:$0xff]  ;;  %v3114_v6 = vpack.c.bf16 %v3078_v4, %v3077_v2  ;;  %v1729_v4 = vld [vmem:[%s5448_s4 + $0xe4] sm:$0xff] }
 0x202   : > { %v1400_v13 = vpack.c.bf16 %v1365_v14, %v1364_v10  ;;  %v3080_v10 = vld [vmem:[%s5448_s4 + $0x50] sm:$0xff] }
 0x207   : > { %4182 = vmatmul.mubr.msk.bf16.gmra.mrb[4].mxu1 %vm389_vm3, %v1399_v8  ;;  %v1385_v8 = vld [vmem:[%s5448_s4 + $0xdb] sm:$0xff] }
 0x208   : > { %4530 = vmatmul.mubr.msk.bf16.gmra.mrb[40].mxu0 %vm389_vm3, %v2780_v9  ;;  %4185 = vmatprep.mubr.msk.bf16.mxu1 %vm5373_vm2, %v5372_v3  ;;  %v3079_v9 = vld [vmem:[%s5448_s4 + $0x48] sm:$0xff]  ;;  %v1410_v14 = vpack.c.bf16 %v1385_v8, %v1384_v7  ;;  %v3100_v7 = vld [vmem:[%s5448_s4 + $0xf0] sm:$0xff] }
 0x209   : > { %4533 = vmatprep.mubr.msk.bf16.mxu0 %vm5373_vm2, %v5372_v3  ;;  %v3115_v11 = vpack.c.bf16 %v3080_v10, %v3079_v9  ;;  %v1731_v10 = vld [vmem:[%s5448_s4 + $0xf4] sm:$0xff] }
 0x20f   : > { %4186 = vmatmul.mubr.msk.bf16.gmra.mrb[8].mxu1 %vm389_vm3, %v1400_v13  ;;  %v1387_v13 = vld [vmem:[%s5448_s4 + $0xeb] sm:$0xff] }
 0x210   : > { %4534 = vmatmul.mubr.msk.bf16.gmra.mrb[44].mxu0 %vm389_vm3, %v2781_v15  ;;  %4189 = vmatprep.mubr.msk.bf16.mxu1 %vm5373_vm2, %v5372_v3  ;;  %v3081_v15 = vld [vmem:[%s5448_s4 + $0x58] sm:$0xff]  ;;  %v1411_v17 = vpack.c.bf16 %v1387_v13, %v1386_v12  ;;  %v3102_v12 = vld [vmem:[%s5448_s4 + $0x100] sm:$0xff] }
 0x211   : > { %4537 = vmatprep.mubr.msk.bf16.mxu0 %vm5373_vm2, %v5372_v3  ;;  %v3116_v18 = vpack.c.bf16 %v3082_v16, %v3081_v15  ;;  %v1733_v16 = vld [vmem:[%s5448_s4 + $0x104] sm:$0xff] }
 0x217   : > { %4190 = vmatmul.mubr.msk.bf16.gmra.mrb[12].mxu1 %vm389_vm3, %v1401_v20  ;;  %v1389_v20 = vld [vmem:[%s5448_s4 + $0xfb] sm:$0xff] }
 0x218   : > { %4538 = vmatmul.mubr.msk.bf16.gmra.mrb[48].mxu0 %vm389_vm3, %v2782_v21  ;;  %4193 = vmatprep.mubr.msk.bf16.mxu1 %vm5373_vm2, %v5372_v3  ;;  %v3083_v21 = vld [vmem:[%s5448_s4 + $0x68] sm:$0xff]  ;;  %v1412_v23 = vpack.c.bf16 %v1389_v20, %v1388_v19  ;;  %v3104_v19 = vld [vmem:[%s5448_s4 + $0x110] sm:$0xff] }
 0x219   : > { %4541 = vmatprep.mubr.msk.bf16.mxu0 %vm5373_vm2, %v5372_v3  ;;  %v3117_v24 = vpack.c.bf16 %v3084_v22, %v3083_v21  ;;  %v1735_v22 = vld [vmem:[%s5448_s4 + $0x114] sm:$0xff] }
 0x21f   : > { %4194 = vmatmul.mubr.msk.bf16.gmra.mrb[16].mxu1 %vm389_vm3, %v1402_v26  ;;  %v1391_v26 = vld [vmem:[%s5448_s4 + $0x10b] sm:$0xff] }
 0x220   : > { %4542 = vmatmul.mubr.msk.bf16.gmra.mrb[52].mxu0 %vm389_vm3, %v2783_v27  ;;  %4197 = vmatprep.mubr.msk.bf16.mxu1 %vm5373_vm2, %v5372_v3  ;;  %v3085_v27 = vld [vmem:[%s5448_s4 + $0x78] sm:$0xff]  ;;  %v1413_v29 = vpack.c.bf16 %v1391_v26, %v1390_v25  ;;  %v3106_v25 = vld [vmem:[%s5448_s4 + $0x120] sm:$0xff] }
 0x221   : > { %4545 = vmatprep.mubr.msk.bf16.mxu0 %vm5373_vm2, %v5372_v3  ;;  %v3118_v30 = vpack.c.bf16 %v3086_v28, %v3085_v27  ;;  %v1737_v28 = vld [vmem:[%s5448_s4 + $0x124] sm:$0xff] }
 0x227   : > { %4198 = vmatmul.mubr.msk.bf16.gmra.mrb[20].mxu1 %vm389_vm3, %v1403_v32  ;;  %v1393_v32 = vld [vmem:[%s5448_s4 + $0x11b] sm:$0xff] }
 0x228   : > { %4546 = vmatmul.mubr.msk.bf16.gmra.mrb[56].mxu0 %vm389_vm3, %v2784_v33  ;;  %4201 = vmatprep.mubr.msk.bf16.mxu1 %vm5373_vm2, %v5372_v3  ;;  %v3087_v33 = vld [vmem:[%s5448_s4 + $0x88] sm:$0xff]  ;;  %v1414_v35 = vpack.c.bf16 %v1393_v32, %v1392_v31  ;;  %v3108_v31 = vld [vmem:[%s5448_s4 + $0x130] sm:$0xff] }
 0x229   : > { %4549 = vmatprep.mubr.msk.bf16.mxu0 %vm5373_vm2, %v5372_v3  ;;  %v3119_v36 = vpack.c.bf16 %v3088_v34, %v3087_v33  ;;  %v1739_v34 = vld [vmem:[%s5448_s4 + $0x134] sm:$0xff] }
 0x22f   : > { %4202 = vmatmul.mubr.msk.bf16.gmra.mrb[24].mxu1 %vm389_vm3, %v1404_v38  ;;  %v1395_v38 = vld [vmem:[%s5448_s4 + $0x12b] sm:$0xff] }
 0x230   : > { %4550 = vmatmul.mubr.msk.bf16.gmra.mrb[60].mxu0 %vm389_vm3, %v2785_v39  ;;  %4205 = vmatprep.mubr.msk.bf16.mxu1 %vm5373_vm2, %v5372_v3  ;;  %v3089_v39 = vld [vmem:[%s5448_s4 + $0x98] sm:$0xff]  ;;  %v1415_v41 = vpack.c.bf16 %v1395_v38, %v1394_v37  ;;  %v3110_v37 = vld [vmem:[%s5448_s4 + $0x140] sm:$0xff] }
 0x231   : > { %4553 = vmatprep.mubr.msk.bf16.mxu0 %vm5373_vm2, %v5372_v3  ;;  %v3120_v42 = vpack.c.bf16 %v3090_v40, %v3089_v39 }
 0x237   : > { %4206 = vmatmul.mubr.msk.bf16.gmra.mrb[28].mxu1 %vm389_vm3, %v1405_v44  ;;  %v1397_v44 = vld [vmem:[%s5448_s4 + $0x13b] sm:$0xff] }
 0x238   : > { %4554 = vmatmul.mubr.msk.bf16.gmra.mrb[64].mxu0 %vm389_vm3, %v2786_v45  ;;  %4209 = vmatprep.mubr.msk.bf16.mxu1 %vm5373_vm2, %v5372_v3  ;;  %v3091_v45 = vld [vmem:[%s5448_s4 + $0xa8] sm:$0xff]  ;;  %v1416_v47 = vpack.c.bf16 %v1397_v44, %v1396_v43 }
 0x239   : > { %4557 = vmatprep.mubr.msk.bf16.mxu0 %vm5373_vm2, %v5372_v3  ;;  %v3121_v48 = vpack.c.bf16 %v3092_v46, %v3091_v45  ;;  %v3111_v44 = vld [vmem:[%s5448_s4 + $0x148] sm:$0xff]  ;;  %v3112_v45 = vld [vmem:[%s5448_s4 + $0x150] sm:$0xff] }
 0x23f   : > { %4210 = vmatmul.mubr.msk.bf16.gmra.mrb[32].mxu1 %vm389_vm3, %v1406_v50  ;;  %v1724_v50 = vld [vmem:[%s5448_s4 + $0xbc] sm:$0xff] }
 0x240   : > { %4558 = vmatmul.mubr.msk.bf16.gmra.mrb[68].mxu0 %vm389_vm3, %v2787_v51  ;;  %4213 = vmatprep.mubr.msk.bf16.mxu1 %vm5373_vm2, %v5372_v3  ;;  %v3093_v51 = vld [vmem:[%s5448_s4 + $0xb8] sm:$0xff]  ;;  %v1751_v53 = vpack.c.bf16 %v1724_v50, %v1723_v49 }
 0x241   : > { %4561 = vmatprep.mubr.msk.bf16.mxu0 %vm5373_vm2, %v5372_v3  ;;  %v3122_v54 = vpack.c.bf16 %v3094_v52, %v3093_v51 }
 0x247   : > { %4214 = vmatmul.mubr.msk.bf16.gmra.mrb[36].mxu1 %vm389_vm3, %v1407_v56  ;;  %v1726_v56 = vld [vmem:[%s5448_s4 + $0xcc] sm:$0xff] }
 0x248   : > { %4562 = vmatmul.mubr.msk.bf16.gmra.mrb[72].mxu0 %vm389_vm3, %v2788_v57  ;;  %4217 = vmatprep.mubr.msk.bf16.mxu1 %vm5373_vm2, %v5372_v3  ;;  %v3095_v57 = vld [vmem:[%s5448_s4 + $0xc8] sm:$0xff]  ;;  %v1752_v59 = vpack.c.bf16 %v1726_v56, %v1725_v55 }
 0x249   : > { %4567 = vmatprep.mubr.msk.bf16.mxu0 %vm5373_vm2, %v5372_v3  ;;  %v3123_v60 = vpack.c.bf16 %v3096_v58, %v3095_v57 }
 0x24f   : > { %4218 = vmatmul.mubr.msk.bf16.gmra.mrb[40].mxu1 %vm389_vm3, %v1408_v62  ;;  %v1728_v62 = vld [vmem:[%s5448_s4 + $0xdc] sm:$0xff] }
 0x250   : > { %4568 = vmatmul.mubr.msk.bf16.vlgmr.msra.gmra.mrb[0].mxu0 %vm389_vm3, %v3113_v63  ;;  %4221 = vmatprep.mubr.msk.bf16.mxu1 %vm5373_vm2, %v5372_v3  ;;  %v3097_v63 = vld [vmem:[%s5448_s4 + $0xd8] sm:$0xff]  ;;  %v1753_v1 = vpack.c.bf16 %v1728_v62, %v1727_v61 }
 0x251   : > { %4571 = vmatprep.mubr.msk.bf16.mxu0 %vm5373_vm2, %v5372_v3  ;;  %v3124_v2 = vpack.c.bf16 %v3098_v0, %v3097_v63 }
 0x257   : > { %4222 = vmatmul.mubr.msk.bf16.gmra.mrb[44].mxu1 %vm389_vm3, %v1409_v5  ;;  %v1730_v5 = vld [vmem:[%s5448_s4 + $0xec] sm:$0xff] }
 0x258   : > { %4572 = vmatmul.mubr.msk.bf16.gmra.mrb[4].mxu0 %vm389_vm3, %v3114_v6  ;;  %4225 = vmatprep.mubr.msk.bf16.mxu1 %vm5373_vm2, %v5372_v3  ;;  %v3099_v6 = vld [vmem:[%s5448_s4 + $0xe8] sm:$0xff]  ;;  %v1754_v8 = vpack.c.bf16 %v1730_v5, %v1729_v4 }
 0x259   : > { %4575 = vmatprep.mubr.msk.bf16.mxu0 %vm5373_vm2, %v5372_v3  ;;  %v3125_v9 = vpack.c.bf16 %v3100_v7, %v3099_v6 }
 0x25f   : > { %4226 = vmatmul.mubr.msk.bf16.gmra.mrb[48].mxu1 %vm389_vm3, %v1410_v14  ;;  %v1732_v14 = vld [vmem:[%s5448_s4 + $0xfc] sm:$0xff] }
 0x260   : > { %4576 = vmatmul.mubr.msk.bf16.gmra.mrb[8].mxu0 %vm389_vm3, %v3115_v11  ;;  %4229 = vmatprep.mubr.msk.bf16.mxu1 %vm5373_vm2, %v5372_v3  ;;  %v3101_v11 = vld [vmem:[%s5448_s4 + $0xf8] sm:$0xff]  ;;  %v1755_v13 = vpack.c.bf16 %v1732_v14, %v1731_v10 }
 0x261   : > { %4579 = vmatprep.mubr.msk.bf16.mxu0 %vm5373_vm2, %v5372_v3  ;;  %v3126_v15 = vpack.c.bf16 %v3102_v12, %v3101_v11 }
 0x267   : > { %4230 = vmatmul.mubr.msk.bf16.gmra.mrb[52].mxu1 %vm389_vm3, %v1411_v17  ;;  %v1734_v17 = vld [vmem:[%s5448_s4 + $0x10c] sm:$0xff] }
 0x268   : > { %4580 = vmatmul.mubr.msk.bf16.gmra.mrb[12].mxu0 %vm389_vm3, %v3116_v18  ;;  %4233 = vmatprep.mubr.msk.bf16.mxu1 %vm5373_vm2, %v5372_v3  ;;  %v3103_v18 = vld [vmem:[%s5448_s4 + $0x108] sm:$0xff]  ;;  %v1756_v20 = vpack.c.bf16 %v1734_v17, %v1733_v16 }
 0x269   : > { %4583 = vmatprep.mubr.msk.bf16.mxu0 %vm5373_vm2, %v5372_v3  ;;  %v3127_v21 = vpack.c.bf16 %v3104_v19, %v3103_v18  ;;  %v292_v19 = vld [vmem:[%s5459_s24] sm:$0xff] }
 0x26f   : > { %4234 = vmatmul.mubr.msk.bf16.gmra.mrb[56].mxu1 %vm389_vm3, %v1412_v23  ;;  %v1736_v23 = vld [vmem:[%s5448_s4 + $0x11c] sm:$0xff] }
 0x270   : > { %4584 = vmatmul.mubr.msk.bf16.gmra.mrb[16].mxu0 %vm389_vm3, %v3117_v24  ;;  %4237 = vmatprep.mubr.msk.bf16.mxu1 %vm5373_vm2, %v5372_v3  ;;  %v3105_v24 = vld [vmem:[%s5448_s4 + $0x118] sm:$0xff]  ;;  %v1757_v26 = vpack.c.bf16 %v1736_v23, %v1735_v22 }
 0x271   : > { %4587 = vmatprep.mubr.msk.bf16.mxu0 %vm5373_vm2, %v5372_v3  ;;  %v3128_v27 = vpack.c.bf16 %v3106_v25, %v3105_v24 }
 0x277   : > { %4238 = vmatmul.mubr.msk.bf16.gmra.mrb[60].mxu1 %vm389_vm3, %v1413_v29  ;;  %v1738_v29 = vld [vmem:[%s5448_s4 + $0x12c] sm:$0xff] }
 0x278   : > { %4588 = vmatmul.mubr.msk.bf16.gmra.mrb[20].mxu0 %vm389_vm3, %v3118_v30  ;;  %4241 = vmatprep.mubr.msk.bf16.mxu1 %vm5373_vm2, %v5372_v3  ;;  %v3107_v30 = vld [vmem:[%s5448_s4 + $0x128] sm:$0xff]  ;;  %v1758_v32 = vpack.c.bf16 %v1738_v29, %v1737_v28  ;;  %v294_v29 = vld [vmem:[%s5459_s24 + $0x10] sm:$0xff] }
 0x279   : > { %4591 = vmatprep.mubr.msk.bf16.mxu0 %vm5373_vm2, %v5372_v3  ;;  %v3129_v33 = vpack.c.bf16 %v3108_v31, %v3107_v30  ;;  %v295_v30 = vld [vmem:[%s5459_s24 + $0x18] sm:$0xff] }
 0x27f   : > { %4242 = vmatmul.mubr.msk.bf16.gmra.mrb[64].mxu1 %vm389_vm3, %v1414_v35  ;;  %v1740_v35 = vld [vmem:[%s5448_s4 + $0x13c] sm:$0xff] }
 0x280   : > { %4592 = vmatmul.mubr.msk.bf16.gmra.mrb[24].mxu0 %vm389_vm3, %v3119_v36  ;;  %4245 = vmatprep.mubr.msk.bf16.mxu1 %vm5373_vm2, %v5372_v3  ;;  %v3109_v36 = vld [vmem:[%s5448_s4 + $0x138] sm:$0xff]  ;;  %v1759_v40 = vpack.c.bf16 %v1740_v35, %v1739_v34 }
 0x281   : > { %4595 = vmatprep.mubr.msk.bf16.mxu0 %vm5373_vm2, %v5372_v3 }
 0x287   : > { %4246 = vmatmul.mubr.msk.bf16.gmra.mrb[68].mxu1 %vm389_vm3, %v1415_v41  ;;  %v3130_v41 = vpack.c.bf16 %v3110_v37, %v3109_v36 }
 0x288   : > { %4596 = vmatmul.mubr.msk.bf16.gmra.mrb[28].mxu0 %vm389_vm3, %v3120_v42  ;;  %4249 = vmatprep.mubr.msk.bf16.mxu1 %vm5373_vm2, %v5372_v3 }
 0x289   : > { %4599 = vmatprep.mubr.msk.bf16.mxu0 %vm5373_vm2, %v5372_v3 }
 0x28f   : > { %4250 = vmatmul.mubr.msk.bf16.gmra.mrb[72].mxu1 %vm389_vm3, %v1416_v47 }
 0x290   : > { %4600 = vmatmul.mubr.msk.bf16.gmra.mrb[32].mxu0 %vm389_vm3, %v3121_v48  ;;  %4295 = vmatprep.mubr.msk.bf16.mxu1 %vm5373_vm2, %v5372_v3  ;;  %v3131_v48 = vpack.c.bf16 %v3112_v45, %v3111_v44 }
 0x291   : > { %4603 = vmatprep.mubr.msk.bf16.mxu0 %vm5373_vm2, %v5372_v3 }
 0x297   : > { %4296 = vmatmul.mubr.msk.bf16.vlgmr.msra.gmra.mrb[40].mxu1 %vm389_vm3, %v1751_v53 }
 0x298   : > { %4604 = vmatmul.mubr.msk.bf16.gmra.mrb[36].mxu0 %vm389_vm3, %v3122_v54  ;;  %4299 = vmatprep.mubr.msk.bf16.mxu1 %vm5373_vm2, %v5372_v3 }
 0x299   : > { %4607 = vmatprep.mubr.msk.bf16.mxu0 %vm5373_vm2, %v5372_v3 }
 0x29f   : > { %4300 = vmatmul.mubr.msk.bf16.gmra.mrb[44].mxu1 %vm389_vm3, %v1752_v59 }
 0x2a0   : > { %4608 = vmatmul.mubr.msk.bf16.gmra.mrb[40].mxu0 %vm389_vm3, %v3123_v60  ;;  %4303 = vmatprep.mubr.msk.bf16.mxu1 %vm5373_vm2, %v5372_v3 }
 0x2a1   : > { %4611 = vmatprep.mubr.msk.bf16.mxu0 %vm5373_vm2, %v5372_v3 }
 0x2a7   : > { %4304 = vmatmul.mubr.msk.bf16.gmra.mrb[48].mxu1 %vm389_vm3, %v1753_v1 }
 0x2a8   : > { %4612 = vmatmul.mubr.msk.bf16.gmra.mrb[44].mxu0 %vm389_vm3, %v3124_v2  ;;  %4307 = vmatprep.mubr.msk.bf16.mxu1 %vm5373_vm2, %v5372_v3 }
 0x2a9   : > { %4615 = vmatprep.mubr.msk.bf16.mxu0 %vm5373_vm2, %v5372_v3 }
 0x2af   : > { %4308 = vmatmul.mubr.msk.bf16.gmra.mrb[52].mxu1 %vm389_vm3, %v1754_v8 }
 0x2b0   : > { %4616 = vmatmul.mubr.msk.bf16.gmra.mrb[48].mxu0 %vm389_vm3, %v3125_v9  ;;  %4311 = vmatprep.mubr.msk.bf16.mxu1 %vm5373_vm2, %v5372_v3 }
 0x2b1   : > { %4619 = vmatprep.mubr.msk.bf16.mxu0 %vm5373_vm2, %v5372_v3 }
 0x2b7   : > { %4312 = vmatmul.mubr.msk.bf16.gmra.mrb[56].mxu1 %vm389_vm3, %v1755_v13 }
 0x2b8   : > { %4620 = vmatmul.mubr.msk.bf16.gmra.mrb[52].mxu0 %vm389_vm3, %v3126_v15  ;;  %4315 = vmatprep.mubr.msk.bf16.mxu1 %vm5373_vm2, %v5372_v3 }
 0x2b9   : > { %4623 = vmatprep.mubr.msk.bf16.mxu0 %vm5373_vm2, %v5372_v3 }
 0x2bf   : > { %4316 = vmatmul.mubr.msk.bf16.gmra.mrb[60].mxu1 %vm389_vm3, %v1756_v20  ;;  %v293_v20 = vld [vmem:[%s5459_s24 + $0x8] sm:$0xff] }
 0x2c0   : > { %4624 = vmatmul.mubr.msk.bf16.gmra.mrb[56].mxu0 %vm389_vm3, %v3127_v21  ;;  %4319 = vmatprep.mubr.msk.bf16.mxu1 %vm5373_vm2, %v5372_v3 }
 0x2c1   : > { %4627 = vmatprep.mubr.msk.bf16.mxu0 %vm5373_vm2, %v5372_v3 }
 0x2c7   : > { %4320 = vmatmul.mubr.msk.bf16.gmra.mrb[64].mxu1 %vm389_vm3, %v1757_v26 }
 0x2c8   : > { %4628 = vmatmul.mubr.msk.bf16.gmra.mrb[60].mxu0 %vm389_vm3, %v3128_v27  ;;  %4323 = vmatprep.mubr.msk.bf16.mxu1 %vm5373_vm2, %v5372_v3 }
 0x2c9   : > { %4631 = vmatprep.mubr.msk.bf16.mxu0 %vm5373_vm2, %v5372_v3 }
 0x2cf   : > { %4324 = vmatmul.mubr.msk.bf16.gmra.mrb[68].mxu1 %vm389_vm3, %v1758_v32 }
 0x2d0   : > { %4632 = vmatmul.mubr.msk.bf16.gmra.mrb[64].mxu0 %vm389_vm3, %v3129_v33  ;;  %4327 = vmatprep.mubr.msk.bf16.mxu1 %vm5373_vm2, %v5372_v3 }
 0x2d1   : > { %4635 = vmatprep.mubr.msk.bf16.mxu0 %vm5373_vm2, %v5372_v3 }
 0x2d2   : > { %v1514_v38 = vpop.f32.mrb[0].mxu1 }
 0x2d3   : > { %v4179_v39 = vpop.f32.mrb[1].mxu1  ;;  %v4645_v21 = vadd.f32 %v1514_v38, %v292_v19 }
 0x2d4   : > { %v1517_v42 = vpop.f32.mrb[2].mxu1  ;;  %v296_v39 = vld [vmem:[%s5459_s24 + $0x20] sm:$0xff] }
 0x2d5   : > { %v4180_v43 = vpop.f32.mrb[3].mxu1  ;;  %v4647_v23 = vadd.f32 %v1517_v42, %v293_v20 }
 0x2d7   : > { %4328 = vmatmul.mubr.msk.bf16.gmra.mrb[72].mxu1 %vm389_vm3, %v1759_v40  ;;  %v297_v40 = vld [vmem:[%s5459_s24 + $0x28] sm:$0xff] }
 0x2d8   : > { %4636 = vmatmul.mubr.msk.bf16.gmra.mrb[68].mxu0 %vm389_vm3, %v3130_v41 }
 0x2d9   : > { %4639 = vmatprep.mubr.msk.bf16.mxu0 %vm5373_vm2, %v5372_v3 }
 0x2da   : > { %v1522_v46 = vpop.f32.mrb[4].mxu1 }
 0x2db   : > { %v4183_v47 = vpop.f32.mrb[5].mxu1  ;;  %v4649_v31 = vadd.f32 %v1522_v46, %v294_v29 }
 0x2dc   : > { %v1525_v49 = vpop.f32.mrb[6].mxu1 }
 0x2dd   : > { %v4184_v50 = vpop.f32.mrb[7].mxu1  ;;  %v4651_v33 = vadd.f32 %v1525_v49, %v295_v30  ;;  %v298_v49 = vld [vmem:[%s5459_s24 + $0x30] sm:$0xff] }
 0x2de   : > { %v299_v50 = vld [vmem:[%s5459_s24 + $0x38] sm:$0xff] }
 0x2e0   : > { %4640 = vmatmul.mubr.msk.bf16.gmra.mrb[72].mxu0 %vm389_vm3, %v3131_v48 }
 0x2e2   : > { %v1530_v51 = vpop.f32.mrb[8].mxu1 }
 0x2e3   : > { %v4187_v52 = vpop.f32.mrb[9].mxu1  ;;  %v4653_v41 = vadd.f32 %v1530_v51, %v296_v39 }
 0x2e4   : > { %v1533_v53 = vpop.f32.mrb[10].mxu1 }
 0x2e5   : > { %v4188_v54 = vpop.f32.mrb[11].mxu1  ;;  %v4655_v43 = vadd.f32 %v1533_v53, %v297_v40 }
 0x2ea   : > { %v6428_v55 = vpop.f32.mrb[12].mxu1 }
 0x2eb   : > { %v4191_v56 = vpop.f32.mrb[13].mxu1  ;;  %v4657_v52 = vadd.f32 %v6428_v55, %v298_v49  ;;  %v310_v49 = vld [vmem:[%s5459_s24 + $0x90] sm:$0xff] }
 0x2ec   : > { %v6430_v57 = vpop.f32.mrb[14].mxu1 }
 0x2ed   : > { %v4192_v58 = vpop.f32.mrb[15].mxu1  ;;  %v4659_v53 = vadd.f32 %v6430_v57, %v299_v50  ;;  %v311_v50 = vld [vmem:[%s5459_s24 + $0x98] sm:$0xff] }
 0x2f2   : > { %v6432_v3 = vpop.f32.mrb[16].mxu1 }
 0x2f3   : > { %v4195_v59 = vpop.f32.mrb[17].mxu1 }
 0x2f4   : > { %v6434_v60 = vpop.f32.mrb[18].mxu1 }
 0x2f5   : > { %v4196_v61 = vpop.f32.mrb[19].mxu1 }
 0x2fa   : > { %v6436_v62 = vpop.f32.mrb[20].mxu1 }
 0x2fb   : > { %v4199_v63 = vpop.f32.mrb[21].mxu1 }
 0x2fc   : > { %v6438_v0 = vpop.f32.mrb[22].mxu1  ;;  %v300_v63 = vld [vmem:[%s5459_s24 + $0x40] sm:$0xff] }
 0x2fd   : > { %v4200_v1 = vpop.f32.mrb[23].mxu1  ;;  %v4661_v55 = vadd.f32 %v6432_v3, %v300_v63 }
 0x2fe   : > { %v301_v1 = vld [vmem:[%s5459_s24 + $0x48] sm:$0xff] }
 0x2ff   : > { %v4663_v57 = vadd.f32 %v6434_v60, %v301_v1 }
 0x302   : > { %v6440_v2 = vpop.f32.mrb[24].mxu1 }
 0x303   : > { %v4203_v4 = vpop.f32.mrb[25].mxu1 }
 0x304   : > { %v6442_v5 = vpop.f32.mrb[26].mxu1 }
 0x305   : > { %v4204_v6 = vpop.f32.mrb[27].mxu1 }
 0x30a   : > { %v6444_v7 = vpop.f32.mrb[28].mxu1 }
 0x30b   : > { %v4207_v8 = vpop.f32.mrb[29].mxu1 }
 0x30c   : > { %v6446_v9 = vpop.f32.mrb[30].mxu1 }
 0x30d   : > { %v4208_v10 = vpop.f32.mrb[31].mxu1 }
 0x312   : > { %v6448_v14 = vpop.f32.mrb[32].mxu1 }
 0x313   : > { %v4211_v11 = vpop.f32.mrb[33].mxu1 }
 0x314   : > { %v6450_v12 = vpop.f32.mrb[34].mxu1 }
 0x315   : > { %v4212_v13 = vpop.f32.mrb[35].mxu1 }
 0x31a   : > { %v6452_v15 = vpop.f32.mrb[36].mxu1 }
 0x31b   : > { %v4215_v16 = vpop.f32.mrb[37].mxu1 }
 0x31c   : > { %v6454_v17 = vpop.f32.mrb[38].mxu1  ;;  %v302_v16 = vld [vmem:[%s5459_s24 + $0x50] sm:$0xff] }
 0x31d   : > { %v4216_v18 = vpop.f32.mrb[39].mxu1  ;;  %v4665_v3 = vadd.f32 %v6436_v62, %v302_v16 }
 0x31e   : > { %v303_v18 = vld [vmem:[%s5459_s24 + $0x58] sm:$0xff] }
 0x31f   : > { %v4667_v60 = vadd.f32 %v6438_v0, %v303_v18 }
 0x323   : > { %v3229_v22 = vpop.f32.mrb[0].mxu0 }
 0x324   : > { %v4646_v24 = vadd.f32 %v4645_v21, %v3229_v22  ;;  %v4569_v25 = vpop.f32.mrb[1].mxu0 }
 0x325   : > { %v3232_v26 = vpop.f32.mrb[2].mxu0  ;;  %v304_v25 = vld [vmem:[%s5459_s24 + $0x60] sm:$0xff] }
 0x326   : > { %3419 = vst.msk [vmem:[%s5459_s24] sm:$0xff] %vm3418_vm4, %v4646_v24  ;;  %v4648_v27 = vadd.f32 %v4647_v23, %v3232_v26  ;;  %v4570_v28 = vpop.f32.mrb[3].mxu0  ;;  %v305_v26 = vld [vmem:[%s5459_s24 + $0x68] sm:$0xff]  ;;  %v4669_v62 = vadd.f32 %v6440_v2, %v304_v25 }
 0x327   : > { %v4671_v0 = vadd.f32 %v6442_v5, %v305_v26 }
 0x328   : > { %3420 = vst.msk [vmem:[%s5459_s24 + $0x8] sm:$0xff] %vm3418_vm4, %v4648_v27 }
 0x32b   : > { %v3237_v32 = vpop.f32.mrb[4].mxu0 }
 0x32c   : > { %v4650_v34 = vadd.f32 %v4649_v31, %v3237_v32  ;;  %v4573_v35 = vpop.f32.mrb[5].mxu0 }
 0x32d   : > { %v3240_v36 = vpop.f32.mrb[6].mxu0 }
 0x32e   : > { %3421 = vst.msk [vmem:[%s5459_s24 + $0x10] sm:$0xff] %vm3418_vm4, %v4650_v34  ;;  %v4652_v37 = vadd.f32 %v4651_v33, %v3240_v36  ;;  %v4574_v38 = vpop.f32.mrb[7].mxu0  ;;  %v306_v33 = vld [vmem:[%s5459_s24 + $0x70] sm:$0xff]  ;;  %v307_v34 = vld [vmem:[%s5459_s24 + $0x78] sm:$0xff] }
 0x32f   : > { %v4673_v2 = vadd.f32 %v6444_v7, %v306_v33  ;;  %v4675_v5 = vadd.f32 %v6446_v9, %v307_v34 }
 0x330   : > { %3422 = vst.msk [vmem:[%s5459_s24 + $0x18] sm:$0xff] %vm3418_vm4, %v4652_v37 }
 0x333   : > { %v3245_v42 = vpop.f32.mrb[8].mxu0 }
 0x334   : > { %v4654_v44 = vadd.f32 %v4653_v41, %v3245_v42  ;;  %v4577_v45 = vpop.f32.mrb[9].mxu0  ;;  %v308_v41 = vld [vmem:[%s5459_s24 + $0x80] sm:$0xff]  ;;  %v309_v42 = vld [vmem:[%s5459_s24 + $0x88] sm:$0xff] }
 0x335   : > { %v3248_v46 = vpop.f32.mrb[10].mxu0  ;;  %v4677_v7 = vadd.f32 %v6448_v14, %v308_v41  ;;  %v4679_v9 = vadd.f32 %v6450_v12, %v309_v42  ;;  %v4681_v14 = vadd.f32 %v6452_v15, %v310_v49  ;;  %v4683_v12 = vadd.f32 %v6454_v17, %v311_v50  ;;  %v313_v15 = vld [vmem:[%s5459_s24 + $0xa8] sm:$0xff] }
 0x336   : > { %3423 = vst.msk [vmem:[%s5459_s24 + $0x20] sm:$0xff] %vm3418_vm4, %v4654_v44  ;;  %v4656_v47 = vadd.f32 %v4655_v43, %v3248_v46  ;;  %v4578_v48 = vpop.f32.mrb[11].mxu0 }
 0x338   : > { %3424 = vst.msk [vmem:[%s5459_s24 + $0x28] sm:$0xff] %vm3418_vm4, %v4656_v47 }
 0x33b   : > { %v3253_v51 = vpop.f32.mrb[12].mxu0 }
 0x33c   : > { %v4658_v54 = vadd.f32 %v4657_v52, %v3253_v51  ;;  %v4581_v56 = vpop.f32.mrb[13].mxu0 }
 0x33d   : > { %v3256_v58 = vpop.f32.mrb[14].mxu0 }
 0x33e   : > { %3425 = vst.msk [vmem:[%s5459_s24 + $0x30] sm:$0xff] %vm3418_vm4, %v4658_v54  ;;  %v4660_v59 = vadd.f32 %v4659_v53, %v3256_v58  ;;  %v4582_v61 = vpop.f32.mrb[15].mxu0 }
 0x340   : > { %3426 = vst.msk [vmem:[%s5459_s24 + $0x38] sm:$0xff] %vm3418_vm4, %v4660_v59 }
 0x343   : > { %v3261_v4 = vpop.f32.mrb[16].mxu0 }
 0x344   : > { %v4662_v6 = vadd.f32 %v4661_v55, %v3261_v4  ;;  %v4585_v8 = vpop.f32.mrb[17].mxu0  ;;  %v312_v55 = vld [vmem:[%s5459_s24 + $0xa0] sm:$0xff] }
 0x345   : > { %v3264_v10 = vpop.f32.mrb[18].mxu0 }
 0x346   : > { %3427 = vst.msk [vmem:[%s5459_s24 + $0x40] sm:$0xff] %vm3418_vm4, %v4662_v6  ;;  %v4664_v11 = vadd.f32 %v4663_v57, %v3264_v10  ;;  %v4586_v13 = vpop.f32.mrb[19].mxu0 }
 0x348   : > { %3428 = vst.msk [vmem:[%s5459_s24 + $0x48] sm:$0xff] %vm3418_vm4, %v4664_v11 }
 0x34b   : > { %v3269_v19 = vpop.f32.mrb[20].mxu0 }
 0x34c   : > { %v4666_v20 = vadd.f32 %v4665_v3, %v3269_v19  ;;  %v4589_v21 = vpop.f32.mrb[21].mxu0 }
 0x34d   : > { %v3272_v22 = vpop.f32.mrb[22].mxu0 }
 0x34e   : > { %3429 = vst.msk [vmem:[%s5459_s24 + $0x50] sm:$0xff] %vm3418_vm4, %v4666_v20  ;;  %v4668_v23 = vadd.f32 %v4667_v60, %v3272_v22  ;;  %v4590_v24 = vpop.f32.mrb[23].mxu0  ;;  %v314_v60 = vld [vmem:[%s5459_s24 + $0xb0] sm:$0xff]  ;;  %v315_v20 = vld [vmem:[%s5459_s24 + $0xb8] sm:$0xff] }
 0x350   : > { %3430 = vst.msk [vmem:[%s5459_s24 + $0x58] sm:$0xff] %vm3418_vm4, %v4668_v23 }
 0x353   : > { %v3277_v27 = vpop.f32.mrb[24].mxu0 }
 0x354   : > { %v4670_v28 = vadd.f32 %v4669_v62, %v3277_v27  ;;  %v4593_v29 = vpop.f32.mrb[25].mxu0 }
 0x355   : > { %v3280_v30 = vpop.f32.mrb[26].mxu0 }
 0x356   : > { %3431 = vst.msk [vmem:[%s5459_s24 + $0x60] sm:$0xff] %vm3418_vm4, %v4670_v28  ;;  %v4672_v31 = vadd.f32 %v4671_v0, %v3280_v30  ;;  %v4594_v32 = vpop.f32.mrb[27].mxu0 }
 0x357   : > { %v317_v32 = vld [vmem:[%s5459_s24 + $0xc8] sm:$0xff] }
 0x358   : > { %3432 = vst.msk [vmem:[%s5459_s24 + $0x68] sm:$0xff] %vm3418_vm4, %v4672_v31  ;;  %v316_v31 = vld [vmem:[%s5459_s24 + $0xc0] sm:$0xff] }
 0x35b   : > { %v3285_v35 = vpop.f32.mrb[28].mxu0 }
 0x35c   : > { %v4674_v36 = vadd.f32 %v4673_v2, %v3285_v35  ;;  %v4597_v37 = vpop.f32.mrb[29].mxu0 }
 0x35d   : > { %v3288_v38 = vpop.f32.mrb[30].mxu0 }
 0x35e   : > { %3433 = vst.msk [vmem:[%s5459_s24 + $0x70] sm:$0xff] %vm3418_vm4, %v4674_v36  ;;  %v4676_v39 = vadd.f32 %v4675_v5, %v3288_v38  ;;  %v4598_v40 = vpop.f32.mrb[31].mxu0 }
 0x360   : > { %3434 = vst.msk [vmem:[%s5459_s24 + $0x78] sm:$0xff] %vm3418_vm4, %v4676_v39 }
 0x363   : > { %v3293_v43 = vpop.f32.mrb[32].mxu0 }
 0x364   : > { %v4678_v44 = vadd.f32 %v4677_v7, %v3293_v43  ;;  %v4601_v45 = vpop.f32.mrb[33].mxu0  ;;  %v318_v7 = vld [vmem:[%s5459_s24 + $0xd0] sm:$0xff]  ;;  %v319_v43 = vld [vmem:[%s5459_s24 + $0xd8] sm:$0xff] }
 0x365   : > { %v3296_v46 = vpop.f32.mrb[34].mxu0 }
 0x366   : > { %3435 = vst.msk [vmem:[%s5459_s24 + $0x80] sm:$0xff] %vm3418_vm4, %v4678_v44  ;;  %v4680_v47 = vadd.f32 %v4679_v9, %v3296_v46  ;;  %v4602_v48 = vpop.f32.mrb[35].mxu0 }
 0x368   : > { %3436 = vst.msk [vmem:[%s5459_s24 + $0x88] sm:$0xff] %vm3418_vm4, %v4680_v47 }
 0x36a   : > { %v1937_v52 = vpop.f32.mrb[40].mxu1 }
 0x36b   : > { %v3301_v51 = vpop.f32.mrb[36].mxu0  ;;  %v4297_v54 = vpop.f32.mrb[41].mxu1  ;;  %v4685_v4 = vadd.f32 %v1937_v52, %v312_v55 }
 0x36c   : > { %v4682_v53 = vadd.f32 %v4681_v14, %v3301_v51  ;;  %v4605_v56 = vpop.f32.mrb[37].mxu0  ;;  %v1940_v58 = vpop.f32.mrb[42].mxu1  ;;  %v321_v54 = vld [vmem:[%s5459_s24 + $0xe8] sm:$0xff] }
 0x36d   : > { %v3304_v59 = vpop.f32.mrb[38].mxu0  ;;  %v4298_v63 = vpop.f32.mrb[43].mxu1  ;;  %v4687_v6 = vadd.f32 %v1940_v58, %v313_v15 }
 0x36e   : > { %3437 = vst.msk [vmem:[%s5459_s24 + $0x90] sm:$0xff] %vm3418_vm4, %v4682_v53  ;;  %v4684_v61 = vadd.f32 %v4683_v12, %v3304_v59  ;;  %v4606_v1 = vpop.f32.mrb[39].mxu0  ;;  %v320_v53 = vld [vmem:[%s5459_s24 + $0xe0] sm:$0xff] }
 0x370   : > { %3438 = vst.msk [vmem:[%s5459_s24 + $0x98] sm:$0xff] %vm3418_vm4, %v4684_v61 }
 0x372   : > { %v1945_v17 = vpop.f32.mrb[44].mxu1 }
 0x373   : > { %v3309_v57 = vpop.f32.mrb[40].mxu0  ;;  %v4301_v10 = vpop.f32.mrb[45].mxu1  ;;  %v4689_v21 = vadd.f32 %v1945_v17, %v314_v60 }
 0x374   : > { %v4686_v8 = vadd.f32 %v4685_v4, %v3309_v57  ;;  %v4609_v11 = vpop.f32.mrb[41].mxu0  ;;  %v1948_v13 = vpop.f32.mrb[46].mxu1  ;;  %v323_v10 = vld [vmem:[%s5459_s24 + $0xf8] sm:$0xff] }
 0x375   : > { %v3312_v16 = vpop.f32.mrb[42].mxu0  ;;  %v4302_v3 = vpop.f32.mrb[47].mxu1  ;;  %v4691_v24 = vadd.f32 %v1948_v13, %v315_v20 }
 0x376   : > { %3439 = vst.msk [vmem:[%s5459_s24 + $0xa0] sm:$0xff] %vm3418_vm4, %v4686_v8  ;;  %v4688_v18 = vadd.f32 %v4687_v6, %v3312_v16  ;;  %v4610_v19 = vpop.f32.mrb[43].mxu0  ;;  %v322_v8 = vld [vmem:[%s5459_s24 + $0xf0] sm:$0xff] }
 0x378   : > { %3440 = vst.msk [vmem:[%s5459_s24 + $0xa8] sm:$0xff] %vm3418_vm4, %v4688_v18 }
 0x37a   : > { %v1953_v22 = vpop.f32.mrb[48].mxu1 }
 0x37b   : > { %v3317_v23 = vpop.f32.mrb[44].mxu0  ;;  %v4305_v26 = vpop.f32.mrb[49].mxu1  ;;  %v4693_v33 = vadd.f32 %v1953_v22, %v316_v31 }
 0x37c   : > { %v4690_v25 = vadd.f32 %v4689_v21, %v3317_v23  ;;  %v4613_v62 = vpop.f32.mrb[45].mxu0  ;;  %v1956_v27 = vpop.f32.mrb[50].mxu1  ;;  %v325_v26 = vld [vmem:[%s5459_s24 + $0x108] sm:$0xff] }
 0x37d   : > { %v3320_v0 = vpop.f32.mrb[46].mxu0  ;;  %v4306_v29 = vpop.f32.mrb[51].mxu1  ;;  %v4695_v35 = vadd.f32 %v1956_v27, %v317_v32 }
 0x37e   : > { %3441 = vst.msk [vmem:[%s5459_s24 + $0xb0] sm:$0xff] %vm3418_vm4, %v4690_v25  ;;  %v4692_v28 = vadd.f32 %v4691_v24, %v3320_v0  ;;  %v4614_v30 = vpop.f32.mrb[47].mxu0  ;;  %v324_v25 = vld [vmem:[%s5459_s24 + $0x100] sm:$0xff] }
 0x380   : > { %3442 = vst.msk [vmem:[%s5459_s24 + $0xb8] sm:$0xff] %vm3418_vm4, %v4692_v28 }
 0x382   : > { %v1961_v34 = vpop.f32.mrb[52].mxu1 }
 0x383   : > { %v3325_v2 = vpop.f32.mrb[48].mxu0  ;;  %v4309_v36 = vpop.f32.mrb[53].mxu1  ;;  %v4697_v9 = vadd.f32 %v1961_v34, %v318_v7 }
 0x384   : > { %v4694_v5 = vadd.f32 %v4693_v33, %v3325_v2  ;;  %v4617_v37 = vpop.f32.mrb[49].mxu0  ;;  %v1964_v38 = vpop.f32.mrb[54].mxu1  ;;  %v327_v36 = vld [vmem:[%s5459_s24 + $0x118] sm:$0xff] }
 0x385   : > { %v3328_v39 = vpop.f32.mrb[50].mxu0  ;;  %v4310_v41 = vpop.f32.mrb[55].mxu1  ;;  %v4699_v46 = vadd.f32 %v1964_v38, %v319_v43 }
 0x386   : > { %3443 = vst.msk [vmem:[%s5459_s24 + $0xc0] sm:$0xff] %vm3418_vm4, %v4694_v5  ;;  %v4696_v40 = vadd.f32 %v4695_v35, %v3328_v39  ;;  %v4618_v42 = vpop.f32.mrb[51].mxu0  ;;  %v326_v5 = vld [vmem:[%s5459_s24 + $0x110] sm:$0xff] }
 0x388   : > { %3444 = vst.msk [vmem:[%s5459_s24 + $0xc8] sm:$0xff] %vm3418_vm4, %v4696_v40 }
 0x38a   : > { %v1969_v44 = vpop.f32.mrb[56].mxu1 }
 0x38b   : > { %v3333_v45 = vpop.f32.mrb[52].mxu0  ;;  %v4313_v48 = vpop.f32.mrb[57].mxu1  ;;  %v4701_v56 = vadd.f32 %v1969_v44, %v320_v53 }
 0x38c   : > { %v4698_v47 = vadd.f32 %v4697_v9, %v3333_v45  ;;  %v4621_v49 = vpop.f32.mrb[53].mxu0  ;;  %v1972_v50 = vpop.f32.mrb[58].mxu1  ;;  %v329_v48 = vld [vmem:[%s5459_s24 + $0x128] sm:$0xff] }
 0x38d   : > { %v3336_v14 = vpop.f32.mrb[54].mxu0  ;;  %v4314_v51 = vpop.f32.mrb[59].mxu1  ;;  %v4703_v61 = vadd.f32 %v1972_v50, %v321_v54 }
 0x38e   : > { %3445 = vst.msk [vmem:[%s5459_s24 + $0xd0] sm:$0xff] %vm3418_vm4, %v4698_v47  ;;  %v4700_v52 = vadd.f32 %v4699_v46, %v3336_v14  ;;  %v4622_v12 = vpop.f32.mrb[55].mxu0  ;;  %v328_v47 = vld [vmem:[%s5459_s24 + $0x120] sm:$0xff] }
 0x390   : > { %3446 = vst.msk [vmem:[%s5459_s24 + $0xd8] sm:$0xff] %vm3418_vm4, %v4700_v52 }
 0x392   : > { %v1977_v58 = vpop.f32.mrb[60].mxu1 }
 0x393   : > { %v3341_v59 = vpop.f32.mrb[56].mxu0  ;;  %v4317_v1 = vpop.f32.mrb[61].mxu1  ;;  %v4705_v11 = vadd.f32 %v1977_v58, %v322_v8 }
 0x394   : > { %v4702_v63 = vadd.f32 %v4701_v56, %v3341_v59  ;;  %v4625_v55 = vpop.f32.mrb[57].mxu0  ;;  %v1980_v15 = vpop.f32.mrb[62].mxu1 }
 0x395   : > { %v3344_v4 = vpop.f32.mrb[58].mxu0  ;;  %v4318_v57 = vpop.f32.mrb[63].mxu1  ;;  %v4707_v18 = vadd.f32 %v1980_v15, %v323_v10 }
 0x396   : > { %3447 = vst.msk [vmem:[%s5459_s24 + $0xe0] sm:$0xff] %vm3418_vm4, %v4702_v63  ;;  %v4704_v17 = vadd.f32 %v4703_v61, %v3344_v4  ;;  %v4626_v6 = vpop.f32.mrb[59].mxu0 }
 0x398   : > { %3448 = vst.msk [vmem:[%s5459_s24 + $0xe8] sm:$0xff] %vm3418_vm4, %v4704_v17 }
 0x39a   : > { %v1985_v13 = vpop.f32.mrb[64].mxu1 }
 0x39b   : > { %v3349_v16 = vpop.f32.mrb[60].mxu0  ;;  %v4321_v19 = vpop.f32.mrb[65].mxu1  ;;  %v4709_v62 = vadd.f32 %v1985_v13, %v324_v25 }
 0x39c   : > { %v4706_v3 = vadd.f32 %v4705_v11, %v3349_v16  ;;  %v4629_v60 = vpop.f32.mrb[61].mxu0  ;;  %v1988_v20 = vpop.f32.mrb[66].mxu1 }
 0x39d   : > { %v3352_v21 = vpop.f32.mrb[62].mxu0  ;;  %v4322_v23 = vpop.f32.mrb[67].mxu1  ;;  %v4711_v28 = vadd.f32 %v1988_v20, %v325_v26 }
 0x39e   : > { %3449 = vst.msk [vmem:[%s5459_s24 + $0xf0] sm:$0xff] %vm3418_vm4, %v4706_v3  ;;  %v4708_v22 = vadd.f32 %v4707_v18, %v3352_v21  ;;  %v4630_v24 = vpop.f32.mrb[63].mxu0 }
 0x3a0   : > { %3450 = vst.msk [vmem:[%s5459_s24 + $0xf8] sm:$0xff] %vm3418_vm4, %v4708_v22 }
 0x3a2   : > { %v1993_v27 = vpop.f32.mrb[68].mxu1 }
 0x3a3   : > { %v3357_v0 = vpop.f32.mrb[64].mxu0  ;;  %v4325_v30 = vpop.f32.mrb[69].mxu1  ;;  %v4713_v37 = vadd.f32 %v1993_v27, %v326_v5 }
 0x3a4   : > { %v4710_v29 = vadd.f32 %v4709_v62, %v3357_v0  ;;  %v4633_v31 = vpop.f32.mrb[65].mxu0  ;;  %v1996_v32 = vpop.f32.mrb[70].mxu1 }
 0x3a5   : > { %v3360_v33 = vpop.f32.mrb[66].mxu0  ;;  %v4326_v2 = vpop.f32.mrb[71].mxu1  ;;  %v4715_v40 = vadd.f32 %v1996_v32, %v327_v36 }
 0x3a6   : > { %3451 = vst.msk [vmem:[%s5459_s24 + $0x100] sm:$0xff] %vm3418_vm4, %v4710_v29  ;;  %v4712_v34 = vadd.f32 %v4711_v28, %v3360_v33  ;;  %v4634_v35 = vpop.f32.mrb[67].mxu0 }
 0x3a8   : > { %3452 = vst.msk [vmem:[%s5459_s24 + $0x108] sm:$0xff] %vm3418_vm4, %v4712_v34 }
 0x3aa   : > { %v2001_v38 = vpop.f32.mrb[72].mxu1 }
 0x3ab   : > { %v3365_v39 = vpop.f32.mrb[68].mxu0  ;;  %v4329_v42 = vpop.f32.mrb[73].mxu1  ;;  %v4717_v49 = vadd.f32 %v2001_v38, %v328_v47 }
 0x3ac   : > { %v4714_v41 = vadd.f32 %v4713_v37, %v3365_v39  ;;  %v4637_v7 = vpop.f32.mrb[69].mxu0  ;;  %v2004_v43 = vpop.f32.mrb[74].mxu1 }
 0x3ad   : > { %v3368_v9 = vpop.f32.mrb[70].mxu0  ;;  %v4330_v45 = vpop.f32.mrb[75].mxu1  ;;  %v4719_v14 = vadd.f32 %v2004_v43, %v329_v48 }
 0x3ae   : > { %3453 = vst.msk [vmem:[%s5459_s24 + $0x110] sm:$0xff] %vm3418_vm4, %v4714_v41  ;;  %v4716_v44 = vadd.f32 %v4715_v40, %v3368_v9  ;;  %v4638_v46 = vpop.f32.mrb[71].mxu0 }
 0x3b0   : > { %3454 = vst.msk [vmem:[%s5459_s24 + $0x118] sm:$0xff] %vm3418_vm4, %v4716_v44 }
 0x3b3   : > { %v3373_v50 = vpop.f32.mrb[72].mxu0 }
 0x3b4   : > { %v4718_v52 = vadd.f32 %v4717_v49, %v3373_v50  ;;  %v4641_v51 = vpop.f32.mrb[73].mxu0 }
 0x3b5   : > { %v3376_v12 = vpop.f32.mrb[74].mxu0 }
 0x3b6   : > { %3455 = vst.msk [vmem:[%s5459_s24 + $0x120] sm:$0xff] %vm3418_vm4, %v4718_v52  ;;  %v4720_v53 = vadd.f32 %v4719_v14, %v3376_v12  ;;  %v4642_v54 = vpop.f32.mrb[75].mxu0 }
 0x3b8   : > { %3456 = vst.msk [vmem:[%s5459_s24 + $0x128] sm:$0xff] %vm3418_vm4, %v4720_v53 }
 0x3b9 PF: > { %s13_s18 = sadd.s32 1, %s5370_s18   ;;  %s6609_s12 = smov %s5358_s15 }
 0x3ba   : > { %p10_p11 = scmp.ge.s32.totalorder %s13_s18, 98   ;;  %s6610_s13 = smov %s5362_s16 }
 0x3bb   : > { %s6611_s14 = smov %s5366_s17  ;;  %s6612_s15 = smov %s6616_s19 }
 0x3bc   : > { %s6613_s16 = smov %s6620_s20  ;;  %s6614_s17 = smov %s6624_s21 }
 0x3bd   :  { %12 = sbr.rel (!%p10_p11) target bundleno = 4 (0x4), region = 77 }

</bundles_post_ra>
